<compile_context>
chip_gen: v6e
topology: v6e:2x2x1
jax: 0.10.0
libtpu: 0.0.40
codegen_flags: <defaults>
</compile_context>

<pallas_src>
import math
import functools

import numpy as np
import jax
import jax.numpy as jnp
from jax import lax
from jax.experimental import pallas as pl
from jax.experimental.pallas import tpu as pltpu


_N_TAPS = 25                      # 5x5 conv2 taps
_N_PAIRS = 13                     # 25 taps padded to 26 -> 13 pairs (K = 2*odim)
_P_COLS = 2 * _N_PAIRS * 9        # 234 patch columns: (conv2-tap major, conv1-tap minor)


def _round_up(x, m):
    return (x + m - 1) // m * m


# ----------------------------- Pallas kernel --------------------------------

def _fused_subsample_kernel(p_ref, w1p_ref, b1p_ref, w2p_ref, b2_ref,
                            wl_ref, bl_ref, pe_ref, o_ref,
                            *, t2_tile, f2, odim):
    """One (batch, time-tile) step of conv1+ReLU+conv2+ReLU+Linear+PosEnc.

    p_ref : (f2*t2_tile, 234) bf16   im2col rows ordered (f2, t2); cols (tap26, 9)
    w1p_ref: (18, 2*odim)     bf16   block-diagonal conv1 weight (tap pair)
    b1p_ref: (1, 2*odim)      f32
    w2p_ref: (13, 2*odim, odim) bf16 paired conv2 taps (c_in-pair, c_out)
    b2_ref : (1, odim)        f32
    wl_ref : (f2, odim, odim) bf16   per-frequency Linear blocks, xscale folded in
    bl_ref : (1, odim)        f32    xscale folded in
    pe_ref : (t2_tile, odim)  f32
    o_ref  : (t2_tile, odim)  f32
    """
    f32 = jnp.float32
    bf16 = jnp.bfloat16
    w1p = w1p_ref[...]
    b1p = b1p_ref[...]
    b2 = b2_ref[...]

    acc3 = jnp.zeros((t2_tile, odim), f32)
    for i in range(f2):                       # frequency-column chunks of the rows
        r0 = i * t2_tile
        acc2 = jnp.zeros((t2_tile, odim), f32)
        for j in range(_N_PAIRS):             # conv2 tap pairs -> K = 2*odim matmuls
            pj = p_ref[r0:r0 + t2_tile, j * 18:(j + 1) * 18]      # (t2_tile, 18)
            y1 = jnp.dot(pj, w1p, preferred_element_type=f32)     # fused conv1
            y1 = jnp.maximum(y1 + b1p, 0.0).astype(bf16)          # (t2_tile, 2*odim)
            acc2 = acc2 + jnp.dot(y1, w2p_ref[j], preferred_element_type=f32)
        z = jnp.maximum(acc2 + b2, 0.0).astype(bf16)              # (t2_tile, odim)
        acc3 = acc3 + jnp.dot(z, wl_ref[i], preferred_element_type=f32)
    # xscale already folded into wl/bl; add positional encoding, lane-dense store.
    o_ref[...] = (acc3 + bl_ref[...] + pe_ref[...]).astype(o_ref.dtype)


# ----------------------------- host-side helpers ----------------------------

def _make_pe(length, d_model):
    """Sinusoidal positional encoding, built once with numpy (no jnp scatter)."""
    position = np.arange(length, dtype=np.float32)[:, None]
    div_term = np.exp(np.arange(0, d_model, 2, dtype=np.float32)
                      * -(math.log(10000.0) / d_model))
    pe = np.zeros((length, d_model), np.float32)
    pe[:, 0::2] = np.sin(position * div_term)
    pe[:, 1::2] = np.cos(position * div_term)
    return jnp.asarray(pe)


def make_params(idim, odim, key):
    """Torch-default-style uniform init for the module's parameters."""
    f2 = ((idim - 1) // 2 - 2) // 3
    ks = jax.random.split(key, 6)

    def u(k, shape, fan_in):
        bound = 1.0 / math.sqrt(fan_in)
        return jax.random.uniform(k, shape, jnp.float32, -bound, bound)

    return dict(
        w1=u(ks[0], (odim, 1, 3, 3), 1 * 3 * 3),
        b1=u(ks[1], (odim,), 1 * 3 * 3),
        w2=u(ks[2], (odim, odim, 5, 5), odim * 5 * 5),
        b2=u(ks[3], (odim,), odim * 5 * 5),
        wl=u(ks[4], (odim, odim * f2), odim * f2),
        bl=u(ks[5], (odim,), odim * f2),
    )


def prepare_weights(params, idim, odim, *, max_t2=1024):
    """One-time re-blocking of module parameters into kernel layout (hoisted out
    of the per-call path)."""
    F2 = ((idim - 1) // 2 - 2) // 3
    xscale = math.sqrt(odim)
    bf16 = jnp.bfloat16

    # conv1 (odim,1,3,3) -> (9, odim); block-diagonal pair form (18, 2*odim).
    w1 = params["w1"].reshape(odim, 9).T.astype(bf16)
    z9 = jnp.zeros((9, odim), bf16)
    w1p = jnp.concatenate(
        [jnp.concatenate([w1, z9], axis=1), jnp.concatenate([z9, w1], axis=1)], axis=0)
    b1p = jnp.tile(params["b1"].reshape(1, odim).astype(jnp.float32), (1, 2))

    # conv2 (odim,odim,5,5) -> per-tap (c_in, c_out); pad 25->26; pair -> K=2*odim.
    w2 = jnp.transpose(params["w2"], (2, 3, 1, 0)).reshape(_N_TAPS, odim, odim)
    w2 = jnp.pad(w2, ((0, 1), (0, 0), (0, 0)))                    # zero pad tap
    w2p = w2.reshape(_N_PAIRS, 2 * odim, odim).astype(bf16)
    b2 = params["b2"].reshape(1, odim).astype(jnp.float32)

    # Linear(odim*F2 -> odim): per-frequency (c_in, c_out) blocks, xscale folded in.
    wl = jnp.transpose((params["wl"] * xscale).reshape(odim, odim, F2),
                       (2, 1, 0)).astype(bf16)
    bl = (params["bl"] * xscale).reshape(1, odim).astype(jnp.float32)

    pe = _make_pe(max_t2, odim)
    return dict(w1p=w1p, b1p=b1p, w2p=w2p, b2=b2, wl=wl, bl=bl, pe=pe)


def _build_patches(x, T2p, F2, t2_tile):
    """conv1 im2col directly in kernel layout: (B, n_m, F2*t2_tile, 234) bf16.

    p[b, m, f2*t2_tile + t2, (ki*5+kj)*9 + di*3 + dj]
        = x[b, 6*(m*t2_tile+t2) + 2*ki + di, 6*f2 + 2*kj + dj]
    """
    B, T, idim = x.shape
    n_m = T2p // t2_tile
    T_in = max(T, 6 * T2p + 5)
    F_in = max(idim, 6 * F2 + 5)
    xq = jnp.pad(x.astype(jnp.bfloat16), ((0, 0), (0, T_in - T), (0, F_in - idim)))

    taps = []
    for ki in range(5):
        for kj in range(5):
            for di in range(3):
                for dj in range(3):
                    r0 = 2 * ki + di
                    c0 = 2 * kj + dj
                    taps.append(xq[:, r0:r0 + 6 * (T2p - 1) + 1:6,
                                      c0:c0 + 6 * (F2 - 1) + 1:6])
    p = jnp.stack(taps, axis=-1)                           # (B, T2p, F2, 225)
    p = p.reshape(B, n_m, t2_tile, F2, 225)
    p = jnp.transpose(p, (0, 1, 3, 2, 4))                  # rows ordered (f2, t2)
    p = p.reshape(B, n_m, F2 * t2_tile, 225)
    p = jnp.pad(p, ((0, 0), (0, 0), (0, 0), (0, _P_COLS - 225)))   # 26th (zero) tap
    return p


def _vmem_limit_bytes(rows, t2_tile, odim, F2):
    """Derive vmem_limit_bytes from actual buffer sizes (v7x has only 64 MiB)."""
    lane = lambda n: _round_up(n, 128)
    p_blk = _round_up(rows, 16) * lane(_P_COLS) * 2
    pe_blk = _round_up(t2_tile, 8) * lane(odim) * 4
    out_blk = _round_up(t2_tile, 8) * lane(odim) * 4
    w_bytes = (_round_up(18, 16) * lane(2 * odim) * 2
               + 8 * lane(2 * odim) * 4
               + _N_PAIRS * _round_up(2 * odim, 16) * lane(odim) * 2
               + 8 * lane(odim) * 4
               + F2 * _round_up(odim, 16) * lane(odim) * 2
               + 8 * lane(odim) * 4)
    # double-buffered grid-varying blocks + weights (x2 even if Buffered(1) is used)
    est = 2 * (p_blk + pe_blk + out_blk) + 2 * w_bytes
    return int(min(48 * 1024 * 1024, max(8 * 1024 * 1024, 2 * est)))


# ----------------------------- forward pass ---------------------------------

@functools.partial(jax.jit, static_argnames=("idim", "odim", "t2_tile",
                                              "single_buffer_weights"))
def _forward(prep, x, *, idim, odim, t2_tile, single_buffer_weights):
    B, T, idim_x = x.shape
    assert idim_x == idim
    F1 = (idim - 1) // 2
    T1 = (T - 1) // 2
    F2 = (F1 - 2) // 3
    T2 = (T1 - 2) // 3
    assert F2 >= 1 and T2 >= 1, "input too small for Conv2dSubsampling6"
    assert t2_tile % 8 == 0 and t2_tile > 0
    assert odim % 2 == 0

    n_m = pl.cdiv(T2, t2_tile)
    T2p = n_m * t2_tile
    rows = F2 * t2_tile
    assert T2p <= prep["pe"].shape[0], "increase max_t2 in prepare_weights()"

    p = _build_patches(x, T2p, F2, t2_tile)                # (B, n_m, rows, 234) bf16
    pe = lax.slice(prep["pe"], (0, 0), (T2p, odim))        # (T2p, odim) f32
    w1p, b1p, w2p = prep["w1p"], prep["b1p"], prep["w2p"]
    b2, wl, bl = prep["b2"], prep["wl"], prep["bl"]

    wkw = dict(pipeline_mode=pl.Buffered(1)) if single_buffer_weights else {}
    in_specs = [
        pl.BlockSpec((None, None, rows, _P_COLS), lambda b, m: (b, m, 0, 0)),
        pl.BlockSpec((18, 2 * odim), lambda b, m: (0, 0), **wkw),
        pl.BlockSpec((1, 2 * odim), lambda b, m: (0, 0), **wkw),
        pl.BlockSpec((_N_PAIRS, 2 * odim, odim), lambda b, m: (0, 0, 0), **wkw),
        pl.BlockSpec((1, odim), lambda b, m: (0, 0), **wkw),
        pl.BlockSpec((F2, odim, odim), lambda b, m: (0, 0, 0), **wkw),
        pl.BlockSpec((1, odim), lambda b, m: (0, 0), **wkw),
        pl.BlockSpec((t2_tile, odim), lambda b, m: (m, 0)),
    ]
    out_specs = pl.BlockSpec((None, t2_tile, odim), lambda b, m: (b, m, 0))

    conv1_flops = 2 * t2_tile * 18 * (2 * odim)
    conv2_flops = 2 * t2_tile * (2 * odim) * odim
    lin_flops = 2 * t2_tile * odim * odim
    flops = B * n_m * F2 * (_N_PAIRS * (conv1_flops + conv2_flops) + lin_flops)
    bytes_accessed = (p.size * 2
                      + (w1p.size + w2p.size + wl.size) * 2
                      + (b1p.size + b2.size + bl.size) * 4
                      + T2p * odim * 4
                      + B * T2p * odim * 4)

    kernel = functools.partial(_fused_subsample_kernel,
                               t2_tile=t2_tile, f2=F2, odim=odim)

    out = pl.pallas_call(
        kernel,
        out_shape=jax.ShapeDtypeStruct((B, T2p, odim), jnp.float32),
        grid=(B, n_m),
        in_specs=in_specs,
        out_specs=out_specs,
        compiler_params=pltpu.CompilerParams(
            dimension_semantics=("parallel", "parallel"),
            vmem_limit_bytes=_vmem_limit_bytes(rows, t2_tile, odim, F2)),
        cost_estimate=pl.CostEstimate(flops=int(flops), transcendentals=0,
                                      bytes_accessed=int(bytes_accessed)),
    )(p, w1p, b1p, w2p, b2, wl, bl, pe)

    return out[:, :T2, :]


def conv2d_subsampling6(prep, x, x_mask, idim, odim, *, t2_tile=None):
    """Forward pass of Conv2dSubsampling6 (inference; dropout is identity).

    prep : output of prepare_weights(params, idim, odim) (kernel-layout weights).
    Returns (subsampled features (B, T', odim), subsampled mask).
    """
    B, T, _ = x.shape
    T2 = ((T - 1) // 2 - 2) // 3
    if t2_tile is None:
        # Matmul M dimension per grid step; big tiles for long inputs (MXU fill),
        # small for short ones (avoid wasted padded compute).
        t2_tile = max(8, min(128, _round_up(T2, 8)))
    try:
        out = _forward(prep, x, idim=idim, odim=odim, t2_tile=t2_tile,
                       single_buffer_weights=True)
    except Exception:
        # Fallback if pipeline_mode=pl.Buffered(1) is unsupported on this jax build.
        out = _forward(prep, x, idim=idim, odim=odim, t2_tile=t2_tile,
                       single_buffer_weights=False)
    if x_mask is None:
        return out, None
    return out, x_mask[:, :, :-2:2][:, :, :-4:3]


# ------------- pure-JAX reference (same bf16 quantization points) ------------

def _reference(params, x, odim):
    f32 = jnp.float32
    q = lambda a: a.astype(jnp.bfloat16)
    dn = ("NCHW", "OIHW", "NCHW")
    xscale = math.sqrt(odim)
    y = lax.conv_general_dilated(q(x)[:, None, :, :], q(params["w1"]), (2, 2),
                                 "VALID", dimension_numbers=dn,
                                 preferred_element_type=f32)
    y = jnp.maximum(y + params["b1"][None, :, None, None], 0.0)
    y = lax.conv_general_dilated(q(y), q(params["w2"]), (3, 3),
                                 "VALID", dimension_numbers=dn,
                                 preferred_element_type=f32)
    y = jnp.maximum(y + params["b2"][None, :, None, None], 0.0)
    B, C, T2, F2 = y.shape
    y = jnp.transpose(y, (0, 2, 1, 3)).reshape(B, T2, C * F2)
    wl_s = q(params["wl"] * xscale)
    y = jnp.dot(q(y), wl_s.T, preferred_element_type=f32) + params["bl"] * xscale
    return y + _make_pe(T2, odim)[None]


if __name__ == "__main__":
    # T=60 -> T1=29 -> T2=9 ; idim=17 -> F1=8 -> F2=2 ; odim=128 (lane-dense output)
    B, T, idim, odim = 2, 60, 17, 128
    key = jax.random.PRNGKey(0)
    kx, kp = jax.random.split(key)

    x = jax.random.normal(kx, (B, T, idim), jnp.float32)
    x_mask = jnp.ones((B, 1, T), dtype=bool)
    params = make_params(idim, odim, kp)
    prep = prepare_weights(params, idim, odim)       # one-time weight re-blocking

    out, mask = conv2d_subsampling6(prep, x, x_mask, idim, odim)
    out = jax.block_until_ready(out)

    T2 = ((T - 1) // 2 - 2) // 3
    assert out.shape == (B, T2, odim), out.shape
    assert mask.shape == (B, 1, T2), mask.shape

    ref = jax.block_until_ready(_reference(params, x, odim))
    np.testing.assert_allclose(np.asarray(out), np.asarray(ref),
                               rtol=2e-3, atol=2e-3)

    print("KERNEL_OK")
</pallas_src>

<mosaic_0001>
module attributes {stable_mosaic.version = 11 : i64} {
  func.func @_fused_subsample_kernel(%arg0: i32, %arg1: i32, %arg2: memref<1x1x32x234xbf16, #tpu.memory_space<vmem>>, %arg3: memref<18x256xbf16, #tpu.memory_space<vmem>>, %arg4: memref<1x256xf32, #tpu.memory_space<vmem>>, %arg5: memref<13x256x128xbf16, #tpu.memory_space<vmem>>, %arg6: memref<1x128xf32, #tpu.memory_space<vmem>>, %arg7: memref<2x128x128xbf16, #tpu.memory_space<vmem>>, %arg8: memref<1x128xf32, #tpu.memory_space<vmem>>, %arg9: memref<16x128xf32, #tpu.memory_space<vmem>>, %arg10: memref<1x16x128xf32, #tpu.memory_space<vmem>>) attributes {dimension_semantics = [#tpu.dimension_semantics<parallel>, #tpu.dimension_semantics<parallel>], iteration_bounds = array<i64: 2, 1>, scalar_prefetch = 0 : i64, scratch_operands = 0 : i64, tpu.core_type = #tpu.core_type<tc>, window_params = [{transform_indices = @transform_0, window_bounds = array<i64: 1, 1, 32, 234>}, {pipeline_mode = #tpu.pipeline_mode<synchronous>, transform_indices = @transform_1, window_bounds = array<i64: 18, 256>}, {pipeline_mode = #tpu.pipeline_mode<synchronous>, transform_indices = @transform_2, window_bounds = array<i64: 1, 256>}, {pipeline_mode = #tpu.pipeline_mode<synchronous>, transform_indices = @transform_3, window_bounds = array<i64: 13, 256, 128>}, {pipeline_mode = #tpu.pipeline_mode<synchronous>, transform_indices = @transform_4, window_bounds = array<i64: 1, 128>}, {pipeline_mode = #tpu.pipeline_mode<synchronous>, transform_indices = @transform_5, window_bounds = array<i64: 2, 128, 128>}, {pipeline_mode = #tpu.pipeline_mode<synchronous>, transform_indices = @transform_6, window_bounds = array<i64: 1, 128>}, {transform_indices = @transform_7, window_bounds = array<i64: 16, 128>}, {transform_indices = @transform_8, window_bounds = array<i64: 1, 16, 128>}]} {
    %c0 = arith.constant 0 : index
    %c0_0 = arith.constant 0 : index
    %0 = vector.load %arg3[%c0, %c0_0] : memref<18x256xbf16, #tpu.memory_space<vmem>>, vector<18x256xbf16>
    %c0_1 = arith.constant 0 : index
    %c0_2 = arith.constant 0 : index
    %1 = vector.load %arg4[%c0_1, %c0_2] : memref<1x256xf32, #tpu.memory_space<vmem>>, vector<1x256xf32>
    %c0_3 = arith.constant 0 : index
    %c0_4 = arith.constant 0 : index
    %2 = vector.load %arg6[%c0_3, %c0_4] : memref<1x128xf32, #tpu.memory_space<vmem>>, vector<1x128xf32>
    %cst = arith.constant 0.000000e+00 : f32
    %3 = vector.broadcast %cst : f32 to vector<16x128xf32>
    %cst_5 = arith.constant 0.000000e+00 : f32
    %4 = vector.broadcast %cst_5 : f32 to vector<16x128xf32>
    %c0_6 = arith.constant 0 : index
    %c0_7 = arith.constant 0 : index
    %c0_8 = arith.constant 0 : index
    %c0_9 = arith.constant 0 : index
    %5 = vector.load %arg2[%c0_6, %c0_7, %c0_8, %c0_9] : memref<1x1x32x234xbf16, #tpu.memory_space<vmem>>, vector<1x1x16x18xbf16>
    %6 = vector.shape_cast %5 : vector<1x1x16x18xbf16> to vector<16x18xbf16>
    %cst_10 = arith.constant dense<0.000000e+00> : vector<16x256xf32>
    %7 = tpu.matmul %6, %0, %cst_10 {dimension_numbers = #tpu.dot_dimension_numbers<[1], [0], [0], [1], [0, 0, 1, 1], [], []>} : vector<16x18xbf16>, vector<18x256xbf16>, vector<16x256xf32> -> vector<16x256xf32>
    %8 = vector.broadcast %1 : vector<1x256xf32> to vector<16x256xf32>
    %9 = arith.addf %7, %8 : vector<16x256xf32>
    %cst_11 = arith.constant 0.000000e+00 : f32
    %10 = vector.broadcast %cst_11 : f32 to vector<16x256xf32>
    %11 = arith.maximumf %9, %10 : vector<16x256xf32>
    %12 = arith.truncf %11 : vector<16x256xf32> to vector<16x256xbf16>
    %c0_12 = arith.constant 0 : index
    %c0_13 = arith.constant 0 : index
    %c0_14 = arith.constant 0 : index
    %13 = vector.load %arg5[%c0_12, %c0_13, %c0_14] : memref<13x256x128xbf16, #tpu.memory_space<vmem>>, vector<1x256x128xbf16>
    %14 = vector.shape_cast %13 : vector<1x256x128xbf16> to vector<256x128xbf16>
    %cst_15 = arith.constant dense<0.000000e+00> : vector<16x128xf32>
    %15 = tpu.matmul %12, %14, %cst_15 {dimension_numbers = #tpu.dot_dimension_numbers<[1], [0], [0], [1], [0, 0, 1, 1], [], []>} : vector<16x256xbf16>, vector<256x128xbf16>, vector<16x128xf32> -> vector<16x128xf32>
    %16 = arith.addf %4, %15 : vector<16x128xf32>
    %c0_16 = arith.constant 0 : index
    %c0_17 = arith.constant 0 : index
    %c0_18 = arith.constant 0 : index
    %c18 = arith.constant 18 : index
    %17 = vector.load %arg2[%c0_16, %c0_17, %c0_18, %c18] : memref<1x1x32x234xbf16, #tpu.memory_space<vmem>>, vector<1x1x16x18xbf16>
    %18 = vector.shape_cast %17 : vector<1x1x16x18xbf16> to vector<16x18xbf16>
    %cst_19 = arith.constant dense<0.000000e+00> : vector<16x256xf32>
    %19 = tpu.matmul %18, %0, %cst_19 {dimension_numbers = #tpu.dot_dimension_numbers<[1], [0], [0], [1], [0, 0, 1, 1], [], []>} : vector<16x18xbf16>, vector<18x256xbf16>, vector<16x256xf32> -> vector<16x256xf32>
    %20 = vector.broadcast %1 : vector<1x256xf32> to vector<16x256xf32>
    %21 = arith.addf %19, %20 : vector<16x256xf32>
    %cst_20 = arith.constant 0.000000e+00 : f32
    %22 = vector.broadcast %cst_20 : f32 to vector<16x256xf32>
    %23 = arith.maximumf %21, %22 : vector<16x256xf32>
    %24 = arith.truncf %23 : vector<16x256xf32> to vector<16x256xbf16>
    %c1 = arith.constant 1 : index
    %c0_21 = arith.constant 0 : index
    %c0_22 = arith.constant 0 : index
    %25 = vector.load %arg5[%c1, %c0_21, %c0_22] : memref<13x256x128xbf16, #tpu.memory_space<vmem>>, vector<1x256x128xbf16>
    %26 = vector.shape_cast %25 : vector<1x256x128xbf16> to vector<256x128xbf16>
    %cst_23 = arith.constant dense<0.000000e+00> : vector<16x128xf32>
    %27 = tpu.matmul %24, %26, %cst_23 {dimension_numbers = #tpu.dot_dimension_numbers<[1], [0], [0], [1], [0, 0, 1, 1], [], []>} : vector<16x256xbf16>, vector<256x128xbf16>, vector<16x128xf32> -> vector<16x128xf32>
    %28 = arith.addf %16, %27 : vector<16x128xf32>
    %c0_24 = arith.constant 0 : index
    %c0_25 = arith.constant 0 : index
    %c0_26 = arith.constant 0 : index
    %c36 = arith.constant 36 : index
    %29 = vector.load %arg2[%c0_24, %c0_25, %c0_26, %c36] : memref<1x1x32x234xbf16, #tpu.memory_space<vmem>>, vector<1x1x16x18xbf16>
    %30 = vector.shape_cast %29 : vector<1x1x16x18xbf16> to vector<16x18xbf16>
    %cst_27 = arith.constant dense<0.000000e+00> : vector<16x256xf32>
    %31 = tpu.matmul %30, %0, %cst_27 {dimension_numbers = #tpu.dot_dimension_numbers<[1], [0], [0], [1], [0, 0, 1, 1], [], []>} : vector<16x18xbf16>, vector<18x256xbf16>, vector<16x256xf32> -> vector<16x256xf32>
    %32 = vector.broadcast %1 : vector<1x256xf32> to vector<16x256xf32>
    %33 = arith.addf %31, %32 : vector<16x256xf32>
    %cst_28 = arith.constant 0.000000e+00 : f32
    %34 = vector.broadcast %cst_28 : f32 to vector<16x256xf32>
    %35 = arith.maximumf %33, %34 : vector<16x256xf32>
    %36 = arith.truncf %35 : vector<16x256xf32> to vector<16x256xbf16>
    %c2 = arith.constant 2 : index
    %c0_29 = arith.constant 0 : index
    %c0_30 = arith.constant 0 : index
    %37 = vector.load %arg5[%c2, %c0_29, %c0_30] : memref<13x256x128xbf16, #tpu.memory_space<vmem>>, vector<1x256x128xbf16>
    %38 = vector.shape_cast %37 : vector<1x256x128xbf16> to vector<256x128xbf16>
    %cst_31 = arith.constant dense<0.000000e+00> : vector<16x128xf32>
    %39 = tpu.matmul %36, %38, %cst_31 {dimension_numbers = #tpu.dot_dimension_numbers<[1], [0], [0], [1], [0, 0, 1, 1], [], []>} : vector<16x256xbf16>, vector<256x128xbf16>, vector<16x128xf32> -> vector<16x128xf32>
    %40 = arith.addf %28, %39 : vector<16x128xf32>
    %c0_32 = arith.constant 0 : index
    %c0_33 = arith.constant 0 : index
    %c0_34 = arith.constant 0 : index
    %c54 = arith.constant 54 : index
    %41 = vector.load %arg2[%c0_32, %c0_33, %c0_34, %c54] : memref<1x1x32x234xbf16, #tpu.memory_space<vmem>>, vector<1x1x16x18xbf16>
    %42 = vector.shape_cast %41 : vector<1x1x16x18xbf16> to vector<16x18xbf16>
    %cst_35 = arith.constant dense<0.000000e+00> : vector<16x256xf32>
    %43 = tpu.matmul %42, %0, %cst_35 {dimension_numbers = #tpu.dot_dimension_numbers<[1], [0], [0], [1], [0, 0, 1, 1], [], []>} : vector<16x18xbf16>, vector<18x256xbf16>, vector<16x256xf32> -> vector<16x256xf32>
    %44 = vector.broadcast %1 : vector<1x256xf32> to vector<16x256xf32>
    %45 = arith.addf %43, %44 : vector<16x256xf32>
    %cst_36 = arith.constant 0.000000e+00 : f32
    %46 = vector.broadcast %cst_36 : f32 to vector<16x256xf32>
    %47 = arith.maximumf %45, %46 : vector<16x256xf32>
    %48 = arith.truncf %47 : vector<16x256xf32> to vector<16x256xbf16>
    %c3 = arith.constant 3 : index
    %c0_37 = arith.constant 0 : index
    %c0_38 = arith.constant 0 : index
    %49 = vector.load %arg5[%c3, %c0_37, %c0_38] : memref<13x256x128xbf16, #tpu.memory_space<vmem>>, vector<1x256x128xbf16>
    %50 = vector.shape_cast %49 : vector<1x256x128xbf16> to vector<256x128xbf16>
    %cst_39 = arith.constant dense<0.000000e+00> : vector<16x128xf32>
    %51 = tpu.matmul %48, %50, %cst_39 {dimension_numbers = #tpu.dot_dimension_numbers<[1], [0], [0], [1], [0, 0, 1, 1], [], []>} : vector<16x256xbf16>, vector<256x128xbf16>, vector<16x128xf32> -> vector<16x128xf32>
    %52 = arith.addf %40, %51 : vector<16x128xf32>
    %c0_40 = arith.constant 0 : index
    %c0_41 = arith.constant 0 : index
    %c0_42 = arith.constant 0 : index
    %c72 = arith.constant 72 : index
    %53 = vector.load %arg2[%c0_40, %c0_41, %c0_42, %c72] : memref<1x1x32x234xbf16, #tpu.memory_space<vmem>>, vector<1x1x16x18xbf16>
    %54 = vector.shape_cast %53 : vector<1x1x16x18xbf16> to vector<16x18xbf16>
    %cst_43 = arith.constant dense<0.000000e+00> : vector<16x256xf32>
    %55 = tpu.matmul %54, %0, %cst_43 {dimension_numbers = #tpu.dot_dimension_numbers<[1], [0], [0], [1], [0, 0, 1, 1], [], []>} : vector<16x18xbf16>, vector<18x256xbf16>, vector<16x256xf32> -> vector<16x256xf32>
    %56 = vector.broadcast %1 : vector<1x256xf32> to vector<16x256xf32>
    %57 = arith.addf %55, %56 : vector<16x256xf32>
    %cst_44 = arith.constant 0.000000e+00 : f32
    %58 = vector.broadcast %cst_44 : f32 to vector<16x256xf32>
    %59 = arith.maximumf %57, %58 : vector<16x256xf32>
    %60 = arith.truncf %59 : vector<16x256xf32> to vector<16x256xbf16>
    %c4 = arith.constant 4 : index
    %c0_45 = arith.constant 0 : index
    %c0_46 = arith.constant 0 : index
    %61 = vector.load %arg5[%c4, %c0_45, %c0_46] : memref<13x256x128xbf16, #tpu.memory_space<vmem>>, vector<1x256x128xbf16>
    %62 = vector.shape_cast %61 : vector<1x256x128xbf16> to vector<256x128xbf16>
    %cst_47 = arith.constant dense<0.000000e+00> : vector<16x128xf32>
    %63 = tpu.matmul %60, %62, %cst_47 {dimension_numbers = #tpu.dot_dimension_numbers<[1], [0], [0], [1], [0, 0, 1, 1], [], []>} : vector<16x256xbf16>, vector<256x128xbf16>, vector<16x128xf32> -> vector<16x128xf32>
    %64 = arith.addf %52, %63 : vector<16x128xf32>
    %c0_48 = arith.constant 0 : index
    %c0_49 = arith.constant 0 : index
    %c0_50 = arith.constant 0 : index
    %c90 = arith.constant 90 : index
    %65 = vector.load %arg2[%c0_48, %c0_49, %c0_50, %c90] : memref<1x1x32x234xbf16, #tpu.memory_space<vmem>>, vector<1x1x16x18xbf16>
    %66 = vector.shape_cast %65 : vector<1x1x16x18xbf16> to vector<16x18xbf16>
    %cst_51 = arith.constant dense<0.000000e+00> : vector<16x256xf32>
    %67 = tpu.matmul %66, %0, %cst_51 {dimension_numbers = #tpu.dot_dimension_numbers<[1], [0], [0], [1], [0, 0, 1, 1], [], []>} : vector<16x18xbf16>, vector<18x256xbf16>, vector<16x256xf32> -> vector<16x256xf32>
    %68 = vector.broadcast %1 : vector<1x256xf32> to vector<16x256xf32>
    %69 = arith.addf %67, %68 : vector<16x256xf32>
    %cst_52 = arith.constant 0.000000e+00 : f32
    %70 = vector.broadcast %cst_52 : f32 to vector<16x256xf32>
    %71 = arith.maximumf %69, %70 : vector<16x256xf32>
    %72 = arith.truncf %71 : vector<16x256xf32> to vector<16x256xbf16>
    %c5 = arith.constant 5 : index
    %c0_53 = arith.constant 0 : index
    %c0_54 = arith.constant 0 : index
    %73 = vector.load %arg5[%c5, %c0_53, %c0_54] : memref<13x256x128xbf16, #tpu.memory_space<vmem>>, vector<1x256x128xbf16>
    %74 = vector.shape_cast %73 : vector<1x256x128xbf16> to vector<256x128xbf16>
    %cst_55 = arith.constant dense<0.000000e+00> : vector<16x128xf32>
    %75 = tpu.matmul %72, %74, %cst_55 {dimension_numbers = #tpu.dot_dimension_numbers<[1], [0], [0], [1], [0, 0, 1, 1], [], []>} : vector<16x256xbf16>, vector<256x128xbf16>, vector<16x128xf32> -> vector<16x128xf32>
    %76 = arith.addf %64, %75 : vector<16x128xf32>
    %c0_56 = arith.constant 0 : index
    %c0_57 = arith.constant 0 : index
    %c0_58 = arith.constant 0 : index
    %c108 = arith.constant 108 : index
    %77 = vector.load %arg2[%c0_56, %c0_57, %c0_58, %c108] : memref<1x1x32x234xbf16, #tpu.memory_space<vmem>>, vector<1x1x16x18xbf16>
    %78 = vector.shape_cast %77 : vector<1x1x16x18xbf16> to vector<16x18xbf16>
    %cst_59 = arith.constant dense<0.000000e+00> : vector<16x256xf32>
    %79 = tpu.matmul %78, %0, %cst_59 {dimension_numbers = #tpu.dot_dimension_numbers<[1], [0], [0], [1], [0, 0, 1, 1], [], []>} : vector<16x18xbf16>, vector<18x256xbf16>, vector<16x256xf32> -> vector<16x256xf32>
    %80 = vector.broadcast %1 : vector<1x256xf32> to vector<16x256xf32>
    %81 = arith.addf %79, %80 : vector<16x256xf32>
    %cst_60 = arith.constant 0.000000e+00 : f32
    %82 = vector.broadcast %cst_60 : f32 to vector<16x256xf32>
    %83 = arith.maximumf %81, %82 : vector<16x256xf32>
    %84 = arith.truncf %83 : vector<16x256xf32> to vector<16x256xbf16>
    %c6 = arith.constant 6 : index
    %c0_61 = arith.constant 0 : index
    %c0_62 = arith.constant 0 : index
    %85 = vector.load %arg5[%c6, %c0_61, %c0_62] : memref<13x256x128xbf16, #tpu.memory_space<vmem>>, vector<1x256x128xbf16>
    %86 = vector.shape_cast %85 : vector<1x256x128xbf16> to vector<256x128xbf16>
    %cst_63 = arith.constant dense<0.000000e+00> : vector<16x128xf32>
    %87 = tpu.matmul %84, %86, %cst_63 {dimension_numbers = #tpu.dot_dimension_numbers<[1], [0], [0], [1], [0, 0, 1, 1], [], []>} : vector<16x256xbf16>, vector<256x128xbf16>, vector<16x128xf32> -> vector<16x128xf32>
    %88 = arith.addf %76, %87 : vector<16x128xf32>
    %c0_64 = arith.constant 0 : index
    %c0_65 = arith.constant 0 : index
    %c0_66 = arith.constant 0 : index
    %c126 = arith.constant 126 : index
    %89 = vector.load %arg2[%c0_64, %c0_65, %c0_66, %c126] : memref<1x1x32x234xbf16, #tpu.memory_space<vmem>>, vector<1x1x16x18xbf16>
    %90 = vector.shape_cast %89 : vector<1x1x16x18xbf16> to vector<16x18xbf16>
    %cst_67 = arith.constant dense<0.000000e+00> : vector<16x256xf32>
    %91 = tpu.matmul %90, %0, %cst_67 {dimension_numbers = #tpu.dot_dimension_numbers<[1], [0], [0], [1], [0, 0, 1, 1], [], []>} : vector<16x18xbf16>, vector<18x256xbf16>, vector<16x256xf32> -> vector<16x256xf32>
    %92 = vector.broadcast %1 : vector<1x256xf32> to vector<16x256xf32>
    %93 = arith.addf %91, %92 : vector<16x256xf32>
    %cst_68 = arith.constant 0.000000e+00 : f32
    %94 = vector.broadcast %cst_68 : f32 to vector<16x256xf32>
    %95 = arith.maximumf %93, %94 : vector<16x256xf32>
    %96 = arith.truncf %95 : vector<16x256xf32> to vector<16x256xbf16>
    %c7 = arith.constant 7 : index
    %c0_69 = arith.constant 0 : index
    %c0_70 = arith.constant 0 : index
    %97 = vector.load %arg5[%c7, %c0_69, %c0_70] : memref<13x256x128xbf16, #tpu.memory_space<vmem>>, vector<1x256x128xbf16>
    %98 = vector.shape_cast %97 : vector<1x256x128xbf16> to vector<256x128xbf16>
    %cst_71 = arith.constant dense<0.000000e+00> : vector<16x128xf32>
    %99 = tpu.matmul %96, %98, %cst_71 {dimension_numbers = #tpu.dot_dimension_numbers<[1], [0], [0], [1], [0, 0, 1, 1], [], []>} : vector<16x256xbf16>, vector<256x128xbf16>, vector<16x128xf32> -> vector<16x128xf32>
    %100 = arith.addf %88, %99 : vector<16x128xf32>
    %c0_72 = arith.constant 0 : index
    %c0_73 = arith.constant 0 : index
    %c0_74 = arith.constant 0 : index
    %c144 = arith.constant 144 : index
    %101 = vector.load %arg2[%c0_72, %c0_73, %c0_74, %c144] : memref<1x1x32x234xbf16, #tpu.memory_space<vmem>>, vector<1x1x16x18xbf16>
    %102 = vector.shape_cast %101 : vector<1x1x16x18xbf16> to vector<16x18xbf16>
    %cst_75 = arith.constant dense<0.000000e+00> : vector<16x256xf32>
    %103 = tpu.matmul %102, %0, %cst_75 {dimension_numbers = #tpu.dot_dimension_numbers<[1], [0], [0], [1], [0, 0, 1, 1], [], []>} : vector<16x18xbf16>, vector<18x256xbf16>, vector<16x256xf32> -> vector<16x256xf32>
    %104 = vector.broadcast %1 : vector<1x256xf32> to vector<16x256xf32>
    %105 = arith.addf %103, %104 : vector<16x256xf32>
    %cst_76 = arith.constant 0.000000e+00 : f32
    %106 = vector.broadcast %cst_76 : f32 to vector<16x256xf32>
    %107 = arith.maximumf %105, %106 : vector<16x256xf32>
    %108 = arith.truncf %107 : vector<16x256xf32> to vector<16x256xbf16>
    %c8 = arith.constant 8 : index
    %c0_77 = arith.constant 0 : index
    %c0_78 = arith.constant 0 : index
    %109 = vector.load %arg5[%c8, %c0_77, %c0_78] : memref<13x256x128xbf16, #tpu.memory_space<vmem>>, vector<1x256x128xbf16>
    %110 = vector.shape_cast %109 : vector<1x256x128xbf16> to vector<256x128xbf16>
    %cst_79 = arith.constant dense<0.000000e+00> : vector<16x128xf32>
    %111 = tpu.matmul %108, %110, %cst_79 {dimension_numbers = #tpu.dot_dimension_numbers<[1], [0], [0], [1], [0, 0, 1, 1], [], []>} : vector<16x256xbf16>, vector<256x128xbf16>, vector<16x128xf32> -> vector<16x128xf32>
    %112 = arith.addf %100, %111 : vector<16x128xf32>
    %c0_80 = arith.constant 0 : index
    %c0_81 = arith.constant 0 : index
    %c0_82 = arith.constant 0 : index
    %c162 = arith.constant 162 : index
    %113 = vector.load %arg2[%c0_80, %c0_81, %c0_82, %c162] : memref<1x1x32x234xbf16, #tpu.memory_space<vmem>>, vector<1x1x16x18xbf16>
    %114 = vector.shape_cast %113 : vector<1x1x16x18xbf16> to vector<16x18xbf16>
    %cst_83 = arith.constant dense<0.000000e+00> : vector<16x256xf32>
    %115 = tpu.matmul %114, %0, %cst_83 {dimension_numbers = #tpu.dot_dimension_numbers<[1], [0], [0], [1], [0, 0, 1, 1], [], []>} : vector<16x18xbf16>, vector<18x256xbf16>, vector<16x256xf32> -> vector<16x256xf32>
    %116 = vector.broadcast %1 : vector<1x256xf32> to vector<16x256xf32>
    %117 = arith.addf %115, %116 : vector<16x256xf32>
    %cst_84 = arith.constant 0.000000e+00 : f32
    %118 = vector.broadcast %cst_84 : f32 to vector<16x256xf32>
    %119 = arith.maximumf %117, %118 : vector<16x256xf32>
    %120 = arith.truncf %119 : vector<16x256xf32> to vector<16x256xbf16>
    %c9 = arith.constant 9 : index
    %c0_85 = arith.constant 0 : index
    %c0_86 = arith.constant 0 : index
    %121 = vector.load %arg5[%c9, %c0_85, %c0_86] : memref<13x256x128xbf16, #tpu.memory_space<vmem>>, vector<1x256x128xbf16>
    %122 = vector.shape_cast %121 : vector<1x256x128xbf16> to vector<256x128xbf16>
    %cst_87 = arith.constant dense<0.000000e+00> : vector<16x128xf32>
    %123 = tpu.matmul %120, %122, %cst_87 {dimension_numbers = #tpu.dot_dimension_numbers<[1], [0], [0], [1], [0, 0, 1, 1], [], []>} : vector<16x256xbf16>, vector<256x128xbf16>, vector<16x128xf32> -> vector<16x128xf32>
    %124 = arith.addf %112, %123 : vector<16x128xf32>
    %c0_88 = arith.constant 0 : index
    %c0_89 = arith.constant 0 : index
    %c0_90 = arith.constant 0 : index
    %c180 = arith.constant 180 : index
    %125 = vector.load %arg2[%c0_88, %c0_89, %c0_90, %c180] : memref<1x1x32x234xbf16, #tpu.memory_space<vmem>>, vector<1x1x16x18xbf16>
    %126 = vector.shape_cast %125 : vector<1x1x16x18xbf16> to vector<16x18xbf16>
    %cst_91 = arith.constant dense<0.000000e+00> : vector<16x256xf32>
    %127 = tpu.matmul %126, %0, %cst_91 {dimension_numbers = #tpu.dot_dimension_numbers<[1], [0], [0], [1], [0, 0, 1, 1], [], []>} : vector<16x18xbf16>, vector<18x256xbf16>, vector<16x256xf32> -> vector<16x256xf32>
    %128 = vector.broadcast %1 : vector<1x256xf32> to vector<16x256xf32>
    %129 = arith.addf %127, %128 : vector<16x256xf32>
    %cst_92 = arith.constant 0.000000e+00 : f32
    %130 = vector.broadcast %cst_92 : f32 to vector<16x256xf32>
    %131 = arith.maximumf %129, %130 : vector<16x256xf32>
    %132 = arith.truncf %131 : vector<16x256xf32> to vector<16x256xbf16>
    %c10 = arith.constant 10 : index
    %c0_93 = arith.constant 0 : index
    %c0_94 = arith.constant 0 : index
    %133 = vector.load %arg5[%c10, %c0_93, %c0_94] : memref<13x256x128xbf16, #tpu.memory_space<vmem>>, vector<1x256x128xbf16>
    %134 = vector.shape_cast %133 : vector<1x256x128xbf16> to vector<256x128xbf16>
    %cst_95 = arith.constant dense<0.000000e+00> : vector<16x128xf32>
    %135 = tpu.matmul %132, %134, %cst_95 {dimension_numbers = #tpu.dot_dimension_numbers<[1], [0], [0], [1], [0, 0, 1, 1], [], []>} : vector<16x256xbf16>, vector<256x128xbf16>, vector<16x128xf32> -> vector<16x128xf32>
    %136 = arith.addf %124, %135 : vector<16x128xf32>
    %c0_96 = arith.constant 0 : index
    %c0_97 = arith.constant 0 : index
    %c0_98 = arith.constant 0 : index
    %c198 = arith.constant 198 : index
    %137 = vector.load %arg2[%c0_96, %c0_97, %c0_98, %c198] : memref<1x1x32x234xbf16, #tpu.memory_space<vmem>>, vector<1x1x16x18xbf16>
    %138 = vector.shape_cast %137 : vector<1x1x16x18xbf16> to vector<16x18xbf16>
    %cst_99 = arith.constant dense<0.000000e+00> : vector<16x256xf32>
    %139 = tpu.matmul %138, %0, %cst_99 {dimension_numbers = #tpu.dot_dimension_numbers<[1], [0], [0], [1], [0, 0, 1, 1], [], []>} : vector<16x18xbf16>, vector<18x256xbf16>, vector<16x256xf32> -> vector<16x256xf32>
    %140 = vector.broadcast %1 : vector<1x256xf32> to vector<16x256xf32>
    %141 = arith.addf %139, %140 : vector<16x256xf32>
    %cst_100 = arith.constant 0.000000e+00 : f32
    %142 = vector.broadcast %cst_100 : f32 to vector<16x256xf32>
    %143 = arith.maximumf %141, %142 : vector<16x256xf32>
    %144 = arith.truncf %143 : vector<16x256xf32> to vector<16x256xbf16>
    %c11 = arith.constant 11 : index
    %c0_101 = arith.constant 0 : index
    %c0_102 = arith.constant 0 : index
    %145 = vector.load %arg5[%c11, %c0_101, %c0_102] : memref<13x256x128xbf16, #tpu.memory_space<vmem>>, vector<1x256x128xbf16>
    %146 = vector.shape_cast %145 : vector<1x256x128xbf16> to vector<256x128xbf16>
    %cst_103 = arith.constant dense<0.000000e+00> : vector<16x128xf32>
    %147 = tpu.matmul %144, %146, %cst_103 {dimension_numbers = #tpu.dot_dimension_numbers<[1], [0], [0], [1], [0, 0, 1, 1], [], []>} : vector<16x256xbf16>, vector<256x128xbf16>, vector<16x128xf32> -> vector<16x128xf32>
    %148 = arith.addf %136, %147 : vector<16x128xf32>
    %c0_104 = arith.constant 0 : index
    %c0_105 = arith.constant 0 : index
    %c0_106 = arith.constant 0 : index
    %c216 = arith.constant 216 : index
    %149 = vector.load %arg2[%c0_104, %c0_105, %c0_106, %c216] : memref<1x1x32x234xbf16, #tpu.memory_space<vmem>>, vector<1x1x16x18xbf16>
    %150 = vector.shape_cast %149 : vector<1x1x16x18xbf16> to vector<16x18xbf16>
    %cst_107 = arith.constant dense<0.000000e+00> : vector<16x256xf32>
    %151 = tpu.matmul %150, %0, %cst_107 {dimension_numbers = #tpu.dot_dimension_numbers<[1], [0], [0], [1], [0, 0, 1, 1], [], []>} : vector<16x18xbf16>, vector<18x256xbf16>, vector<16x256xf32> -> vector<16x256xf32>
    %152 = vector.broadcast %1 : vector<1x256xf32> to vector<16x256xf32>
    %153 = arith.addf %151, %152 : vector<16x256xf32>
    %cst_108 = arith.constant 0.000000e+00 : f32
    %154 = vector.broadcast %cst_108 : f32 to vector<16x256xf32>
    %155 = arith.maximumf %153, %154 : vector<16x256xf32>
    %156 = arith.truncf %155 : vector<16x256xf32> to vector<16x256xbf16>
    %c12 = arith.constant 12 : index
    %c0_109 = arith.constant 0 : index
    %c0_110 = arith.constant 0 : index
    %157 = vector.load %arg5[%c12, %c0_109, %c0_110] : memref<13x256x128xbf16, #tpu.memory_space<vmem>>, vector<1x256x128xbf16>
    %158 = vector.shape_cast %157 : vector<1x256x128xbf16> to vector<256x128xbf16>
    %cst_111 = arith.constant dense<0.000000e+00> : vector<16x128xf32>
    %159 = tpu.matmul %156, %158, %cst_111 {dimension_numbers = #tpu.dot_dimension_numbers<[1], [0], [0], [1], [0, 0, 1, 1], [], []>} : vector<16x256xbf16>, vector<256x128xbf16>, vector<16x128xf32> -> vector<16x128xf32>
    %160 = arith.addf %148, %159 : vector<16x128xf32>
    %161 = vector.broadcast %2 : vector<1x128xf32> to vector<16x128xf32>
    %162 = arith.addf %160, %161 : vector<16x128xf32>
    %cst_112 = arith.constant 0.000000e+00 : f32
    %163 = vector.broadcast %cst_112 : f32 to vector<16x128xf32>
    %164 = arith.maximumf %162, %163 : vector<16x128xf32>
    %165 = arith.truncf %164 : vector<16x128xf32> to vector<16x128xbf16>
    %c0_113 = arith.constant 0 : index
    %c0_114 = arith.constant 0 : index
    %c0_115 = arith.constant 0 : index
    %166 = vector.load %arg7[%c0_113, %c0_114, %c0_115] : memref<2x128x128xbf16, #tpu.memory_space<vmem>>, vector<1x128x128xbf16>
    %167 = vector.shape_cast %166 : vector<1x128x128xbf16> to vector<128x128xbf16>
    %cst_116 = arith.constant dense<0.000000e+00> : vector<16x128xf32>
    %168 = tpu.matmul %165, %167, %cst_116 {dimension_numbers = #tpu.dot_dimension_numbers<[1], [0], [0], [1], [0, 0, 1, 1], [], []>} : vector<16x128xbf16>, vector<128x128xbf16>, vector<16x128xf32> -> vector<16x128xf32>
    %169 = arith.addf %3, %168 : vector<16x128xf32>
    %cst_117 = arith.constant 0.000000e+00 : f32
    %170 = vector.broadcast %cst_117 : f32 to vector<16x128xf32>
    %c0_118 = arith.constant 0 : index
    %c0_119 = arith.constant 0 : index
    %c16 = arith.constant 16 : index
    %c0_120 = arith.constant 0 : index
    %171 = vector.load %arg2[%c0_118, %c0_119, %c16, %c0_120] : memref<1x1x32x234xbf16, #tpu.memory_space<vmem>>, vector<1x1x16x18xbf16>
    %172 = vector.shape_cast %171 : vector<1x1x16x18xbf16> to vector<16x18xbf16>
    %cst_121 = arith.constant dense<0.000000e+00> : vector<16x256xf32>
    %173 = tpu.matmul %172, %0, %cst_121 {dimension_numbers = #tpu.dot_dimension_numbers<[1], [0], [0], [1], [0, 0, 1, 1], [], []>} : vector<16x18xbf16>, vector<18x256xbf16>, vector<16x256xf32> -> vector<16x256xf32>
    %174 = vector.broadcast %1 : vector<1x256xf32> to vector<16x256xf32>
    %175 = arith.addf %173, %174 : vector<16x256xf32>
    %cst_122 = arith.constant 0.000000e+00 : f32
    %176 = vector.broadcast %cst_122 : f32 to vector<16x256xf32>
    %177 = arith.maximumf %175, %176 : vector<16x256xf32>
    %178 = arith.truncf %177 : vector<16x256xf32> to vector<16x256xbf16>
    %c0_123 = arith.constant 0 : index
    %c0_124 = arith.constant 0 : index
    %c0_125 = arith.constant 0 : index
    %179 = vector.load %arg5[%c0_123, %c0_124, %c0_125] : memref<13x256x128xbf16, #tpu.memory_space<vmem>>, vector<1x256x128xbf16>
    %180 = vector.shape_cast %179 : vector<1x256x128xbf16> to vector<256x128xbf16>
    %cst_126 = arith.constant dense<0.000000e+00> : vector<16x128xf32>
    %181 = tpu.matmul %178, %180, %cst_126 {dimension_numbers = #tpu.dot_dimension_numbers<[1], [0], [0], [1], [0, 0, 1, 1], [], []>} : vector<16x256xbf16>, vector<256x128xbf16>, vector<16x128xf32> -> vector<16x128xf32>
    %182 = arith.addf %170, %181 : vector<16x128xf32>
    %c0_127 = arith.constant 0 : index
    %c0_128 = arith.constant 0 : index
    %c16_129 = arith.constant 16 : index
    %c18_130 = arith.constant 18 : index
    %183 = vector.load %arg2[%c0_127, %c0_128, %c16_129, %c18_130] : memref<1x1x32x234xbf16, #tpu.memory_space<vmem>>, vector<1x1x16x18xbf16>
    %184 = vector.shape_cast %183 : vector<1x1x16x18xbf16> to vector<16x18xbf16>
    %cst_131 = arith.constant dense<0.000000e+00> : vector<16x256xf32>
    %185 = tpu.matmul %184, %0, %cst_131 {dimension_numbers = #tpu.dot_dimension_numbers<[1], [0], [0], [1], [0, 0, 1, 1], [], []>} : vector<16x18xbf16>, vector<18x256xbf16>, vector<16x256xf32> -> vector<16x256xf32>
    %186 = vector.broadcast %1 : vector<1x256xf32> to vector<16x256xf32>
    %187 = arith.addf %185, %186 : vector<16x256xf32>
    %cst_132 = arith.constant 0.000000e+00 : f32
    %188 = vector.broadcast %cst_132 : f32 to vector<16x256xf32>
    %189 = arith.maximumf %187, %188 : vector<16x256xf32>
    %190 = arith.truncf %189 : vector<16x256xf32> to vector<16x256xbf16>
    %c1_133 = arith.constant 1 : index
    %c0_134 = arith.constant 0 : index
    %c0_135 = arith.constant 0 : index
    %191 = vector.load %arg5[%c1_133, %c0_134, %c0_135] : memref<13x256x128xbf16, #tpu.memory_space<vmem>>, vector<1x256x128xbf16>
    %192 = vector.shape_cast %191 : vector<1x256x128xbf16> to vector<256x128xbf16>
    %cst_136 = arith.constant dense<0.000000e+00> : vector<16x128xf32>
    %193 = tpu.matmul %190, %192, %cst_136 {dimension_numbers = #tpu.dot_dimension_numbers<[1], [0], [0], [1], [0, 0, 1, 1], [], []>} : vector<16x256xbf16>, vector<256x128xbf16>, vector<16x128xf32> -> vector<16x128xf32>
    %194 = arith.addf %182, %193 : vector<16x128xf32>
    %c0_137 = arith.constant 0 : index
    %c0_138 = arith.constant 0 : index
    %c16_139 = arith.constant 16 : index
    %c36_140 = arith.constant 36 : index
    %195 = vector.load %arg2[%c0_137, %c0_138, %c16_139, %c36_140] : memref<1x1x32x234xbf16, #tpu.memory_space<vmem>>, vector<1x1x16x18xbf16>
    %196 = vector.shape_cast %195 : vector<1x1x16x18xbf16> to vector<16x18xbf16>
    %cst_141 = arith.constant dense<0.000000e+00> : vector<16x256xf32>
    %197 = tpu.matmul %196, %0, %cst_141 {dimension_numbers = #tpu.dot_dimension_numbers<[1], [0], [0], [1], [0, 0, 1, 1], [], []>} : vector<16x18xbf16>, vector<18x256xbf16>, vector<16x256xf32> -> vector<16x256xf32>
    %198 = vector.broadcast %1 : vector<1x256xf32> to vector<16x256xf32>
    %199 = arith.addf %197, %198 : vector<16x256xf32>
    %cst_142 = arith.constant 0.000000e+00 : f32
    %200 = vector.broadcast %cst_142 : f32 to vector<16x256xf32>
    %201 = arith.maximumf %199, %200 : vector<16x256xf32>
    %202 = arith.truncf %201 : vector<16x256xf32> to vector<16x256xbf16>
    %c2_143 = arith.constant 2 : index
    %c0_144 = arith.constant 0 : index
    %c0_145 = arith.constant 0 : index
    %203 = vector.load %arg5[%c2_143, %c0_144, %c0_145] : memref<13x256x128xbf16, #tpu.memory_space<vmem>>, vector<1x256x128xbf16>
    %204 = vector.shape_cast %203 : vector<1x256x128xbf16> to vector<256x128xbf16>
    %cst_146 = arith.constant dense<0.000000e+00> : vector<16x128xf32>
    %205 = tpu.matmul %202, %204, %cst_146 {dimension_numbers = #tpu.dot_dimension_numbers<[1], [0], [0], [1], [0, 0, 1, 1], [], []>} : vector<16x256xbf16>, vector<256x128xbf16>, vector<16x128xf32> -> vector<16x128xf32>
    %206 = arith.addf %194, %205 : vector<16x128xf32>
    %c0_147 = arith.constant 0 : index
    %c0_148 = arith.constant 0 : index
    %c16_149 = arith.constant 16 : index
    %c54_150 = arith.constant 54 : index
    %207 = vector.load %arg2[%c0_147, %c0_148, %c16_149, %c54_150] : memref<1x1x32x234xbf16, #tpu.memory_space<vmem>>, vector<1x1x16x18xbf16>
    %208 = vector.shape_cast %207 : vector<1x1x16x18xbf16> to vector<16x18xbf16>
    %cst_151 = arith.constant dense<0.000000e+00> : vector<16x256xf32>
    %209 = tpu.matmul %208, %0, %cst_151 {dimension_numbers = #tpu.dot_dimension_numbers<[1], [0], [0], [1], [0, 0, 1, 1], [], []>} : vector<16x18xbf16>, vector<18x256xbf16>, vector<16x256xf32> -> vector<16x256xf32>
    %210 = vector.broadcast %1 : vector<1x256xf32> to vector<16x256xf32>
    %211 = arith.addf %209, %210 : vector<16x256xf32>
    %cst_152 = arith.constant 0.000000e+00 : f32
    %212 = vector.broadcast %cst_152 : f32 to vector<16x256xf32>
    %213 = arith.maximumf %211, %212 : vector<16x256xf32>
    %214 = arith.truncf %213 : vector<16x256xf32> to vector<16x256xbf16>
    %c3_153 = arith.constant 3 : index
    %c0_154 = arith.constant 0 : index
    %c0_155 = arith.constant 0 : index
    %215 = vector.load %arg5[%c3_153, %c0_154, %c0_155] : memref<13x256x128xbf16, #tpu.memory_space<vmem>>, vector<1x256x128xbf16>
    %216 = vector.shape_cast %215 : vector<1x256x128xbf16> to vector<256x128xbf16>
    %cst_156 = arith.constant dense<0.000000e+00> : vector<16x128xf32>
    %217 = tpu.matmul %214, %216, %cst_156 {dimension_numbers = #tpu.dot_dimension_numbers<[1], [0], [0], [1], [0, 0, 1, 1], [], []>} : vector<16x256xbf16>, vector<256x128xbf16>, vector<16x128xf32> -> vector<16x128xf32>
    %218 = arith.addf %206, %217 : vector<16x128xf32>
    %c0_157 = arith.constant 0 : index
    %c0_158 = arith.constant 0 : index
    %c16_159 = arith.constant 16 : index
    %c72_160 = arith.constant 72 : index
    %219 = vector.load %arg2[%c0_157, %c0_158, %c16_159, %c72_160] : memref<1x1x32x234xbf16, #tpu.memory_space<vmem>>, vector<1x1x16x18xbf16>
    %220 = vector.shape_cast %219 : vector<1x1x16x18xbf16> to vector<16x18xbf16>
    %cst_161 = arith.constant dense<0.000000e+00> : vector<16x256xf32>
    %221 = tpu.matmul %220, %0, %cst_161 {dimension_numbers = #tpu.dot_dimension_numbers<[1], [0], [0], [1], [0, 0, 1, 1], [], []>} : vector<16x18xbf16>, vector<18x256xbf16>, vector<16x256xf32> -> vector<16x256xf32>
    %222 = vector.broadcast %1 : vector<1x256xf32> to vector<16x256xf32>
    %223 = arith.addf %221, %222 : vector<16x256xf32>
    %cst_162 = arith.constant 0.000000e+00 : f32
    %224 = vector.broadcast %cst_162 : f32 to vector<16x256xf32>
    %225 = arith.maximumf %223, %224 : vector<16x256xf32>
    %226 = arith.truncf %225 : vector<16x256xf32> to vector<16x256xbf16>
    %c4_163 = arith.constant 4 : index
    %c0_164 = arith.constant 0 : index
    %c0_165 = arith.constant 0 : index
    %227 = vector.load %arg5[%c4_163, %c0_164, %c0_165] : memref<13x256x128xbf16, #tpu.memory_space<vmem>>, vector<1x256x128xbf16>
    %228 = vector.shape_cast %227 : vector<1x256x128xbf16> to vector<256x128xbf16>
    %cst_166 = arith.constant dense<0.000000e+00> : vector<16x128xf32>
    %229 = tpu.matmul %226, %228, %cst_166 {dimension_numbers = #tpu.dot_dimension_numbers<[1], [0], [0], [1], [0, 0, 1, 1], [], []>} : vector<16x256xbf16>, vector<256x128xbf16>, vector<16x128xf32> -> vector<16x128xf32>
    %230 = arith.addf %218, %229 : vector<16x128xf32>
    %c0_167 = arith.constant 0 : index
    %c0_168 = arith.constant 0 : index
    %c16_169 = arith.constant 16 : index
    %c90_170 = arith.constant 90 : index
    %231 = vector.load %arg2[%c0_167, %c0_168, %c16_169, %c90_170] : memref<1x1x32x234xbf16, #tpu.memory_space<vmem>>, vector<1x1x16x18xbf16>
    %232 = vector.shape_cast %231 : vector<1x1x16x18xbf16> to vector<16x18xbf16>
    %cst_171 = arith.constant dense<0.000000e+00> : vector<16x256xf32>
    %233 = tpu.matmul %232, %0, %cst_171 {dimension_numbers = #tpu.dot_dimension_numbers<[1], [0], [0], [1], [0, 0, 1, 1], [], []>} : vector<16x18xbf16>, vector<18x256xbf16>, vector<16x256xf32> -> vector<16x256xf32>
    %234 = vector.broadcast %1 : vector<1x256xf32> to vector<16x256xf32>
    %235 = arith.addf %233, %234 : vector<16x256xf32>
    %cst_172 = arith.constant 0.000000e+00 : f32
    %236 = vector.broadcast %cst_172 : f32 to vector<16x256xf32>
    %237 = arith.maximumf %235, %236 : vector<16x256xf32>
    %238 = arith.truncf %237 : vector<16x256xf32> to vector<16x256xbf16>
    %c5_173 = arith.constant 5 : index
    %c0_174 = arith.constant 0 : index
    %c0_175 = arith.constant 0 : index
    %239 = vector.load %arg5[%c5_173, %c0_174, %c0_175] : memref<13x256x128xbf16, #tpu.memory_space<vmem>>, vector<1x256x128xbf16>
    %240 = vector.shape_cast %239 : vector<1x256x128xbf16> to vector<256x128xbf16>
    %cst_176 = arith.constant dense<0.000000e+00> : vector<16x128xf32>
    %241 = tpu.matmul %238, %240, %cst_176 {dimension_numbers = #tpu.dot_dimension_numbers<[1], [0], [0], [1], [0, 0, 1, 1], [], []>} : vector<16x256xbf16>, vector<256x128xbf16>, vector<16x128xf32> -> vector<16x128xf32>
    %242 = arith.addf %230, %241 : vector<16x128xf32>
    %c0_177 = arith.constant 0 : index
    %c0_178 = arith.constant 0 : index
    %c16_179 = arith.constant 16 : index
    %c108_180 = arith.constant 108 : index
    %243 = vector.load %arg2[%c0_177, %c0_178, %c16_179, %c108_180] : memref<1x1x32x234xbf16, #tpu.memory_space<vmem>>, vector<1x1x16x18xbf16>
    %244 = vector.shape_cast %243 : vector<1x1x16x18xbf16> to vector<16x18xbf16>
    %cst_181 = arith.constant dense<0.000000e+00> : vector<16x256xf32>
    %245 = tpu.matmul %244, %0, %cst_181 {dimension_numbers = #tpu.dot_dimension_numbers<[1], [0], [0], [1], [0, 0, 1, 1], [], []>} : vector<16x18xbf16>, vector<18x256xbf16>, vector<16x256xf32> -> vector<16x256xf32>
    %246 = vector.broadcast %1 : vector<1x256xf32> to vector<16x256xf32>
    %247 = arith.addf %245, %246 : vector<16x256xf32>
    %cst_182 = arith.constant 0.000000e+00 : f32
    %248 = vector.broadcast %cst_182 : f32 to vector<16x256xf32>
    %249 = arith.maximumf %247, %248 : vector<16x256xf32>
    %250 = arith.truncf %249 : vector<16x256xf32> to vector<16x256xbf16>
    %c6_183 = arith.constant 6 : index
    %c0_184 = arith.constant 0 : index
    %c0_185 = arith.constant 0 : index
    %251 = vector.load %arg5[%c6_183, %c0_184, %c0_185] : memref<13x256x128xbf16, #tpu.memory_space<vmem>>, vector<1x256x128xbf16>
    %252 = vector.shape_cast %251 : vector<1x256x128xbf16> to vector<256x128xbf16>
    %cst_186 = arith.constant dense<0.000000e+00> : vector<16x128xf32>
    %253 = tpu.matmul %250, %252, %cst_186 {dimension_numbers = #tpu.dot_dimension_numbers<[1], [0], [0], [1], [0, 0, 1, 1], [], []>} : vector<16x256xbf16>, vector<256x128xbf16>, vector<16x128xf32> -> vector<16x128xf32>
    %254 = arith.addf %242, %253 : vector<16x128xf32>
    %c0_187 = arith.constant 0 : index
    %c0_188 = arith.constant 0 : index
    %c16_189 = arith.constant 16 : index
    %c126_190 = arith.constant 126 : index
    %255 = vector.load %arg2[%c0_187, %c0_188, %c16_189, %c126_190] : memref<1x1x32x234xbf16, #tpu.memory_space<vmem>>, vector<1x1x16x18xbf16>
    %256 = vector.shape_cast %255 : vector<1x1x16x18xbf16> to vector<16x18xbf16>
    %cst_191 = arith.constant dense<0.000000e+00> : vector<16x256xf32>
    %257 = tpu.matmul %256, %0, %cst_191 {dimension_numbers = #tpu.dot_dimension_numbers<[1], [0], [0], [1], [0, 0, 1, 1], [], []>} : vector<16x18xbf16>, vector<18x256xbf16>, vector<16x256xf32> -> vector<16x256xf32>
    %258 = vector.broadcast %1 : vector<1x256xf32> to vector<16x256xf32>
    %259 = arith.addf %257, %258 : vector<16x256xf32>
    %cst_192 = arith.constant 0.000000e+00 : f32
    %260 = vector.broadcast %cst_192 : f32 to vector<16x256xf32>
    %261 = arith.maximumf %259, %260 : vector<16x256xf32>
    %262 = arith.truncf %261 : vector<16x256xf32> to vector<16x256xbf16>
    %c7_193 = arith.constant 7 : index
    %c0_194 = arith.constant 0 : index
    %c0_195 = arith.constant 0 : index
    %263 = vector.load %arg5[%c7_193, %c0_194, %c0_195] : memref<13x256x128xbf16, #tpu.memory_space<vmem>>, vector<1x256x128xbf16>
    %264 = vector.shape_cast %263 : vector<1x256x128xbf16> to vector<256x128xbf16>
    %cst_196 = arith.constant dense<0.000000e+00> : vector<16x128xf32>
    %265 = tpu.matmul %262, %264, %cst_196 {dimension_numbers = #tpu.dot_dimension_numbers<[1], [0], [0], [1], [0, 0, 1, 1], [], []>} : vector<16x256xbf16>, vector<256x128xbf16>, vector<16x128xf32> -> vector<16x128xf32>
    %266 = arith.addf %254, %265 : vector<16x128xf32>
    %c0_197 = arith.constant 0 : index
    %c0_198 = arith.constant 0 : index
    %c16_199 = arith.constant 16 : index
    %c144_200 = arith.constant 144 : index
    %267 = vector.load %arg2[%c0_197, %c0_198, %c16_199, %c144_200] : memref<1x1x32x234xbf16, #tpu.memory_space<vmem>>, vector<1x1x16x18xbf16>
    %268 = vector.shape_cast %267 : vector<1x1x16x18xbf16> to vector<16x18xbf16>
    %cst_201 = arith.constant dense<0.000000e+00> : vector<16x256xf32>
    %269 = tpu.matmul %268, %0, %cst_201 {dimension_numbers = #tpu.dot_dimension_numbers<[1], [0], [0], [1], [0, 0, 1, 1], [], []>} : vector<16x18xbf16>, vector<18x256xbf16>, vector<16x256xf32> -> vector<16x256xf32>
    %270 = vector.broadcast %1 : vector<1x256xf32> to vector<16x256xf32>
    %271 = arith.addf %269, %270 : vector<16x256xf32>
    %cst_202 = arith.constant 0.000000e+00 : f32
    %272 = vector.broadcast %cst_202 : f32 to vector<16x256xf32>
    %273 = arith.maximumf %271, %272 : vector<16x256xf32>
    %274 = arith.truncf %273 : vector<16x256xf32> to vector<16x256xbf16>
    %c8_203 = arith.constant 8 : index
    %c0_204 = arith.constant 0 : index
    %c0_205 = arith.constant 0 : index
    %275 = vector.load %arg5[%c8_203, %c0_204, %c0_205] : memref<13x256x128xbf16, #tpu.memory_space<vmem>>, vector<1x256x128xbf16>
    %276 = vector.shape_cast %275 : vector<1x256x128xbf16> to vector<256x128xbf16>
    %cst_206 = arith.constant dense<0.000000e+00> : vector<16x128xf32>
    %277 = tpu.matmul %274, %276, %cst_206 {dimension_numbers = #tpu.dot_dimension_numbers<[1], [0], [0], [1], [0, 0, 1, 1], [], []>} : vector<16x256xbf16>, vector<256x128xbf16>, vector<16x128xf32> -> vector<16x128xf32>
    %278 = arith.addf %266, %277 : vector<16x128xf32>
    %c0_207 = arith.constant 0 : index
    %c0_208 = arith.constant 0 : index
    %c16_209 = arith.constant 16 : index
    %c162_210 = arith.constant 162 : index
    %279 = vector.load %arg2[%c0_207, %c0_208, %c16_209, %c162_210] : memref<1x1x32x234xbf16, #tpu.memory_space<vmem>>, vector<1x1x16x18xbf16>
    %280 = vector.shape_cast %279 : vector<1x1x16x18xbf16> to vector<16x18xbf16>
    %cst_211 = arith.constant dense<0.000000e+00> : vector<16x256xf32>
    %281 = tpu.matmul %280, %0, %cst_211 {dimension_numbers = #tpu.dot_dimension_numbers<[1], [0], [0], [1], [0, 0, 1, 1], [], []>} : vector<16x18xbf16>, vector<18x256xbf16>, vector<16x256xf32> -> vector<16x256xf32>
    %282 = vector.broadcast %1 : vector<1x256xf32> to vector<16x256xf32>
    %283 = arith.addf %281, %282 : vector<16x256xf32>
    %cst_212 = arith.constant 0.000000e+00 : f32
    %284 = vector.broadcast %cst_212 : f32 to vector<16x256xf32>
    %285 = arith.maximumf %283, %284 : vector<16x256xf32>
    %286 = arith.truncf %285 : vector<16x256xf32> to vector<16x256xbf16>
    %c9_213 = arith.constant 9 : index
    %c0_214 = arith.constant 0 : index
    %c0_215 = arith.constant 0 : index
    %287 = vector.load %arg5[%c9_213, %c0_214, %c0_215] : memref<13x256x128xbf16, #tpu.memory_space<vmem>>, vector<1x256x128xbf16>
    %288 = vector.shape_cast %287 : vector<1x256x128xbf16> to vector<256x128xbf16>
    %cst_216 = arith.constant dense<0.000000e+00> : vector<16x128xf32>
    %289 = tpu.matmul %286, %288, %cst_216 {dimension_numbers = #tpu.dot_dimension_numbers<[1], [0], [0], [1], [0, 0, 1, 1], [], []>} : vector<16x256xbf16>, vector<256x128xbf16>, vector<16x128xf32> -> vector<16x128xf32>
    %290 = arith.addf %278, %289 : vector<16x128xf32>
    %c0_217 = arith.constant 0 : index
    %c0_218 = arith.constant 0 : index
    %c16_219 = arith.constant 16 : index
    %c180_220 = arith.constant 180 : index
    %291 = vector.load %arg2[%c0_217, %c0_218, %c16_219, %c180_220] : memref<1x1x32x234xbf16, #tpu.memory_space<vmem>>, vector<1x1x16x18xbf16>
    %292 = vector.shape_cast %291 : vector<1x1x16x18xbf16> to vector<16x18xbf16>
    %cst_221 = arith.constant dense<0.000000e+00> : vector<16x256xf32>
    %293 = tpu.matmul %292, %0, %cst_221 {dimension_numbers = #tpu.dot_dimension_numbers<[1], [0], [0], [1], [0, 0, 1, 1], [], []>} : vector<16x18xbf16>, vector<18x256xbf16>, vector<16x256xf32> -> vector<16x256xf32>
    %294 = vector.broadcast %1 : vector<1x256xf32> to vector<16x256xf32>
    %295 = arith.addf %293, %294 : vector<16x256xf32>
    %cst_222 = arith.constant 0.000000e+00 : f32
    %296 = vector.broadcast %cst_222 : f32 to vector<16x256xf32>
    %297 = arith.maximumf %295, %296 : vector<16x256xf32>
    %298 = arith.truncf %297 : vector<16x256xf32> to vector<16x256xbf16>
    %c10_223 = arith.constant 10 : index
    %c0_224 = arith.constant 0 : index
    %c0_225 = arith.constant 0 : index
    %299 = vector.load %arg5[%c10_223, %c0_224, %c0_225] : memref<13x256x128xbf16, #tpu.memory_space<vmem>>, vector<1x256x128xbf16>
    %300 = vector.shape_cast %299 : vector<1x256x128xbf16> to vector<256x128xbf16>
    %cst_226 = arith.constant dense<0.000000e+00> : vector<16x128xf32>
    %301 = tpu.matmul %298, %300, %cst_226 {dimension_numbers = #tpu.dot_dimension_numbers<[1], [0], [0], [1], [0, 0, 1, 1], [], []>} : vector<16x256xbf16>, vector<256x128xbf16>, vector<16x128xf32> -> vector<16x128xf32>
    %302 = arith.addf %290, %301 : vector<16x128xf32>
    %c0_227 = arith.constant 0 : index
    %c0_228 = arith.constant 0 : index
    %c16_229 = arith.constant 16 : index
    %c198_230 = arith.constant 198 : index
    %303 = vector.load %arg2[%c0_227, %c0_228, %c16_229, %c198_230] : memref<1x1x32x234xbf16, #tpu.memory_space<vmem>>, vector<1x1x16x18xbf16>
    %304 = vector.shape_cast %303 : vector<1x1x16x18xbf16> to vector<16x18xbf16>
    %cst_231 = arith.constant dense<0.000000e+00> : vector<16x256xf32>
    %305 = tpu.matmul %304, %0, %cst_231 {dimension_numbers = #tpu.dot_dimension_numbers<[1], [0], [0], [1], [0, 0, 1, 1], [], []>} : vector<16x18xbf16>, vector<18x256xbf16>, vector<16x256xf32> -> vector<16x256xf32>
    %306 = vector.broadcast %1 : vector<1x256xf32> to vector<16x256xf32>
    %307 = arith.addf %305, %306 : vector<16x256xf32>
    %cst_232 = arith.constant 0.000000e+00 : f32
    %308 = vector.broadcast %cst_232 : f32 to vector<16x256xf32>
    %309 = arith.maximumf %307, %308 : vector<16x256xf32>
    %310 = arith.truncf %309 : vector<16x256xf32> to vector<16x256xbf16>
    %c11_233 = arith.constant 11 : index
    %c0_234 = arith.constant 0 : index
    %c0_235 = arith.constant 0 : index
    %311 = vector.load %arg5[%c11_233, %c0_234, %c0_235] : memref<13x256x128xbf16, #tpu.memory_space<vmem>>, vector<1x256x128xbf16>
    %312 = vector.shape_cast %311 : vector<1x256x128xbf16> to vector<256x128xbf16>
    %cst_236 = arith.constant dense<0.000000e+00> : vector<16x128xf32>
    %313 = tpu.matmul %310, %312, %cst_236 {dimension_numbers = #tpu.dot_dimension_numbers<[1], [0], [0], [1], [0, 0, 1, 1], [], []>} : vector<16x256xbf16>, vector<256x128xbf16>, vector<16x128xf32> -> vector<16x128xf32>
    %314 = arith.addf %302, %313 : vector<16x128xf32>
    %c0_237 = arith.constant 0 : index
    %c0_238 = arith.constant 0 : index
    %c16_239 = arith.constant 16 : index
    %c216_240 = arith.constant 216 : index
    %315 = vector.load %arg2[%c0_237, %c0_238, %c16_239, %c216_240] : memref<1x1x32x234xbf16, #tpu.memory_space<vmem>>, vector<1x1x16x18xbf16>
    %316 = vector.shape_cast %315 : vector<1x1x16x18xbf16> to vector<16x18xbf16>
    %cst_241 = arith.constant dense<0.000000e+00> : vector<16x256xf32>
    %317 = tpu.matmul %316, %0, %cst_241 {dimension_numbers = #tpu.dot_dimension_numbers<[1], [0], [0], [1], [0, 0, 1, 1], [], []>} : vector<16x18xbf16>, vector<18x256xbf16>, vector<16x256xf32> -> vector<16x256xf32>
    %318 = vector.broadcast %1 : vector<1x256xf32> to vector<16x256xf32>
    %319 = arith.addf %317, %318 : vector<16x256xf32>
    %cst_242 = arith.constant 0.000000e+00 : f32
    %320 = vector.broadcast %cst_242 : f32 to vector<16x256xf32>
    %321 = arith.maximumf %319, %320 : vector<16x256xf32>
    %322 = arith.truncf %321 : vector<16x256xf32> to vector<16x256xbf16>
    %c12_243 = arith.constant 12 : index
    %c0_244 = arith.constant 0 : index
    %c0_245 = arith.constant 0 : index
    %323 = vector.load %arg5[%c12_243, %c0_244, %c0_245] : memref<13x256x128xbf16, #tpu.memory_space<vmem>>, vector<1x256x128xbf16>
    %324 = vector.shape_cast %323 : vector<1x256x128xbf16> to vector<256x128xbf16>
    %cst_246 = arith.constant dense<0.000000e+00> : vector<16x128xf32>
    %325 = tpu.matmul %322, %324, %cst_246 {dimension_numbers = #tpu.dot_dimension_numbers<[1], [0], [0], [1], [0, 0, 1, 1], [], []>} : vector<16x256xbf16>, vector<256x128xbf16>, vector<16x128xf32> -> vector<16x128xf32>
    %326 = arith.addf %314, %325 : vector<16x128xf32>
    %327 = vector.broadcast %2 : vector<1x128xf32> to vector<16x128xf32>
    %328 = arith.addf %326, %327 : vector<16x128xf32>
    %cst_247 = arith.constant 0.000000e+00 : f32
    %329 = vector.broadcast %cst_247 : f32 to vector<16x128xf32>
    %330 = arith.maximumf %328, %329 : vector<16x128xf32>
    %331 = arith.truncf %330 : vector<16x128xf32> to vector<16x128xbf16>
    %c1_248 = arith.constant 1 : index
    %c0_249 = arith.constant 0 : index
    %c0_250 = arith.constant 0 : index
    %332 = vector.load %arg7[%c1_248, %c0_249, %c0_250] : memref<2x128x128xbf16, #tpu.memory_space<vmem>>, vector<1x128x128xbf16>
    %333 = vector.shape_cast %332 : vector<1x128x128xbf16> to vector<128x128xbf16>
    %cst_251 = arith.constant dense<0.000000e+00> : vector<16x128xf32>
    %334 = tpu.matmul %331, %333, %cst_251 {dimension_numbers = #tpu.dot_dimension_numbers<[1], [0], [0], [1], [0, 0, 1, 1], [], []>} : vector<16x128xbf16>, vector<128x128xbf16>, vector<16x128xf32> -> vector<16x128xf32>
    %335 = arith.addf %169, %334 : vector<16x128xf32>
    %c0_252 = arith.constant 0 : index
    %c0_253 = arith.constant 0 : index
    %336 = vector.load %arg8[%c0_252, %c0_253] : memref<1x128xf32, #tpu.memory_space<vmem>>, vector<1x128xf32>
    %337 = vector.broadcast %336 : vector<1x128xf32> to vector<16x128xf32>
    %338 = arith.addf %335, %337 : vector<16x128xf32>
    %c0_254 = arith.constant 0 : index
    %c0_255 = arith.constant 0 : index
    %339 = vector.load %arg9[%c0_254, %c0_255] : memref<16x128xf32, #tpu.memory_space<vmem>>, vector<16x128xf32>
    %340 = arith.addf %338, %339 : vector<16x128xf32>
    %c0_256 = arith.constant 0 : index
    %c0_257 = arith.constant 0 : index
    %c0_258 = arith.constant 0 : index
    %341 = vector.load %arg10[%c0_256, %c0_257, %c0_258] : memref<1x16x128xf32, #tpu.memory_space<vmem>>, vector<1x16x128xf32>
    %342 = vector.shape_cast %341 : vector<1x16x128xf32> to vector<16x128xf32>
    %343 = vector.shape_cast %340 : vector<16x128xf32> to vector<1x16x128xf32>
    tpu.vector_store %arg10[%c0_256, %c0_257, %c0_258], %343 {strides = array<i32>} : memref<1x16x128xf32, #tpu.memory_space<vmem>>, vector<1x16x128xf32>,
    return
  }
  func.func @transform_0(%arg0: i32, %arg1: i32) -> (i32, i32, i32, i32) {
    %c0_i32 = arith.constant 0 : i32
    %c0_i32_0 = arith.constant 0 : i32
    %c0_i32_1 = arith.constant 0 : i32
    return %arg0, %arg1, %c0_i32, %c0_i32_0 : i32, i32, i32, i32
  }
  func.func @transform_1(%arg0: i32, %arg1: i32) -> (i32, i32) {
    %c0_i32 = arith.constant 0 : i32
    %c0_i32_0 = arith.constant 0 : i32
    %c0_i32_1 = arith.constant 0 : i32
    return %c0_i32, %c0_i32_0 : i32, i32
  }
  func.func @transform_2(%arg0: i32, %arg1: i32) -> (i32, i32) {
    %c0_i32 = arith.constant 0 : i32
    %c0_i32_0 = arith.constant 0 : i32
    %c0_i32_1 = arith.constant 0 : i32
    return %c0_i32, %c0_i32_0 : i32, i32
  }
  func.func @transform_3(%arg0: i32, %arg1: i32) -> (i32, i32, i32) {
    %c0_i32 = arith.constant 0 : i32
    %c0_i32_0 = arith.constant 0 : i32
    %c0_i32_1 = arith.constant 0 : i32
    %c0_i32_2 = arith.constant 0 : i32
    return %c0_i32, %c0_i32_0, %c0_i32_1 : i32, i32, i32
  }
  func.func @transform_4(%arg0: i32, %arg1: i32) -> (i32, i32) {
    %c0_i32 = arith.constant 0 : i32
    %c0_i32_0 = arith.constant 0 : i32
    %c0_i32_1 = arith.constant 0 : i32
    return %c0_i32, %c0_i32_0 : i32, i32
  }
  func.func @transform_5(%arg0: i32, %arg1: i32) -> (i32, i32, i32) {
    %c0_i32 = arith.constant 0 : i32
    %c0_i32_0 = arith.constant 0 : i32
    %c0_i32_1 = arith.constant 0 : i32
    %c0_i32_2 = arith.constant 0 : i32
    return %c0_i32, %c0_i32_0, %c0_i32_1 : i32, i32, i32
  }
  func.func @transform_6(%arg0: i32, %arg1: i32) -> (i32, i32) {
    %c0_i32 = arith.constant 0 : i32
    %c0_i32_0 = arith.constant 0 : i32
    %c0_i32_1 = arith.constant 0 : i32
    return %c0_i32, %c0_i32_0 : i32, i32
  }
  func.func @transform_7(%arg0: i32, %arg1: i32) -> (i32, i32) {
    %c0_i32 = arith.constant 0 : i32
    %c0_i32_0 = arith.constant 0 : i32
    return %arg1, %c0_i32 : i32, i32
  }
  func.func @transform_8(%arg0: i32, %arg1: i32) -> (i32, i32, i32) {
    %c0_i32 = arith.constant 0 : i32
    %c0_i32_0 = arith.constant 0 : i32
    return %arg0, %arg1, %c0_i32 : i32, i32, i32
  }
}

module attributes {stable_mosaic.version = 11 : i64} {
  func.func @_fused_subsample_kernel(%arg0: i32, %arg1: i32, %arg2: memref<1x1x32x234xbf16, #tpu.memory_space<vmem>>, %arg3: memref<18x256xbf16, #tpu.memory_space<vmem>>, %arg4: memref<1x256xf32, #tpu.memory_space<vmem>>, %arg5: memref<13x256x128xbf16, #tpu.memory_space<vmem>>, %arg6: memref<1x128xf32, #tpu.memory_space<vmem>>, %arg7: memref<2x128x128xbf16, #tpu.memory_space<vmem>>, %arg8: memref<1x128xf32, #tpu.memory_space<vmem>>, %arg9: memref<16x128xf32, #tpu.memory_space<vmem>>, %arg10: memref<1x16x128xf32, #tpu.memory_space<vmem>>) attributes {dimension_semantics = [#tpu.dimension_semantics<parallel>, #tpu.dimension_semantics<parallel>], iteration_bounds = array<i64: 2, 1>, scalar_prefetch = 0 : i64, scratch_operands = 0 : i64, tpu.core_type = #tpu.core_type<tc>, window_params = [{transform_indices = @transform_0, window_bounds = array<i64: 1, 1, 32, 234>}, {pipeline_mode = #tpu.pipeline_mode<synchronous>, transform_indices = @transform_1, window_bounds = array<i64: 18, 256>}, {pipeline_mode = #tpu.pipeline_mode<synchronous>, transform_indices = @transform_2, window_bounds = array<i64: 1, 256>}, {pipeline_mode = #tpu.pipeline_mode<synchronous>, transform_indices = @transform_3, window_bounds = array<i64: 13, 256, 128>}, {pipeline_mode = #tpu.pipeline_mode<synchronous>, transform_indices = @transform_4, window_bounds = array<i64: 1, 128>}, {pipeline_mode = #tpu.pipeline_mode<synchronous>, transform_indices = @transform_5, window_bounds = array<i64: 2, 128, 128>}, {pipeline_mode = #tpu.pipeline_mode<synchronous>, transform_indices = @transform_6, window_bounds = array<i64: 1, 128>}, {transform_indices = @transform_7, window_bounds = array<i64: 16, 128>}, {transform_indices = @transform_8, window_bounds = array<i64: 1, 16, 128>}]} {
    %c0 = arith.constant 0 : index
    %c0_0 = arith.constant 0 : index
    %0 = vector.load %arg3[%c0, %c0_0] : memref<18x256xbf16, #tpu.memory_space<vmem>>, vector<18x256xbf16>
    %c0_1 = arith.constant 0 : index
    %c0_2 = arith.constant 0 : index
    %1 = vector.load %arg4[%c0_1, %c0_2] : memref<1x256xf32, #tpu.memory_space<vmem>>, vector<1x256xf32>
    %c0_3 = arith.constant 0 : index
    %c0_4 = arith.constant 0 : index
    %2 = vector.load %arg6[%c0_3, %c0_4] : memref<1x128xf32, #tpu.memory_space<vmem>>, vector<1x128xf32>
    %cst = arith.constant 0.000000e+00 : f32
    %3 = vector.broadcast %cst : f32 to vector<16x128xf32>
    %cst_5 = arith.constant 0.000000e+00 : f32
    %4 = vector.broadcast %cst_5 : f32 to vector<16x128xf32>
    %c0_6 = arith.constant 0 : index
    %c0_7 = arith.constant 0 : index
    %c0_8 = arith.constant 0 : index
    %c0_9 = arith.constant 0 : index
    %5 = vector.load %arg2[%c0_6, %c0_7, %c0_8, %c0_9] : memref<1x1x32x234xbf16, #tpu.memory_space<vmem>>, vector<1x1x16x18xbf16>
    %6 = vector.shape_cast %5 : vector<1x1x16x18xbf16> to vector<16x18xbf16>
    %cst_10 = arith.constant dense<0.000000e+00> : vector<16x256xf32>
    %7 = tpu.matmul %6, %0, %cst_10 {dimension_numbers = #tpu.dot_dimension_numbers<[1], [0], [0], [1], [0, 0, 1, 1], [], []>} : vector<16x18xbf16>, vector<18x256xbf16>, vector<16x256xf32> -> vector<16x256xf32>
    %8 = vector.broadcast %1 : vector<1x256xf32> to vector<16x256xf32>
    %9 = arith.addf %7, %8 : vector<16x256xf32>
    %cst_11 = arith.constant 0.000000e+00 : f32
    %10 = vector.broadcast %cst_11 : f32 to vector<16x256xf32>
    %11 = arith.maximumf %9, %10 : vector<16x256xf32>
    %12 = arith.truncf %11 : vector<16x256xf32> to vector<16x256xbf16>
    %c0_12 = arith.constant 0 : index
    %c0_13 = arith.constant 0 : index
    %c0_14 = arith.constant 0 : index
    %13 = vector.load %arg5[%c0_12, %c0_13, %c0_14] : memref<13x256x128xbf16, #tpu.memory_space<vmem>>, vector<1x256x128xbf16>
    %14 = vector.shape_cast %13 : vector<1x256x128xbf16> to vector<256x128xbf16>
    %cst_15 = arith.constant dense<0.000000e+00> : vector<16x128xf32>
    %15 = tpu.matmul %12, %14, %cst_15 {dimension_numbers = #tpu.dot_dimension_numbers<[1], [0], [0], [1], [0, 0, 1, 1], [], []>} : vector<16x256xbf16>, vector<256x128xbf16>, vector<16x128xf32> -> vector<16x128xf32>
    %16 = arith.addf %4, %15 : vector<16x128xf32>
    %c0_16 = arith.constant 0 : index
    %c0_17 = arith.constant 0 : index
    %c0_18 = arith.constant 0 : index
    %c18 = arith.constant 18 : index
    %17 = vector.load %arg2[%c0_16, %c0_17, %c0_18, %c18] : memref<1x1x32x234xbf16, #tpu.memory_space<vmem>>, vector<1x1x16x18xbf16>
    %18 = vector.shape_cast %17 : vector<1x1x16x18xbf16> to vector<16x18xbf16>
    %cst_19 = arith.constant dense<0.000000e+00> : vector<16x256xf32>
    %19 = tpu.matmul %18, %0, %cst_19 {dimension_numbers = #tpu.dot_dimension_numbers<[1], [0], [0], [1], [0, 0, 1, 1], [], []>} : vector<16x18xbf16>, vector<18x256xbf16>, vector<16x256xf32> -> vector<16x256xf32>
    %20 = vector.broadcast %1 : vector<1x256xf32> to vector<16x256xf32>
    %21 = arith.addf %19, %20 : vector<16x256xf32>
    %cst_20 = arith.constant 0.000000e+00 : f32
    %22 = vector.broadcast %cst_20 : f32 to vector<16x256xf32>
    %23 = arith.maximumf %21, %22 : vector<16x256xf32>
    %24 = arith.truncf %23 : vector<16x256xf32> to vector<16x256xbf16>
    %c1 = arith.constant 1 : index
    %c0_21 = arith.constant 0 : index
    %c0_22 = arith.constant 0 : index
    %25 = vector.load %arg5[%c1, %c0_21, %c0_22] : memref<13x256x128xbf16, #tpu.memory_space<vmem>>, vector<1x256x128xbf16>
    %26 = vector.shape_cast %25 : vector<1x256x128xbf16> to vector<256x128xbf16>
    %cst_23 = arith.constant dense<0.000000e+00> : vector<16x128xf32>
    %27 = tpu.matmul %24, %26, %cst_23 {dimension_numbers = #tpu.dot_dimension_numbers<[1], [0], [0], [1], [0, 0, 1, 1], [], []>} : vector<16x256xbf16>, vector<256x128xbf16>, vector<16x128xf32> -> vector<16x128xf32>
    %28 = arith.addf %16, %27 : vector<16x128xf32>
    %c0_24 = arith.constant 0 : index
    %c0_25 = arith.constant 0 : index
    %c0_26 = arith.constant 0 : index
    %c36 = arith.constant 36 : index
    %29 = vector.load %arg2[%c0_24, %c0_25, %c0_26, %c36] : memref<1x1x32x234xbf16, #tpu.memory_space<vmem>>, vector<1x1x16x18xbf16>
    %30 = vector.shape_cast %29 : vector<1x1x16x18xbf16> to vector<16x18xbf16>
    %cst_27 = arith.constant dense<0.000000e+00> : vector<16x256xf32>
    %31 = tpu.matmul %30, %0, %cst_27 {dimension_numbers = #tpu.dot_dimension_numbers<[1], [0], [0], [1], [0, 0, 1, 1], [], []>} : vector<16x18xbf16>, vector<18x256xbf16>, vector<16x256xf32> -> vector<16x256xf32>
    %32 = vector.broadcast %1 : vector<1x256xf32> to vector<16x256xf32>
    %33 = arith.addf %31, %32 : vector<16x256xf32>
    %cst_28 = arith.constant 0.000000e+00 : f32
    %34 = vector.broadcast %cst_28 : f32 to vector<16x256xf32>
    %35 = arith.maximumf %33, %34 : vector<16x256xf32>
    %36 = arith.truncf %35 : vector<16x256xf32> to vector<16x256xbf16>
    %c2 = arith.constant 2 : index
    %c0_29 = arith.constant 0 : index
    %c0_30 = arith.constant 0 : index
    %37 = vector.load %arg5[%c2, %c0_29, %c0_30] : memref<13x256x128xbf16, #tpu.memory_space<vmem>>, vector<1x256x128xbf16>
    %38 = vector.shape_cast %37 : vector<1x256x128xbf16> to vector<256x128xbf16>
    %cst_31 = arith.constant dense<0.000000e+00> : vector<16x128xf32>
    %39 = tpu.matmul %36, %38, %cst_31 {dimension_numbers = #tpu.dot_dimension_numbers<[1], [0], [0], [1], [0, 0, 1, 1], [], []>} : vector<16x256xbf16>, vector<256x128xbf16>, vector<16x128xf32> -> vector<16x128xf32>
    %40 = arith.addf %28, %39 : vector<16x128xf32>
    %c0_32 = arith.constant 0 : index
    %c0_33 = arith.constant 0 : index
    %c0_34 = arith.constant 0 : index
    %c54 = arith.constant 54 : index
    %41 = vector.load %arg2[%c0_32, %c0_33, %c0_34, %c54] : memref<1x1x32x234xbf16, #tpu.memory_space<vmem>>, vector<1x1x16x18xbf16>
    %42 = vector.shape_cast %41 : vector<1x1x16x18xbf16> to vector<16x18xbf16>
    %cst_35 = arith.constant dense<0.000000e+00> : vector<16x256xf32>
    %43 = tpu.matmul %42, %0, %cst_35 {dimension_numbers = #tpu.dot_dimension_numbers<[1], [0], [0], [1], [0, 0, 1, 1], [], []>} : vector<16x18xbf16>, vector<18x256xbf16>, vector<16x256xf32> -> vector<16x256xf32>
    %44 = vector.broadcast %1 : vector<1x256xf32> to vector<16x256xf32>
    %45 = arith.addf %43, %44 : vector<16x256xf32>
    %cst_36 = arith.constant 0.000000e+00 : f32
    %46 = vector.broadcast %cst_36 : f32 to vector<16x256xf32>
    %47 = arith.maximumf %45, %46 : vector<16x256xf32>
    %48 = arith.truncf %47 : vector<16x256xf32> to vector<16x256xbf16>
    %c3 = arith.constant 3 : index
    %c0_37 = arith.constant 0 : index
    %c0_38 = arith.constant 0 : index
    %49 = vector.load %arg5[%c3, %c0_37, %c0_38] : memref<13x256x128xbf16, #tpu.memory_space<vmem>>, vector<1x256x128xbf16>
    %50 = vector.shape_cast %49 : vector<1x256x128xbf16> to vector<256x128xbf16>
    %cst_39 = arith.constant dense<0.000000e+00> : vector<16x128xf32>
    %51 = tpu.matmul %48, %50, %cst_39 {dimension_numbers = #tpu.dot_dimension_numbers<[1], [0], [0], [1], [0, 0, 1, 1], [], []>} : vector<16x256xbf16>, vector<256x128xbf16>, vector<16x128xf32> -> vector<16x128xf32>
    %52 = arith.addf %40, %51 : vector<16x128xf32>
    %c0_40 = arith.constant 0 : index
    %c0_41 = arith.constant 0 : index
    %c0_42 = arith.constant 0 : index
    %c72 = arith.constant 72 : index
    %53 = vector.load %arg2[%c0_40, %c0_41, %c0_42, %c72] : memref<1x1x32x234xbf16, #tpu.memory_space<vmem>>, vector<1x1x16x18xbf16>
    %54 = vector.shape_cast %53 : vector<1x1x16x18xbf16> to vector<16x18xbf16>
    %cst_43 = arith.constant dense<0.000000e+00> : vector<16x256xf32>
    %55 = tpu.matmul %54, %0, %cst_43 {dimension_numbers = #tpu.dot_dimension_numbers<[1], [0], [0], [1], [0, 0, 1, 1], [], []>} : vector<16x18xbf16>, vector<18x256xbf16>, vector<16x256xf32> -> vector<16x256xf32>
    %56 = vector.broadcast %1 : vector<1x256xf32> to vector<16x256xf32>
    %57 = arith.addf %55, %56 : vector<16x256xf32>
    %cst_44 = arith.constant 0.000000e+00 : f32
    %58 = vector.broadcast %cst_44 : f32 to vector<16x256xf32>
    %59 = arith.maximumf %57, %58 : vector<16x256xf32>
    %60 = arith.truncf %59 : vector<16x256xf32> to vector<16x256xbf16>
    %c4 = arith.constant 4 : index
    %c0_45 = arith.constant 0 : index
    %c0_46 = arith.constant 0 : index
    %61 = vector.load %arg5[%c4, %c0_45, %c0_46] : memref<13x256x128xbf16, #tpu.memory_space<vmem>>, vector<1x256x128xbf16>
    %62 = vector.shape_cast %61 : vector<1x256x128xbf16> to vector<256x128xbf16>
    %cst_47 = arith.constant dense<0.000000e+00> : vector<16x128xf32>
    %63 = tpu.matmul %60, %62, %cst_47 {dimension_numbers = #tpu.dot_dimension_numbers<[1], [0], [0], [1], [0, 0, 1, 1], [], []>} : vector<16x256xbf16>, vector<256x128xbf16>, vector<16x128xf32> -> vector<16x128xf32>
    %64 = arith.addf %52, %63 : vector<16x128xf32>
    %c0_48 = arith.constant 0 : index
    %c0_49 = arith.constant 0 : index
    %c0_50 = arith.constant 0 : index
    %c90 = arith.constant 90 : index
    %65 = vector.load %arg2[%c0_48, %c0_49, %c0_50, %c90] : memref<1x1x32x234xbf16, #tpu.memory_space<vmem>>, vector<1x1x16x18xbf16>
    %66 = vector.shape_cast %65 : vector<1x1x16x18xbf16> to vector<16x18xbf16>
    %cst_51 = arith.constant dense<0.000000e+00> : vector<16x256xf32>
    %67 = tpu.matmul %66, %0, %cst_51 {dimension_numbers = #tpu.dot_dimension_numbers<[1], [0], [0], [1], [0, 0, 1, 1], [], []>} : vector<16x18xbf16>, vector<18x256xbf16>, vector<16x256xf32> -> vector<16x256xf32>
    %68 = vector.broadcast %1 : vector<1x256xf32> to vector<16x256xf32>
    %69 = arith.addf %67, %68 : vector<16x256xf32>
    %cst_52 = arith.constant 0.000000e+00 : f32
    %70 = vector.broadcast %cst_52 : f32 to vector<16x256xf32>
    %71 = arith.maximumf %69, %70 : vector<16x256xf32>
    %72 = arith.truncf %71 : vector<16x256xf32> to vector<16x256xbf16>
    %c5 = arith.constant 5 : index
    %c0_53 = arith.constant 0 : index
    %c0_54 = arith.constant 0 : index
    %73 = vector.load %arg5[%c5, %c0_53, %c0_54] : memref<13x256x128xbf16, #tpu.memory_space<vmem>>, vector<1x256x128xbf16>
    %74 = vector.shape_cast %73 : vector<1x256x128xbf16> to vector<256x128xbf16>
    %cst_55 = arith.constant dense<0.000000e+00> : vector<16x128xf32>
    %75 = tpu.matmul %72, %74, %cst_55 {dimension_numbers = #tpu.dot_dimension_numbers<[1], [0], [0], [1], [0, 0, 1, 1], [], []>} : vector<16x256xbf16>, vector<256x128xbf16>, vector<16x128xf32> -> vector<16x128xf32>
    %76 = arith.addf %64, %75 : vector<16x128xf32>
    %c0_56 = arith.constant 0 : index
    %c0_57 = arith.constant 0 : index
    %c0_58 = arith.constant 0 : index
    %c108 = arith.constant 108 : index
    %77 = vector.load %arg2[%c0_56, %c0_57, %c0_58, %c108] : memref<1x1x32x234xbf16, #tpu.memory_space<vmem>>, vector<1x1x16x18xbf16>
    %78 = vector.shape_cast %77 : vector<1x1x16x18xbf16> to vector<16x18xbf16>
    %cst_59 = arith.constant dense<0.000000e+00> : vector<16x256xf32>
    %79 = tpu.matmul %78, %0, %cst_59 {dimension_numbers = #tpu.dot_dimension_numbers<[1], [0], [0], [1], [0, 0, 1, 1], [], []>} : vector<16x18xbf16>, vector<18x256xbf16>, vector<16x256xf32> -> vector<16x256xf32>
    %80 = vector.broadcast %1 : vector<1x256xf32> to vector<16x256xf32>
    %81 = arith.addf %79, %80 : vector<16x256xf32>
    %cst_60 = arith.constant 0.000000e+00 : f32
    %82 = vector.broadcast %cst_60 : f32 to vector<16x256xf32>
    %83 = arith.maximumf %81, %82 : vector<16x256xf32>
    %84 = arith.truncf %83 : vector<16x256xf32> to vector<16x256xbf16>
    %c6 = arith.constant 6 : index
    %c0_61 = arith.constant 0 : index
    %c0_62 = arith.constant 0 : index
    %85 = vector.load %arg5[%c6, %c0_61, %c0_62] : memref<13x256x128xbf16, #tpu.memory_space<vmem>>, vector<1x256x128xbf16>
    %86 = vector.shape_cast %85 : vector<1x256x128xbf16> to vector<256x128xbf16>
    %cst_63 = arith.constant dense<0.000000e+00> : vector<16x128xf32>
    %87 = tpu.matmul %84, %86, %cst_63 {dimension_numbers = #tpu.dot_dimension_numbers<[1], [0], [0], [1], [0, 0, 1, 1], [], []>} : vector<16x256xbf16>, vector<256x128xbf16>, vector<16x128xf32> -> vector<16x128xf32>
    %88 = arith.addf %76, %87 : vector<16x128xf32>
    %c0_64 = arith.constant 0 : index
    %c0_65 = arith.constant 0 : index
    %c0_66 = arith.constant 0 : index
    %c126 = arith.constant 126 : index
    %89 = vector.load %arg2[%c0_64, %c0_65, %c0_66, %c126] : memref<1x1x32x234xbf16, #tpu.memory_space<vmem>>, vector<1x1x16x18xbf16>
    %90 = vector.shape_cast %89 : vector<1x1x16x18xbf16> to vector<16x18xbf16>
    %cst_67 = arith.constant dense<0.000000e+00> : vector<16x256xf32>
    %91 = tpu.matmul %90, %0, %cst_67 {dimension_numbers = #tpu.dot_dimension_numbers<[1], [0], [0], [1], [0, 0, 1, 1], [], []>} : vector<16x18xbf16>, vector<18x256xbf16>, vector<16x256xf32> -> vector<16x256xf32>
    %92 = vector.broadcast %1 : vector<1x256xf32> to vector<16x256xf32>
    %93 = arith.addf %91, %92 : vector<16x256xf32>
    %cst_68 = arith.constant 0.000000e+00 : f32
    %94 = vector.broadcast %cst_68 : f32 to vector<16x256xf32>
    %95 = arith.maximumf %93, %94 : vector<16x256xf32>
    %96 = arith.truncf %95 : vector<16x256xf32> to vector<16x256xbf16>
    %c7 = arith.constant 7 : index
    %c0_69 = arith.constant 0 : index
    %c0_70 = arith.constant 0 : index
    %97 = vector.load %arg5[%c7, %c0_69, %c0_70] : memref<13x256x128xbf16, #tpu.memory_space<vmem>>, vector<1x256x128xbf16>
    %98 = vector.shape_cast %97 : vector<1x256x128xbf16> to vector<256x128xbf16>
    %cst_71 = arith.constant dense<0.000000e+00> : vector<16x128xf32>
    %99 = tpu.matmul %96, %98, %cst_71 {dimension_numbers = #tpu.dot_dimension_numbers<[1], [0], [0], [1], [0, 0, 1, 1], [], []>} : vector<16x256xbf16>, vector<256x128xbf16>, vector<16x128xf32> -> vector<16x128xf32>
    %100 = arith.addf %88, %99 : vector<16x128xf32>
    %c0_72 = arith.constant 0 : index
    %c0_73 = arith.constant 0 : index
    %c0_74 = arith.constant 0 : index
    %c144 = arith.constant 144 : index
    %101 = vector.load %arg2[%c0_72, %c0_73, %c0_74, %c144] : memref<1x1x32x234xbf16, #tpu.memory_space<vmem>>, vector<1x1x16x18xbf16>
    %102 = vector.shape_cast %101 : vector<1x1x16x18xbf16> to vector<16x18xbf16>
    %cst_75 = arith.constant dense<0.000000e+00> : vector<16x256xf32>
    %103 = tpu.matmul %102, %0, %cst_75 {dimension_numbers = #tpu.dot_dimension_numbers<[1], [0], [0], [1], [0, 0, 1, 1], [], []>} : vector<16x18xbf16>, vector<18x256xbf16>, vector<16x256xf32> -> vector<16x256xf32>
    %104 = vector.broadcast %1 : vector<1x256xf32> to vector<16x256xf32>
    %105 = arith.addf %103, %104 : vector<16x256xf32>
    %cst_76 = arith.constant 0.000000e+00 : f32
    %106 = vector.broadcast %cst_76 : f32 to vector<16x256xf32>
    %107 = arith.maximumf %105, %106 : vector<16x256xf32>
    %108 = arith.truncf %107 : vector<16x256xf32> to vector<16x256xbf16>
    %c8 = arith.constant 8 : index
    %c0_77 = arith.constant 0 : index
    %c0_78 = arith.constant 0 : index
    %109 = vector.load %arg5[%c8, %c0_77, %c0_78] : memref<13x256x128xbf16, #tpu.memory_space<vmem>>, vector<1x256x128xbf16>
    %110 = vector.shape_cast %109 : vector<1x256x128xbf16> to vector<256x128xbf16>
    %cst_79 = arith.constant dense<0.000000e+00> : vector<16x128xf32>
    %111 = tpu.matmul %108, %110, %cst_79 {dimension_numbers = #tpu.dot_dimension_numbers<[1], [0], [0], [1], [0, 0, 1, 1], [], []>} : vector<16x256xbf16>, vector<256x128xbf16>, vector<16x128xf32> -> vector<16x128xf32>
    %112 = arith.addf %100, %111 : vector<16x128xf32>
    %c0_80 = arith.constant 0 : index
    %c0_81 = arith.constant 0 : index
    %c0_82 = arith.constant 0 : index
    %c162 = arith.constant 162 : index
    %113 = vector.load %arg2[%c0_80, %c0_81, %c0_82, %c162] : memref<1x1x32x234xbf16, #tpu.memory_space<vmem>>, vector<1x1x16x18xbf16>
    %114 = vector.shape_cast %113 : vector<1x1x16x18xbf16> to vector<16x18xbf16>
    %cst_83 = arith.constant dense<0.000000e+00> : vector<16x256xf32>
    %115 = tpu.matmul %114, %0, %cst_83 {dimension_numbers = #tpu.dot_dimension_numbers<[1], [0], [0], [1], [0, 0, 1, 1], [], []>} : vector<16x18xbf16>, vector<18x256xbf16>, vector<16x256xf32> -> vector<16x256xf32>
    %116 = vector.broadcast %1 : vector<1x256xf32> to vector<16x256xf32>
    %117 = arith.addf %115, %116 : vector<16x256xf32>
    %cst_84 = arith.constant 0.000000e+00 : f32
    %118 = vector.broadcast %cst_84 : f32 to vector<16x256xf32>
    %119 = arith.maximumf %117, %118 : vector<16x256xf32>
    %120 = arith.truncf %119 : vector<16x256xf32> to vector<16x256xbf16>
    %c9 = arith.constant 9 : index
    %c0_85 = arith.constant 0 : index
    %c0_86 = arith.constant 0 : index
    %121 = vector.load %arg5[%c9, %c0_85, %c0_86] : memref<13x256x128xbf16, #tpu.memory_space<vmem>>, vector<1x256x128xbf16>
    %122 = vector.shape_cast %121 : vector<1x256x128xbf16> to vector<256x128xbf16>
    %cst_87 = arith.constant dense<0.000000e+00> : vector<16x128xf32>
    %123 = tpu.matmul %120, %122, %cst_87 {dimension_numbers = #tpu.dot_dimension_numbers<[1], [0], [0], [1], [0, 0, 1, 1], [], []>} : vector<16x256xbf16>, vector<256x128xbf16>, vector<16x128xf32> -> vector<16x128xf32>
    %124 = arith.addf %112, %123 : vector<16x128xf32>
    %c0_88 = arith.constant 0 : index
    %c0_89 = arith.constant 0 : index
    %c0_90 = arith.constant 0 : index
    %c180 = arith.constant 180 : index
    %125 = vector.load %arg2[%c0_88, %c0_89, %c0_90, %c180] : memref<1x1x32x234xbf16, #tpu.memory_space<vmem>>, vector<1x1x16x18xbf16>
    %126 = vector.shape_cast %125 : vector<1x1x16x18xbf16> to vector<16x18xbf16>
    %cst_91 = arith.constant dense<0.000000e+00> : vector<16x256xf32>
    %127 = tpu.matmul %126, %0, %cst_91 {dimension_numbers = #tpu.dot_dimension_numbers<[1], [0], [0], [1], [0, 0, 1, 1], [], []>} : vector<16x18xbf16>, vector<18x256xbf16>, vector<16x256xf32> -> vector<16x256xf32>
    %128 = vector.broadcast %1 : vector<1x256xf32> to vector<16x256xf32>
    %129 = arith.addf %127, %128 : vector<16x256xf32>
    %cst_92 = arith.constant 0.000000e+00 : f32
    %130 = vector.broadcast %cst_92 : f32 to vector<16x256xf32>
    %131 = arith.maximumf %129, %130 : vector<16x256xf32>
    %132 = arith.truncf %131 : vector<16x256xf32> to vector<16x256xbf16>
    %c10 = arith.constant 10 : index
    %c0_93 = arith.constant 0 : index
    %c0_94 = arith.constant 0 : index
    %133 = vector.load %arg5[%c10, %c0_93, %c0_94] : memref<13x256x128xbf16, #tpu.memory_space<vmem>>, vector<1x256x128xbf16>
    %134 = vector.shape_cast %133 : vector<1x256x128xbf16> to vector<256x128xbf16>
    %cst_95 = arith.constant dense<0.000000e+00> : vector<16x128xf32>
    %135 = tpu.matmul %132, %134, %cst_95 {dimension_numbers = #tpu.dot_dimension_numbers<[1], [0], [0], [1], [0, 0, 1, 1], [], []>} : vector<16x256xbf16>, vector<256x128xbf16>, vector<16x128xf32> -> vector<16x128xf32>
    %136 = arith.addf %124, %135 : vector<16x128xf32>
    %c0_96 = arith.constant 0 : index
    %c0_97 = arith.constant 0 : index
    %c0_98 = arith.constant 0 : index
    %c198 = arith.constant 198 : index
    %137 = vector.load %arg2[%c0_96, %c0_97, %c0_98, %c198] : memref<1x1x32x234xbf16, #tpu.memory_space<vmem>>, vector<1x1x16x18xbf16>
    %138 = vector.shape_cast %137 : vector<1x1x16x18xbf16> to vector<16x18xbf16>
    %cst_99 = arith.constant dense<0.000000e+00> : vector<16x256xf32>
    %139 = tpu.matmul %138, %0, %cst_99 {dimension_numbers = #tpu.dot_dimension_numbers<[1], [0], [0], [1], [0, 0, 1, 1], [], []>} : vector<16x18xbf16>, vector<18x256xbf16>, vector<16x256xf32> -> vector<16x256xf32>
    %140 = vector.broadcast %1 : vector<1x256xf32> to vector<16x256xf32>
    %141 = arith.addf %139, %140 : vector<16x256xf32>
    %cst_100 = arith.constant 0.000000e+00 : f32
    %142 = vector.broadcast %cst_100 : f32 to vector<16x256xf32>
    %143 = arith.maximumf %141, %142 : vector<16x256xf32>
    %144 = arith.truncf %143 : vector<16x256xf32> to vector<16x256xbf16>
    %c11 = arith.constant 11 : index
    %c0_101 = arith.constant 0 : index
    %c0_102 = arith.constant 0 : index
    %145 = vector.load %arg5[%c11, %c0_101, %c0_102] : memref<13x256x128xbf16, #tpu.memory_space<vmem>>, vector<1x256x128xbf16>
    %146 = vector.shape_cast %145 : vector<1x256x128xbf16> to vector<256x128xbf16>
    %cst_103 = arith.constant dense<0.000000e+00> : vector<16x128xf32>
    %147 = tpu.matmul %144, %146, %cst_103 {dimension_numbers = #tpu.dot_dimension_numbers<[1], [0], [0], [1], [0, 0, 1, 1], [], []>} : vector<16x256xbf16>, vector<256x128xbf16>, vector<16x128xf32> -> vector<16x128xf32>
    %148 = arith.addf %136, %147 : vector<16x128xf32>
    %c0_104 = arith.constant 0 : index
    %c0_105 = arith.constant 0 : index
    %c0_106 = arith.constant 0 : index
    %c216 = arith.constant 216 : index
    %149 = vector.load %arg2[%c0_104, %c0_105, %c0_106, %c216] : memref<1x1x32x234xbf16, #tpu.memory_space<vmem>>, vector<1x1x16x18xbf16>
    %150 = vector.shape_cast %149 : vector<1x1x16x18xbf16> to vector<16x18xbf16>
    %cst_107 = arith.constant dense<0.000000e+00> : vector<16x256xf32>
    %151 = tpu.matmul %150, %0, %cst_107 {dimension_numbers = #tpu.dot_dimension_numbers<[1], [0], [0], [1], [0, 0, 1, 1], [], []>} : vector<16x18xbf16>, vector<18x256xbf16>, vector<16x256xf32> -> vector<16x256xf32>
    %152 = vector.broadcast %1 : vector<1x256xf32> to vector<16x256xf32>
    %153 = arith.addf %151, %152 : vector<16x256xf32>
    %cst_108 = arith.constant 0.000000e+00 : f32
    %154 = vector.broadcast %cst_108 : f32 to vector<16x256xf32>
    %155 = arith.maximumf %153, %154 : vector<16x256xf32>
    %156 = arith.truncf %155 : vector<16x256xf32> to vector<16x256xbf16>
    %c12 = arith.constant 12 : index
    %c0_109 = arith.constant 0 : index
    %c0_110 = arith.constant 0 : index
    %157 = vector.load %arg5[%c12, %c0_109, %c0_110] : memref<13x256x128xbf16, #tpu.memory_space<vmem>>, vector<1x256x128xbf16>
    %158 = vector.shape_cast %157 : vector<1x256x128xbf16> to vector<256x128xbf16>
    %cst_111 = arith.constant dense<0.000000e+00> : vector<16x128xf32>
    %159 = tpu.matmul %156, %158, %cst_111 {dimension_numbers = #tpu.dot_dimension_numbers<[1], [0], [0], [1], [0, 0, 1, 1], [], []>} : vector<16x256xbf16>, vector<256x128xbf16>, vector<16x128xf32> -> vector<16x128xf32>
    %160 = arith.addf %148, %159 : vector<16x128xf32>
    %161 = vector.broadcast %2 : vector<1x128xf32> to vector<16x128xf32>
    %162 = arith.addf %160, %161 : vector<16x128xf32>
    %cst_112 = arith.constant 0.000000e+00 : f32
    %163 = vector.broadcast %cst_112 : f32 to vector<16x128xf32>
    %164 = arith.maximumf %162, %163 : vector<16x128xf32>
    %165 = arith.truncf %164 : vector<16x128xf32> to vector<16x128xbf16>
    %c0_113 = arith.constant 0 : index
    %c0_114 = arith.constant 0 : index
    %c0_115 = arith.constant 0 : index
    %166 = vector.load %arg7[%c0_113, %c0_114, %c0_115] : memref<2x128x128xbf16, #tpu.memory_space<vmem>>, vector<1x128x128xbf16>
    %167 = vector.shape_cast %166 : vector<1x128x128xbf16> to vector<128x128xbf16>
    %cst_116 = arith.constant dense<0.000000e+00> : vector<16x128xf32>
    %168 = tpu.matmul %165, %167, %cst_116 {dimension_numbers = #tpu.dot_dimension_numbers<[1], [0], [0], [1], [0, 0, 1, 1], [], []>} : vector<16x128xbf16>, vector<128x128xbf16>, vector<16x128xf32> -> vector<16x128xf32>
    %169 = arith.addf %3, %168 : vector<16x128xf32>
    %cst_117 = arith.constant 0.000000e+00 : f32
    %170 = vector.broadcast %cst_117 : f32 to vector<16x128xf32>
    %c0_118 = arith.constant 0 : index
    %c0_119 = arith.constant 0 : index
    %c16 = arith.constant 16 : index
    %c0_120 = arith.constant 0 : index
    %171 = vector.load %arg2[%c0_118, %c0_119, %c16, %c0_120] : memref<1x1x32x234xbf16, #tpu.memory_space<vmem>>, vector<1x1x16x18xbf16>
    %172 = vector.shape_cast %171 : vector<1x1x16x18xbf16> to vector<16x18xbf16>
    %cst_121 = arith.constant dense<0.000000e+00> : vector<16x256xf32>
    %173 = tpu.matmul %172, %0, %cst_121 {dimension_numbers = #tpu.dot_dimension_numbers<[1], [0], [0], [1], [0, 0, 1, 1], [], []>} : vector<16x18xbf16>, vector<18x256xbf16>, vector<16x256xf32> -> vector<16x256xf32>
    %174 = vector.broadcast %1 : vector<1x256xf32> to vector<16x256xf32>
    %175 = arith.addf %173, %174 : vector<16x256xf32>
    %cst_122 = arith.constant 0.000000e+00 : f32
    %176 = vector.broadcast %cst_122 : f32 to vector<16x256xf32>
    %177 = arith.maximumf %175, %176 : vector<16x256xf32>
    %178 = arith.truncf %177 : vector<16x256xf32> to vector<16x256xbf16>
    %c0_123 = arith.constant 0 : index
    %c0_124 = arith.constant 0 : index
    %c0_125 = arith.constant 0 : index
    %179 = vector.load %arg5[%c0_123, %c0_124, %c0_125] : memref<13x256x128xbf16, #tpu.memory_space<vmem>>, vector<1x256x128xbf16>
    %180 = vector.shape_cast %179 : vector<1x256x128xbf16> to vector<256x128xbf16>
    %cst_126 = arith.constant dense<0.000000e+00> : vector<16x128xf32>
    %181 = tpu.matmul %178, %180, %cst_126 {dimension_numbers = #tpu.dot_dimension_numbers<[1], [0], [0], [1], [0, 0, 1, 1], [], []>} : vector<16x256xbf16>, vector<256x128xbf16>, vector<16x128xf32> -> vector<16x128xf32>
    %182 = arith.addf %170, %181 : vector<16x128xf32>
    %c0_127 = arith.constant 0 : index
    %c0_128 = arith.constant 0 : index
    %c16_129 = arith.constant 16 : index
    %c18_130 = arith.constant 18 : index
    %183 = vector.load %arg2[%c0_127, %c0_128, %c16_129, %c18_130] : memref<1x1x32x234xbf16, #tpu.memory_space<vmem>>, vector<1x1x16x18xbf16>
    %184 = vector.shape_cast %183 : vector<1x1x16x18xbf16> to vector<16x18xbf16>
    %cst_131 = arith.constant dense<0.000000e+00> : vector<16x256xf32>
    %185 = tpu.matmul %184, %0, %cst_131 {dimension_numbers = #tpu.dot_dimension_numbers<[1], [0], [0], [1], [0, 0, 1, 1], [], []>} : vector<16x18xbf16>, vector<18x256xbf16>, vector<16x256xf32> -> vector<16x256xf32>
    %186 = vector.broadcast %1 : vector<1x256xf32> to vector<16x256xf32>
    %187 = arith.addf %185, %186 : vector<16x256xf32>
    %cst_132 = arith.constant 0.000000e+00 : f32
    %188 = vector.broadcast %cst_132 : f32 to vector<16x256xf32>
    %189 = arith.maximumf %187, %188 : vector<16x256xf32>
    %190 = arith.truncf %189 : vector<16x256xf32> to vector<16x256xbf16>
    %c1_133 = arith.constant 1 : index
    %c0_134 = arith.constant 0 : index
    %c0_135 = arith.constant 0 : index
    %191 = vector.load %arg5[%c1_133, %c0_134, %c0_135] : memref<13x256x128xbf16, #tpu.memory_space<vmem>>, vector<1x256x128xbf16>
    %192 = vector.shape_cast %191 : vector<1x256x128xbf16> to vector<256x128xbf16>
    %cst_136 = arith.constant dense<0.000000e+00> : vector<16x128xf32>
    %193 = tpu.matmul %190, %192, %cst_136 {dimension_numbers = #tpu.dot_dimension_numbers<[1], [0], [0], [1], [0, 0, 1, 1], [], []>} : vector<16x256xbf16>, vector<256x128xbf16>, vector<16x128xf32> -> vector<16x128xf32>
    %194 = arith.addf %182, %193 : vector<16x128xf32>
    %c0_137 = arith.constant 0 : index
    %c0_138 = arith.constant 0 : index
    %c16_139 = arith.constant 16 : index
    %c36_140 = arith.constant 36 : index
    %195 = vector.load %arg2[%c0_137, %c0_138, %c16_139, %c36_140] : memref<1x1x32x234xbf16, #tpu.memory_space<vmem>>, vector<1x1x16x18xbf16>
    %196 = vector.shape_cast %195 : vector<1x1x16x18xbf16> to vector<16x18xbf16>
    %cst_141 = arith.constant dense<0.000000e+00> : vector<16x256xf32>
    %197 = tpu.matmul %196, %0, %cst_141 {dimension_numbers = #tpu.dot_dimension_numbers<[1], [0], [0], [1], [0, 0, 1, 1], [], []>} : vector<16x18xbf16>, vector<18x256xbf16>, vector<16x256xf32> -> vector<16x256xf32>
    %198 = vector.broadcast %1 : vector<1x256xf32> to vector<16x256xf32>
    %199 = arith.addf %197, %198 : vector<16x256xf32>
    %cst_142 = arith.constant 0.000000e+00 : f32
    %200 = vector.broadcast %cst_142 : f32 to vector<16x256xf32>
    %201 = arith.maximumf %199, %200 : vector<16x256xf32>
    %202 = arith.truncf %201 : vector<16x256xf32> to vector<16x256xbf16>
    %c2_143 = arith.constant 2 : index
    %c0_144 = arith.constant 0 : index
    %c0_145 = arith.constant 0 : index
    %203 = vector.load %arg5[%c2_143, %c0_144, %c0_145] : memref<13x256x128xbf16, #tpu.memory_space<vmem>>, vector<1x256x128xbf16>
    %204 = vector.shape_cast %203 : vector<1x256x128xbf16> to vector<256x128xbf16>
    %cst_146 = arith.constant dense<0.000000e+00> : vector<16x128xf32>
    %205 = tpu.matmul %202, %204, %cst_146 {dimension_numbers = #tpu.dot_dimension_numbers<[1], [0], [0], [1], [0, 0, 1, 1], [], []>} : vector<16x256xbf16>, vector<256x128xbf16>, vector<16x128xf32> -> vector<16x128xf32>
    %206 = arith.addf %194, %205 : vector<16x128xf32>
    %c0_147 = arith.constant 0 : index
    %c0_148 = arith.constant 0 : index
    %c16_149 = arith.constant 16 : index
    %c54_150 = arith.constant 54 : index
    %207 = vector.load %arg2[%c0_147, %c0_148, %c16_149, %c54_150] : memref<1x1x32x234xbf16, #tpu.memory_space<vmem>>, vector<1x1x16x18xbf16>
    %208 = vector.shape_cast %207 : vector<1x1x16x18xbf16> to vector<16x18xbf16>
    %cst_151 = arith.constant dense<0.000000e+00> : vector<16x256xf32>
    %209 = tpu.matmul %208, %0, %cst_151 {dimension_numbers = #tpu.dot_dimension_numbers<[1], [0], [0], [1], [0, 0, 1, 1], [], []>} : vector<16x18xbf16>, vector<18x256xbf16>, vector<16x256xf32> -> vector<16x256xf32>
    %210 = vector.broadcast %1 : vector<1x256xf32> to vector<16x256xf32>
    %211 = arith.addf %209, %210 : vector<16x256xf32>
    %cst_152 = arith.constant 0.000000e+00 : f32
    %212 = vector.broadcast %cst_152 : f32 to vector<16x256xf32>
    %213 = arith.maximumf %211, %212 : vector<16x256xf32>
    %214 = arith.truncf %213 : vector<16x256xf32> to vector<16x256xbf16>
    %c3_153 = arith.constant 3 : index
    %c0_154 = arith.constant 0 : index
    %c0_155 = arith.constant 0 : index
    %215 = vector.load %arg5[%c3_153, %c0_154, %c0_155] : memref<13x256x128xbf16, #tpu.memory_space<vmem>>, vector<1x256x128xbf16>
    %216 = vector.shape_cast %215 : vector<1x256x128xbf16> to vector<256x128xbf16>
    %cst_156 = arith.constant dense<0.000000e+00> : vector<16x128xf32>
    %217 = tpu.matmul %214, %216, %cst_156 {dimension_numbers = #tpu.dot_dimension_numbers<[1], [0], [0], [1], [0, 0, 1, 1], [], []>} : vector<16x256xbf16>, vector<256x128xbf16>, vector<16x128xf32> -> vector<16x128xf32>
    %218 = arith.addf %206, %217 : vector<16x128xf32>
    %c0_157 = arith.constant 0 : index
    %c0_158 = arith.constant 0 : index
    %c16_159 = arith.constant 16 : index
    %c72_160 = arith.constant 72 : index
    %219 = vector.load %arg2[%c0_157, %c0_158, %c16_159, %c72_160] : memref<1x1x32x234xbf16, #tpu.memory_space<vmem>>, vector<1x1x16x18xbf16>
    %220 = vector.shape_cast %219 : vector<1x1x16x18xbf16> to vector<16x18xbf16>
    %cst_161 = arith.constant dense<0.000000e+00> : vector<16x256xf32>
    %221 = tpu.matmul %220, %0, %cst_161 {dimension_numbers = #tpu.dot_dimension_numbers<[1], [0], [0], [1], [0, 0, 1, 1], [], []>} : vector<16x18xbf16>, vector<18x256xbf16>, vector<16x256xf32> -> vector<16x256xf32>
    %222 = vector.broadcast %1 : vector<1x256xf32> to vector<16x256xf32>
    %223 = arith.addf %221, %222 : vector<16x256xf32>
    %cst_162 = arith.constant 0.000000e+00 : f32
    %224 = vector.broadcast %cst_162 : f32 to vector<16x256xf32>
    %225 = arith.maximumf %223, %224 : vector<16x256xf32>
    %226 = arith.truncf %225 : vector<16x256xf32> to vector<16x256xbf16>
    %c4_163 = arith.constant 4 : index
    %c0_164 = arith.constant 0 : index
    %c0_165 = arith.constant 0 : index
    %227 = vector.load %arg5[%c4_163, %c0_164, %c0_165] : memref<13x256x128xbf16, #tpu.memory_space<vmem>>, vector<1x256x128xbf16>
    %228 = vector.shape_cast %227 : vector<1x256x128xbf16> to vector<256x128xbf16>
    %cst_166 = arith.constant dense<0.000000e+00> : vector<16x128xf32>
    %229 = tpu.matmul %226, %228, %cst_166 {dimension_numbers = #tpu.dot_dimension_numbers<[1], [0], [0], [1], [0, 0, 1, 1], [], []>} : vector<16x256xbf16>, vector<256x128xbf16>, vector<16x128xf32> -> vector<16x128xf32>
    %230 = arith.addf %218, %229 : vector<16x128xf32>
    %c0_167 = arith.constant 0 : index
    %c0_168 = arith.constant 0 : index
    %c16_169 = arith.constant 16 : index
    %c90_170 = arith.constant 90 : index
    %231 = vector.load %arg2[%c0_167, %c0_168, %c16_169, %c90_170] : memref<1x1x32x234xbf16, #tpu.memory_space<vmem>>, vector<1x1x16x18xbf16>
    %232 = vector.shape_cast %231 : vector<1x1x16x18xbf16> to vector<16x18xbf16>
    %cst_171 = arith.constant dense<0.000000e+00> : vector<16x256xf32>
    %233 = tpu.matmul %232, %0, %cst_171 {dimension_numbers = #tpu.dot_dimension_numbers<[1], [0], [0], [1], [0, 0, 1, 1], [], []>} : vector<16x18xbf16>, vector<18x256xbf16>, vector<16x256xf32> -> vector<16x256xf32>
    %234 = vector.broadcast %1 : vector<1x256xf32> to vector<16x256xf32>
    %235 = arith.addf %233, %234 : vector<16x256xf32>
    %cst_172 = arith.constant 0.000000e+00 : f32
    %236 = vector.broadcast %cst_172 : f32 to vector<16x256xf32>
    %237 = arith.maximumf %235, %236 : vector<16x256xf32>
    %238 = arith.truncf %237 : vector<16x256xf32> to vector<16x256xbf16>
    %c5_173 = arith.constant 5 : index
    %c0_174 = arith.constant 0 : index
    %c0_175 = arith.constant 0 : index
    %239 = vector.load %arg5[%c5_173, %c0_174, %c0_175] : memref<13x256x128xbf16, #tpu.memory_space<vmem>>, vector<1x256x128xbf16>
    %240 = vector.shape_cast %239 : vector<1x256x128xbf16> to vector<256x128xbf16>
    %cst_176 = arith.constant dense<0.000000e+00> : vector<16x128xf32>
    %241 = tpu.matmul %238, %240, %cst_176 {dimension_numbers = #tpu.dot_dimension_numbers<[1], [0], [0], [1], [0, 0, 1, 1], [], []>} : vector<16x256xbf16>, vector<256x128xbf16>, vector<16x128xf32> -> vector<16x128xf32>
    %242 = arith.addf %230, %241 : vector<16x128xf32>
    %c0_177 = arith.constant 0 : index
    %c0_178 = arith.constant 0 : index
    %c16_179 = arith.constant 16 : index
    %c108_180 = arith.constant 108 : index
    %243 = vector.load %arg2[%c0_177, %c0_178, %c16_179, %c108_180] : memref<1x1x32x234xbf16, #tpu.memory_space<vmem>>, vector<1x1x16x18xbf16>
    %244 = vector.shape_cast %243 : vector<1x1x16x18xbf16> to vector<16x18xbf16>
    %cst_181 = arith.constant dense<0.000000e+00> : vector<16x256xf32>
    %245 = tpu.matmul %244, %0, %cst_181 {dimension_numbers = #tpu.dot_dimension_numbers<[1], [0], [0], [1], [0, 0, 1, 1], [], []>} : vector<16x18xbf16>, vector<18x256xbf16>, vector<16x256xf32> -> vector<16x256xf32>
    %246 = vector.broadcast %1 : vector<1x256xf32> to vector<16x256xf32>
    %247 = arith.addf %245, %246 : vector<16x256xf32>
    %cst_182 = arith.constant 0.000000e+00 : f32
    %248 = vector.broadcast %cst_182 : f32 to vector<16x256xf32>
    %249 = arith.maximumf %247, %248 : vector<16x256xf32>
    %250 = arith.truncf %249 : vector<16x256xf32> to vector<16x256xbf16>
    %c6_183 = arith.constant 6 : index
    %c0_184 = arith.constant 0 : index
    %c0_185 = arith.constant 0 : index
    %251 = vector.load %arg5[%c6_183, %c0_184, %c0_185] : memref<13x256x128xbf16, #tpu.memory_space<vmem>>, vector<1x256x128xbf16>
    %252 = vector.shape_cast %251 : vector<1x256x128xbf16> to vector<256x128xbf16>
    %cst_186 = arith.constant dense<0.000000e+00> : vector<16x128xf32>
    %253 = tpu.matmul %250, %252, %cst_186 {dimension_numbers = #tpu.dot_dimension_numbers<[1], [0], [0], [1], [0, 0, 1, 1], [], []>} : vector<16x256xbf16>, vector<256x128xbf16>, vector<16x128xf32> -> vector<16x128xf32>
    %254 = arith.addf %242, %253 : vector<16x128xf32>
    %c0_187 = arith.constant 0 : index
    %c0_188 = arith.constant 0 : index
    %c16_189 = arith.constant 16 : index
    %c126_190 = arith.constant 126 : index
    %255 = vector.load %arg2[%c0_187, %c0_188, %c16_189, %c126_190] : memref<1x1x32x234xbf16, #tpu.memory_space<vmem>>, vector<1x1x16x18xbf16>
    %256 = vector.shape_cast %255 : vector<1x1x16x18xbf16> to vector<16x18xbf16>
    %cst_191 = arith.constant dense<0.000000e+00> : vector<16x256xf32>
    %257 = tpu.matmul %256, %0, %cst_191 {dimension_numbers = #tpu.dot_dimension_numbers<[1], [0], [0], [1], [0, 0, 1, 1], [], []>} : vector<16x18xbf16>, vector<18x256xbf16>, vector<16x256xf32> -> vector<16x256xf32>
    %258 = vector.broadcast %1 : vector<1x256xf32> to vector<16x256xf32>
    %259 = arith.addf %257, %258 : vector<16x256xf32>
    %cst_192 = arith.constant 0.000000e+00 : f32
    %260 = vector.broadcast %cst_192 : f32 to vector<16x256xf32>
    %261 = arith.maximumf %259, %260 : vector<16x256xf32>
    %262 = arith.truncf %261 : vector<16x256xf32> to vector<16x256xbf16>
    %c7_193 = arith.constant 7 : index
    %c0_194 = arith.constant 0 : index
    %c0_195 = arith.constant 0 : index
    %263 = vector.load %arg5[%c7_193, %c0_194, %c0_195] : memref<13x256x128xbf16, #tpu.memory_space<vmem>>, vector<1x256x128xbf16>
    %264 = vector.shape_cast %263 : vector<1x256x128xbf16> to vector<256x128xbf16>
    %cst_196 = arith.constant dense<0.000000e+00> : vector<16x128xf32>
    %265 = tpu.matmul %262, %264, %cst_196 {dimension_numbers = #tpu.dot_dimension_numbers<[1], [0], [0], [1], [0, 0, 1, 1], [], []>} : vector<16x256xbf16>, vector<256x128xbf16>, vector<16x128xf32> -> vector<16x128xf32>
    %266 = arith.addf %254, %265 : vector<16x128xf32>
    %c0_197 = arith.constant 0 : index
    %c0_198 = arith.constant 0 : index
    %c16_199 = arith.constant 16 : index
    %c144_200 = arith.constant 144 : index
    %267 = vector.load %arg2[%c0_197, %c0_198, %c16_199, %c144_200] : memref<1x1x32x234xbf16, #tpu.memory_space<vmem>>, vector<1x1x16x18xbf16>
    %268 = vector.shape_cast %267 : vector<1x1x16x18xbf16> to vector<16x18xbf16>
    %cst_201 = arith.constant dense<0.000000e+00> : vector<16x256xf32>
    %269 = tpu.matmul %268, %0, %cst_201 {dimension_numbers = #tpu.dot_dimension_numbers<[1], [0], [0], [1], [0, 0, 1, 1], [], []>} : vector<16x18xbf16>, vector<18x256xbf16>, vector<16x256xf32> -> vector<16x256xf32>
    %270 = vector.broadcast %1 : vector<1x256xf32> to vector<16x256xf32>
    %271 = arith.addf %269, %270 : vector<16x256xf32>
    %cst_202 = arith.constant 0.000000e+00 : f32
    %272 = vector.broadcast %cst_202 : f32 to vector<16x256xf32>
    %273 = arith.maximumf %271, %272 : vector<16x256xf32>
    %274 = arith.truncf %273 : vector<16x256xf32> to vector<16x256xbf16>
    %c8_203 = arith.constant 8 : index
    %c0_204 = arith.constant 0 : index
    %c0_205 = arith.constant 0 : index
    %275 = vector.load %arg5[%c8_203, %c0_204, %c0_205] : memref<13x256x128xbf16, #tpu.memory_space<vmem>>, vector<1x256x128xbf16>
    %276 = vector.shape_cast %275 : vector<1x256x128xbf16> to vector<256x128xbf16>
    %cst_206 = arith.constant dense<0.000000e+00> : vector<16x128xf32>
    %277 = tpu.matmul %274, %276, %cst_206 {dimension_numbers = #tpu.dot_dimension_numbers<[1], [0], [0], [1], [0, 0, 1, 1], [], []>} : vector<16x256xbf16>, vector<256x128xbf16>, vector<16x128xf32> -> vector<16x128xf32>
    %278 = arith.addf %266, %277 : vector<16x128xf32>
    %c0_207 = arith.constant 0 : index
    %c0_208 = arith.constant 0 : index
    %c16_209 = arith.constant 16 : index
    %c162_210 = arith.constant 162 : index
    %279 = vector.load %arg2[%c0_207, %c0_208, %c16_209, %c162_210] : memref<1x1x32x234xbf16, #tpu.memory_space<vmem>>, vector<1x1x16x18xbf16>
    %280 = vector.shape_cast %279 : vector<1x1x16x18xbf16> to vector<16x18xbf16>
    %cst_211 = arith.constant dense<0.000000e+00> : vector<16x256xf32>
    %281 = tpu.matmul %280, %0, %cst_211 {dimension_numbers = #tpu.dot_dimension_numbers<[1], [0], [0], [1], [0, 0, 1, 1], [], []>} : vector<16x18xbf16>, vector<18x256xbf16>, vector<16x256xf32> -> vector<16x256xf32>
    %282 = vector.broadcast %1 : vector<1x256xf32> to vector<16x256xf32>
    %283 = arith.addf %281, %282 : vector<16x256xf32>
    %cst_212 = arith.constant 0.000000e+00 : f32
    %284 = vector.broadcast %cst_212 : f32 to vector<16x256xf32>
    %285 = arith.maximumf %283, %284 : vector<16x256xf32>
    %286 = arith.truncf %285 : vector<16x256xf32> to vector<16x256xbf16>
    %c9_213 = arith.constant 9 : index
    %c0_214 = arith.constant 0 : index
    %c0_215 = arith.constant 0 : index
    %287 = vector.load %arg5[%c9_213, %c0_214, %c0_215] : memref<13x256x128xbf16, #tpu.memory_space<vmem>>, vector<1x256x128xbf16>
    %288 = vector.shape_cast %287 : vector<1x256x128xbf16> to vector<256x128xbf16>
    %cst_216 = arith.constant dense<0.000000e+00> : vector<16x128xf32>
    %289 = tpu.matmul %286, %288, %cst_216 {dimension_numbers = #tpu.dot_dimension_numbers<[1], [0], [0], [1], [0, 0, 1, 1], [], []>} : vector<16x256xbf16>, vector<256x128xbf16>, vector<16x128xf32> -> vector<16x128xf32>
    %290 = arith.addf %278, %289 : vector<16x128xf32>
    %c0_217 = arith.constant 0 : index
    %c0_218 = arith.constant 0 : index
    %c16_219 = arith.constant 16 : index
    %c180_220 = arith.constant 180 : index
    %291 = vector.load %arg2[%c0_217, %c0_218, %c16_219, %c180_220] : memref<1x1x32x234xbf16, #tpu.memory_space<vmem>>, vector<1x1x16x18xbf16>
    %292 = vector.shape_cast %291 : vector<1x1x16x18xbf16> to vector<16x18xbf16>
    %cst_221 = arith.constant dense<0.000000e+00> : vector<16x256xf32>
    %293 = tpu.matmul %292, %0, %cst_221 {dimension_numbers = #tpu.dot_dimension_numbers<[1], [0], [0], [1], [0, 0, 1, 1], [], []>} : vector<16x18xbf16>, vector<18x256xbf16>, vector<16x256xf32> -> vector<16x256xf32>
    %294 = vector.broadcast %1 : vector<1x256xf32> to vector<16x256xf32>
    %295 = arith.addf %293, %294 : vector<16x256xf32>
    %cst_222 = arith.constant 0.000000e+00 : f32
    %296 = vector.broadcast %cst_222 : f32 to vector<16x256xf32>
    %297 = arith.maximumf %295, %296 : vector<16x256xf32>
    %298 = arith.truncf %297 : vector<16x256xf32> to vector<16x256xbf16>
    %c10_223 = arith.constant 10 : index
    %c0_224 = arith.constant 0 : index
    %c0_225 = arith.constant 0 : index
    %299 = vector.load %arg5[%c10_223, %c0_224, %c0_225] : memref<13x256x128xbf16, #tpu.memory_space<vmem>>, vector<1x256x128xbf16>
    %300 = vector.shape_cast %299 : vector<1x256x128xbf16> to vector<256x128xbf16>
    %cst_226 = arith.constant dense<0.000000e+00> : vector<16x128xf32>
    %301 = tpu.matmul %298, %300, %cst_226 {dimension_numbers = #tpu.dot_dimension_numbers<[1], [0], [0], [1], [0, 0, 1, 1], [], []>} : vector<16x256xbf16>, vector<256x128xbf16>, vector<16x128xf32> -> vector<16x128xf32>
    %302 = arith.addf %290, %301 : vector<16x128xf32>
    %c0_227 = arith.constant 0 : index
    %c0_228 = arith.constant 0 : index
    %c16_229 = arith.constant 16 : index
    %c198_230 = arith.constant 198 : index
    %303 = vector.load %arg2[%c0_227, %c0_228, %c16_229, %c198_230] : memref<1x1x32x234xbf16, #tpu.memory_space<vmem>>, vector<1x1x16x18xbf16>
    %304 = vector.shape_cast %303 : vector<1x1x16x18xbf16> to vector<16x18xbf16>
    %cst_231 = arith.constant dense<0.000000e+00> : vector<16x256xf32>
    %305 = tpu.matmul %304, %0, %cst_231 {dimension_numbers = #tpu.dot_dimension_numbers<[1], [0], [0], [1], [0, 0, 1, 1], [], []>} : vector<16x18xbf16>, vector<18x256xbf16>, vector<16x256xf32> -> vector<16x256xf32>
    %306 = vector.broadcast %1 : vector<1x256xf32> to vector<16x256xf32>
    %307 = arith.addf %305, %306 : vector<16x256xf32>
    %cst_232 = arith.constant 0.000000e+00 : f32
    %308 = vector.broadcast %cst_232 : f32 to vector<16x256xf32>
    %309 = arith.maximumf %307, %308 : vector<16x256xf32>
    %310 = arith.truncf %309 : vector<16x256xf32> to vector<16x256xbf16>
    %c11_233 = arith.constant 11 : index
    %c0_234 = arith.constant 0 : index
    %c0_235 = arith.constant 0 : index
    %311 = vector.load %arg5[%c11_233, %c0_234, %c0_235] : memref<13x256x128xbf16, #tpu.memory_space<vmem>>, vector<1x256x128xbf16>
    %312 = vector.shape_cast %311 : vector<1x256x128xbf16> to vector<256x128xbf16>
    %cst_236 = arith.constant dense<0.000000e+00> : vector<16x128xf32>
    %313 = tpu.matmul %310, %312, %cst_236 {dimension_numbers = #tpu.dot_dimension_numbers<[1], [0], [0], [1], [0, 0, 1, 1], [], []>} : vector<16x256xbf16>, vector<256x128xbf16>, vector<16x128xf32> -> vector<16x128xf32>
    %314 = arith.addf %302, %313 : vector<16x128xf32>
    %c0_237 = arith.constant 0 : index
    %c0_238 = arith.constant 0 : index
    %c16_239 = arith.constant 16 : index
    %c216_240 = arith.constant 216 : index
    %315 = vector.load %arg2[%c0_237, %c0_238, %c16_239, %c216_240] : memref<1x1x32x234xbf16, #tpu.memory_space<vmem>>, vector<1x1x16x18xbf16>
    %316 = vector.shape_cast %315 : vector<1x1x16x18xbf16> to vector<16x18xbf16>
    %cst_241 = arith.constant dense<0.000000e+00> : vector<16x256xf32>
    %317 = tpu.matmul %316, %0, %cst_241 {dimension_numbers = #tpu.dot_dimension_numbers<[1], [0], [0], [1], [0, 0, 1, 1], [], []>} : vector<16x18xbf16>, vector<18x256xbf16>, vector<16x256xf32> -> vector<16x256xf32>
    %318 = vector.broadcast %1 : vector<1x256xf32> to vector<16x256xf32>
    %319 = arith.addf %317, %318 : vector<16x256xf32>
    %cst_242 = arith.constant 0.000000e+00 : f32
    %320 = vector.broadcast %cst_242 : f32 to vector<16x256xf32>
    %321 = arith.maximumf %319, %320 : vector<16x256xf32>
    %322 = arith.truncf %321 : vector<16x256xf32> to vector<16x256xbf16>
    %c12_243 = arith.constant 12 : index
    %c0_244 = arith.constant 0 : index
    %c0_245 = arith.constant 0 : index
    %323 = vector.load %arg5[%c12_243, %c0_244, %c0_245] : memref<13x256x128xbf16, #tpu.memory_space<vmem>>, vector<1x256x128xbf16>
    %324 = vector.shape_cast %323 : vector<1x256x128xbf16> to vector<256x128xbf16>
    %cst_246 = arith.constant dense<0.000000e+00> : vector<16x128xf32>
    %325 = tpu.matmul %322, %324, %cst_246 {dimension_numbers = #tpu.dot_dimension_numbers<[1], [0], [0], [1], [0, 0, 1, 1], [], []>} : vector<16x256xbf16>, vector<256x128xbf16>, vector<16x128xf32> -> vector<16x128xf32>
    %326 = arith.addf %314, %325 : vector<16x128xf32>
    %327 = vector.broadcast %2 : vector<1x128xf32> to vector<16x128xf32>
    %328 = arith.addf %326, %327 : vector<16x128xf32>
    %cst_247 = arith.constant 0.000000e+00 : f32
    %329 = vector.broadcast %cst_247 : f32 to vector<16x128xf32>
    %330 = arith.maximumf %328, %329 : vector<16x128xf32>
    %331 = arith.truncf %330 : vector<16x128xf32> to vector<16x128xbf16>
    %c1_248 = arith.constant 1 : index
    %c0_249 = arith.constant 0 : index
    %c0_250 = arith.constant 0 : index
    %332 = vector.load %arg7[%c1_248, %c0_249, %c0_250] : memref<2x128x128xbf16, #tpu.memory_space<vmem>>, vector<1x128x128xbf16>
    %333 = vector.shape_cast %332 : vector<1x128x128xbf16> to vector<128x128xbf16>
    %cst_251 = arith.constant dense<0.000000e+00> : vector<16x128xf32>
    %334 = tpu.matmul %331, %333, %cst_251 {dimension_numbers = #tpu.dot_dimension_numbers<[1], [0], [0], [1], [0, 0, 1, 1], [], []>} : vector<16x128xbf16>, vector<128x128xbf16>, vector<16x128xf32> -> vector<16x128xf32>
    %335 = arith.addf %169, %334 : vector<16x128xf32>
    %c0_252 = arith.constant 0 : index
    %c0_253 = arith.constant 0 : index
    %336 = vector.load %arg8[%c0_252, %c0_253] : memref<1x128xf32, #tpu.memory_space<vmem>>, vector<1x128xf32>
    %337 = vector.broadcast %336 : vector<1x128xf32> to vector<16x128xf32>
    %338 = arith.addf %335, %337 : vector<16x128xf32>
    %c0_254 = arith.constant 0 : index
    %c0_255 = arith.constant 0 : index
    %339 = vector.load %arg9[%c0_254, %c0_255] : memref<16x128xf32, #tpu.memory_space<vmem>>, vector<16x128xf32>
    %340 = arith.addf %338, %339 : vector<16x128xf32>
    %c0_256 = arith.constant 0 : index
    %c0_257 = arith.constant 0 : index
    %c0_258 = arith.constant 0 : index
    %341 = vector.load %arg10[%c0_256, %c0_257, %c0_258] : memref<1x16x128xf32, #tpu.memory_space<vmem>>, vector<1x16x128xf32>
    %342 = vector.shape_cast %341 : vector<1x16x128xf32> to vector<16x128xf32>
    %343 = vector.shape_cast %340 : vector<16x128xf32> to vector<1x16x128xf32>
    tpu.vector_store %arg10[%c0_256, %c0_257, %c0_258], %343 {strides = array<i32>} : memref<1x16x128xf32, #tpu.memory_space<vmem>>, vector<1x16x128xf32>,
    return
  }
  func.func @transform_0(%arg0: i32, %arg1: i32) -> (i32, i32, i32, i32) {
    %c0_i32 = arith.constant 0 : i32
    %c0_i32_0 = arith.constant 0 : i32
    %c0_i32_1 = arith.constant 0 : i32
    return %arg0, %arg1, %c0_i32, %c0_i32_0 : i32, i32, i32, i32
  }
  func.func @transform_1(%arg0: i32, %arg1: i32) -> (i32, i32) {
    %c0_i32 = arith.constant 0 : i32
    %c0_i32_0 = arith.constant 0 : i32
    %c0_i32_1 = arith.constant 0 : i32
    return %c0_i32, %c0_i32_0 : i32, i32
  }
  func.func @transform_2(%arg0: i32, %arg1: i32) -> (i32, i32) {
    %c0_i32 = arith.constant 0 : i32
    %c0_i32_0 = arith.constant 0 : i32
    %c0_i32_1 = arith.constant 0 : i32
    return %c0_i32, %c0_i32_0 : i32, i32
  }
  func.func @transform_3(%arg0: i32, %arg1: i32) -> (i32, i32, i32) {
    %c0_i32 = arith.constant 0 : i32
    %c0_i32_0 = arith.constant 0 : i32
    %c0_i32_1 = arith.constant 0 : i32
    %c0_i32_2 = arith.constant 0 : i32
    return %c0_i32, %c0_i32_0, %c0_i32_1 : i32, i32, i32
  }
  func.func @transform_4(%arg0: i32, %arg1: i32) -> (i32, i32) {
    %c0_i32 = arith.constant 0 : i32
    %c0_i32_0 = arith.constant 0 : i32
    %c0_i32_1 = arith.constant 0 : i32
    return %c0_i32, %c0_i32_0 : i32, i32
  }
  func.func @transform_5(%arg0: i32, %arg1: i32) -> (i32, i32, i32) {
    %c0_i32 = arith.constant 0 : i32
    %c0_i32_0 = arith.constant 0 : i32
    %c0_i32_1 = arith.constant 0 : i32
    %c0_i32_2 = arith.constant 0 : i32
    return %c0_i32, %c0_i32_0, %c0_i32_1 : i32, i32, i32
  }
  func.func @transform_6(%arg0: i32, %arg1: i32) -> (i32, i32) {
    %c0_i32 = arith.constant 0 : i32
    %c0_i32_0 = arith.constant 0 : i32
    %c0_i32_1 = arith.constant 0 : i32
    return %c0_i32, %c0_i32_0 : i32, i32
  }
  func.func @transform_7(%arg0: i32, %arg1: i32) -> (i32, i32) {
    %c0_i32 = arith.constant 0 : i32
    %c0_i32_0 = arith.constant 0 : i32
    return %arg1, %c0_i32 : i32, i32
  }
  func.func @transform_8(%arg0: i32, %arg1: i32) -> (i32, i32, i32) {
    %c0_i32 = arith.constant 0 : i32
    %c0_i32_0 = arith.constant 0 : i32
    return %arg0, %arg1, %c0_i32 : i32, i32, i32
  }
}

</mosaic_0001>

<bundles_post_ra>
// kernel: _forward.1
= control target key start
LH: loop header
LB: loop body
LE: loop exit
PB: predicated region body
PF: predicated region fallthrough
CT: control target
= control target key end

     0   :  { %s6905_s27 = smov 0   ;;  %s6907_s28 = smov 0   ;;  %s8774_s0 = inlined_call_operand.vmem [shape: bf16[2,1,32,234], index: 0, kind: input, shape index: {}]   ;;  %s8775_s1 = inlined_call_operand.vmem [shape: bf16[18,256], index: 1, kind: input, shape index: {}]   ;;  %s8776_s2 = inlined_call_operand.vmem [shape: f32[1,256], index: 2, kind: input, shape index: {}]   ;;  %s8777_s3 = inlined_call_operand.vmem [shape: bf16[13,256,128], index: 3, kind: input, shape index: {}]   ;;  %s8778_s4 = inlined_call_operand.vmem [shape: f32[1,128], index: 4, kind: input, shape index: {}]   ;;  %s8779_s5 = inlined_call_operand.vmem [shape: bf16[2,128,128], index: 5, kind: input, shape index: {}]   ;;  %s8780_s6 = inlined_call_operand.vmem [shape: f32[1,128], index: 6, kind: input, shape index: {}]   ;;  %s8781_s7 = inlined_call_operand.vmem [shape: f32[16,128], index: 7, kind: input, shape index: {}]   ;;  %s8782_s8 = inlined_call_operand.vmem [shape: f32[2,16,128], index: 8, kind: output, shape index: {}]  }
   0x1   :  { %s6909_s29 = smov 0  }
   0x2 LB: > { %s30_s30 = sadd.s32 1, %s6839_s28  ;;  %p4998_p0 = scmp.ge.s32.totalorder %s6843_s29, 1  ;;  %s6843_s29 = sphi %s6909_s29, %s18_s29   ;;  %s6839_s28 = sphi %s6907_s28, %s8794_s28   ;;  %s6835_s27 = sphi %s6905_s27, %s8793_s27  }
   0x3   : > { %p32_p1 = scmp.ge.s32.totalorder %s30_s30, 2  ;;  %p293_p2 = scmp.lt.s32.totalorder %s6843_s29, 3 }
   0x5   : > { %s8796_s30 = smov (%p32_p1, %s30_s30), 0  ;;  %p294_p3 = pnand %p4998_p0, %p293_p2 }
   0x6   : > { %p340_p4 = scmp.lt.s32.totalorder (!%p294_p3), %s6835_s27, 1  ;;  %s6846_s19 = smov (!%p294_p3), 110  }
   0x7   : > { %297 = sbr.rel (%p294_p3) target bundleno = 3326 (0xcfe), region = 52  ;;  %s6847_s20 = smov (!%p294_p3), 92  }
   0x8   : > { %s6848_s23 = smov (!%p294_p3), 74   ;;  %s6849_s10 = smov (!%p294_p3), 56  }
   0x9   : > { %s6850_s12 = smov (!%p294_p3), 38   ;;  %s6852_s24 = smov (!%p294_p3), 20  }
   0xa   : > { %s8783_s13 = smov (!%p294_p3), 112   ;;  %s8784_s25 = smov (!%p294_p3), 94  }
   0xb   : > { %s8786_s17 = smov (!%p294_p3), 58   ;;  %s8788_s16 = smov (!%p294_p3), 112  }
   0xc   : > { %v368_v0 = vld [vmem:[%s8775_s1 + $0x10] sm:$0x11]  ;;  %vm408_vm0 = vcmask 1040384   ;;  %v6368_v3 = vld [vmem:[%s8775_s1 + $0x4] ss:$8 sps:$4 sm:$0xff]   ;;  %s8798_s27 = smov (!%p340_p4, %s6835_s27), 1  ;;  %v374_v37 = vlaneseq }
   0xd   : > { %v6926_v1 = vcombine.high %v368_v0, %v368_v0  ;;  %v5006_v2 = vcombine.low %v368_v0, %v368_v0  ;;  %v6845_v4 = vmov 0   ;;  %v6370_v6 = vld [vmem:[%s8775_s1] ss:$8 sps:$4 sm:$0xff]   ;;  %s5695_s15 = sshll.u32 %s8798_s27, 5  ;;  %vm404_vm1 = vcmask 146432   ;;  %v6372_v8 = vld [vmem:[%s8777_s3 + $0x78] sm:$0xff]  }
   0xe   : > { %447 = vmatprep.mubr.bf16.mxu1 %v6845_v4  ;;  %s6947_s18 = scalar_lea.vmem %s8774_s0, %s5695_s15  ;;  %v6388_v9 = vld [vmem:[%s8777_s3 + $0xf8] sm:$0xff]   ;;  %v6390_v11 = vld [vmem:[%s8777_s3 + $0xf0] sm:$0xff]   ;;  %v6392_v13 = vld [vmem:[%s8777_s3 + $0xe8] sm:$0xff]   ;;  %v375_v40 = vshrl.u32 %v374_v37, 7  ;;  %s6851_s15 = smov 2   ;;  %vm2001_vm2 = vcmask 15360  }
   0xf   : > { %5008 = vmatprep.subr.msk.bf16.mxu1 %vm408_vm0, %v6926_v1  ;;  %v6937_v5 = vsel %vm408_vm0, %v5006_v2, 0  ;;  %v6371_v7 = vld [vmem:[%s6947_s18] ss:$8 sps:$4 sm:$0xff]   ;;  %v6389_v10 = vld [vmem:[%s8777_s3 + $0xb8] sm:$0xff]   ;;  %5697 = vmatprep.subr.bf16.mxu0 %v6388_v9  ;;  %v6391_v12 = vld [vmem:[%s8777_s3 + $0xb0] sm:$0xff]   ;;  %s8789_s21 = smov 94  }
  0x10   : > { %428 = vmatpush1.bf16.msra.mxu1 %v6937_v5  ;;  %496 = vrot.lane.b32.xlu0 %v6371_v7, %s6846_s19  ;;  %v6393_v14 = vld [vmem:[%s8777_s3 + $0xa8] sm:$0xff]   ;;  %v6394_v15 = vld [vmem:[%s8777_s3 + $0xe0] sm:$0xff]   ;;  %v6396_v17 = vld [vmem:[%s8777_s3 + $0xd8] sm:$0xff]   ;;  %v376_v44 = vsub.s32 0, %v375_v40  ;;  %v380_v46 = vsub.s32 1, %v375_v40  ;;  %vm6859_vm3 = vmmov 0  }
  0x11   : > { %429 = vmatprep.subr.bf16.mxu1 %v6368_v3  ;;  %857 = vrot.lane.b32.xlu1 %v6371_v7, %s6847_s20  ;;  %v6395_v16 = vld [vmem:[%s8777_s3 + $0xa0] sm:$0xff]   ;;  %v6397_v18 = vld [vmem:[%s8777_s3 + $0x98] sm:$0xff]   ;;  %v6374_v20 = vld [vmem:[%s8777_s3 + $0x70] sm:$0xff]  }
  0x12   : > { %5698 = vmatpush3.bf16.msra.mxu0 %v6389_v10  ;;  %v6373_v19 = vld [vmem:[%s8777_s3 + $0x38] sm:$0xff]   ;;  %v6375_v22 = vld [vmem:[%s8777_s3 + $0x30] sm:$0xff]   ;;  %v6376_v23 = vld [vmem:[%s8777_s3 + $0x68] sm:$0xff]  }
  0x13   : > { %5699 = vmatprep.subr.bf16.mxu0 %v6390_v11  ;;  %v6377_v24 = vld [vmem:[%s8777_s3 + $0x28] sm:$0xff]   ;;  %v6378_v25 = vld [vmem:[%s8777_s3 + $0x60] sm:$0xff]   ;;  %v6380_v27 = vld [vmem:[%s8777_s3 + $0x58] sm:$0xff]  }
  0x14   : > { %430 = vmatpush1.bf16.msra.mxu1 %v6370_v6  ;;  %1083 = vrot.lane.b32.xlu0 %v6371_v7, %s6848_s23  ;;  %v6379_v26 = vld [vmem:[%s8777_s3 + $0x20] sm:$0xff]   ;;  %v6381_v28 = vld [vmem:[%s8777_s3 + $0x18] sm:$0xff]   ;;  %v6382_v29 = vld [vmem:[%s8777_s3 + $0x50] sm:$0xff]  }
  0x15   : > { %5010 = vmatprep.subr.msk.bf16.mxu1 %vm408_vm0, %v6926_v1  ;;  %v6383_v30 = vld [vmem:[%s8777_s3 + $0x10] sm:$0xff]   ;;  %v6384_v31 = vld [vmem:[%s8777_s3 + $0x48] sm:$0xff]   ;;  %v6386_v33 = vld [vmem:[%s8777_s3 + $0x40] sm:$0xff]  }
  0x16   : > { %5700 = vmatpush3.bf16.msra.mxu0 %v6391_v12  ;;  %v6385_v32 = vld [vmem:[%s8777_s3 + $0x8] sm:$0xff]   ;;  %v6387_v34 = vld [vmem:[%s8777_s3] sm:$0xff]   ;;  %v6398_v35 = vld [vmem:[%s8777_s3 + $0xd0] sm:$0xff]  }
  0x17   : > { %5009 = vmatmul.mubr.msk.bf16.vlgmr.msra.gmra.mxu1 %vm404_vm1, %v6371_v7  ;;  %5701 = vmatprep.subr.bf16.mxu0 %v6392_v13  ;;  %v6399_v36 = vld [vmem:[%s8777_s3 + $0x90] sm:$0xff]   ;;  %v6400_v38 = vld [vmem:[%s8777_s3 + $0xc8] sm:$0xff]   ;;  %v6402_v41 = vld [vmem:[%s8777_s3 + $0xc0] sm:$0xff]  }
  0x18   : > { %514 = vmatpush1.bf16.msra.mxu1 %v6937_v5  ;;  %533 = vmatprep.mubr.bf16.mxu1 %v6845_v4  ;;  %v6401_v39 = vld [vmem:[%s8777_s3 + $0x88] sm:$0xff]   ;;  %v6403_v43 = vld [vmem:[%s8777_s3 + $0x80] sm:$0xff]   ;;  %v6404_v0 = vld [vmem:[%s8777_s3 + $0x178] sm:$0xff]  }
  0x19   : > { %515 = vmatprep.subr.bf16.mxu1 %v6368_v3  ;;  %v7055_v42 = vld [vmem:[%s6947_s18] ss:$8 sps:$4 sm:$0xff]   ;;  %v7080_v63 = vld [vmem:[%s8775_s1 + $0x4] ss:$8 sps:$4 sm:$0xff]   ;;  %v6406_v7 = vld [vmem:[%s8777_s3 + $0x170] sm:$0xff]  }
  0x1a   : > { %5702 = vmatpush3.bf16.msra.mxu0 %v6393_v14  ;;  %1309 = vrot.lane.b32.xlu0 %v7055_v42, %s6849_s10  ;;  %v369_v45 = vld [vmem:[%s8776_s2] sm:$0x3]  ;;  %v6408_v9 = vld [vmem:[%s8777_s3 + $0x168] sm:$0xff]   ;;  %v6412_v13 = vld [vmem:[%s8777_s3 + $0x158] sm:$0xff]  }
  0x1b   : > { %5703 = vmatprep.subr.bf16.mxu0 %v6394_v15  ;;  %v7067_v47 = vrot.slane %v369_v45, %v376_v44  ;;  %v7069_v48 = vrot.slane %v369_v45, %v380_v46  ;;  %v7089_v2 = vld [vmem:[%s8775_s1] ss:$8 sps:$4 sm:$0xff]   ;;  %v6413_v14 = vld [vmem:[%s8777_s3 + $0x118] sm:$0xff]   ;;  %v6414_v15 = vld [vmem:[%s8777_s3 + $0x150] sm:$0xff]   ;;  %1535 = vrot.lane.b32.xlu1 %v7055_v42, %s6850_s12 }
  0x1c   : > { %516 = vmatpush1.bf16.msra.mxu1 %v6370_v6  ;;  %v6405_v6 = vld [vmem:[%s8777_s3 + $0x138] sm:$0xff]   ;;  %v6409_v10 = vld [vmem:[%s8777_s3 + $0x128] sm:$0xff]   ;;  %v6410_v11 = vld [vmem:[%s8777_s3 + $0x160] sm:$0xff]  }
  0x1d   : > { %5719 = vmatprep.subr.bf16.mxu1 %v6372_v8  ;;  %v6407_v8 = vld [vmem:[%s8777_s3 + $0x130] sm:$0xff]   ;;  %v6411_v12 = vld [vmem:[%s8777_s3 + $0x120] sm:$0xff]   ;;  %v6421_v37 = vld [vmem:[%s8777_s3 + $0x1b8] sm:$0xff]  }
  0x1e   : > { %5704 = vmatpush3.bf16.msra.mxu0 %v6395_v16  ;;  %v6415_v16 = vld [vmem:[%s8777_s3 + $0x110] sm:$0xff]   ;;  %v6424_v40 = vld [vmem:[%s8777_s3 + $0x1e8] sm:$0xff]   ;;  %v6427_v44 = vld [vmem:[%s8777_s3 + $0x1a0] sm:$0xff]  }
  0x1f   : > { %5705 = vmatprep.subr.bf16.mxu0 %v6396_v17  ;;  %v6416_v17 = vld [vmem:[%s8777_s3 + $0x148] sm:$0xff]   ;;  %v6428_v45 = vld [vmem:[%s8777_s3 + $0x1d8] sm:$0xff]  }
  0x20   : > { %v6429_v46 = vld [vmem:[%s8777_s3 + $0x198] sm:$0xff]  }
  0x22   : > { %5706 = vmatpush3.bf16.msra.mxu0 %v6397_v18  ;;  %v6417_v18 = vld [vmem:[%s8777_s3 + $0x108] sm:$0xff]  }
  0x23   : > { %5707 = vmatprep.subr.bf16.mxu0 %v6398_v35  ;;  %v6420_v35 = vld [vmem:[%s8777_s3 + $0x1f8] sm:$0xff]  }
  0x26   : > { %5708 = vmatpush3.bf16.msra.mxu0 %v6399_v36 }
  0x27   : > { %5709 = vmatprep.subr.bf16.mxu0 %v6400_v38  ;;  %v6422_v38 = vld [vmem:[%s8777_s3 + $0x1f0] sm:$0xff]  }
  0x2a   : > { %5710 = vmatpush3.bf16.msra.mxu0 %v6401_v39  ;;  %v6423_v39 = vld [vmem:[%s8777_s3 + $0x1b0] sm:$0xff]  }
  0x2b   : > { %5711 = vmatprep.subr.bf16.mxu0 %v6402_v41  ;;  %v6425_v41 = vld [vmem:[%s8777_s3 + $0x1a8] sm:$0xff]  }
  0x2e   : > { %5712 = vmatpush3.bf16.msra.mxu0 %v6403_v43  ;;  %v6426_v43 = vld [vmem:[%s8777_s3 + $0x1e0] sm:$0xff]  }
  0x2f   : > { %5126 = vmatprep.subr.msk.bf16.mxu0 %vm408_vm0, %v6926_v1 }
  0x82   : > { %v497_v21 = vpop.permute.xlu0 %496 }
  0x83   : > { %5011 = vmatmul.mubr.msk.bf16.vlgmr.msra.gmra.mxu1 %vm404_vm1, %v497_v21  ;;  %v858_v3 = vpop.permute.xlu1 %857 }
  0x84   : > { %5720 = vmatpush3.bf16.msra.mxu1 %v6373_v19  ;;  %v6418_v19 = vld [vmem:[%s8777_s3 + $0x140] sm:$0xff]  }
  0x85   : > { %5721 = vmatprep.subr.bf16.mxu1 %v6374_v20  ;;  %v6419_v20 = vld [vmem:[%s8777_s3 + $0x100] sm:$0xff]  }
  0x86   : > { %v1084_v36 = vpop.permute.xlu0 %1083 }
  0x88   : > { %5722 = vmatpush3.bf16.msra.mxu1 %v6375_v22 }
  0x89   : > { %5723 = vmatprep.subr.bf16.mxu1 %v6376_v23 }
  0x8c   : > { %5724 = vmatpush3.bf16.msra.mxu1 %v6377_v24 }
  0x8d   : > { %5725 = vmatprep.subr.bf16.mxu1 %v6378_v25 }
  0x90   : > { %5726 = vmatpush3.bf16.msra.mxu1 %v6379_v26 }
  0x91   : > { %5727 = vmatprep.subr.bf16.mxu1 %v6380_v27 }
  0x94   : > { %5728 = vmatpush3.bf16.msra.mxu1 %v6381_v28 }
  0x95   : > { %5729 = vmatprep.subr.bf16.mxu1 %v6382_v29 }
  0x98   : > { %5730 = vmatpush3.bf16.msra.mxu1 %v6383_v30 }
  0x99   : > { %5731 = vmatprep.subr.bf16.mxu1 %v6384_v31 }
  0x9c   : > { %5732 = vmatpush3.bf16.msra.mxu1 %v6385_v32 }
  0x9d   : > { %5733 = vmatprep.subr.bf16.mxu1 %v6386_v33 }
  0xa0   : > { %5734 = vmatpush3.bf16.msra.mxu1 %v6387_v34 }
  0xa1   : > { %5076 = vmatprep.subr.msk.bf16.mxu1 %vm408_vm0, %v6926_v1 }
  0xd7   : > { %v449_v49 = vpop.f32.mrf.mxu1 }
  0xd8   : > { %v450_v50 = vadd.f32 %v449_v49, %v7067_v47  ;;  %v6430_v49 = vld [vmem:[%s8777_s3 + $0x1d0] sm:$0xff]  }
  0xd9   : > { %v451_v51 = vpop.f32.mrf.mxu1 }
  0xda   : > { %v452_v52 = vadd.f32 %v451_v51, %v7069_v48  ;;  %v458_v55 = vmax.f32 %v450_v50, 0.0  ;;  %v6431_v50 = vld [vmem:[%s8777_s3 + $0x190] sm:$0xff]   ;;  %v6432_v51 = vld [vmem:[%s6947_s18] ss:$8 sps:$4 sm:$0xff]  }
  0xdb   : > { %v453_v53 = vpop.f32.mrf.mxu1  ;;  %1997 = vrot.lane.b32.xlu1 %v6432_v51, %s6851_s15 }
  0xdc   : > { %v454_v54 = vadd.f32 %v453_v53, %v7067_v47  ;;  %v459_v57 = vmax.f32 %v452_v52, 0.0  ;;  %v6434_v52 = vld [vmem:[%s8777_s3 + $0x1c8] sm:$0xff]  }
  0xdd   : > { %v455_v56 = vpop.f32.mrf.mxu1  ;;  %v6435_v53 = vld [vmem:[%s8777_s3 + $0x188] sm:$0xff]  }
  0xde   : > { %v460_v58 = vmax.f32 %v454_v54, 0.0  ;;  %v456_v59 = vadd.f32 %v455_v56, %v7069_v48  ;;  %v6437_v56 = vld [vmem:[%s8777_s3 + $0x180] sm:$0xff]  }
  0xdf   : > { %1761 = vrot.lane.b32.xlu1 %v7055_v42, %s6852_s24 }
  0xe0   : > { %v461_v60 = vmax.f32 %v456_v59, 0.0  ;;  %v462_v61 = vpack.c.bf16 %v460_v58, %v458_v55  ;;  %v6436_v55 = vld [vmem:[%s8777_s3 + $0x1c0] sm:$0xff]  }
  0xe2   : > { %v463_v62 = vpack.c.bf16 %v461_v60, %v459_v57 }
  0xe4   : > { %848 = vmatprep.mubr.bf16.mxu1 %v463_v62 }
  0xe5   : > { %849 = vmatmul.mubr.bf16.vlgmr.msra.gmra.mxu1 %v462_v61 }
  0xe6   : > { %875 = vmatpush1.bf16.msra.mxu1 %v6937_v5  ;;  %894 = vmatprep.mubr.bf16.mxu1 %v6845_v4 }
  0xe7   : > { %876 = vmatprep.subr.bf16.mxu1 %v7080_v63 }
  0xea   : > { %877 = vmatpush1.bf16.msra.mxu1 %v7089_v2 }
  0xeb   : > { %5741 = vmatprep.subr.bf16.mxu1 %v6404_v0 }
  0xed   : > { %5077 = vmatmul.mubr.msk.bf16.vlgmr.msra.gmra.mxu1 %vm404_vm1, %v858_v3 }
  0xee   : > { %5742 = vmatpush3.bf16.msra.mxu1 %v6405_v6 }
  0xef   : > { %5743 = vmatprep.subr.bf16.mxu1 %v6406_v7 }
  0xf2   : > { %5744 = vmatpush3.bf16.msra.mxu1 %v6407_v8 }
  0xf3   : > { %5745 = vmatprep.subr.bf16.mxu1 %v6408_v9 }
  0xf6   : > { %5746 = vmatpush3.bf16.msra.mxu1 %v6409_v10 }
  0xf7   : > { %5747 = vmatprep.subr.bf16.mxu1 %v6410_v11 }
  0xfa   : > { %5748 = vmatpush3.bf16.msra.mxu1 %v6411_v12 }
  0xfb   : > { %5749 = vmatprep.subr.bf16.mxu1 %v6412_v13 }
  0xfe   : > { %5750 = vmatpush3.bf16.msra.mxu1 %v6413_v14 }
  0xff   : > { %5751 = vmatprep.subr.bf16.mxu1 %v6414_v15 }
 0x102   : > { %5752 = vmatpush3.bf16.msra.mxu1 %v6415_v16  ;;  %v6438_v16 = vld [vmem:[%s8777_s3 + $0x278] sm:$0xff]  }
 0x103   : > { %5753 = vmatprep.subr.bf16.mxu1 %v6416_v17  ;;  %v1310_v17 = vpop.permute.xlu0 %1309 }
 0x106   : > { %5754 = vmatpush3.bf16.msra.mxu1 %v6417_v18  ;;  %v6439_v18 = vld [vmem:[%s8777_s3 + $0x238] sm:$0xff]  }
 0x107   : > { %5755 = vmatprep.subr.bf16.mxu1 %v6418_v19  ;;  %v6440_v19 = vld [vmem:[%s8777_s3 + $0x270] sm:$0xff]  }
 0x10a   : > { %5756 = vmatpush3.bf16.msra.mxu1 %v6419_v20  ;;  %v6441_v20 = vld [vmem:[%s8777_s3 + $0x230] sm:$0xff]  }
 0x10b   : > { %5176 = vmatprep.subr.msk.bf16.mxu1 %vm408_vm0, %v6926_v1 }
 0x143   : > { %v535_v21 = vpop.f32.mrf.mxu1 }
 0x144   : > { %v536_v26 = vadd.f32 %v535_v21, %v7067_v47  ;;  %v6442_v21 = vld [vmem:[%s8777_s3 + $0x268] sm:$0xff]  }
 0x145   : > { %v537_v22 = vpop.f32.mrf.mxu1 }
 0x146   : > { %v538_v24 = vadd.f32 %v537_v22, %v7069_v48  ;;  %v544_v32 = vmax.f32 %v536_v26, 0.0  ;;  %v6443_v22 = vld [vmem:[%s8777_s3 + $0x228] sm:$0xff]   ;;  %v6447_v26 = vld [vmem:[%s8777_s3 + $0x218] sm:$0xff]  }
 0x147   : > { %v539_v23 = vpop.f32.mrf.mxu1 }
 0x148   : > { %v540_v25 = vadd.f32 %v539_v23, %v7067_v47  ;;  %v545_v30 = vmax.f32 %v538_v24, 0.0  ;;  %v6444_v23 = vld [vmem:[%s8777_s3 + $0x260] sm:$0xff]  }
 0x149   : > { %v541_v27 = vpop.f32.mrf.mxu1  ;;  %v6445_v24 = vld [vmem:[%s8777_s3 + $0x220] sm:$0xff]  }
 0x14a   : > { %v542_v28 = vadd.f32 %v541_v27, %v7069_v48  ;;  %v546_v29 = vmax.f32 %v540_v25, 0.0  ;;  %v6446_v25 = vld [vmem:[%s8777_s3 + $0x258] sm:$0xff]   ;;  %v6448_v27 = vld [vmem:[%s8777_s3 + $0x250] sm:$0xff]  }
 0x14c   : > { %v547_v31 = vmax.f32 %v542_v28, 0.0  ;;  %v548_v34 = vpack.c.bf16 %v546_v29, %v544_v32  ;;  %v6449_v28 = vld [vmem:[%s8777_s3 + $0x210] sm:$0xff]   ;;  %v6450_v29 = vld [vmem:[%s8777_s3 + $0x248] sm:$0xff]   ;;  %v6453_v32 = vld [vmem:[%s8777_s3 + $0x200] sm:$0xff]  }
 0x14e   : > { %v549_v33 = vpack.c.bf16 %v547_v31, %v545_v30  ;;  %v6451_v30 = vld [vmem:[%s8777_s3 + $0x208] sm:$0xff]   ;;  %v6452_v31 = vld [vmem:[%s8777_s3 + $0x240] sm:$0xff]  }
 0x150   : > { %711 = vmatprep.mubr.bf16.mxu0 %v549_v33  ;;  %v6454_v33 = vld [vmem:[%s6947_s18 + $0x4] ss:$8 sps:$4 sm:$0xff]  }
 0x151   : > { %712 = vmatmul.mubr.bf16.vlgmr.msra.gmra.mxu0 %v548_v34  ;;  %1999 = vrot.lane.b32.xlu0 %v6454_v33, %s6851_s15 }
 0x152   : > { %1101 = vmatpush1.bf16.msra.mxu0 %v6937_v5  ;;  %1120 = vmatprep.mubr.bf16.mxu0 %v6845_v4 }
 0x153   : > { %1102 = vmatprep.subr.bf16.mxu0 %v7080_v63 }
 0x156   : > { %1103 = vmatpush1.bf16.msra.mxu0 %v7089_v2 }
 0x157   : > { %5763 = vmatprep.subr.bf16.mxu0 %v6420_v35 }
 0x159   : > { %5127 = vmatmul.mubr.msk.bf16.vlgmr.msra.gmra.mxu0 %vm404_vm1, %v1084_v36 }
 0x15a   : > { %5764 = vmatpush3.bf16.msra.mxu0 %v6421_v37 }
 0x15b   : > { %5765 = vmatprep.subr.bf16.mxu0 %v6422_v38 }
 0x15e   : > { %5766 = vmatpush3.bf16.msra.mxu0 %v6423_v39 }
 0x15f   : > { %5767 = vmatprep.subr.bf16.mxu0 %v6424_v40 }
 0x162   : > { %5768 = vmatpush3.bf16.msra.mxu0 %v6425_v41 }
 0x163   : > { %5769 = vmatprep.subr.bf16.mxu0 %v6426_v43 }
 0x166   : > { %5770 = vmatpush3.bf16.msra.mxu0 %v6427_v44 }
 0x167   : > { %5771 = vmatprep.subr.bf16.mxu0 %v6428_v45 }
 0x16a   : > { %5772 = vmatpush3.bf16.msra.mxu0 %v6429_v46 }
 0x16b   : > { %5773 = vmatprep.subr.bf16.mxu0 %v6430_v49 }
 0x16e   : > { %5774 = vmatpush3.bf16.msra.mxu0 %v6431_v50 }
 0x16f   : > { %5775 = vmatprep.subr.bf16.mxu0 %v6434_v52 }
 0x172   : > { %5776 = vmatpush3.bf16.msra.mxu0 %v6435_v53 }
 0x173   : > { %5777 = vmatprep.subr.bf16.mxu0 %v6436_v55 }
 0x176   : > { %5778 = vmatpush3.bf16.msra.mxu0 %v6437_v56 }
 0x177   : > { %5226 = vmatprep.subr.msk.bf16.mxu0 %vm408_vm0, %v6926_v1 }
 0x1a5   : > { %v5735_v54 = vpop.f32.mrf.mxu1 }
 0x1a7   : > { %v5736_v57 = vpop.f32.mrf.mxu1 }
 0x1a8   : > { %v7203_v58 = vadd.f32 %v5736_v57, %v5735_v54 }
 0x1a9   : > { %v5738_v59 = vpop.f32.mrf.mxu1 }
 0x1ab   : > { %v5739_v60 = vpop.f32.mrf.mxu1 }
 0x1ac   : > { %v7207_v61 = vadd.f32 %v5739_v60, %v5738_v59  ;;  %v6455_v59 = vld [vmem:[%s8777_s3 + $0x2f8] sm:$0xff]   ;;  %v1536_v60 = vpop.permute.xlu1 %1535 }
 0x1ad   : > { %v896_v62 = vpop.f32.mrf.mxu1 }
 0x1ae   : > { %v897_v0 = vadd.f32 %v896_v62, %v7067_v47  ;;  %v6457_v62 = vld [vmem:[%s8777_s3 + $0x2f0] sm:$0xff]  }
 0x1af   : > { %v898_v42 = vpop.f32.mrf.mxu1 }
 0x1b0   : > { %v899_v3 = vadd.f32 %v898_v42, %v7069_v48  ;;  %v905_v8 = vmax.f32 %v897_v0, 0.0  ;;  %v6458_v0 = vld [vmem:[%s8777_s3 + $0x2b0] sm:$0xff]   ;;  %v6459_v42 = vld [vmem:[%s8777_s3 + $0x2e8] sm:$0xff]  }
 0x1b1   : > { %v900_v6 = vpop.f32.mrf.mxu1 }
 0x1b2   : > { %v901_v7 = vadd.f32 %v900_v6, %v7067_v47  ;;  %v906_v10 = vmax.f32 %v899_v3, 0.0  ;;  %v6460_v3 = vld [vmem:[%s8777_s3 + $0x2a8] sm:$0xff]   ;;  %v6461_v6 = vld [vmem:[%s8777_s3 + $0x2e0] sm:$0xff]  }
 0x1b3   : > { %v902_v9 = vpop.f32.mrf.mxu1 }
 0x1b4   : > { %v907_v11 = vmax.f32 %v901_v7, 0.0  ;;  %v903_v12 = vadd.f32 %v902_v9, %v7069_v48  ;;  %v6462_v7 = vld [vmem:[%s8777_s3 + $0x2a0] sm:$0xff]   ;;  %v6464_v9 = vld [vmem:[%s8777_s3 + $0x298] sm:$0xff]  }
 0x1b6   : > { %v908_v13 = vmax.f32 %v903_v12, 0.0  ;;  %v909_v14 = vpack.c.bf16 %v907_v11, %v905_v8  ;;  %v6463_v8 = vld [vmem:[%s8777_s3 + $0x2d8] sm:$0xff]   ;;  %v6466_v11 = vld [vmem:[%s8777_s3 + $0x290] sm:$0xff]   ;;  %v6467_v12 = vld [vmem:[%s8777_s3 + $0x2c8] sm:$0xff]  }
 0x1b8   : > { %v910_v15 = vpack.c.bf16 %v908_v13, %v906_v10  ;;  %v6465_v10 = vld [vmem:[%s8777_s3 + $0x2d0] sm:$0xff]   ;;  %v6468_v13 = vld [vmem:[%s8777_s3 + $0x288] sm:$0xff]  }
 0x1ba   : > { %1072 = vmatprep.mubr.bf16.mxu1 %v910_v15 }
 0x1bb   : > { %1073 = vmatmul.mubr.bf16.vlgmr.msra.gmra.mxu1 %v909_v14  ;;  %v7328_v14 = vld [vmem:[%s6947_s18 + $0x4] ss:$8 sps:$4 sm:$0xff]  }
 0x1bc   : > { %1327 = vmatpush1.bf16.msra.mxu1 %v6937_v5  ;;  %1346 = vmatprep.mubr.bf16.mxu1 %v6845_v4 }
 0x1bd   : > { %1328 = vmatprep.subr.bf16.mxu1 %v7080_v63  ;;  %2234 = vrot.lane.b32.xlu1 %v7328_v14, %s8783_s13  ;;  %s8785_s13 = smov 76  }
 0x1be   : > { %2460 = vrot.lane.b32.xlu0 %v7328_v14, %s8784_s25  ;;  %s5696_s25 = sshll.u32 %s8798_s27, 4 }
 0x1c0   : > { %1329 = vmatpush1.bf16.msra.mxu1 %v7089_v2 }
 0x1c1   : > { %5785 = vmatprep.subr.bf16.mxu1 %v6438_v16  ;;  %v6470_v16 = vld [vmem:[%s8777_s3 + $0x2c0] sm:$0xff]   ;;  %2686 = vrot.lane.b32.xlu1 %v7328_v14, %s8785_s13  ;;  %s8787_s13 = smov 40  }
 0x1c2   : > { %2912 = vrot.lane.b32.xlu0 %v7328_v14, %s8786_s17 }
 0x1c3   : > { %5177 = vmatmul.mubr.msk.bf16.vlgmr.msra.gmra.mxu1 %vm404_vm1, %v1310_v17  ;;  %v6471_v17 = vld [vmem:[%s8777_s3 + $0x280] sm:$0xff]  }
 0x1c4   : > { %5786 = vmatpush3.bf16.msra.mxu1 %v6439_v18 }
 0x1c5   : > { %5787 = vmatprep.subr.bf16.mxu1 %v6440_v19  ;;  %3138 = vrot.lane.b32.xlu1 %v7328_v14, %s8787_s13 }
 0x1c8   : > { %5788 = vmatpush3.bf16.msra.mxu1 %v6441_v20 }
 0x1c9   : > { %5789 = vmatprep.subr.bf16.mxu1 %v6442_v21 }
 0x1cc   : > { %5790 = vmatpush3.bf16.msra.mxu1 %v6443_v22 }
 0x1cd   : > { %5791 = vmatprep.subr.bf16.mxu1 %v6444_v23 }
 0x1d0   : > { %5792 = vmatpush3.bf16.msra.mxu1 %v6445_v24 }
 0x1d1   : > { %5793 = vmatprep.subr.bf16.mxu1 %v6446_v25 }
 0x1d4   : > { %5794 = vmatpush3.bf16.msra.mxu1 %v6447_v26 }
 0x1d5   : > { %5795 = vmatprep.subr.bf16.mxu1 %v6448_v27 }
 0x1d8   : > { %5796 = vmatpush3.bf16.msra.mxu1 %v6449_v28 }
 0x1d9   : > { %5797 = vmatprep.subr.bf16.mxu1 %v6450_v29 }
 0x1dc   : > { %5798 = vmatpush3.bf16.msra.mxu1 %v6451_v30 }
 0x1dd   : > { %5799 = vmatprep.subr.bf16.mxu1 %v6452_v31 }
 0x1e0   : > { %5800 = vmatpush3.bf16.msra.mxu1 %v6453_v32 }
 0x1e1   : > { %5276 = vmatprep.subr.msk.bf16.mxu1 %vm408_vm0, %v6926_v1 }
 0x211   : > { %v5713_v34 = vpop.f32.mrf.mxu0 }
 0x213   : > { %v5714_v35 = vpop.f32.mrf.mxu0 }
 0x214   : > { %v5715_v36 = vadd.f32 %v5714_v35, %v5713_v34 }
 0x215   : > { %v5716_v37 = vpop.f32.mrf.mxu0 }
 0x216   : > { %v7271_v38 = vadd.f32 %v7203_v58, %v5715_v36 }
 0x217   : > { %v5717_v39 = vpop.f32.mrf.mxu0 }
 0x218   : > { %v5718_v40 = vadd.f32 %v5717_v39, %v5716_v37  ;;  %v7350_v39 = vpop.permute.xlu1 %1997 }
 0x219   : > { %v1122_v41 = vpop.f32.mrf.mxu0 }
 0x21a   : > { %v7274_v43 = vadd.f32 %v7207_v61, %v5718_v40  ;;  %v1123_v50 = vadd.f32 %v1122_v41, %v7067_v47  ;;  %v6456_v61 = vld [vmem:[%s8777_s3 + $0x2b8] sm:$0xff]  }
 0x21b   : > { %v1124_v44 = vpop.f32.mrf.mxu0  ;;  %v6472_v40 = vld [vmem:[%s8777_s3 + $0x378] sm:$0xff]  }
 0x21c   : > { %v1125_v46 = vadd.f32 %v1124_v44, %v7069_v48  ;;  %v1131_v56 = vmax.f32 %v1123_v50, 0.0  ;;  %v1762_v41 = vpop.permute.xlu1 %1761  ;;  %v6474_v44 = vld [vmem:[%s8777_s3 + $0x370] sm:$0xff]   ;;  %v6478_v50 = vld [vmem:[%s8777_s3 + $0x360] sm:$0xff]  }
 0x21d   : > { %v1126_v45 = vpop.f32.mrf.mxu0 }
 0x21e   : > { %v1127_v49 = vadd.f32 %v1126_v45, %v7067_v47  ;;  %v1132_v54 = vmax.f32 %v1125_v46, 0.0  ;;  %v6475_v45 = vld [vmem:[%s8777_s3 + $0x330] sm:$0xff]   ;;  %v6476_v46 = vld [vmem:[%s8777_s3 + $0x368] sm:$0xff]  }
 0x21f   : > { %v1128_v51 = vpop.f32.mrf.mxu0 }
 0x220   : > { %v1129_v52 = vadd.f32 %v1128_v51, %v7069_v48  ;;  %v1133_v53 = vmax.f32 %v1127_v49, 0.0  ;;  %v6477_v49 = vld [vmem:[%s8777_s3 + $0x328] sm:$0xff]   ;;  %v6479_v51 = vld [vmem:[%s8777_s3 + $0x320] sm:$0xff]  }
 0x222   : > { %v1134_v55 = vmax.f32 %v1129_v52, 0.0  ;;  %v1135_v58 = vpack.c.bf16 %v1133_v53, %v1131_v56  ;;  %v6480_v52 = vld [vmem:[%s8777_s3 + $0x358] sm:$0xff]   ;;  %v6484_v56 = vld [vmem:[%s8777_s3 + $0x348] sm:$0xff]  }
 0x223   : > { %v6481_v53 = vld [vmem:[%s8777_s3 + $0x318] sm:$0xff]  }
 0x224   : > { %v1136_v57 = vpack.c.bf16 %v1134_v55, %v1132_v54  ;;  %v6482_v54 = vld [vmem:[%s8777_s3 + $0x350] sm:$0xff]  }
 0x225   : > { %v6483_v55 = vld [vmem:[%s8777_s3 + $0x310] sm:$0xff]  }
 0x226   : > { %1298 = vmatprep.mubr.bf16.mxu0 %v1136_v57  ;;  %v6485_v57 = vld [vmem:[%s8777_s3 + $0x308] sm:$0xff]  }
 0x227   : > { %1299 = vmatmul.mubr.bf16.vlgmr.msra.gmra.mxu0 %v1135_v58  ;;  %v6486_v58 = vld [vmem:[%s8777_s3 + $0x340] sm:$0xff]  }
 0x228   : > { %1553 = vmatpush1.bf16.msra.mxu0 %v6937_v5  ;;  %1572 = vmatprep.mubr.bf16.mxu0 %v6845_v4 }
 0x229   : > { %1554 = vmatprep.subr.bf16.mxu0 %v7080_v63 }
 0x22c   : > { %1555 = vmatpush1.bf16.msra.mxu0 %v7089_v2 }
 0x22d   : > { %5807 = vmatprep.subr.bf16.mxu0 %v6455_v59  ;;  %v6487_v59 = vld [vmem:[%s8777_s3 + $0x300] sm:$0xff]  }
 0x22f   : > { %5227 = vmatmul.mubr.msk.bf16.vlgmr.msra.gmra.mxu0 %vm404_vm1, %v1536_v60 }
 0x230   : > { %5808 = vmatpush3.bf16.msra.mxu0 %v6456_v61 }
 0x231   : > { %5809 = vmatprep.subr.bf16.mxu0 %v6457_v62 }
 0x234   : > { %5810 = vmatpush3.bf16.msra.mxu0 %v6458_v0 }
 0x235   : > { %5811 = vmatprep.subr.bf16.mxu0 %v6459_v42 }
 0x238   : > { %5812 = vmatpush3.bf16.msra.mxu0 %v6460_v3 }
 0x239   : > { %5813 = vmatprep.subr.bf16.mxu0 %v6461_v6 }
 0x23c   : > { %5814 = vmatpush3.bf16.msra.mxu0 %v6462_v7 }
 0x23d   : > { %5815 = vmatprep.subr.bf16.mxu0 %v6463_v8 }
 0x240   : > { %5816 = vmatpush3.bf16.msra.mxu0 %v6464_v9 }
 0x241   : > { %5817 = vmatprep.subr.bf16.mxu0 %v6465_v10 }
 0x244   : > { %5818 = vmatpush3.bf16.msra.mxu0 %v6466_v11 }
 0x245   : > { %5819 = vmatprep.subr.bf16.mxu0 %v6467_v12 }
 0x248   : > { %5820 = vmatpush3.bf16.msra.mxu0 %v6468_v13 }
 0x249   : > { %5821 = vmatprep.subr.bf16.mxu0 %v6470_v16 }
 0x24c   : > { %5822 = vmatpush3.bf16.msra.mxu0 %v6471_v17 }
 0x24d   : > { %5328 = vmatprep.subr.msk.bf16.mxu0 %vm408_vm0, %v6926_v1 }
 0x27b   : > { %v5757_v15 = vpop.f32.mrf.mxu1 }
 0x27d   : > { %v5758_v18 = vpop.f32.mrf.mxu1 }
 0x27e   : > { %v5759_v19 = vadd.f32 %v5758_v18, %v5757_v15 }
 0x27f   : > { %v5760_v20 = vpop.f32.mrf.mxu1 }
 0x280   : > { %v7341_v21 = vadd.f32 %v5759_v19, %v7271_v38 }
 0x281   : > { %v5761_v22 = vpop.f32.mrf.mxu1 }
 0x282   : > { %v5762_v23 = vadd.f32 %v5761_v22, %v5760_v20 }
 0x283   : > { %v1348_v24 = vpop.f32.mrf.mxu1 }
 0x284   : > { %v7344_v25 = vadd.f32 %v5762_v23, %v7274_v43  ;;  %v1349_v26 = vadd.f32 %v1348_v24, %v7067_v47  ;;  %v6473_v43 = vld [vmem:[%s8777_s3 + $0x338] sm:$0xff]   ;;  %v2000_v23 = vpop.permute.xlu0 %1999 }
 0x285   : > { %v1350_v27 = vpop.f32.mrf.mxu1  ;;  %v6488_v24 = vld [vmem:[%s8777_s3 + $0x3f8] sm:$0xff]  }
 0x286   : > { %v1351_v28 = vadd.f32 %v1350_v27, %v7069_v48  ;;  %v1357_v31 = vmax.f32 %v1349_v26, 0.0  ;;  %v6489_v26 = vld [vmem:[%s8777_s3 + $0x3b8] sm:$0xff]   ;;  %v6490_v27 = vld [vmem:[%s8777_s3 + $0x3f0] sm:$0xff]  }
 0x287   : > { %v1352_v29 = vpop.f32.mrf.mxu1 }
 0x288   : > { %v1353_v30 = vadd.f32 %v1352_v29, %v7067_v47  ;;  %v1358_v33 = vmax.f32 %v1351_v28, 0.0  ;;  %v6491_v28 = vld [vmem:[%s8777_s3 + $0x3b0] sm:$0xff]   ;;  %v6492_v29 = vld [vmem:[%s8777_s3 + $0x3e8] sm:$0xff]  }
 0x289   : > { %v1354_v32 = vpop.f32.mrf.mxu1 }
 0x28a   : > { %v1359_v34 = vmax.f32 %v1353_v30, 0.0  ;;  %v1355_v35 = vadd.f32 %v1354_v32, %v7069_v48  ;;  %v6493_v30 = vld [vmem:[%s8777_s3 + $0x3a8] sm:$0xff]   ;;  %v6495_v32 = vld [vmem:[%s8777_s3 + $0x3a0] sm:$0xff]  }
 0x28c   : > { %v1360_v36 = vmax.f32 %v1355_v35, 0.0  ;;  %v1361_v37 = vpack.c.bf16 %v1359_v34, %v1357_v31  ;;  %v6494_v31 = vld [vmem:[%s8777_s3 + $0x3e0] sm:$0xff]   ;;  %v6497_v34 = vld [vmem:[%s8777_s3 + $0x398] sm:$0xff]   ;;  %v6498_v35 = vld [vmem:[%s8777_s3 + $0x3d0] sm:$0xff]  }
 0x28e   : > { %v1362_v38 = vpack.c.bf16 %v1360_v36, %v1358_v33  ;;  %v6496_v33 = vld [vmem:[%s8777_s3 + $0x3d8] sm:$0xff]   ;;  %v6499_v36 = vld [vmem:[%s8777_s3 + $0x390] sm:$0xff]  }
 0x290   : > { %1524 = vmatprep.mubr.bf16.mxu1 %v1362_v38  ;;  %v6501_v38 = vld [vmem:[%s8777_s3 + $0x388] sm:$0xff]  }
 0x291   : > { %1525 = vmatmul.mubr.bf16.vlgmr.msra.gmra.mxu1 %v1361_v37  ;;  %v6500_v37 = vld [vmem:[%s8777_s3 + $0x3c8] sm:$0xff]  }
 0x292   : > { %1779 = vmatpush1.bf16.msra.mxu1 %v6937_v5  ;;  %1798 = vmatprep.mubr.bf16.mxu1 %v6845_v4 }
 0x293   : > { %1780 = vmatprep.subr.bf16.mxu1 %v7080_v63 }
 0x296   : > { %1781 = vmatpush1.bf16.msra.mxu1 %v7089_v2 }
 0x297   : > { %5829 = vmatprep.subr.bf16.mxu1 %v6472_v40  ;;  %v6502_v40 = vld [vmem:[%s8777_s3 + $0x3c0] sm:$0xff]  }
 0x299   : > { %5277 = vmatmul.mubr.msk.bf16.vlgmr.msra.gmra.mxu1 %vm404_vm1, %v1762_v41  ;;  %v6503_v41 = vld [vmem:[%s8777_s3 + $0x380] sm:$0xff]  }
 0x29a   : > { %5830 = vmatpush3.bf16.msra.mxu1 %v6473_v43 }
 0x29b   : > { %5831 = vmatprep.subr.bf16.mxu1 %v6474_v44 }
 0x29e   : > { %5832 = vmatpush3.bf16.msra.mxu1 %v6475_v45 }
 0x29f   : > { %5833 = vmatprep.subr.bf16.mxu1 %v6476_v46 }
 0x2a2   : > { %5834 = vmatpush3.bf16.msra.mxu1 %v6477_v49 }
 0x2a3   : > { %5835 = vmatprep.subr.bf16.mxu1 %v6478_v50 }
 0x2a6   : > { %5836 = vmatpush3.bf16.msra.mxu1 %v6479_v51 }
 0x2a7   : > { %5837 = vmatprep.subr.bf16.mxu1 %v6480_v52 }
 0x2aa   : > { %5838 = vmatpush3.bf16.msra.mxu1 %v6481_v53 }
 0x2ab   : > { %5839 = vmatprep.subr.bf16.mxu1 %v6482_v54 }
 0x2ae   : > { %5840 = vmatpush3.bf16.msra.mxu1 %v6483_v55 }
 0x2af   : > { %5841 = vmatprep.subr.bf16.mxu1 %v6484_v56 }
 0x2b2   : > { %5842 = vmatpush3.bf16.msra.mxu1 %v6485_v57 }
 0x2b3   : > { %5843 = vmatprep.subr.bf16.mxu1 %v6486_v58 }
 0x2b6   : > { %5844 = vmatpush3.bf16.msra.mxu1 %v6487_v59 }
 0x2b7   : > { %5379 = vmatprep.subr.msk.bf16.mxu1 %vm408_vm0, %v6926_v1 }
 0x2e7   : > { %v5779_v60 = vpop.f32.mrf.mxu0 }
 0x2e9   : > { %v5780_v61 = vpop.f32.mrf.mxu0 }
 0x2ea   : > { %v5781_v62 = vadd.f32 %v5780_v61, %v5779_v60 }
 0x2eb   : > { %v5782_v0 = vpop.f32.mrf.mxu0 }
 0x2ec   : > { %v7410_v42 = vadd.f32 %v5781_v62, %v7341_v21 }
 0x2ed   : > { %v5783_v3 = vpop.f32.mrf.mxu0 }
 0x2ee   : > { %v5784_v6 = vadd.f32 %v5783_v3, %v5782_v0 }
 0x2ef   : > { %v1574_v7 = vpop.f32.mrf.mxu0 }
 0x2f0   : > { %v7413_v8 = vadd.f32 %v5784_v6, %v7344_v25  ;;  %v1575_v13 = vadd.f32 %v1574_v7, %v7067_v47  ;;  %v2002_v25 = vsel %vm2001_vm2, %v7350_v39, %v2000_v23  ;;  %v6504_v6 = vld [vmem:[%s8777_s3 + $0x478] sm:$0xff]   ;;  %v2235_v7 = vpop.permute.xlu1 %2234  ;;  %v6519_v23 = vld [vmem:[%s8777_s3 + $0x400] sm:$0xff]  }
 0x2f1   : > { %v1576_v9 = vpop.f32.mrf.mxu0 }
 0x2f2   : > { %v1577_v11 = vadd.f32 %v1576_v9, %v7069_v48  ;;  %v1583_v20 = vmax.f32 %v1575_v13, 0.0  ;;  %v6506_v9 = vld [vmem:[%s8777_s3 + $0x470] sm:$0xff]   ;;  %v6510_v13 = vld [vmem:[%s8777_s3 + $0x460] sm:$0xff]  }
 0x2f3   : > { %v1578_v10 = vpop.f32.mrf.mxu0 }
 0x2f4   : > { %v1579_v12 = vadd.f32 %v1578_v10, %v7067_v47  ;;  %v1584_v18 = vmax.f32 %v1577_v11, 0.0  ;;  %v6507_v10 = vld [vmem:[%s8777_s3 + $0x430] sm:$0xff]   ;;  %v6508_v11 = vld [vmem:[%s8777_s3 + $0x468] sm:$0xff]  }
 0x2f5   : > { %v1580_v15 = vpop.f32.mrf.mxu0 }
 0x2f6   : > { %v1581_v16 = vadd.f32 %v1580_v15, %v7069_v48  ;;  %v1585_v17 = vmax.f32 %v1579_v12, 0.0  ;;  %v6509_v12 = vld [vmem:[%s8777_s3 + $0x428] sm:$0xff]   ;;  %v6511_v15 = vld [vmem:[%s8777_s3 + $0x420] sm:$0xff]  }
 0x2f8   : > { %v1586_v19 = vmax.f32 %v1581_v16, 0.0  ;;  %v1587_v22 = vpack.c.bf16 %v1585_v17, %v1583_v20  ;;  %v6512_v16 = vld [vmem:[%s8777_s3 + $0x458] sm:$0xff]   ;;  %v6516_v20 = vld [vmem:[%s8777_s3 + $0x448] sm:$0xff]  }
 0x2f9   : > { %v6513_v17 = vld [vmem:[%s8777_s3 + $0x418] sm:$0xff]  }
 0x2fa   : > { %v1588_v21 = vpack.c.bf16 %v1586_v19, %v1584_v18  ;;  %v6514_v18 = vld [vmem:[%s8777_s3 + $0x450] sm:$0xff]  }
 0x2fb   : > { %v6515_v19 = vld [vmem:[%s8777_s3 + $0x410] sm:$0xff]  }
 0x2fc   : > { %1750 = vmatprep.mubr.bf16.mxu0 %v1588_v21  ;;  %v6517_v21 = vld [vmem:[%s8777_s3 + $0x408] sm:$0xff]  }
 0x2fd   : > { %1751 = vmatmul.mubr.bf16.vlgmr.msra.gmra.mxu0 %v1587_v22  ;;  %v6518_v22 = vld [vmem:[%s8777_s3 + $0x440] sm:$0xff]  }
 0x2fe   : > { %2019 = vmatpush1.bf16.msra.mxu0 %v6937_v5  ;;  %2038 = vmatprep.mubr.bf16.mxu0 %v6845_v4 }
 0x2ff   : > { %2020 = vmatprep.subr.bf16.mxu0 %v7080_v63 }
 0x302   : > { %2021 = vmatpush1.bf16.msra.mxu0 %v7089_v2 }
 0x303   : > { %5851 = vmatprep.subr.bf16.mxu0 %v6488_v24 }
 0x305   : > { %5329 = vmatmul.mubr.msk.bf16.vlgmr.msra.gmra.mxu0 %vm404_vm1, %v2002_v25 }
 0x306   : > { %5852 = vmatpush3.bf16.msra.mxu0 %v6489_v26 }
 0x307   : > { %5853 = vmatprep.subr.bf16.mxu0 %v6490_v27 }
 0x30a   : > { %5854 = vmatpush3.bf16.msra.mxu0 %v6491_v28 }
 0x30b   : > { %5855 = vmatprep.subr.bf16.mxu0 %v6492_v29 }
 0x30e   : > { %5856 = vmatpush3.bf16.msra.mxu0 %v6493_v30 }
 0x30f   : > { %5857 = vmatprep.subr.bf16.mxu0 %v6494_v31 }
 0x312   : > { %5858 = vmatpush3.bf16.msra.mxu0 %v6495_v32 }
 0x313   : > { %5859 = vmatprep.subr.bf16.mxu0 %v6496_v33 }
 0x316   : > { %5860 = vmatpush3.bf16.msra.mxu0 %v6497_v34 }
 0x317   : > { %5861 = vmatprep.subr.bf16.mxu0 %v6498_v35 }
 0x31a   : > { %5862 = vmatpush3.bf16.msra.mxu0 %v6499_v36 }
 0x31b   : > { %5863 = vmatprep.subr.bf16.mxu0 %v6500_v37 }
 0x31e   : > { %5864 = vmatpush3.bf16.msra.mxu0 %v6501_v38 }
 0x31f   : > { %5865 = vmatprep.subr.bf16.mxu0 %v6502_v40 }
 0x322   : > { %5866 = vmatpush3.bf16.msra.mxu0 %v6503_v41 }
 0x323   : > { %5429 = vmatprep.subr.msk.bf16.mxu0 %vm408_vm0, %v6926_v1 }
 0x351   : > { %v5801_v39 = vpop.f32.mrf.mxu1 }
 0x353   : > { %v5802_v43 = vpop.f32.mrf.mxu1 }
 0x354   : > { %v5803_v44 = vadd.f32 %v5802_v43, %v5801_v39 }
 0x355   : > { %v5804_v45 = vpop.f32.mrf.mxu1 }
 0x356   : > { %v7479_v46 = vadd.f32 %v5803_v44, %v7410_v42 }
 0x357   : > { %v5805_v49 = vpop.f32.mrf.mxu1 }
 0x358   : > { %v5806_v50 = vadd.f32 %v5805_v49, %v5804_v45  ;;  %v6520_v49 = vld [vmem:[%s8777_s3 + $0x4f8] sm:$0xff]  }
 0x359   : > { %v1800_v51 = vpop.f32.mrf.mxu1 }
 0x35a   : > { %v7482_v52 = vadd.f32 %v5806_v50, %v7413_v8  ;;  %v1801_v53 = vadd.f32 %v1800_v51, %v7067_v47  ;;  %v6505_v8 = vld [vmem:[%s8777_s3 + $0x438] sm:$0xff]   ;;  %v2461_v50 = vpop.permute.xlu0 %2460 }
 0x35b   : > { %v1802_v54 = vpop.f32.mrf.mxu1  ;;  %v6521_v51 = vld [vmem:[%s8777_s3 + $0x4b8] sm:$0xff]  }
 0x35c   : > { %v1803_v55 = vadd.f32 %v1802_v54, %v7069_v48  ;;  %v1809_v58 = vmax.f32 %v1801_v53, 0.0  ;;  %v6525_v53 = vld [vmem:[%s8777_s3 + $0x4a8] sm:$0xff]   ;;  %v6526_v54 = vld [vmem:[%s8777_s3 + $0x4e0] sm:$0xff]  }
 0x35d   : > { %v1804_v56 = vpop.f32.mrf.mxu1 }
 0x35e   : > { %v1805_v57 = vadd.f32 %v1804_v56, %v7067_v47  ;;  %v1810_v60 = vmax.f32 %v1803_v55, 0.0  ;;  %v6527_v55 = vld [vmem:[%s8777_s3 + $0x4a0] sm:$0xff]   ;;  %v6528_v56 = vld [vmem:[%s8777_s3 + $0x4d8] sm:$0xff]  }
 0x35f   : > { %v1806_v59 = vpop.f32.mrf.mxu1 }
 0x360   : > { %v1811_v61 = vmax.f32 %v1805_v57, 0.0  ;;  %v1807_v62 = vadd.f32 %v1806_v59, %v7069_v48  ;;  %v6529_v57 = vld [vmem:[%s8777_s3 + $0x498] sm:$0xff]   ;;  %v6531_v59 = vld [vmem:[%s8777_s3 + $0x490] sm:$0xff]  }
 0x362   : > { %v1812_v0 = vmax.f32 %v1807_v62, 0.0  ;;  %v1813_v42 = vpack.c.bf16 %v1811_v61, %v1809_v58  ;;  %v6530_v58 = vld [vmem:[%s8777_s3 + $0x4d0] sm:$0xff]   ;;  %v6533_v61 = vld [vmem:[%s8777_s3 + $0x488] sm:$0xff]  }
 0x364   : > { %v1814_v3 = vpack.c.bf16 %v1812_v0, %v1810_v60  ;;  %v6532_v60 = vld [vmem:[%s8777_s3 + $0x4c8] sm:$0xff]   ;;  %v6534_v0 = vld [vmem:[%s8777_s3 + $0x4c0] sm:$0xff]  }
 0x366   : > { %1976 = vmatprep.mubr.bf16.mxu1 %v1814_v3 }
 0x367   : > { %1977 = vmatmul.mubr.bf16.vlgmr.msra.gmra.mxu1 %v1813_v42  ;;  %v6535_v42 = vld [vmem:[%s8777_s3 + $0x480] sm:$0xff]  }
 0x368   : > { %2252 = vmatpush1.bf16.msra.mxu1 %v6937_v5  ;;  %2271 = vmatprep.mubr.bf16.mxu1 %v6845_v4 }
 0x369   : > { %2253 = vmatprep.subr.bf16.mxu1 %v7080_v63 }
 0x36c   : > { %2254 = vmatpush1.bf16.msra.mxu1 %v7089_v2 }
 0x36d   : > { %5873 = vmatprep.subr.bf16.mxu1 %v6504_v6 }
 0x36f   : > { %5380 = vmatmul.mubr.msk.bf16.vlgmr.msra.gmra.mxu1 %vm404_vm1, %v2235_v7 }
 0x370   : > { %5874 = vmatpush3.bf16.msra.mxu1 %v6505_v8 }
 0x371   : > { %5875 = vmatprep.subr.bf16.mxu1 %v6506_v9 }
 0x374   : > { %5876 = vmatpush3.bf16.msra.mxu1 %v6507_v10 }
 0x375   : > { %5877 = vmatprep.subr.bf16.mxu1 %v6508_v11 }
 0x378   : > { %5878 = vmatpush3.bf16.msra.mxu1 %v6509_v12 }
 0x379   : > { %5879 = vmatprep.subr.bf16.mxu1 %v6510_v13 }
 0x37c   : > { %5880 = vmatpush3.bf16.msra.mxu1 %v6511_v15 }
 0x37d   : > { %5881 = vmatprep.subr.bf16.mxu1 %v6512_v16 }
 0x380   : > { %5882 = vmatpush3.bf16.msra.mxu1 %v6513_v17 }
 0x381   : > { %5883 = vmatprep.subr.bf16.mxu1 %v6514_v18 }
 0x384   : > { %5884 = vmatpush3.bf16.msra.mxu1 %v6515_v19 }
 0x385   : > { %5885 = vmatprep.subr.bf16.mxu1 %v6516_v20 }
 0x388   : > { %5886 = vmatpush3.bf16.msra.mxu1 %v6517_v21 }
 0x389   : > { %5887 = vmatprep.subr.bf16.mxu1 %v6518_v22 }
 0x38c   : > { %5888 = vmatpush3.bf16.msra.mxu1 %v6519_v23 }
 0x38d   : > { %5479 = vmatprep.subr.msk.bf16.mxu1 %vm408_vm0, %v6926_v1 }
 0x3bd   : > { %v5823_v24 = vpop.f32.mrf.mxu0 }
 0x3bf   : > { %v5824_v25 = vpop.f32.mrf.mxu0 }
 0x3c0   : > { %v5825_v26 = vadd.f32 %v5824_v25, %v5823_v24 }
 0x3c1   : > { %v5826_v27 = vpop.f32.mrf.mxu0 }
 0x3c2   : > { %v7546_v28 = vadd.f32 %v5825_v26, %v7479_v46  ;;  %v7627_v26 = vld [vmem:[%s8775_s1 + $0x4] ss:$8 sps:$4 sm:$0xff]  }
 0x3c3   : > { %v5827_v29 = vpop.f32.mrf.mxu0 }
 0x3c4   : > { %v5828_v30 = vadd.f32 %v5827_v29, %v5826_v27  ;;  %v6536_v27 = vld [vmem:[%s8777_s3 + $0x578] sm:$0xff]   ;;  %v2687_v29 = vpop.permute.xlu1 %2686 }
 0x3c5   : > { %v2040_v31 = vpop.f32.mrf.mxu0 }
 0x3c6   : > { %v7549_v32 = vadd.f32 %v5828_v30, %v7482_v52  ;;  %v2041_v37 = vadd.f32 %v2040_v31, %v7067_v47  ;;  %v6522_v52 = vld [vmem:[%s8777_s3 + $0x4f0] sm:$0xff]   ;;  %v6537_v30 = vld [vmem:[%s8777_s3 + $0x538] sm:$0xff]  }
 0x3c7   : > { %v2042_v33 = vpop.f32.mrf.mxu0  ;;  %v6538_v31 = vld [vmem:[%s8777_s3 + $0x570] sm:$0xff]  }
 0x3c8   : > { %v2043_v35 = vadd.f32 %v2042_v33, %v7069_v48  ;;  %v2049_v44 = vmax.f32 %v2041_v37, 0.0  ;;  %v6540_v33 = vld [vmem:[%s8777_s3 + $0x568] sm:$0xff]   ;;  %v6544_v37 = vld [vmem:[%s8777_s3 + $0x558] sm:$0xff]  }
 0x3c9   : > { %v2044_v34 = vpop.f32.mrf.mxu0 }
 0x3ca   : > { %v2045_v36 = vadd.f32 %v2044_v34, %v7067_v47  ;;  %v2050_v41 = vmax.f32 %v2043_v35, 0.0  ;;  %v6541_v34 = vld [vmem:[%s8777_s3 + $0x528] sm:$0xff]   ;;  %v6542_v35 = vld [vmem:[%s8777_s3 + $0x560] sm:$0xff]  }
 0x3cb   : > { %v2046_v38 = vpop.f32.mrf.mxu0 }
 0x3cc   : > { %v2047_v39 = vadd.f32 %v2046_v38, %v7069_v48  ;;  %v2051_v40 = vmax.f32 %v2045_v36, 0.0  ;;  %v6543_v36 = vld [vmem:[%s8777_s3 + $0x520] sm:$0xff]   ;;  %v6545_v38 = vld [vmem:[%s8777_s3 + $0x518] sm:$0xff]  }
 0x3ce   : > { %v2052_v43 = vmax.f32 %v2047_v39, 0.0  ;;  %v2053_v46 = vpack.c.bf16 %v2051_v40, %v2049_v44  ;;  %v6546_v39 = vld [vmem:[%s8777_s3 + $0x550] sm:$0xff]   ;;  %v6550_v44 = vld [vmem:[%s8777_s3 + $0x540] sm:$0xff]  }
 0x3cf   : > { %v6547_v40 = vld [vmem:[%s8777_s3 + $0x510] sm:$0xff]  }
 0x3d0   : > { %v2054_v45 = vpack.c.bf16 %v2052_v43, %v2050_v41  ;;  %v6548_v41 = vld [vmem:[%s8777_s3 + $0x548] sm:$0xff]  }
 0x3d1   : > { %v6549_v43 = vld [vmem:[%s8777_s3 + $0x508] sm:$0xff]  }
 0x3d2   : > { %2216 = vmatprep.mubr.bf16.mxu0 %v2054_v45  ;;  %v6551_v45 = vld [vmem:[%s8777_s3 + $0x500] sm:$0xff]  }
 0x3d3   : > { %2217 = vmatmul.mubr.bf16.vlgmr.msra.gmra.mxu0 %v2053_v46 }
 0x3d4   : > { %2478 = vmatpush1.bf16.msra.mxu0 %v6937_v5  ;;  %2497 = vmatprep.mubr.bf16.mxu0 %v6845_v4 }
 0x3d5   : > { %2479 = vmatprep.subr.bf16.mxu0 %v7080_v63  ;;  %v6523_v63 = vld [vmem:[%s8777_s3 + $0x4b0] sm:$0xff]  }
 0x3d8   : > { %2480 = vmatpush1.bf16.msra.mxu0 %v7089_v2  ;;  %v6524_v2 = vld [vmem:[%s8777_s3 + $0x4e8] sm:$0xff]  }
 0x3d9   : > { %5895 = vmatprep.subr.bf16.mxu0 %v6520_v49 }
 0x3db   : > { %5430 = vmatmul.mubr.msk.bf16.vlgmr.msra.gmra.mxu0 %vm404_vm1, %v2461_v50 }
 0x3dc   : > { %5896 = vmatpush3.bf16.msra.mxu0 %v6521_v51 }
 0x3dd   : > { %5897 = vmatprep.subr.bf16.mxu0 %v6522_v52  ;;  %v7688_v52 = vld [vmem:[%s6947_s18 + $0x10] ss:$8 sps:$4 sm:$0xff]  }
 0x3de   : > { %3450 = vrot.lane.b32.xlu0 %v7688_v52, %s6846_s19  ;;  %3683 = vrot.lane.b32.xlu1 %v7688_v52, %s6848_s23  ;;  %s8790_s19 = smov 76  }
 0x3e0   : > { %5898 = vmatpush3.bf16.msra.mxu0 %v6523_v63 }
 0x3e1   : > { %5899 = vmatprep.subr.bf16.mxu0 %v6524_v2 }
 0x3e2   : > { %3586 = vrot.lane.b32.xlu0 %v7688_v52, %s6847_s20  ;;  %3877 = vrot.lane.b32.xlu1 %v7688_v52, %s6850_s12  ;;  %s8791_s20 = smov 58  }
 0x3e4   : > { %5900 = vmatpush3.bf16.msra.mxu0 %v6525_v53 }
 0x3e5   : > { %5901 = vmatprep.subr.bf16.mxu0 %v6526_v54 }
 0x3e6   : > { %3780 = vrot.lane.b32.xlu0 %v7688_v52, %s6849_s10 }
 0x3e8   : > { %5902 = vmatpush3.bf16.msra.mxu0 %v6527_v55 }
 0x3e9   : > { %5903 = vmatprep.subr.bf16.mxu0 %v6528_v56 }
 0x3ea   : > { %3974 = vrot.lane.b32.xlu0 %v7688_v52, %s6852_s24 }
 0x3ec   : > { %5904 = vmatpush3.bf16.msra.mxu0 %v6529_v57 }
 0x3ed   : > { %5905 = vmatprep.subr.bf16.mxu0 %v6530_v58 }
 0x3f0   : > { %5906 = vmatpush3.bf16.msra.mxu0 %v6531_v59 }
 0x3f1   : > { %5907 = vmatprep.subr.bf16.mxu0 %v6532_v60 }
 0x3f4   : > { %5908 = vmatpush3.bf16.msra.mxu0 %v6533_v61 }
 0x3f5   : > { %5909 = vmatprep.subr.bf16.mxu0 %v6534_v0 }
 0x3f8   : > { %5910 = vmatpush3.bf16.msra.mxu0 %v6535_v42 }
 0x3f9   : > { %5529 = vmatprep.subr.msk.bf16.mxu0 %vm408_vm0, %v6926_v1 }
 0x427   : > { %v5845_v62 = vpop.f32.mrf.mxu1 }
 0x429   : > { %v5846_v3 = vpop.f32.mrf.mxu1 }
 0x42a   : > { %v5847_v6 = vadd.f32 %v5846_v3, %v5845_v62 }
 0x42b   : > { %v5848_v7 = vpop.f32.mrf.mxu1 }
 0x42c   : > { %v7613_v8 = vadd.f32 %v5847_v6, %v7546_v28  ;;  %v7636_v28 = vld [vmem:[%s8775_s1] ss:$8 sps:$4 sm:$0xff]  }
 0x42d   : > { %v5849_v9 = vpop.f32.mrf.mxu1 }
 0x42e   : > { %v5850_v10 = vadd.f32 %v5849_v9, %v5848_v7  ;;  %v6553_v9 = vld [vmem:[%s8777_s3 + $0x5f8] sm:$0xff]  }
 0x42f   : > { %v2273_v11 = vpop.f32.mrf.mxu1 }
 0x430   : > { %v7616_v14 = vadd.f32 %v5850_v10, %v7549_v32  ;;  %v2274_v12 = vadd.f32 %v2273_v11, %v7067_v47  ;;  %v6539_v32 = vld [vmem:[%s8777_s3 + $0x530] sm:$0xff]   ;;  %v2913_v10 = vpop.permute.xlu0 %2912  ;;  %v6554_v11 = vld [vmem:[%s8777_s3 + $0x5b8] sm:$0xff]  }
 0x431   : > { %v2275_v13 = vpop.f32.mrf.mxu1 }
 0x432   : > { %v2276_v15 = vadd.f32 %v2275_v13, %v7069_v48  ;;  %v2282_v18 = vmax.f32 %v2274_v12, 0.0  ;;  %v6556_v12 = vld [vmem:[%s8777_s3 + $0x5b0] sm:$0xff]   ;;  %v6557_v13 = vld [vmem:[%s8777_s3 + $0x5e8] sm:$0xff]  }
 0x433   : > { %v2277_v16 = vpop.f32.mrf.mxu1 }
 0x434   : > { %v2278_v17 = vadd.f32 %v2277_v16, %v7067_v47  ;;  %v2283_v20 = vmax.f32 %v2276_v15, 0.0  ;;  %v6558_v15 = vld [vmem:[%s8777_s3 + $0x5a8] sm:$0xff]   ;;  %v6559_v16 = vld [vmem:[%s8777_s3 + $0x5e0] sm:$0xff]  }
 0x435   : > { %v2279_v19 = vpop.f32.mrf.mxu1 }
 0x436   : > { %v2284_v21 = vmax.f32 %v2278_v17, 0.0  ;;  %v2280_v22 = vadd.f32 %v2279_v19, %v7069_v48  ;;  %v6560_v17 = vld [vmem:[%s8777_s3 + $0x5a0] sm:$0xff]   ;;  %v6562_v19 = vld [vmem:[%s8777_s3 + $0x598] sm:$0xff]  }
 0x438   : > { %v2285_v23 = vmax.f32 %v2280_v22, 0.0  ;;  %v2286_v24 = vpack.c.bf16 %v2284_v21, %v2282_v18  ;;  %v6561_v18 = vld [vmem:[%s8777_s3 + $0x5d8] sm:$0xff]   ;;  %v6564_v21 = vld [vmem:[%s8777_s3 + $0x590] sm:$0xff]   ;;  %v6565_v22 = vld [vmem:[%s8777_s3 + $0x5c8] sm:$0xff]  }
 0x43a   : > { %v2287_v25 = vpack.c.bf16 %v2285_v23, %v2283_v20  ;;  %v6563_v20 = vld [vmem:[%s8777_s3 + $0x5d0] sm:$0xff]   ;;  %v6566_v23 = vld [vmem:[%s8777_s3 + $0x588] sm:$0xff]  }
 0x43c   : > { %2449 = vmatprep.mubr.bf16.mxu1 %v2287_v25  ;;  %v6567_v25 = vld [vmem:[%s8777_s3 + $0x5c0] sm:$0xff]  }
 0x43d   : > { %2450 = vmatmul.mubr.bf16.vlgmr.msra.gmra.mxu1 %v2286_v24 }
 0x43e   : > { %2704 = vmatpush1.bf16.msra.mxu1 %v6937_v5  ;;  %2723 = vmatprep.mubr.bf16.mxu1 %v6845_v4 }
 0x43f   : > { %2705 = vmatprep.subr.bf16.mxu1 %v7627_v26 }
 0x442   : > { %2706 = vmatpush1.bf16.msra.mxu1 %v7636_v28 }
 0x443   : > { %5917 = vmatprep.subr.bf16.mxu1 %v6536_v27  ;;  %v6568_v27 = vld [vmem:[%s8777_s3 + $0x580] sm:$0xff]  }
 0x445   : > { %5480 = vmatmul.mubr.msk.bf16.vlgmr.msra.gmra.mxu1 %vm404_vm1, %v2687_v29 }
 0x446   : > { %5918 = vmatpush3.bf16.msra.mxu1 %v6537_v30 }
 0x447   : > { %5919 = vmatprep.subr.bf16.mxu1 %v6538_v31 }
 0x44a   : > { %5920 = vmatpush3.bf16.msra.mxu1 %v6539_v32 }
 0x44b   : > { %5921 = vmatprep.subr.bf16.mxu1 %v6540_v33 }
 0x44e   : > { %5922 = vmatpush3.bf16.msra.mxu1 %v6541_v34 }
 0x44f   : > { %5923 = vmatprep.subr.bf16.mxu1 %v6542_v35 }
 0x452   : > { %5924 = vmatpush3.bf16.msra.mxu1 %v6543_v36 }
 0x453   : > { %5925 = vmatprep.subr.bf16.mxu1 %v6544_v37 }
 0x456   : > { %5926 = vmatpush3.bf16.msra.mxu1 %v6545_v38 }
 0x457   : > { %5927 = vmatprep.subr.bf16.mxu1 %v6546_v39 }
 0x45a   : > { %5928 = vmatpush3.bf16.msra.mxu1 %v6547_v40 }
 0x45b   : > { %5929 = vmatprep.subr.bf16.mxu1 %v6548_v41 }
 0x45e   : > { %5930 = vmatpush3.bf16.msra.mxu1 %v6549_v43 }
 0x45f   : > { %5931 = vmatprep.subr.bf16.mxu1 %v6550_v44 }
 0x462   : > { %5932 = vmatpush3.bf16.msra.mxu1 %v6551_v45 }
 0x463   : > { %5579 = vmatprep.subr.msk.bf16.mxu1 %vm408_vm0, %v6926_v1 }
 0x493   : > { %v5867_v46 = vpop.f32.mrf.mxu0 }
 0x495   : > { %v5868_v49 = vpop.f32.mrf.mxu0 }
 0x496   : > { %v5869_v50 = vadd.f32 %v5868_v49, %v5867_v46 }
 0x497   : > { %v5870_v51 = vpop.f32.mrf.mxu0 }
 0x498   : > { %v7691_v63 = vadd.f32 %v5869_v50, %v7613_v8 }
 0x499   : > { %v5871_v2 = vpop.f32.mrf.mxu0 }
 0x49a   : > { %v5872_v53 = vadd.f32 %v5871_v2, %v5870_v51  ;;  %v6569_v2 = vld [vmem:[%s8777_s3 + $0x678] sm:$0xff]  }
 0x49b   : > { %v2499_v54 = vpop.f32.mrf.mxu0 }
 0x49c   : > { %v7698_v55 = vadd.f32 %v5872_v53, %v7616_v14  ;;  %v2500_v60 = vadd.f32 %v2499_v54, %v7067_v47  ;;  %v6555_v14 = vld [vmem:[%s8777_s3 + $0x5f0] sm:$0xff]   ;;  %v3139_v53 = vpop.permute.xlu1 %3138  ;;  %v6570_v54 = vld [vmem:[%s8777_s3 + $0x638] sm:$0xff]  }
 0x49d   : > { %v2501_v56 = vpop.f32.mrf.mxu0 }
 0x49e   : > { %v2502_v58 = vadd.f32 %v2501_v56, %v7069_v48  ;;  %v2508_v6 = vmax.f32 %v2500_v60, 0.0  ;;  %v6572_v56 = vld [vmem:[%s8777_s3 + $0x630] sm:$0xff]   ;;  %v6576_v60 = vld [vmem:[%s8777_s3 + $0x620] sm:$0xff]  }
 0x49f   : > { %v2503_v57 = vpop.f32.mrf.mxu0 }
 0x4a0   : > { %v2504_v59 = vadd.f32 %v2503_v57, %v7067_v47  ;;  %v2509_v42 = vmax.f32 %v2502_v58, 0.0  ;;  %v6573_v57 = vld [vmem:[%s8777_s3 + $0x668] sm:$0xff]  }
 0x4a1   : > { %v2505_v61 = vpop.f32.mrf.mxu0  ;;  %v6574_v58 = vld [vmem:[%s8777_s3 + $0x628] sm:$0xff]  }
 0x4a2   : > { %v2506_v62 = vadd.f32 %v2505_v61, %v7069_v48  ;;  %v2510_v0 = vmax.f32 %v2504_v59, 0.0  ;;  %v6575_v59 = vld [vmem:[%s8777_s3 + $0x660] sm:$0xff]   ;;  %v6577_v61 = vld [vmem:[%s8777_s3 + $0x658] sm:$0xff]  }
 0x4a4   : > { %v2511_v3 = vmax.f32 %v2506_v62, 0.0  ;;  %v2512_v8 = vpack.c.bf16 %v2510_v0, %v2508_v6  ;;  %v6578_v62 = vld [vmem:[%s8777_s3 + $0x618] sm:$0xff]   ;;  %v6579_v0 = vld [vmem:[%s8777_s3 + $0x650] sm:$0xff]   ;;  %v6582_v6 = vld [vmem:[%s8777_s3 + $0x608] sm:$0xff]  }
 0x4a6   : > { %v2513_v7 = vpack.c.bf16 %v2511_v3, %v2509_v42  ;;  %v6580_v42 = vld [vmem:[%s8777_s3 + $0x610] sm:$0xff]   ;;  %v6581_v3 = vld [vmem:[%s8777_s3 + $0x648] sm:$0xff]  }
 0x4a8   : > { %2675 = vmatprep.mubr.bf16.mxu0 %v2513_v7  ;;  %v6583_v7 = vld [vmem:[%s8777_s3 + $0x640] sm:$0xff]  }
 0x4a9   : > { %2676 = vmatmul.mubr.bf16.vlgmr.msra.gmra.mxu0 %v2512_v8  ;;  %v6584_v8 = vld [vmem:[%s8777_s3 + $0x600] sm:$0xff]  }
 0x4aa   : > { %2930 = vmatpush1.bf16.msra.mxu0 %v6937_v5  ;;  %2949 = vmatprep.mubr.bf16.mxu0 %v6845_v4 }
 0x4ab   : > { %2931 = vmatprep.subr.bf16.mxu0 %v7627_v26 }
 0x4ae   : > { %2932 = vmatpush1.bf16.msra.mxu0 %v7636_v28 }
 0x4af   : > { %5939 = vmatprep.subr.bf16.mxu0 %v6553_v9  ;;  %v6610_v9 = vld [vmem:[%s8777_s3 + $0x78] sm:$0xff]  }
 0x4b1   : > { %5530 = vmatmul.mubr.msk.bf16.vlgmr.msra.gmra.mxu0 %vm404_vm1, %v2913_v10 }
 0x4b2   : > { %5940 = vmatpush3.bf16.msra.mxu0 %v6554_v11 }
 0x4b3   : > { %5941 = vmatprep.subr.bf16.mxu0 %v6555_v14 }
 0x4b6   : > { %5942 = vmatpush3.bf16.msra.mxu0 %v6556_v12 }
 0x4b7   : > { %5943 = vmatprep.subr.bf16.mxu0 %v6557_v13 }
 0x4ba   : > { %5944 = vmatpush3.bf16.msra.mxu0 %v6558_v15 }
 0x4bb   : > { %5945 = vmatprep.subr.bf16.mxu0 %v6559_v16 }
 0x4be   : > { %5946 = vmatpush3.bf16.msra.mxu0 %v6560_v17 }
 0x4bf   : > { %5947 = vmatprep.subr.bf16.mxu0 %v6561_v18 }
 0x4c2   : > { %5948 = vmatpush3.bf16.msra.mxu0 %v6562_v19 }
 0x4c3   : > { %5949 = vmatprep.subr.bf16.mxu0 %v6563_v20 }
 0x4c6   : > { %5950 = vmatpush3.bf16.msra.mxu0 %v6564_v21 }
 0x4c7   : > { %5951 = vmatprep.subr.bf16.mxu0 %v6565_v22 }
 0x4ca   : > { %5952 = vmatpush3.bf16.msra.mxu0 %v6566_v23 }
 0x4cb   : > { %5953 = vmatprep.subr.bf16.mxu0 %v6567_v25 }
 0x4ce   : > { %5954 = vmatpush3.bf16.msra.mxu0 %v6568_v27 }
 0x4cf   : > { %5631 = vmatprep.subr.msk.bf16.mxu0 %vm408_vm0, %v6926_v1 }
 0x4fd   : > { %v5889_v24 = vpop.f32.mrf.mxu1 }
 0x4ff   : > { %v5890_v29 = vpop.f32.mrf.mxu1 }
 0x500   : > { %v5891_v30 = vadd.f32 %v5890_v29, %v5889_v24 }
 0x501   : > { %v5892_v31 = vpop.f32.mrf.mxu1 }
 0x502   : > { %v7768_v32 = vadd.f32 %v5891_v30, %v7691_v63 }
 0x503   : > { %v5893_v33 = vpop.f32.mrf.mxu1 }
 0x504   : > { %v5894_v34 = vadd.f32 %v5893_v33, %v5892_v31 }
 0x505   : > { %v2725_v35 = vpop.f32.mrf.mxu1 }
 0x506   : > { %v7771_v36 = vadd.f32 %v5894_v34, %v7698_v55  ;;  %v2726_v37 = vadd.f32 %v2725_v35, %v7067_v47  ;;  %v6571_v55 = vld [vmem:[%s8777_s3 + $0x670] sm:$0xff]   ;;  %v3451_v34 = vpop.permute.xlu0 %3450  ;;  %v6611_v35 = vld [vmem:[%s8777_s3 + $0xf8] sm:$0xff]  }
 0x507   : > { %v2727_v38 = vpop.f32.mrf.mxu1 }
 0x508   : > { %v2728_v39 = vadd.f32 %v2727_v38, %v7069_v48  ;;  %v2734_v43 = vmax.f32 %v2726_v37, 0.0  ;;  %v6614_v37 = vld [vmem:[%s8777_s3 + $0xb0] sm:$0xff]   ;;  %v6615_v38 = vld [vmem:[%s8777_s3 + $0xe8] sm:$0xff]  }
 0x509   : > { %v2729_v40 = vpop.f32.mrf.mxu1 }
 0x50a   : > { %v2730_v41 = vadd.f32 %v2729_v40, %v7067_v47  ;;  %v2735_v45 = vmax.f32 %v2728_v39, 0.0  ;;  %v6616_v39 = vld [vmem:[%s8777_s3 + $0xa8] sm:$0xff]   ;;  %v6617_v40 = vld [vmem:[%s8777_s3 + $0xe0] sm:$0xff]  }
 0x50b   : > { %v2731_v44 = vpop.f32.mrf.mxu1 }
 0x50c   : > { %v2736_v46 = vmax.f32 %v2730_v41, 0.0  ;;  %v2732_v49 = vadd.f32 %v2731_v44, %v7069_v48  ;;  %v6618_v41 = vld [vmem:[%s8777_s3 + $0xa0] sm:$0xff]   ;;  %v6620_v44 = vld [vmem:[%s8777_s3 + $0x98] sm:$0xff]  }
 0x50e   : > { %v2737_v50 = vmax.f32 %v2732_v49, 0.0  ;;  %v2738_v51 = vpack.c.bf16 %v2736_v46, %v2734_v43  ;;  %v6619_v43 = vld [vmem:[%s8777_s3 + $0xd8] sm:$0xff]   ;;  %v6622_v46 = vld [vmem:[%s8777_s3 + $0x90] sm:$0xff]   ;;  %v6623_v49 = vld [vmem:[%s8777_s3 + $0xc8] sm:$0xff]  }
 0x510   : > { %v2739_v63 = vpack.c.bf16 %v2737_v50, %v2735_v45  ;;  %v6621_v45 = vld [vmem:[%s8777_s3 + $0xd0] sm:$0xff]   ;;  %v6624_v50 = vld [vmem:[%s8777_s3 + $0x88] sm:$0xff]  }
 0x512   : > { %2901 = vmatprep.mubr.bf16.mxu1 %v2739_v63  ;;  %v6626_v63 = vld [vmem:[%s8777_s3 + $0x80] sm:$0xff]  }
 0x513   : > { %2902 = vmatmul.mubr.bf16.vlgmr.msra.gmra.mxu1 %v2738_v51  ;;  %v6625_v51 = vld [vmem:[%s8777_s3 + $0xc0] sm:$0xff]  }
 0x514   : > { %3156 = vmatpush1.bf16.msra.mxu1 %v6937_v5  ;;  %3175 = vmatprep.mubr.bf16.mxu1 %v6845_v4 }
 0x515   : > { %3157 = vmatprep.subr.bf16.mxu1 %v7627_v26 }
 0x518   : > { %3158 = vmatpush1.bf16.msra.mxu1 %v7636_v28 }
 0x519   : > { %5961 = vmatprep.subr.bf16.mxu1 %v6569_v2 }
 0x51b   : > { %5580 = vmatmul.mubr.msk.bf16.vlgmr.msra.gmra.mxu1 %vm404_vm1, %v3139_v53 }
 0x51c   : > { %5962 = vmatpush3.bf16.msra.mxu1 %v6570_v54 }
 0x51d   : > { %5963 = vmatprep.subr.bf16.mxu1 %v6571_v55 }
 0x520   : > { %5964 = vmatpush3.bf16.msra.mxu1 %v6572_v56 }
 0x521   : > { %5965 = vmatprep.subr.bf16.mxu1 %v6573_v57 }
 0x524   : > { %5966 = vmatpush3.bf16.msra.mxu1 %v6574_v58 }
 0x525   : > { %5967 = vmatprep.subr.bf16.mxu1 %v6575_v59 }
 0x528   : > { %5968 = vmatpush3.bf16.msra.mxu1 %v6576_v60 }
 0x529   : > { %5969 = vmatprep.subr.bf16.mxu1 %v6577_v61 }
 0x52c   : > { %5970 = vmatpush3.bf16.msra.mxu1 %v6578_v62 }
 0x52d   : > { %5971 = vmatprep.subr.bf16.mxu1 %v6579_v0 }
 0x530   : > { %5972 = vmatpush3.bf16.msra.mxu1 %v6580_v42 }
 0x531   : > { %5973 = vmatprep.subr.bf16.mxu1 %v6581_v3 }
 0x534   : > { %5974 = vmatpush3.bf16.msra.mxu1 %v6582_v6 }
 0x535   : > { %5975 = vmatprep.subr.bf16.mxu1 %v6583_v7 }
 0x538   : > { %5976 = vmatpush3.bf16.msra.mxu1 %v6584_v8 }
 0x539   : > { %6005 = vmatprep.subr.bf16.mxu1 %v6610_v9 }
 0x569   : > { %v5911_v10 = vpop.f32.mrf.mxu0 }
 0x56b   : > { %v5912_v11 = vpop.f32.mrf.mxu0 }
 0x56c   : > { %v5913_v14 = vadd.f32 %v5912_v11, %v5911_v10 }
 0x56d   : > { %v5914_v12 = vpop.f32.mrf.mxu0 }
 0x56e   : > { %v7834_v13 = vadd.f32 %v5913_v14, %v7768_v32 }
 0x56f   : > { %v5915_v15 = vpop.f32.mrf.mxu0 }
 0x570   : > { %v5916_v16 = vadd.f32 %v5915_v15, %v5914_v12  ;;  %v6628_v15 = vld [vmem:[%s8777_s3 + $0x70] sm:$0xff]  }
 0x571   : > { %v2951_v17 = vpop.f32.mrf.mxu0 }
 0x572   : > { %v7837_v18 = vadd.f32 %v5916_v16, %v7771_v36  ;;  %v2952_v23 = vadd.f32 %v2951_v17, %v7067_v47  ;;  %v6613_v36 = vld [vmem:[%s8777_s3 + $0xf0] sm:$0xff]   ;;  %v6630_v17 = vld [vmem:[%s8777_s3 + $0x68] sm:$0xff]  }
 0x573   : > { %v2953_v19 = vpop.f32.mrf.mxu0  ;;  %v6629_v16 = vld [vmem:[%s8777_s3 + $0x30] sm:$0xff]  }
 0x574   : > { %v2954_v21 = vadd.f32 %v2953_v19, %v7069_v48  ;;  %v2960_v31 = vmax.f32 %v2952_v23, 0.0  ;;  %v6632_v19 = vld [vmem:[%s8777_s3 + $0x60] sm:$0xff]   ;;  %v6636_v23 = vld [vmem:[%s8777_s3 + $0x50] sm:$0xff]  }
 0x575   : > { %v2955_v20 = vpop.f32.mrf.mxu0 }
 0x576   : > { %v2956_v22 = vadd.f32 %v2955_v20, %v7067_v47  ;;  %v2961_v29 = vmax.f32 %v2954_v21, 0.0  ;;  %v6633_v20 = vld [vmem:[%s8777_s3 + $0x20] sm:$0xff]   ;;  %v6634_v21 = vld [vmem:[%s8777_s3 + $0x58] sm:$0xff]  }
 0x577   : > { %v2957_v24 = vpop.f32.mrf.mxu0 }
 0x578   : > { %v2958_v25 = vadd.f32 %v2957_v24, %v7069_v48  ;;  %v2962_v27 = vmax.f32 %v2956_v22, 0.0  ;;  %v6635_v22 = vld [vmem:[%s8777_s3 + $0x18] sm:$0xff]   ;;  %v6637_v24 = vld [vmem:[%s8777_s3 + $0x10] sm:$0xff]  }
 0x57a   : > { %v2963_v30 = vmax.f32 %v2958_v25, 0.0  ;;  %v2964_v33 = vpack.c.bf16 %v2962_v27, %v2960_v31  ;;  %v6638_v25 = vld [vmem:[%s8777_s3 + $0x48] sm:$0xff]  }
 0x57b   : > { %v6639_v27 = vld [vmem:[%s8777_s3 + $0x8] sm:$0xff]  }
 0x57c   : > { %v2965_v32 = vpack.c.bf16 %v2963_v30, %v2961_v29  ;;  %v6640_v29 = vld [vmem:[%s8777_s3 + $0x40] sm:$0xff]  }
 0x57d   : > { %v6641_v30 = vld [vmem:[%s8777_s3] sm:$0xff]  }
 0x57e   : > { %3127 = vmatprep.mubr.bf16.mxu0 %v2965_v32 }
 0x57f   : > { %3128 = vmatmul.mubr.bf16.vlgmr.msra.gmra.mxu0 %v2964_v33 }
 0x580   : > { %3414 = vmatpush1.bf16.msra.mxu0 %v6937_v5  ;;  %3433 = vmatprep.mubr.bf16.mxu0 %v6845_v4 }
 0x581   : > { %3415 = vmatprep.subr.bf16.mxu0 %v7627_v26 }
 0x584   : > { %3416 = vmatpush1.bf16.msra.mxu0 %v7636_v28 }
 0x585   : > { %5633 = vmatprep.subr.msk.bf16.mxu0 %vm408_vm0, %v6926_v1 }
 0x587   : > { %5632 = vmatmul.mubr.msk.bf16.vlgmr.msra.gmra.mxu0 %vm404_vm1, %v7688_v52  ;;  %v6612_v52 = vld [vmem:[%s8777_s3 + $0xb8] sm:$0xff]  }
 0x588   : > { %3468 = vmatpush1.bf16.msra.mxu0 %v6937_v5  ;;  %3487 = vmatprep.mubr.bf16.mxu0 %v6845_v4 }
 0x589   : > { %3469 = vmatprep.subr.bf16.mxu0 %v7627_v26 }
 0x58c   : > { %3470 = vmatpush1.bf16.msra.mxu0 %v7636_v28 }
 0x58d   : > { %5983 = vmatprep.subr.bf16.mxu0 %v6611_v35 }
 0x58f   : > { %5634 = vmatmul.mubr.msk.bf16.vlgmr.msra.gmra.mxu0 %vm404_vm1, %v3451_v34 }
 0x590   : > { %5984 = vmatpush3.bf16.msra.mxu0 %v6612_v52 }
 0x591   : > { %5985 = vmatprep.subr.bf16.mxu0 %v6613_v36 }
 0x594   : > { %5986 = vmatpush3.bf16.msra.mxu0 %v6614_v37 }
 0x595   : > { %5987 = vmatprep.subr.bf16.mxu0 %v6615_v38 }
 0x598   : > { %5988 = vmatpush3.bf16.msra.mxu0 %v6616_v39 }
 0x599   : > { %5989 = vmatprep.subr.bf16.mxu0 %v6617_v40 }
 0x59c   : > { %5990 = vmatpush3.bf16.msra.mxu0 %v6618_v41 }
 0x59d   : > { %5991 = vmatprep.subr.bf16.mxu0 %v6619_v43 }
 0x5a0   : > { %5992 = vmatpush3.bf16.msra.mxu0 %v6620_v44 }
 0x5a1   : > { %5993 = vmatprep.subr.bf16.mxu0 %v6621_v45 }
 0x5a4   : > { %5994 = vmatpush3.bf16.msra.mxu0 %v6622_v46 }
 0x5a5   : > { %5995 = vmatprep.subr.bf16.mxu0 %v6623_v49 }
 0x5a8   : > { %5996 = vmatpush3.bf16.msra.mxu0 %v6624_v50 }
 0x5a9   : > { %5997 = vmatprep.subr.bf16.mxu0 %v6625_v51 }
 0x5ac   : > { %5998 = vmatpush3.bf16.msra.mxu0 %v6626_v63 }
 0x5ad   : > { %5635 = vmatprep.subr.msk.bf16.mxu0 %vm408_vm0, %v6926_v1 }
 0x5d3   : > { %v5933_v2 = vpop.f32.mrf.mxu1 }
 0x5d5   : > { %v5934_v53 = vpop.f32.mrf.mxu1 }
 0x5d6   : > { %v5935_v54 = vadd.f32 %v5934_v53, %v5933_v2 }
 0x5d7   : > { %v5936_v55 = vpop.f32.mrf.mxu1 }
 0x5d8   : > { %v2910_v56 = vadd.f32 %v5935_v54, %v7834_v13  ;;  %v6627_v13 = vld [vmem:[%s8777_s3 + $0x38] sm:$0xff]  }
 0x5d9   : > { %v5937_v57 = vpop.f32.mrf.mxu1 }
 0x5da   : > { %v5938_v58 = vadd.f32 %v5937_v57, %v5936_v55 }
 0x5db   : > { %v3177_v59 = vpop.f32.mrf.mxu1 }
 0x5dc   : > { %v2911_v60 = vadd.f32 %v5938_v58, %v7837_v18  ;;  %v3178_v61 = vadd.f32 %v3177_v59, %v7067_v47  ;;  %v6631_v18 = vld [vmem:[%s8777_s3 + $0x28] sm:$0xff]  }
 0x5dd   : > { %v3179_v62 = vpop.f32.mrf.mxu1 }
 0x5de   : > { %v3180_v0 = vadd.f32 %v3179_v62, %v7069_v48  ;;  %v3186_v6 = vmax.f32 %v3178_v61, 0.0 }
 0x5df   : > { %v3181_v42 = vpop.f32.mrf.mxu1 }
 0x5e0   : > { %v3182_v3 = vadd.f32 %v3181_v42, %v7067_v47  ;;  %v3187_v8 = vmax.f32 %v3180_v0, 0.0 }
 0x5e1   : > { %v3183_v7 = vpop.f32.mrf.mxu1 }
 0x5e2   : > { %v3188_v9 = vmax.f32 %v3182_v3, 0.0  ;;  %v3184_v10 = vadd.f32 %v3183_v7, %v7069_v48  ;;  %v3684_v7 = vpop.permute.xlu1 %3683 }
 0x5e4   : > { %v3189_v11 = vmax.f32 %v3184_v10, 0.0  ;;  %v3190_v14 = vpack.c.bf16 %v3188_v9, %v3186_v6  ;;  %v6642_v9 = vld [vmem:[%s8777_s3 + $0x1f8] sm:$0xff]  }
 0x5e5   : > { %v6643_v10 = vld [vmem:[%s8777_s3 + $0x1b8] sm:$0xff]  }
 0x5e6   : > { %v3191_v12 = vpack.c.bf16 %v3189_v11, %v3187_v8  ;;  %v6644_v11 = vld [vmem:[%s8777_s3 + $0x1f0] sm:$0xff]  }
 0x5e8   : > { %3353 = vmatprep.mubr.bf16.mxu1 %v3191_v12  ;;  %v6645_v12 = vld [vmem:[%s8777_s3 + $0x178] sm:$0xff]  }
 0x5e9   : > { %3354 = vmatmul.mubr.bf16.vlgmr.msra.gmra.mxu1 %v3190_v14  ;;  %v3587_v14 = vpop.permute.xlu0 %3586 }
 0x5ea   : > { %6006 = vmatpush3.bf16.msra.mxu1 %v6627_v13  ;;  %v6646_v13 = vld [vmem:[%s8777_s3 + $0x1b0] sm:$0xff]  }
 0x5eb   : > { %6007 = vmatprep.subr.bf16.mxu1 %v6628_v15  ;;  %v6647_v15 = vld [vmem:[%s8777_s3 + $0x1e8] sm:$0xff]  }
 0x5ee   : > { %6008 = vmatpush3.bf16.msra.mxu1 %v6629_v16  ;;  %v6648_v16 = vld [vmem:[%s8777_s3 + $0x138] sm:$0xff]  }
 0x5ef   : > { %6009 = vmatprep.subr.bf16.mxu1 %v6630_v17  ;;  %v6649_v17 = vld [vmem:[%s8777_s3 + $0x170] sm:$0xff]  }
 0x5f2   : > { %6010 = vmatpush3.bf16.msra.mxu1 %v6631_v18  ;;  %v6650_v18 = vld [vmem:[%s8777_s3 + $0x1a8] sm:$0xff]  }
 0x5f3   : > { %6011 = vmatprep.subr.bf16.mxu1 %v6632_v19  ;;  %v6651_v19 = vld [vmem:[%s8777_s3 + $0x1e0] sm:$0xff]  }
 0x5f6   : > { %6012 = vmatpush3.bf16.msra.mxu1 %v6633_v20  ;;  %v6652_v20 = vld [vmem:[%s8777_s3 + $0x130] sm:$0xff]  }
 0x5f7   : > { %6013 = vmatprep.subr.bf16.mxu1 %v6634_v21  ;;  %v6653_v21 = vld [vmem:[%s8777_s3 + $0x168] sm:$0xff]  }
 0x5fa   : > { %6014 = vmatpush3.bf16.msra.mxu1 %v6635_v22  ;;  %v6654_v22 = vld [vmem:[%s8777_s3 + $0x1a0] sm:$0xff]  }
 0x5fb   : > { %6015 = vmatprep.subr.bf16.mxu1 %v6636_v23  ;;  %v6655_v23 = vld [vmem:[%s8777_s3 + $0x1d8] sm:$0xff]  }
 0x5fe   : > { %6016 = vmatpush3.bf16.msra.mxu1 %v6637_v24  ;;  %v6656_v24 = vld [vmem:[%s8777_s3 + $0x128] sm:$0xff]  }
 0x5ff   : > { %6017 = vmatprep.subr.bf16.mxu1 %v6638_v25  ;;  %v6657_v25 = vld [vmem:[%s8777_s3 + $0x160] sm:$0xff]  }
 0x602   : > { %6018 = vmatpush3.bf16.msra.mxu1 %v6639_v27  ;;  %v6658_v27 = vld [vmem:[%s8777_s3 + $0x198] sm:$0xff]  }
 0x603   : > { %6019 = vmatprep.subr.bf16.mxu1 %v6640_v29  ;;  %v6659_v29 = vld [vmem:[%s8777_s3 + $0x1d0] sm:$0xff]  }
 0x606   : > { %6020 = vmatpush3.bf16.msra.mxu1 %v6641_v30  ;;  %v6660_v30 = vld [vmem:[%s8777_s3 + $0x120] sm:$0xff]  }
 0x607   : > { %5637 = vmatprep.subr.msk.bf16.mxu1 %vm408_vm0, %v6926_v1 }
 0x63f   : > { %v5955_v31 = vpop.f32.mrf.mxu0 }
 0x641   : > { %v5956_v32 = vpop.f32.mrf.mxu0 }
 0x642   : > { %v5957_v33 = vadd.f32 %v5956_v32, %v5955_v31  ;;  %v6661_v31 = vld [vmem:[%s8777_s3 + $0x158] sm:$0xff]   ;;  %v6662_v32 = vld [vmem:[%s8777_s3 + $0x190] sm:$0xff]  }
 0x643   : > { %v5958_v34 = vpop.f32.mrf.mxu0 }
 0x644   : > { %v7959_v35 = vadd.f32 %v5957_v33, %v2910_v56  ;;  %v6663_v33 = vld [vmem:[%s8777_s3 + $0x1c8] sm:$0xff]  }
 0x645   : > { %v5959_v52 = vpop.f32.mrf.mxu0 }
 0x646   : > { %v5960_v36 = vadd.f32 %v5959_v52, %v5958_v34  ;;  %v6664_v34 = vld [vmem:[%s8777_s3 + $0x118] sm:$0xff]   ;;  %v6665_v52 = vld [vmem:[%s8777_s3 + $0x150] sm:$0xff]  }
 0x647   : > { %v3435_v37 = vpop.f32.mrf.mxu0 }
 0x648   : > { %v7961_v38 = vadd.f32 %v5960_v36, %v2911_v60  ;;  %v3436_v44 = vadd.f32 %v3435_v37, %v7067_v47  ;;  %v6666_v36 = vld [vmem:[%s8777_s3 + $0x188] sm:$0xff]   ;;  %v6667_v37 = vld [vmem:[%s8777_s3 + $0x1c0] sm:$0xff]  }
 0x649   : > { %v3437_v39 = vpop.f32.mrf.mxu0 }
 0x64a   : > { %v3438_v41 = vadd.f32 %v3437_v39, %v7069_v48  ;;  %v3444_v2 = vmax.f32 %v3436_v44, 0.0  ;;  %v6668_v39 = vld [vmem:[%s8777_s3 + $0x110] sm:$0xff]   ;;  %v6672_v44 = vld [vmem:[%s8777_s3 + $0x140] sm:$0xff]  }
 0x64b   : > { %v3439_v40 = vpop.f32.mrf.mxu0 }
 0x64c   : > { %v3440_v43 = vadd.f32 %v3439_v40, %v7067_v47  ;;  %v3445_v51 = vmax.f32 %v3438_v41, 0.0  ;;  %v6669_v40 = vld [vmem:[%s8777_s3 + $0x148] sm:$0xff]   ;;  %v6670_v41 = vld [vmem:[%s8777_s3 + $0x180] sm:$0xff]  }
 0x64d   : > { %v3441_v45 = vpop.f32.mrf.mxu0 }
 0x64e   : > { %v3442_v46 = vadd.f32 %v3441_v45, %v7069_v48  ;;  %v3446_v49 = vmax.f32 %v3440_v43, 0.0  ;;  %v6671_v43 = vld [vmem:[%s8777_s3 + $0x108] sm:$0xff]   ;;  %v6673_v45 = vld [vmem:[%s8777_s3 + $0x100] sm:$0xff]  }
 0x64f   : > { %v3489_v50 = vpop.f32.mrf.mxu0 }
 0x650   : > { %v3447_v63 = vmax.f32 %v3442_v46, 0.0  ;;  %v3448_v55 = vpack.c.bf16 %v3446_v49, %v3444_v2  ;;  %v3490_v59 = vadd.f32 %v3489_v50, %v7067_v47  ;;  %v5629_v2 = vld [vmem:[%s8778_s4] ss:$0 sm:$0xff] }
 0x651   : > { %v3491_v53 = vpop.f32.mrf.mxu0 }
 0x652   : > { %v3449_v54 = vpack.c.bf16 %v3447_v63, %v3445_v51  ;;  %v3492_v57 = vadd.f32 %v3491_v53, %v7069_v48  ;;  %v3498_v3 = vmax.f32 %v3490_v59, 0.0 }
 0x653   : > { %v3493_v56 = vpop.f32.mrf.mxu0 }
 0x654   : > { %v3494_v58 = vadd.f32 %v3493_v56, %v7067_v47  ;;  %3577 = vmatprep.mubr.bf16.mxu1 %v3449_v54  ;;  %v3499_v0 = vmax.f32 %v3492_v57, 0.0 }
 0x655   : > { %v3495_v60 = vpop.f32.mrf.mxu0  ;;  %3578 = vmatmul.mubr.bf16.vlgmr.msra.gmra.mxu1 %v3448_v55 }
 0x656   : > { %v3496_v61 = vadd.f32 %v3495_v60, %v7069_v48  ;;  %3701 = vmatpush1.bf16.msra.mxu1 %v6937_v5  ;;  %3720 = vmatprep.mubr.bf16.mxu1 %v6845_v4  ;;  %v3500_v62 = vmax.f32 %v3494_v58, 0.0 }
 0x657   : > { %3702 = vmatprep.subr.bf16.mxu1 %v7627_v26 }
 0x658   : > { %v3501_v42 = vmax.f32 %v3496_v61, 0.0  ;;  %v3502_v8 = vpack.c.bf16 %v3500_v62, %v3498_v3  ;;  %v6585_v61 = vld [vmem:[%s6947_s18 + $0x10] ss:$8 sps:$4 sm:$0xff]   ;;  %v6587_v62 = vld [vmem:[%s6947_s18 + $0x14] ss:$8 sps:$4 sm:$0xff]  }
 0x659   : > { %4081 = vrot.lane.b32.xlu1 %v6585_v61, %s6851_s15  ;;  %4083 = vrot.lane.b32.xlu0 %v6587_v62, %s6851_s15  ;;  %v6685_v61 = vld [vmem:[%s8777_s3 + $0x268] sm:$0xff]   ;;  %v6686_v62 = vld [vmem:[%s8777_s3 + $0x2a0] sm:$0xff]   ;;  %s8792_s15 = smov 40  }
 0x65a   : > { %v3503_v6 = vpack.c.bf16 %v3501_v42, %v3499_v0  ;;  %3703 = vmatpush1.bf16.msra.mxu1 %v7636_v28 }
 0x65b   : > { %6049 = vmatprep.subr.bf16.mxu1 %v6642_v9 }
 0x65c   : > { %3536 = vmatprep.mubr.bf16.mxu0 %v3503_v6 }
 0x65d   : > { %3537 = vmatmul.mubr.bf16.vlgmr.msra.gmra.mxu0 %v3502_v8  ;;  %5638 = vmatmul.mubr.msk.bf16.vlgmr.msra.gmra.mxu1 %vm404_vm1, %v3684_v7 }
 0x65e   : > { %3604 = vmatpush1.bf16.msra.mxu0 %v6937_v5  ;;  %3623 = vmatprep.mubr.bf16.mxu0 %v6845_v4 }
 0x65f   : > { %3605 = vmatprep.subr.bf16.mxu0 %v7627_v26  ;;  %6050 = vmatpush3.bf16.msra.mxu1 %v6643_v10 }
 0x660   : > { %6051 = vmatprep.subr.bf16.mxu1 %v6644_v11 }
 0x662   : > { %3606 = vmatpush1.bf16.msra.mxu0 %v7636_v28 }
 0x663   : > { %6027 = vmatprep.subr.bf16.mxu0 %v6645_v12  ;;  %6052 = vmatpush3.bf16.msra.mxu1 %v6646_v13 }
 0x664   : > { %6053 = vmatprep.subr.bf16.mxu1 %v6647_v15 }
 0x665   : > { %5636 = vmatmul.mubr.msk.bf16.vlgmr.msra.gmra.mxu0 %vm404_vm1, %v3587_v14 }
 0x666   : > { %6028 = vmatpush3.bf16.msra.mxu0 %v6648_v16 }
 0x667   : > { %6029 = vmatprep.subr.bf16.mxu0 %v6649_v17  ;;  %6054 = vmatpush3.bf16.msra.mxu1 %v6650_v18 }
 0x668   : > { %6055 = vmatprep.subr.bf16.mxu1 %v6651_v19 }
 0x66a   : > { %6030 = vmatpush3.bf16.msra.mxu0 %v6652_v20 }
 0x66b   : > { %6031 = vmatprep.subr.bf16.mxu0 %v6653_v21  ;;  %6056 = vmatpush3.bf16.msra.mxu1 %v6654_v22 }
 0x66c   : > { %6057 = vmatprep.subr.bf16.mxu1 %v6655_v23 }
 0x66e   : > { %6032 = vmatpush3.bf16.msra.mxu0 %v6656_v24 }
 0x66f   : > { %6033 = vmatprep.subr.bf16.mxu0 %v6657_v25  ;;  %6058 = vmatpush3.bf16.msra.mxu1 %v6658_v27 }
 0x670   : > { %6059 = vmatprep.subr.bf16.mxu1 %v6659_v29 }
 0x672   : > { %6034 = vmatpush3.bf16.msra.mxu0 %v6660_v30 }
 0x673   : > { %6035 = vmatprep.subr.bf16.mxu0 %v6661_v31  ;;  %6060 = vmatpush3.bf16.msra.mxu1 %v6662_v32 }
 0x674   : > { %6061 = vmatprep.subr.bf16.mxu1 %v6663_v33 }
 0x676   : > { %6036 = vmatpush3.bf16.msra.mxu0 %v6664_v34 }
 0x677   : > { %6037 = vmatprep.subr.bf16.mxu0 %v6665_v52  ;;  %6062 = vmatpush3.bf16.msra.mxu1 %v6666_v36 }
 0x678   : > { %6063 = vmatprep.subr.bf16.mxu1 %v6667_v37 }
 0x67a   : > { %6038 = vmatpush3.bf16.msra.mxu0 %v6668_v39 }
 0x67b   : > { %6039 = vmatprep.subr.bf16.mxu0 %v6669_v40  ;;  %6064 = vmatpush3.bf16.msra.mxu1 %v6670_v41 }
 0x67c   : > { %5641 = vmatprep.subr.msk.bf16.mxu1 %vm408_vm0, %v6926_v1 }
 0x67e   : > { %6040 = vmatpush3.bf16.msra.mxu0 %v6671_v43 }
 0x67f   : > { %6041 = vmatprep.subr.bf16.mxu0 %v6672_v44 }
 0x682   : > { %6042 = vmatpush3.bf16.msra.mxu0 %v6673_v45 }
 0x683   : > { %5639 = vmatprep.subr.msk.bf16.mxu0 %vm408_vm0, %v6926_v1 }
 0x6a9   : > { %v5977_v46 = vpop.f32.mrf.mxu1 }
 0x6ab   : > { %v5978_v49 = vpop.f32.mrf.mxu1 }
 0x6ac   : > { %v5979_v50 = vadd.f32 %v5978_v49, %v5977_v46  ;;  %v3878_v46 = vpop.permute.xlu1 %3877 }
 0x6ad   : > { %v5980_v51 = vpop.f32.mrf.mxu1 }
 0x6ae   : > { %v3362_v63 = vadd.f32 %v5979_v50, %v7959_v35  ;;  %v6674_v50 = vld [vmem:[%s8777_s3 + $0x2f8] sm:$0xff]  }
 0x6af   : > { %v5981_v53 = vpop.f32.mrf.mxu1 }
 0x6b0   : > { %v5982_v54 = vadd.f32 %v5981_v53, %v5980_v51  ;;  %v3370_v55 = vadd.f32 %v5629_v2, %v3362_v63  ;;  %v6675_v51 = vld [vmem:[%s8777_s3 + $0x2b8] sm:$0xff]   ;;  %v6676_v63 = vld [vmem:[%s8777_s3 + $0x2f0] sm:$0xff]  }
 0x6b1   : > { %v6677_v53 = vld [vmem:[%s8777_s3 + $0x278] sm:$0xff]  }
 0x6b2   : > { %v3363_v56 = vadd.f32 %v5982_v54, %v7961_v38  ;;  %v3372_v58 = vmax.f32 %v3370_v55, 0.0  ;;  %v6678_v54 = vld [vmem:[%s8777_s3 + $0x2b0] sm:$0xff]   ;;  %v6679_v55 = vld [vmem:[%s8777_s3 + $0x2e8] sm:$0xff]  }
 0x6b4   : > { %v3371_v57 = vadd.f32 %v5629_v2, %v3363_v56  ;;  %v3781_v2 = vpop.permute.xlu0 %3780  ;;  %v6681_v56 = vld [vmem:[%s8777_s3 + $0x270] sm:$0xff]  }
 0x6b6   : > { %v3373_v59 = vmax.f32 %v3371_v57, 0.0  ;;  %v6682_v57 = vld [vmem:[%s8777_s3 + $0x2a8] sm:$0xff]  }
 0x6b8   : > { %v8086_v60 = vpack.c.bf16 %v3373_v59, %v3372_v58  ;;  %v6683_v58 = vld [vmem:[%s8777_s3 + $0x2e0] sm:$0xff]   ;;  %v6684_v59 = vld [vmem:[%s8777_s3 + $0x230] sm:$0xff]  }
 0x715   : > { %v6021_v35 = vpop.f32.mrf.mxu1 }
 0x717   : > { %v6022_v0 = vpop.f32.mrf.mxu1 }
 0x718   : > { %v6023_v42 = vadd.f32 %v6022_v0, %v6021_v35  ;;  %v6687_v35 = vld [vmem:[%s8777_s3 + $0x2d8] sm:$0xff]   ;;  %v6688_v0 = vld [vmem:[%s8777_s3 + $0x228] sm:$0xff]  }
 0x719   : > { %v6024_v3 = vpop.f32.mrf.mxu1 }
 0x71b   : > { %v6025_v6 = vpop.f32.mrf.mxu1 }
 0x71c   : > { %v6026_v7 = vadd.f32 %v6025_v6, %v6024_v3  ;;  %v6690_v3 = vld [vmem:[%s8777_s3 + $0x298] sm:$0xff]   ;;  %v6691_v6 = vld [vmem:[%s8777_s3 + $0x2d0] sm:$0xff]  }
 0x71d   : > { %v5999_v8 = vpop.f32.mrf.mxu0  ;;  %v3722_v9 = vpop.f32.mrf.mxu1 }
 0x71e   : > { %v3723_v10 = vadd.f32 %v3722_v9, %v7067_v47  ;;  %v6694_v9 = vld [vmem:[%s8777_s3 + $0x290] sm:$0xff]  }
 0x71f   : > { %v6000_v38 = vpop.f32.mrf.mxu0  ;;  %v3724_v11 = vpop.f32.mrf.mxu1 }
 0x720   : > { %v6001_v14 = vadd.f32 %v6000_v38, %v5999_v8  ;;  %v3725_v12 = vadd.f32 %v3724_v11, %v7069_v48  ;;  %v3731_v19 = vmax.f32 %v3723_v10, 0.0  ;;  %v6693_v8 = vld [vmem:[%s8777_s3 + $0x258] sm:$0xff]   ;;  %v6695_v38 = vld [vmem:[%s8777_s3 + $0x2c8] sm:$0xff]   ;;  %v6697_v11 = vld [vmem:[%s8777_s3 + $0x250] sm:$0xff]  }
 0x721   : > { %v6002_v13 = vpop.f32.mrf.mxu0  ;;  %v3726_v15 = vpop.f32.mrf.mxu1  ;;  %v6696_v10 = vld [vmem:[%s8777_s3 + $0x218] sm:$0xff]  }
 0x722   : > { %v8094_v16 = vadd.f32 %v6023_v42, %v6001_v14  ;;  %v3727_v17 = vadd.f32 %v3726_v15, %v7067_v47  ;;  %v3732_v22 = vmax.f32 %v3725_v12, 0.0  ;;  %v6689_v42 = vld [vmem:[%s8777_s3 + $0x260] sm:$0xff]   ;;  %v6698_v14 = vld [vmem:[%s8777_s3 + $0x288] sm:$0xff]  }
 0x723   : > { %v6003_v18 = vpop.f32.mrf.mxu0  ;;  %v3728_v20 = vpop.f32.mrf.mxu1  ;;  %v6699_v12 = vld [vmem:[%s8777_s3 + $0x2c0] sm:$0xff]   ;;  %v6701_v15 = vld [vmem:[%s8777_s3 + $0x248] sm:$0xff]  }
 0x724   : > { %v6004_v21 = vadd.f32 %v6003_v18, %v6002_v13  ;;  %v3733_v23 = vmax.f32 %v3727_v17, 0.0  ;;  %v3729_v24 = vadd.f32 %v3728_v20, %v7069_v48  ;;  %v6700_v13 = vld [vmem:[%s8777_s3 + $0x210] sm:$0xff]   ;;  %v6702_v17 = vld [vmem:[%s8777_s3 + $0x280] sm:$0xff]   ;;  %v6703_v18 = vld [vmem:[%s8777_s3 + $0x208] sm:$0xff]  }
 0x725   : > { %v3625_v25 = vpop.f32.mrf.mxu0  ;;  %v6705_v20 = vld [vmem:[%s8777_s3 + $0x200] sm:$0xff]  }
 0x726   : > { %v8098_v27 = vadd.f32 %v6026_v7, %v6004_v21  ;;  %v3734_v29 = vmax.f32 %v3729_v24, 0.0  ;;  %v3735_v31 = vpack.c.bf16 %v3733_v23, %v3731_v19  ;;  %v3626_v36 = vadd.f32 %v3625_v25, %v7067_v47  ;;  %v6692_v7 = vld [vmem:[%s8777_s3 + $0x220] sm:$0xff]   ;;  %v6588_v21 = vld [vmem:[%s6947_s18 + $0x14] ss:$8 sps:$4 sm:$0xff]  }
 0x727   : > { %v3627_v30 = vpop.f32.mrf.mxu0  ;;  %v6704_v19 = vld [vmem:[%s8777_s3 + $0x240] sm:$0xff]   ;;  %4188 = vrot.lane.b32.xlu1 %v6588_v21, %s8788_s16  ;;  %4285 = vrot.lane.b32.xlu0 %v6588_v21, %s8789_s21 }
 0x728   : > { %v3736_v32 = vpack.c.bf16 %v3734_v29, %v3732_v22  ;;  %v3628_v34 = vadd.f32 %v3627_v30, %v7069_v48  ;;  %v3634_v44 = vmax.f32 %v3626_v36, 0.0 }
 0x729   : > { %v3629_v33 = vpop.f32.mrf.mxu0 }
 0x72a   : > { %v3630_v52 = vadd.f32 %v3629_v33, %v7067_v47  ;;  %3769 = vmatprep.mubr.bf16.mxu1 %v3736_v32  ;;  %v3635_v41 = vmax.f32 %v3628_v34, 0.0 }
 0x72b   : > { %v3631_v37 = vpop.f32.mrf.mxu0  ;;  %3770 = vmatmul.mubr.bf16.vlgmr.msra.gmra.mxu1 %v3735_v31  ;;  %4382 = vrot.lane.b32.xlu1 %v6588_v21, %s8790_s19 }
 0x72c   : > { %v3632_v39 = vadd.f32 %v3631_v37, %v7069_v48  ;;  %3895 = vmatpush1.bf16.msra.mxu1 %v6937_v5  ;;  %3914 = vmatprep.mubr.bf16.mxu1 %v6845_v4  ;;  %v3636_v40 = vmax.f32 %v3630_v52, 0.0 }
 0x72d   : > { %3896 = vmatprep.subr.bf16.mxu1 %v7627_v26  ;;  %4479 = vrot.lane.b32.xlu0 %v6588_v21, %s8791_s20 }
 0x72e   : > { %v3637_v43 = vmax.f32 %v3632_v39, 0.0  ;;  %v3638_v49 = vpack.c.bf16 %v3636_v40, %v3634_v44 }
 0x72f   : > { %4576 = vrot.lane.b32.xlu1 %v6588_v21, %s8792_s15  ;;  %v6715_v21 = vld [vmem:[%s8777_s3 + $0x370] sm:$0xff]   ;;  %s363_s15 = scalar_lea.vmem %s8782_s8, %s5696_s25 }
 0x730   : > { %v3639_v45 = vpack.c.bf16 %v3637_v43, %v3635_v41  ;;  %3897 = vmatpush1.bf16.msra.mxu1 %v7636_v28 }
 0x731   : > { %6093 = vmatprep.subr.bf16.mxu1 %v6674_v50 }
 0x732   : > { %3672 = vmatprep.mubr.bf16.mxu0 %v3639_v45 }
 0x733   : > { %3673 = vmatmul.mubr.bf16.vlgmr.msra.gmra.mxu0 %v3638_v49  ;;  %5642 = vmatmul.mubr.msk.bf16.vlgmr.msra.gmra.mxu1 %vm404_vm1, %v3878_v46 }
 0x734   : > { %3798 = vmatpush1.bf16.msra.mxu0 %v6937_v5  ;;  %3817 = vmatprep.mubr.bf16.mxu0 %v6845_v4 }
 0x735   : > { %3799 = vmatprep.subr.bf16.mxu0 %v7627_v26  ;;  %6094 = vmatpush3.bf16.msra.mxu1 %v6675_v51 }
 0x736   : > { %6095 = vmatprep.subr.bf16.mxu1 %v6676_v63 }
 0x738   : > { %3800 = vmatpush1.bf16.msra.mxu0 %v7636_v28  ;;  %v6680_v28 = vld [vmem:[%s8777_s3 + $0x238] sm:$0xff]  }
 0x739   : > { %6071 = vmatprep.subr.bf16.mxu0 %v6677_v53  ;;  %6096 = vmatpush3.bf16.msra.mxu1 %v6678_v54 }
 0x73a   : > { %6097 = vmatprep.subr.bf16.mxu1 %v6679_v55 }
 0x73b   : > { %5640 = vmatmul.mubr.msk.bf16.vlgmr.msra.gmra.mxu0 %vm404_vm1, %v3781_v2 }
 0x73c   : > { %6072 = vmatpush3.bf16.msra.mxu0 %v6680_v28 }
 0x73d   : > { %6073 = vmatprep.subr.bf16.mxu0 %v6681_v56  ;;  %6098 = vmatpush3.bf16.msra.mxu1 %v6682_v57  ;;  %v3975_v57 = vpop.permute.xlu0 %3974 }
 0x73e   : > { %6099 = vmatprep.subr.bf16.mxu1 %v6683_v58 }
 0x740   : > { %6074 = vmatpush3.bf16.msra.mxu0 %v6684_v59 }
 0x741   : > { %6075 = vmatprep.subr.bf16.mxu0 %v6685_v61  ;;  %6100 = vmatpush3.bf16.msra.mxu1 %v6686_v62 }
 0x742   : > { %6101 = vmatprep.subr.bf16.mxu1 %v6687_v35 }
 0x744   : > { %6076 = vmatpush3.bf16.msra.mxu0 %v6688_v0 }
 0x745   : > { %6077 = vmatprep.subr.bf16.mxu0 %v6689_v42  ;;  %6102 = vmatpush3.bf16.msra.mxu1 %v6690_v3  ;;  %v4082_v3 = vpop.permute.xlu1 %4081 }
 0x746   : > { %6103 = vmatprep.subr.bf16.mxu1 %v6691_v6  ;;  %v4084_v6 = vpop.permute.xlu0 %4083 }
 0x748   : > { %6078 = vmatpush3.bf16.msra.mxu0 %v6692_v7 }
 0x749   : > { %6079 = vmatprep.subr.bf16.mxu0 %v6693_v8  ;;  %6104 = vmatpush3.bf16.msra.mxu1 %v6694_v9 }
 0x74a   : > { %6105 = vmatprep.subr.bf16.mxu1 %v6695_v38 }
 0x74c   : > { %6080 = vmatpush3.bf16.msra.mxu0 %v6696_v10  ;;  %v8240_v10 = vld [vmem:[%s8775_s1] ss:$8 sps:$4 sm:$0xff]  }
 0x74d   : > { %6081 = vmatprep.subr.bf16.mxu0 %v6697_v11  ;;  %6106 = vmatpush3.bf16.msra.mxu1 %v6698_v14  ;;  %v4085_v11 = vsel %vm2001_vm2, %v4082_v3, %v4084_v6 }
 0x74e   : > { %6107 = vmatprep.subr.bf16.mxu1 %v6699_v12  ;;  %v8253_v12 = vld [vmem:[%s8775_s1 + $0x4] ss:$8 sps:$4 sm:$0xff]  }
 0x750   : > { %6082 = vmatpush3.bf16.msra.mxu0 %v6700_v13  ;;  %v6709_v13 = vld [vmem:[%s8777_s3 + $0x3b8] sm:$0xff]  }
 0x751   : > { %6083 = vmatprep.subr.bf16.mxu0 %v6701_v15  ;;  %6108 = vmatpush3.bf16.msra.mxu1 %v6702_v17  ;;  %v6710_v15 = vld [vmem:[%s8777_s3 + $0x3f0] sm:$0xff]   ;;  %v6711_v17 = vld [vmem:[%s8777_s3 + $0x378] sm:$0xff]  }
 0x752   : > { %5647 = vmatprep.subr.msk.bf16.mxu1 %vm408_vm0, %v6926_v1 }
 0x754   : > { %6084 = vmatpush3.bf16.msra.mxu0 %v6703_v18  ;;  %v6712_v18 = vld [vmem:[%s8777_s3 + $0x3b0] sm:$0xff]  }
 0x755   : > { %6085 = vmatprep.subr.bf16.mxu0 %v6704_v19  ;;  %v6713_v19 = vld [vmem:[%s8777_s3 + $0x3e8] sm:$0xff]  }
 0x758   : > { %6086 = vmatpush3.bf16.msra.mxu0 %v6705_v20  ;;  %v6714_v20 = vld [vmem:[%s8777_s3 + $0x338] sm:$0xff]  }
 0x759   : > { %5643 = vmatprep.subr.msk.bf16.mxu0 %vm408_vm0, %v6926_v1 }
 0x7eb   : > { %v6065_v22 = vpop.f32.mrf.mxu1 }
 0x7ed   : > { %v6066_v23 = vpop.f32.mrf.mxu1 }
 0x7ee   : > { %v6067_v24 = vadd.f32 %v6066_v23, %v6065_v22  ;;  %v6716_v22 = vld [vmem:[%s8777_s3 + $0x3a8] sm:$0xff]   ;;  %v6717_v23 = vld [vmem:[%s8777_s3 + $0x3e0] sm:$0xff]  }
 0x7ef   : > { %v6068_v25 = vpop.f32.mrf.mxu1 }
 0x7f1   : > { %v6069_v29 = vpop.f32.mrf.mxu1 }
 0x7f2   : > { %v6070_v30 = vadd.f32 %v6069_v29, %v6068_v25  ;;  %v6719_v25 = vld [vmem:[%s8777_s3 + $0x368] sm:$0xff]   ;;  %v6720_v29 = vld [vmem:[%s8777_s3 + $0x3a0] sm:$0xff]  }
 0x7f3   : > { %v6043_v31 = vpop.f32.mrf.mxu0  ;;  %v3916_v32 = vpop.f32.mrf.mxu1 }
 0x7f4   : > { %v3917_v34 = vadd.f32 %v3916_v32, %v7067_v47  ;;  %v6723_v32 = vld [vmem:[%s8777_s3 + $0x360] sm:$0xff]  }
 0x7f5   : > { %v6044_v33 = vpop.f32.mrf.mxu0  ;;  %v3918_v52 = vpop.f32.mrf.mxu1 }
 0x7f6   : > { %v6045_v36 = vadd.f32 %v6044_v33, %v6043_v31  ;;  %v3919_v37 = vadd.f32 %v3918_v52, %v7069_v48  ;;  %v3925_v45 = vmax.f32 %v3917_v34, 0.0  ;;  %v6722_v31 = vld [vmem:[%s8777_s3 + $0x328] sm:$0xff]   ;;  %v6724_v33 = vld [vmem:[%s8777_s3 + $0x398] sm:$0xff]   ;;  %v6725_v34 = vld [vmem:[%s8777_s3 + $0x3d0] sm:$0xff]  }
 0x7f7   : > { %v6046_v39 = vpop.f32.mrf.mxu0  ;;  %v3920_v40 = vpop.f32.mrf.mxu1  ;;  %v6726_v52 = vld [vmem:[%s8777_s3 + $0x320] sm:$0xff]  }
 0x7f8   : > { %v3681_v41 = vadd.f32 %v6045_v36, %v8094_v16  ;;  %v3921_v43 = vadd.f32 %v3920_v40, %v7067_v47  ;;  %v3926_v46 = vmax.f32 %v3919_v37, 0.0  ;;  %v6727_v36 = vld [vmem:[%s8777_s3 + $0x358] sm:$0xff]   ;;  %v6728_v37 = vld [vmem:[%s8777_s3 + $0x390] sm:$0xff]  }
 0x7f9   : > { %v6047_v44 = vpop.f32.mrf.mxu0  ;;  %v3922_v49 = vpop.f32.mrf.mxu1  ;;  %v6730_v40 = vld [vmem:[%s8777_s3 + $0x318] sm:$0xff]  }
 0x7fa   : > { %v8224_v50 = vadd.f32 %v6067_v24, %v3681_v41  ;;  %v6048_v51 = vadd.f32 %v6047_v44, %v6046_v39  ;;  %v3927_v63 = vmax.f32 %v3921_v43, 0.0  ;;  %v3923_v2 = vadd.f32 %v3922_v49, %v7069_v48  ;;  %v6718_v24 = vld [vmem:[%s8777_s3 + $0x330] sm:$0xff]   ;;  %v6729_v39 = vld [vmem:[%s8777_s3 + $0x3c8] sm:$0xff]   ;;  %v6733_v44 = vld [vmem:[%s8777_s3 + $0x3c0] sm:$0xff]  }
 0x7fb   : > { %v3819_v53 = vpop.f32.mrf.mxu0  ;;  %v6731_v41 = vld [vmem:[%s8777_s3 + $0x350] sm:$0xff]   ;;  %v6732_v43 = vld [vmem:[%s8777_s3 + $0x388] sm:$0xff]   ;;  %v6736_v49 = vld [vmem:[%s8777_s3 + $0x380] sm:$0xff]  }
 0x7fc   : > { %v3682_v54 = vadd.f32 %v6048_v51, %v8098_v27  ;;  %v3928_v55 = vmax.f32 %v3923_v2, 0.0  ;;  %v3929_v56 = vpack.c.bf16 %v3927_v63, %v3925_v45  ;;  %v3820_v35 = vadd.f32 %v3819_v53, %v7067_v47  ;;  %v6734_v45 = vld [vmem:[%s8777_s3 + $0x310] sm:$0xff]   ;;  %v6737_v51 = vld [vmem:[%s8777_s3 + $0x308] sm:$0xff]   ;;  %v6738_v63 = vld [vmem:[%s8777_s3 + $0x340] sm:$0xff]  }
 0x7fd   : > { %v3821_v28 = vpop.f32.mrf.mxu0  ;;  %v6739_v2 = vld [vmem:[%s8777_s3 + $0x300] sm:$0xff]  }
 0x7fe   : > { %v8228_v16 = vadd.f32 %v6070_v30, %v3682_v54  ;;  %v3930_v58 = vpack.c.bf16 %v3928_v55, %v3926_v46  ;;  %v3822_v61 = vadd.f32 %v3821_v28, %v7069_v48  ;;  %v3828_v9 = vmax.f32 %v3820_v35, 0.0  ;;  %v6721_v30 = vld [vmem:[%s8777_s3 + $0x3d8] sm:$0xff]   ;;  %v6735_v46 = vld [vmem:[%s8777_s3 + $0x348] sm:$0xff]  }
 0x7ff   : > { %v3823_v59 = vpop.f32.mrf.mxu0 }
 0x800   : > { %v3824_v62 = vadd.f32 %v3823_v59, %v7067_v47  ;;  %3963 = vmatprep.mubr.bf16.mxu1 %v3930_v58  ;;  %v3829_v7 = vmax.f32 %v3822_v61, 0.0 }
 0x801   : > { %v3825_v0 = vpop.f32.mrf.mxu0  ;;  %3964 = vmatmul.mubr.bf16.vlgmr.msra.gmra.mxu1 %v3929_v56 }
 0x802   : > { %v3826_v42 = vadd.f32 %v3825_v0, %v7069_v48  ;;  %4102 = vmatpush1.bf16.msra.mxu1 %v6937_v5  ;;  %4121 = vmatprep.mubr.bf16.mxu1 %v6845_v4  ;;  %v3830_v27 = vmax.f32 %v3824_v62, 0.0 }
 0x803   : > { %4103 = vmatprep.subr.bf16.mxu1 %v7627_v26  ;;  %v6707_v26 = vld [vmem:[%s8777_s3 + $0x3f8] sm:$0xff]  }
 0x804   : > { %v3831_v8 = vmax.f32 %v3826_v42, 0.0  ;;  %v3832_v14 = vpack.c.bf16 %v3830_v27, %v3828_v9 }
 0x806   : > { %v3833_v38 = vpack.c.bf16 %v3831_v8, %v3829_v7  ;;  %4104 = vmatpush1.bf16.msra.mxu1 %v8240_v10 }
 0x807   : > { %6137 = vmatprep.subr.bf16.mxu1 %v6707_v26 }
 0x808   : > { %3866 = vmatprep.mubr.bf16.mxu0 %v3833_v38 }
 0x809   : > { %3867 = vmatmul.mubr.bf16.vlgmr.msra.gmra.mxu0 %v3832_v14  ;;  %5648 = vmatmul.mubr.msk.bf16.vlgmr.msra.gmra.mxu1 %vm404_vm1, %v4085_v11 }
 0x80a   : > { %3992 = vmatpush1.bf16.msra.mxu0 %v6937_v5  ;;  %4011 = vmatprep.mubr.bf16.mxu0 %v6845_v4 }
 0x80b   : > { %3993 = vmatprep.subr.bf16.mxu0 %v8253_v12  ;;  %6138 = vmatpush3.bf16.msra.mxu1 %v6709_v13 }
 0x80c   : > { %6139 = vmatprep.subr.bf16.mxu1 %v6710_v15 }
 0x80e   : > { %3994 = vmatpush1.bf16.msra.mxu0 %v8240_v10 }
 0x80f   : > { %6115 = vmatprep.subr.bf16.mxu0 %v6711_v17  ;;  %6140 = vmatpush3.bf16.msra.mxu1 %v6712_v18 }
 0x810   : > { %6141 = vmatprep.subr.bf16.mxu1 %v6713_v19 }
 0x811   : > { %5644 = vmatmul.mubr.msk.bf16.vlgmr.msra.gmra.mxu0 %vm404_vm1, %v3975_v57 }
 0x812   : > { %6116 = vmatpush3.bf16.msra.mxu0 %v6714_v20 }
 0x813   : > { %6117 = vmatprep.subr.bf16.mxu0 %v6715_v21  ;;  %6142 = vmatpush3.bf16.msra.mxu1 %v6716_v22 }
 0x814   : > { %6143 = vmatprep.subr.bf16.mxu1 %v6717_v23 }
 0x816   : > { %6118 = vmatpush3.bf16.msra.mxu0 %v6718_v24 }
 0x817   : > { %6119 = vmatprep.subr.bf16.mxu0 %v6719_v25  ;;  %6144 = vmatpush3.bf16.msra.mxu1 %v6720_v29 }
 0x818   : > { %6145 = vmatprep.subr.bf16.mxu1 %v6721_v30 }
 0x81a   : > { %6120 = vmatpush3.bf16.msra.mxu0 %v6722_v31 }
 0x81b   : > { %6121 = vmatprep.subr.bf16.mxu0 %v6723_v32  ;;  %6146 = vmatpush3.bf16.msra.mxu1 %v6724_v33 }
 0x81c   : > { %6147 = vmatprep.subr.bf16.mxu1 %v6725_v34 }
 0x81e   : > { %6122 = vmatpush3.bf16.msra.mxu0 %v6726_v52 }
 0x81f   : > { %6123 = vmatprep.subr.bf16.mxu0 %v6727_v36  ;;  %6148 = vmatpush3.bf16.msra.mxu1 %v6728_v37  ;;  %v4286_v36 = vpop.permute.xlu0 %4285 }
 0x820   : > { %6149 = vmatprep.subr.bf16.mxu1 %v6729_v39  ;;  %v6740_v39 = vld [vmem:[%s8777_s3 + $0x4f8] sm:$0xff]  }
 0x822   : > { %6124 = vmatpush3.bf16.msra.mxu0 %v6730_v40  ;;  %v6741_v40 = vld [vmem:[%s8777_s3 + $0x4b8] sm:$0xff]  }
 0x823   : > { %6125 = vmatprep.subr.bf16.mxu0 %v6731_v41  ;;  %6150 = vmatpush3.bf16.msra.mxu1 %v6732_v43  ;;  %v6742_v41 = vld [vmem:[%s8777_s3 + $0x4f0] sm:$0xff]   ;;  %v4189_v43 = vpop.permute.xlu1 %4188 }
 0x824   : > { %6151 = vmatprep.subr.bf16.mxu1 %v6733_v44  ;;  %v6743_v44 = vld [vmem:[%s8777_s3 + $0x478] sm:$0xff]  }
 0x826   : > { %6126 = vmatpush3.bf16.msra.mxu0 %v6734_v45  ;;  %v6744_v45 = vld [vmem:[%s8777_s3 + $0x4b0] sm:$0xff]  }
 0x827   : > { %6127 = vmatprep.subr.bf16.mxu0 %v6735_v46  ;;  %6152 = vmatpush3.bf16.msra.mxu1 %v6736_v49  ;;  %v6745_v46 = vld [vmem:[%s8777_s3 + $0x4e8] sm:$0xff]   ;;  %v6746_v49 = vld [vmem:[%s8777_s3 + $0x438] sm:$0xff]  }
 0x828   : > { %5652 = vmatprep.subr.msk.bf16.mxu1 %vm408_vm0, %v6926_v1 }
 0x82a   : > { %6128 = vmatpush3.bf16.msra.mxu0 %v6737_v51  ;;  %v6747_v51 = vld [vmem:[%s8777_s3 + $0x470] sm:$0xff]  }
 0x82b   : > { %6129 = vmatprep.subr.bf16.mxu0 %v6738_v63  ;;  %v6748_v63 = vld [vmem:[%s8777_s3 + $0x4a8] sm:$0xff]  }
 0x82e   : > { %6130 = vmatpush3.bf16.msra.mxu0 %v6739_v2  ;;  %v6749_v2 = vld [vmem:[%s8777_s3 + $0x4e0] sm:$0xff]  }
 0x82f   : > { %5650 = vmatprep.subr.msk.bf16.mxu0 %vm408_vm0, %v6926_v1 }
 0x8c1   : > { %v6109_v53 = vpop.f32.mrf.mxu1 }
 0x8c3   : > { %v6110_v54 = vpop.f32.mrf.mxu1 }
 0x8c4   : > { %v6111_v55 = vadd.f32 %v6110_v54, %v6109_v53  ;;  %v6750_v53 = vld [vmem:[%s8777_s3 + $0x430] sm:$0xff]   ;;  %v6751_v54 = vld [vmem:[%s8777_s3 + $0x468] sm:$0xff]  }
 0x8c5   : > { %v6112_v28 = vpop.f32.mrf.mxu1 }
 0x8c7   : > { %v6113_v56 = vpop.f32.mrf.mxu1 }
 0x8c8   : > { %v6114_v57 = vadd.f32 %v6113_v56, %v6112_v28  ;;  %v6753_v28 = vld [vmem:[%s8777_s3 + $0x4d8] sm:$0xff]   ;;  %v6754_v56 = vld [vmem:[%s8777_s3 + $0x428] sm:$0xff]  }
 0x8c9   : > { %v6087_v58 = vpop.f32.mrf.mxu0  ;;  %v4123_v59 = vpop.f32.mrf.mxu1 }
 0x8ca   : > { %v4124_v62 = vadd.f32 %v4123_v59, %v7067_v47  ;;  %v6757_v59 = vld [vmem:[%s8777_s3 + $0x4d0] sm:$0xff]  }
 0x8cb   : > { %v6088_v61 = vpop.f32.mrf.mxu0  ;;  %v4125_v35 = vpop.f32.mrf.mxu1 }
 0x8cc   : > { %v6089_v0 = vadd.f32 %v6088_v61, %v6087_v58  ;;  %v4126_v42 = vadd.f32 %v4125_v35, %v7069_v48  ;;  %v4132_v9 = vmax.f32 %v4124_v62, 0.0  ;;  %v6756_v58 = vld [vmem:[%s8777_s3 + $0x498] sm:$0xff]   ;;  %v6758_v61 = vld [vmem:[%s8777_s3 + $0x420] sm:$0xff]   ;;  %v6760_v35 = vld [vmem:[%s8777_s3 + $0x490] sm:$0xff]  }
 0x8cd   : > { %v6090_v27 = vpop.f32.mrf.mxu0  ;;  %v4127_v3 = vpop.f32.mrf.mxu1  ;;  %v6759_v62 = vld [vmem:[%s8777_s3 + $0x458] sm:$0xff]  }
 0x8ce   : > { %v3875_v6 = vadd.f32 %v6089_v0, %v8224_v50  ;;  %v4128_v7 = vadd.f32 %v4127_v3, %v7067_v47  ;;  %v4133_v38 = vmax.f32 %v4126_v42, 0.0  ;;  %v6761_v0 = vld [vmem:[%s8777_s3 + $0x4c8] sm:$0xff]   ;;  %v6762_v42 = vld [vmem:[%s8777_s3 + $0x418] sm:$0xff]  }
 0x8cf   : > { %v6091_v8 = vpop.f32.mrf.mxu0  ;;  %v4129_v11 = vpop.f32.mrf.mxu1  ;;  %v6764_v3 = vld [vmem:[%s8777_s3 + $0x488] sm:$0xff]  }
 0x8d0   : > { %v8359_v14 = vadd.f32 %v6111_v55, %v3875_v6  ;;  %v6092_v26 = vadd.f32 %v6091_v8, %v6090_v27  ;;  %v4134_v13 = vmax.f32 %v4128_v7, 0.0  ;;  %v4130_v15 = vadd.f32 %v4129_v11, %v7069_v48  ;;  %v6752_v55 = vld [vmem:[%s8777_s3 + $0x4a0] sm:$0xff]   ;;  %v6763_v27 = vld [vmem:[%s8777_s3 + $0x450] sm:$0xff]   ;;  %v6767_v8 = vld [vmem:[%s8777_s3 + $0x448] sm:$0xff]  }
 0x8d1   : > { %v4013_v17 = vpop.f32.mrf.mxu0  ;;  %v6765_v6 = vld [vmem:[%s8777_s3 + $0x4c0] sm:$0xff]   ;;  %v6766_v7 = vld [vmem:[%s8777_s3 + $0x410] sm:$0xff]  }
 0x8d2   : > { %v3876_v18 = vadd.f32 %v6092_v26, %v8228_v16  ;;  %v4135_v19 = vmax.f32 %v4130_v15, 0.0  ;;  %v4136_v21 = vpack.c.bf16 %v4134_v13, %v4132_v9  ;;  %v4014_v29 = vadd.f32 %v4013_v17, %v7067_v47  ;;  %v6768_v9 = vld [vmem:[%s8777_s3 + $0x480] sm:$0xff]  }
 0x8d3   : > { %v4015_v20 = vpop.f32.mrf.mxu0  ;;  %v6770_v11 = vld [vmem:[%s8777_s3 + $0x440] sm:$0xff]  }
 0x8d4   : > { %v8363_v22 = vadd.f32 %v6114_v57, %v3876_v18  ;;  %v4137_v50 = vpack.c.bf16 %v4135_v19, %v4133_v38  ;;  %v4016_v24 = vadd.f32 %v4015_v20, %v7069_v48  ;;  %v4022_v34 = vmax.f32 %v4014_v29, 0.0  ;;  %v6755_v57 = vld [vmem:[%s8777_s3 + $0x460] sm:$0xff]   ;;  %v6769_v38 = vld [vmem:[%s8777_s3 + $0x408] sm:$0xff]  }
 0x8d5   : > { %v4017_v23 = vpop.f32.mrf.mxu0  ;;  %v6771_v26 = vld [vmem:[%s8777_s3 + $0x400] sm:$0xff]  }
 0x8d6   : > { %v4018_v25 = vadd.f32 %v4017_v23, %v7067_v47  ;;  %4170 = vmatprep.mubr.bf16.mxu1 %v4137_v50  ;;  %v4023_v32 = vmax.f32 %v4016_v24, 0.0 }
 0x8d7   : > { %v4019_v30 = vpop.f32.mrf.mxu0  ;;  %4171 = vmatmul.mubr.bf16.vlgmr.msra.gmra.mxu1 %v4136_v21 }
 0x8d8   : > { %v4020_v31 = vadd.f32 %v4019_v30, %v7069_v48  ;;  %4303 = vmatpush1.bf16.msra.mxu1 %v6937_v5  ;;  %4322 = vmatprep.mubr.bf16.mxu1 %v6845_v4  ;;  %v4024_v16 = vmax.f32 %v4018_v25, 0.0 }
 0x8d9   : > { %4304 = vmatprep.subr.bf16.mxu1 %v8253_v12 }
 0x8da   : > { %v4025_v33 = vmax.f32 %v4020_v31, 0.0  ;;  %v4026_v37 = vpack.c.bf16 %v4024_v16, %v4022_v34 }
 0x8dc   : > { %v4027_v52 = vpack.c.bf16 %v4025_v33, %v4023_v32  ;;  %4305 = vmatpush1.bf16.msra.mxu1 %v8240_v10 }
 0x8dd   : > { %6181 = vmatprep.subr.bf16.mxu1 %v6740_v39 }
 0x8de   : > { %4060 = vmatprep.mubr.bf16.mxu0 %v4027_v52 }
 0x8df   : > { %4061 = vmatmul.mubr.bf16.vlgmr.msra.gmra.mxu0 %v4026_v37  ;;  %5653 = vmatmul.mubr.msk.bf16.vlgmr.msra.gmra.mxu1 %vm404_vm1, %v4286_v36 }
 0x8e0   : > { %4206 = vmatpush1.bf16.msra.mxu0 %v6937_v5  ;;  %4225 = vmatprep.mubr.bf16.mxu0 %v6845_v4 }
 0x8e1   : > { %4207 = vmatprep.subr.bf16.mxu0 %v8253_v12  ;;  %6182 = vmatpush3.bf16.msra.mxu1 %v6741_v40 }
 0x8e2   : > { %6183 = vmatprep.subr.bf16.mxu1 %v6742_v41 }
 0x8e4   : > { %4208 = vmatpush1.bf16.msra.mxu0 %v8240_v10 }
 0x8e5   : > { %6159 = vmatprep.subr.bf16.mxu0 %v6743_v44  ;;  %6184 = vmatpush3.bf16.msra.mxu1 %v6744_v45 }
 0x8e6   : > { %6185 = vmatprep.subr.bf16.mxu1 %v6745_v46 }
 0x8e7   : > { %5651 = vmatmul.mubr.msk.bf16.vlgmr.msra.gmra.mxu0 %vm404_vm1, %v4189_v43 }
 0x8e8   : > { %6160 = vmatpush3.bf16.msra.mxu0 %v6746_v49 }
 0x8e9   : > { %6161 = vmatprep.subr.bf16.mxu0 %v6747_v51  ;;  %6186 = vmatpush3.bf16.msra.mxu1 %v6748_v63 }
 0x8ea   : > { %6187 = vmatprep.subr.bf16.mxu1 %v6749_v2 }
 0x8ec   : > { %6162 = vmatpush3.bf16.msra.mxu0 %v6750_v53 }
 0x8ed   : > { %6163 = vmatprep.subr.bf16.mxu0 %v6751_v54  ;;  %6188 = vmatpush3.bf16.msra.mxu1 %v6752_v55 }
 0x8ee   : > { %6189 = vmatprep.subr.bf16.mxu1 %v6753_v28 }
 0x8f0   : > { %6164 = vmatpush3.bf16.msra.mxu0 %v6754_v56 }
 0x8f1   : > { %6165 = vmatprep.subr.bf16.mxu0 %v6755_v57  ;;  %6190 = vmatpush3.bf16.msra.mxu1 %v6756_v58 }
 0x8f2   : > { %6191 = vmatprep.subr.bf16.mxu1 %v6757_v59 }
 0x8f4   : > { %6166 = vmatpush3.bf16.msra.mxu0 %v6758_v61 }
 0x8f5   : > { %6167 = vmatprep.subr.bf16.mxu0 %v6759_v62  ;;  %6192 = vmatpush3.bf16.msra.mxu1 %v6760_v35  ;;  %v4480_v62 = vpop.permute.xlu0 %4479 }
 0x8f6   : > { %6193 = vmatprep.subr.bf16.mxu1 %v6761_v0  ;;  %v6772_v0 = vld [vmem:[%s8777_s3 + $0x5f8] sm:$0xff]  }
 0x8f8   : > { %6168 = vmatpush3.bf16.msra.mxu0 %v6762_v42  ;;  %v6773_v42 = vld [vmem:[%s8777_s3 + $0x5b8] sm:$0xff]  }
 0x8f9   : > { %6169 = vmatprep.subr.bf16.mxu0 %v6763_v27  ;;  %6194 = vmatpush3.bf16.msra.mxu1 %v6764_v3  ;;  %v6774_v27 = vld [vmem:[%s8777_s3 + $0x5f0] sm:$0xff]   ;;  %v4383_v3 = vpop.permute.xlu1 %4382 }
 0x8fa   : > { %6195 = vmatprep.subr.bf16.mxu1 %v6765_v6  ;;  %v6775_v6 = vld [vmem:[%s8777_s3 + $0x578] sm:$0xff]  }
 0x8fc   : > { %6170 = vmatpush3.bf16.msra.mxu0 %v6766_v7  ;;  %v6776_v7 = vld [vmem:[%s8777_s3 + $0x5b0] sm:$0xff]  }
 0x8fd   : > { %6171 = vmatprep.subr.bf16.mxu0 %v6767_v8  ;;  %6196 = vmatpush3.bf16.msra.mxu1 %v6768_v9  ;;  %v6777_v8 = vld [vmem:[%s8777_s3 + $0x5e8] sm:$0xff]   ;;  %v6778_v9 = vld [vmem:[%s8777_s3 + $0x538] sm:$0xff]  }
 0x8fe   : > { %5656 = vmatprep.subr.msk.bf16.mxu1 %vm408_vm0, %v6926_v1 }
 0x900   : > { %6172 = vmatpush3.bf16.msra.mxu0 %v6769_v38  ;;  %v6779_v38 = vld [vmem:[%s8777_s3 + $0x570] sm:$0xff]  }
 0x901   : > { %6173 = vmatprep.subr.bf16.mxu0 %v6770_v11  ;;  %v6780_v11 = vld [vmem:[%s8777_s3 + $0x5a8] sm:$0xff]  }
 0x904   : > { %6174 = vmatpush3.bf16.msra.mxu0 %v6771_v26  ;;  %v6781_v26 = vld [vmem:[%s8777_s3 + $0x5e0] sm:$0xff]  }
 0x905   : > { %5654 = vmatprep.subr.msk.bf16.mxu0 %vm408_vm0, %v6926_v1 }
 0x997   : > { %v6153_v13 = vpop.f32.mrf.mxu1 }
 0x999   : > { %v6154_v15 = vpop.f32.mrf.mxu1 }
 0x99a   : > { %v6155_v17 = vadd.f32 %v6154_v15, %v6153_v13  ;;  %v6782_v13 = vld [vmem:[%s8777_s3 + $0x530] sm:$0xff]   ;;  %v6783_v15 = vld [vmem:[%s8777_s3 + $0x568] sm:$0xff]  }
 0x99b   : > { %v6156_v18 = vpop.f32.mrf.mxu1 }
 0x99d   : > { %v6157_v19 = vpop.f32.mrf.mxu1 }
 0x99e   : > { %v6158_v20 = vadd.f32 %v6157_v19, %v6156_v18  ;;  %v6785_v18 = vld [vmem:[%s8777_s3 + $0x5d8] sm:$0xff]   ;;  %v6786_v19 = vld [vmem:[%s8777_s3 + $0x528] sm:$0xff]  }
 0x99f   : > { %v6131_v21 = vpop.f32.mrf.mxu0  ;;  %v4324_v50 = vpop.f32.mrf.mxu1 }
 0x9a0   : > { %v4325_v24 = vadd.f32 %v4324_v50, %v7067_v47  ;;  %v6789_v50 = vld [vmem:[%s8777_s3 + $0x5d0] sm:$0xff]  }
 0x9a1   : > { %v6132_v23 = vpop.f32.mrf.mxu0  ;;  %v4326_v25 = vpop.f32.mrf.mxu1 }
 0x9a2   : > { %v6133_v29 = vadd.f32 %v6132_v23, %v6131_v21  ;;  %v4327_v30 = vadd.f32 %v4326_v25, %v7069_v48  ;;  %v4333_v52 = vmax.f32 %v4325_v24, 0.0  ;;  %v6788_v21 = vld [vmem:[%s8777_s3 + $0x598] sm:$0xff]   ;;  %v6790_v23 = vld [vmem:[%s8777_s3 + $0x520] sm:$0xff]   ;;  %v6792_v25 = vld [vmem:[%s8777_s3 + $0x590] sm:$0xff]  }
 0x9a3   : > { %v6134_v31 = vpop.f32.mrf.mxu0  ;;  %v4328_v16 = vpop.f32.mrf.mxu1  ;;  %v6791_v24 = vld [vmem:[%s8777_s3 + $0x558] sm:$0xff]  }
 0x9a4   : > { %v4069_v32 = vadd.f32 %v6133_v29, %v8359_v14  ;;  %v4329_v33 = vadd.f32 %v4328_v16, %v7067_v47  ;;  %v4334_v36 = vmax.f32 %v4327_v30, 0.0  ;;  %v6793_v29 = vld [vmem:[%s8777_s3 + $0x5c8] sm:$0xff]   ;;  %v6794_v30 = vld [vmem:[%s8777_s3 + $0x518] sm:$0xff]  }
 0x9a5   : > { %v6135_v34 = vpop.f32.mrf.mxu0  ;;  %v4330_v37 = vpop.f32.mrf.mxu1  ;;  %v6796_v16 = vld [vmem:[%s8777_s3 + $0x588] sm:$0xff]  }
 0x9a6   : > { %v8483_v39 = vadd.f32 %v6155_v17, %v4069_v32  ;;  %v6136_v40 = vadd.f32 %v6135_v34, %v6134_v31  ;;  %v4335_v41 = vmax.f32 %v4329_v33, 0.0  ;;  %v4331_v43 = vadd.f32 %v4330_v37, %v7069_v48  ;;  %v6784_v17 = vld [vmem:[%s8777_s3 + $0x5a0] sm:$0xff]   ;;  %v6795_v31 = vld [vmem:[%s8777_s3 + $0x550] sm:$0xff]   ;;  %v6799_v34 = vld [vmem:[%s8777_s3 + $0x548] sm:$0xff]  }
 0x9a7   : > { %v4227_v44 = vpop.f32.mrf.mxu0  ;;  %v6797_v32 = vld [vmem:[%s8777_s3 + $0x5c0] sm:$0xff]   ;;  %v6798_v33 = vld [vmem:[%s8777_s3 + $0x510] sm:$0xff]  }
 0x9a8   : > { %v4070_v45 = vadd.f32 %v6136_v40, %v8363_v22  ;;  %v4336_v46 = vmax.f32 %v4331_v43, 0.0  ;;  %v4337_v51 = vpack.c.bf16 %v4335_v41, %v4333_v52  ;;  %v4228_v55 = vadd.f32 %v4227_v44, %v7067_v47  ;;  %v6800_v52 = vld [vmem:[%s8777_s3 + $0x580] sm:$0xff]  }
 0x9a9   : > { %v4229_v49 = vpop.f32.mrf.mxu0  ;;  %v6802_v37 = vld [vmem:[%s8777_s3 + $0x540] sm:$0xff]  }
 0x9aa   : > { %v8487_v63 = vadd.f32 %v6158_v20, %v4070_v45  ;;  %v4338_v14 = vpack.c.bf16 %v4336_v46, %v4334_v36  ;;  %v4230_v53 = vadd.f32 %v4229_v49, %v7069_v48  ;;  %v4236_v59 = vmax.f32 %v4228_v55, 0.0  ;;  %v6787_v20 = vld [vmem:[%s8777_s3 + $0x560] sm:$0xff]   ;;  %v6801_v36 = vld [vmem:[%s8777_s3 + $0x508] sm:$0xff]  }
 0x9ab   : > { %v4231_v2 = vpop.f32.mrf.mxu0  ;;  %v6803_v40 = vld [vmem:[%s8777_s3 + $0x500] sm:$0xff]  }
 0x9ac   : > { %v4232_v54 = vadd.f32 %v4231_v2, %v7067_v47  ;;  %4371 = vmatprep.mubr.bf16.mxu1 %v4338_v14  ;;  %v4237_v57 = vmax.f32 %v4230_v53, 0.0 }
 0x9ad   : > { %v4233_v28 = vpop.f32.mrf.mxu0  ;;  %4372 = vmatmul.mubr.bf16.vlgmr.msra.gmra.mxu1 %v4337_v51 }
 0x9ae   : > { %v4234_v56 = vadd.f32 %v4233_v28, %v7069_v48  ;;  %4497 = vmatpush1.bf16.msra.mxu1 %v6937_v5  ;;  %4516 = vmatprep.mubr.bf16.mxu1 %v6845_v4  ;;  %v4238_v22 = vmax.f32 %v4232_v54, 0.0 }
 0x9af   : > { %4498 = vmatprep.subr.bf16.mxu1 %v8253_v12 }
 0x9b0   : > { %v4239_v58 = vmax.f32 %v4234_v56, 0.0  ;;  %v4240_v35 = vpack.c.bf16 %v4238_v22, %v4236_v59 }
 0x9b2   : > { %v4241_v61 = vpack.c.bf16 %v4239_v58, %v4237_v57  ;;  %4499 = vmatpush1.bf16.msra.mxu1 %v8240_v10 }
 0x9b3   : > { %6225 = vmatprep.subr.bf16.mxu1 %v6772_v0 }
 0x9b4   : > { %4274 = vmatprep.mubr.bf16.mxu0 %v4241_v61 }
 0x9b5   : > { %4275 = vmatmul.mubr.bf16.vlgmr.msra.gmra.mxu0 %v4240_v35  ;;  %5657 = vmatmul.mubr.msk.bf16.vlgmr.msra.gmra.mxu1 %vm404_vm1, %v4480_v62 }
 0x9b6   : > { %4400 = vmatpush1.bf16.msra.mxu0 %v6937_v5  ;;  %4419 = vmatprep.mubr.bf16.mxu0 %v6845_v4 }
 0x9b7   : > { %4401 = vmatprep.subr.bf16.mxu0 %v8253_v12  ;;  %6226 = vmatpush3.bf16.msra.mxu1 %v6773_v42 }
 0x9b8   : > { %6227 = vmatprep.subr.bf16.mxu1 %v6774_v27 }
 0x9ba   : > { %4402 = vmatpush1.bf16.msra.mxu0 %v8240_v10 }
 0x9bb   : > { %6203 = vmatprep.subr.bf16.mxu0 %v6775_v6  ;;  %6228 = vmatpush3.bf16.msra.mxu1 %v6776_v7 }
 0x9bc   : > { %6229 = vmatprep.subr.bf16.mxu1 %v6777_v8 }
 0x9bd   : > { %5655 = vmatmul.mubr.msk.bf16.vlgmr.msra.gmra.mxu0 %vm404_vm1, %v4383_v3 }
 0x9be   : > { %6204 = vmatpush3.bf16.msra.mxu0 %v6778_v9 }
 0x9bf   : > { %6205 = vmatprep.subr.bf16.mxu0 %v6779_v38  ;;  %6230 = vmatpush3.bf16.msra.mxu1 %v6780_v11 }
 0x9c0   : > { %6231 = vmatprep.subr.bf16.mxu1 %v6781_v26 }
 0x9c2   : > { %6206 = vmatpush3.bf16.msra.mxu0 %v6782_v13 }
 0x9c3   : > { %6207 = vmatprep.subr.bf16.mxu0 %v6783_v15  ;;  %6232 = vmatpush3.bf16.msra.mxu1 %v6784_v17 }
 0x9c4   : > { %6233 = vmatprep.subr.bf16.mxu1 %v6785_v18 }
 0x9c6   : > { %6208 = vmatpush3.bf16.msra.mxu0 %v6786_v19 }
 0x9c7   : > { %6209 = vmatprep.subr.bf16.mxu0 %v6787_v20  ;;  %6234 = vmatpush3.bf16.msra.mxu1 %v6788_v21 }
 0x9c8   : > { %6235 = vmatprep.subr.bf16.mxu1 %v6789_v50 }
 0x9ca   : > { %6210 = vmatpush3.bf16.msra.mxu0 %v6790_v23 }
 0x9cb   : > { %6211 = vmatprep.subr.bf16.mxu0 %v6791_v24  ;;  %6236 = vmatpush3.bf16.msra.mxu1 %v6792_v25  ;;  %v4577_v24 = vpop.permute.xlu1 %4576  ;;  %v6804_v25 = vld [vmem:[%s8777_s3 + $0x678] sm:$0xff]  }
 0x9cc   : > { %6237 = vmatprep.subr.bf16.mxu1 %v6793_v29  ;;  %v6805_v29 = vld [vmem:[%s8777_s3 + $0x638] sm:$0xff]  }
 0x9ce   : > { %6212 = vmatpush3.bf16.msra.mxu0 %v6794_v30  ;;  %v6810_v30 = vld [vmem:[%s8777_s3 + $0x660] sm:$0xff]  }
 0x9cf   : > { %6213 = vmatprep.subr.bf16.mxu0 %v6795_v31  ;;  %6238 = vmatpush3.bf16.msra.mxu1 %v6796_v16  ;;  %v6811_v31 = vld [vmem:[%s8777_s3 + $0x620] sm:$0xff]   ;;  %v6812_v16 = vld [vmem:[%s8777_s3 + $0x658] sm:$0xff]  }
 0x9d0   : > { %6239 = vmatprep.subr.bf16.mxu1 %v6797_v32  ;;  %v6813_v32 = vld [vmem:[%s8777_s3 + $0x618] sm:$0xff]  }
 0x9d2   : > { %6214 = vmatpush3.bf16.msra.mxu0 %v6798_v33  ;;  %v6814_v33 = vld [vmem:[%s8777_s3 + $0x650] sm:$0xff]  }
 0x9d3   : > { %6215 = vmatprep.subr.bf16.mxu0 %v6799_v34  ;;  %6240 = vmatpush3.bf16.msra.mxu1 %v6800_v52  ;;  %v6815_v34 = vld [vmem:[%s8777_s3 + $0x610] sm:$0xff]   ;;  %v6816_v52 = vld [vmem:[%s8777_s3 + $0x648] sm:$0xff]  }
 0x9d6   : > { %6216 = vmatpush3.bf16.msra.mxu0 %v6801_v36  ;;  %v6817_v36 = vld [vmem:[%s8777_s3 + $0x608] sm:$0xff]  }
 0x9d7   : > { %6217 = vmatprep.subr.bf16.mxu0 %v6802_v37  ;;  %v6818_v37 = vld [vmem:[%s8777_s3 + $0x640] sm:$0xff]  }
 0x9da   : > { %6218 = vmatpush3.bf16.msra.mxu0 %v6803_v40  ;;  %v6819_v40 = vld [vmem:[%s8777_s3 + $0x600] sm:$0xff]  }
 0x9db   : > { %5658 = vmatprep.subr.msk.bf16.mxu0 %vm408_vm0, %v6926_v1 }
 0xa6d   : > { %v6197_v41 = vpop.f32.mrf.mxu1 }
 0xa6f   : > { %v6198_v43 = vpop.f32.mrf.mxu1 }
 0xa70   : > { %v6199_v44 = vadd.f32 %v6198_v43, %v6197_v41  ;;  %v6858_v41 = vmov 0.0   ;;  %v6597_v43 = vld [vmem:[%s8779_s5 + $0x78] sm:$0xff]  }
 0xa71   : > { %v6200_v45 = vpop.f32.mrf.mxu1  ;;  %6287 = vmatprep.subr.bf16.mxu1 %v6858_v41 }
 0xa73   : > { %v6201_v46 = vpop.f32.mrf.mxu1 }
 0xa74   : > { %v6202_v49 = vadd.f32 %v6201_v46, %v6200_v45  ;;  %v6599_v45 = vld [vmem:[%s8779_s5 + $0x68] sm:$0xff]   ;;  %v6600_v46 = vld [vmem:[%s8779_s5 + $0x60] sm:$0xff]  }
 0xa75   : > { %v6175_v51 = vpop.f32.mrf.mxu0  ;;  %v4518_v14 = vpop.f32.mrf.mxu1 }
 0xa76   : > { %v4519_v53 = vadd.f32 %v4518_v14, %v7067_v47 }
 0xa77   : > { %v6176_v2 = vpop.f32.mrf.mxu0  ;;  %v4520_v54 = vpop.f32.mrf.mxu1 }
 0xa78   : > { %v6177_v55 = vadd.f32 %v6176_v2, %v6175_v51  ;;  %v4521_v28 = vadd.f32 %v4520_v54, %v7069_v48  ;;  %v4527_v59 = vmax.f32 %v4519_v53, 0.0 }
 0xa79   : > { %v6178_v56 = vpop.f32.mrf.mxu0  ;;  %v4522_v22 = vpop.f32.mrf.mxu1 }
 0xa7a   : > { %v4283_v57 = vadd.f32 %v6177_v55, %v8483_v39  ;;  %v4523_v1 = vadd.f32 %v4522_v22, %v7067_v47  ;;  %v4528_v61 = vmax.f32 %v4521_v28, 0.0 }
 0xa7b   : > { %v6179_v58 = vpop.f32.mrf.mxu0  ;;  %v4524_v62 = vpop.f32.mrf.mxu1 }
 0xa7c   : > { %v8605_v35 = vadd.f32 %v6199_v44, %v4283_v57  ;;  %v6180_v0 = vadd.f32 %v6179_v58, %v6178_v56  ;;  %v4529_v42 = vmax.f32 %v4523_v1, 0.0  ;;  %v4525_v27 = vadd.f32 %v4524_v62, %v7069_v48  ;;  %v6598_v44 = vld [vmem:[%s8779_s5 + $0x70] sm:$0xff]  }
 0xa7d   : > { %v4421_v3 = vpop.f32.mrf.mxu0 }
 0xa7e   : > { %v4284_v6 = vadd.f32 %v6180_v0, %v8487_v63  ;;  %v4530_v7 = vmax.f32 %v4525_v27, 0.0  ;;  %v4531_v9 = vpack.c.bf16 %v4529_v42, %v4527_v59  ;;  %v4422_v15 = vadd.f32 %v4421_v3, %v7067_v47 }
 0xa7f   : > { %v4423_v8 = vpop.f32.mrf.mxu0 }
 0xa80   : > { %v8609_v38 = vadd.f32 %v6202_v49, %v4284_v6  ;;  %v4532_v39 = vpack.c.bf16 %v4530_v7, %v4528_v61  ;;  %v4424_v26 = vadd.f32 %v4423_v8, %v7069_v48  ;;  %v4430_v21 = vmax.f32 %v4422_v15, 0.0  ;;  %v6589_v6 = vld [vmem:[%s8779_s5 + $0x38] sm:$0xff]   ;;  %v6592_v8 = vld [vmem:[%s8779_s5 + $0x20] sm:$0xff]   ;;  %v6603_v15 = vld [vmem:[%s8779_s5 + $0x48] sm:$0xff]  }
 0xa81   : > { %v4425_v11 = vpop.f32.mrf.mxu0 }
 0xa82   : > { %v4426_v13 = vadd.f32 %v4425_v11, %v7067_v47  ;;  %4565 = vmatprep.mubr.bf16.mxu1 %v4532_v39  ;;  %v4431_v63 = vmax.f32 %v4424_v26, 0.0  ;;  %v6595_v39 = vld [vmem:[%s8779_s5 + $0x8] sm:$0xff]   ;;  %v6596_v11 = vld [vmem:[%s8779_s5] sm:$0xff]   ;;  %v6601_v26 = vld [vmem:[%s8779_s5 + $0x58] sm:$0xff]  }
 0xa83   : > { %v4427_v17 = vpop.f32.mrf.mxu0  ;;  %4566 = vmatmul.mubr.bf16.vlgmr.msra.gmra.mxu1 %v4531_v9  ;;  %v6593_v9 = vld [vmem:[%s8779_s5 + $0x18] sm:$0xff]  }
 0xa84   : > { %v4428_v18 = vadd.f32 %v4427_v17, %v7069_v48  ;;  %v4432_v19 = vmax.f32 %v4426_v13, 0.0  ;;  %6303 = vmatprep.mubr.msk.bf16.mxu1 %vm6859_vm3, %v6858_v41  ;;  %6288 = vmatpush3.bf16.msra.mxu1 %v6597_v43  ;;  %v6602_v13 = vld [vmem:[%s8779_s5 + $0x50] sm:$0xff]  }
 0xa85   : > { %6289 = vmatprep.subr.bf16.mxu1 %v6858_v41 }
 0xa86   : > { %v4433_v20 = vmax.f32 %v4428_v18, 0.0  ;;  %v4434_v23 = vpack.c.bf16 %v4432_v19, %v4430_v21 }
 0xa88   : > { %v4435_v50 = vpack.c.bf16 %v4433_v20, %v4431_v63  ;;  %6290 = vmatpush3.bf16.msra.mxu1 %v6598_v44  ;;  %v5692_v44 = vld [vmem:[%s8780_s6] ss:$0 sm:$0xff] }
 0xa89   : > { %6291 = vmatprep.subr.bf16.mxu1 %v6858_v41 }
 0xa8a   : > { %4468 = vmatprep.mubr.bf16.mxu0 %v4435_v50 }
 0xa8b   : > { %4469 = vmatmul.mubr.bf16.vlgmr.msra.gmra.mxu0 %v4434_v23 }
 0xa8c   : > { %4594 = vmatpush1.bf16.msra.mxu0 %v6937_v5  ;;  %4613 = vmatprep.mubr.bf16.mxu0 %v6845_v4  ;;  %v6806_v4 = vld [vmem:[%s8777_s3 + $0x670] sm:$0xff]  }
 0xa8d   : > { %4595 = vmatprep.subr.bf16.mxu0 %v8253_v12  ;;  %v6807_v5 = vld [vmem:[%s8777_s3 + $0x630] sm:$0xff]   ;;  %v6809_v12 = vld [vmem:[%s8777_s3 + $0x628] sm:$0xff]   ;;  %6292 = vmatpush3.bf16.msra.mxu1 %v6599_v45 }
 0xa8e   : > { %6293 = vmatprep.subr.bf16.mxu1 %v6858_v41 }
 0xa90   : > { %4596 = vmatpush1.bf16.msra.mxu0 %v8240_v10  ;;  %v6808_v10 = vld [vmem:[%s8777_s3 + $0x668] sm:$0xff]  }
 0xa91   : > { %6247 = vmatprep.subr.bf16.mxu0 %v6804_v25  ;;  %6294 = vmatpush3.bf16.msra.mxu1 %v6600_v46  ;;  %v4882_v46 = vld [vmem:[%s8781_s7] sm:$0xff] }
 0xa92   : > { %6295 = vmatprep.subr.bf16.mxu1 %v6858_v41 }
 0xa93   : > { %5659 = vmatmul.mubr.msk.bf16.vlgmr.msra.gmra.mxu0 %vm404_vm1, %v4577_v24 }
 0xa94   : > { %6248 = vmatpush3.bf16.msra.mxu0 %v6805_v29 }
 0xa95   : > { %6249 = vmatprep.subr.bf16.mxu0 %v6806_v4  ;;  %6296 = vmatpush3.bf16.msra.mxu1 %v6601_v26 }
 0xa96   : > { %6297 = vmatprep.subr.bf16.mxu1 %v6858_v41 }
 0xa98   : > { %6250 = vmatpush3.bf16.msra.mxu0 %v6807_v5 }
 0xa99   : > { %6251 = vmatprep.subr.bf16.mxu0 %v6808_v10  ;;  %6298 = vmatpush3.bf16.msra.mxu1 %v6602_v13 }
 0xa9a   : > { %6299 = vmatprep.subr.bf16.mxu1 %v6858_v41 }
 0xa9c   : > { %6252 = vmatpush3.bf16.msra.mxu0 %v6809_v12 }
 0xa9d   : > { %6253 = vmatprep.subr.bf16.mxu0 %v6810_v30  ;;  %6300 = vmatpush3.bf16.msra.mxu1 %v6603_v15  ;;  %v6820_v30 = vld [vmem:[%s8778_s4] ss:$0 sm:$0xff] }
 0xa9e   : > { %6301 = vmatprep.subr.bf16.mxu1 %v6858_v41 }
 0xaa0   : > { %6254 = vmatpush3.bf16.msra.mxu0 %v6811_v31 }
 0xaa1   : > { %6255 = vmatprep.subr.bf16.mxu0 %v6812_v16 }
 0xaa4   : > { %6256 = vmatpush3.bf16.msra.mxu0 %v6813_v32 }
 0xaa5   : > { %6257 = vmatprep.subr.bf16.mxu0 %v6814_v33 }
 0xaa8   : > { %6258 = vmatpush3.bf16.msra.mxu0 %v6815_v34 }
 0xaa9   : > { %6259 = vmatprep.subr.bf16.mxu0 %v6816_v52 }
 0xaac   : > { %6260 = vmatpush3.bf16.msra.mxu0 %v6817_v36 }
 0xaad   : > { %6261 = vmatprep.subr.bf16.mxu0 %v6818_v37 }
 0xab0   : > { %6262 = vmatpush3.bf16.msra.mxu0 %v6819_v40 }
 0xab1   : > { %6307 = vmatprep.subr.bf16.mxu0 %v6858_v41 }
 0xb43   : > { %v6241_v17 = vpop.f32.mrf.mxu1 }
 0xb45   : > { %v6242_v18 = vpop.f32.mrf.mxu1 }
 0xb46   : > { %v6243_v63 = vadd.f32 %v6242_v18, %v6241_v17 }
 0xb47   : > { %v6244_v19 = vpop.f32.mrf.mxu1 }
 0xb49   : > { %v6245_v20 = vpop.f32.mrf.mxu1 }
 0xb4a   : > { %v6246_v24 = vadd.f32 %v6245_v20, %v6244_v19 }
 0xb4b   : > { %v6219_v49 = vpop.f32.mrf.mxu0 }
 0xb4d   : > { %v6220_v51 = vpop.f32.mrf.mxu0 }
 0xb4e   : > { %v6221_v14 = vadd.f32 %v6220_v51, %v6219_v49 }
 0xb4f   : > { %v6222_v2 = vpop.f32.mrf.mxu0 }
 0xb50   : > { %v8689_v53 = vadd.f32 %v6221_v14, %v8605_v35 }
 0xb51   : > { %v6223_v54 = vpop.f32.mrf.mxu0 }
 0xb52   : > { %v6224_v55 = vadd.f32 %v6223_v54, %v6222_v2  ;;  %v4574_v23 = vadd.f32 %v6243_v63, %v8689_v53  ;;  %v4883_v54 = vld [vmem:[%s8781_s7 + $0x8] sm:$0xff] }
 0xb53   : > { %v4615_v28 = vpop.f32.mrf.mxu0 }
 0xb54   : > { %v8692_v56 = vadd.f32 %v6224_v55, %v8609_v38  ;;  %v4616_v59 = vadd.f32 %v4615_v28, %v7067_v47  ;;  %v6594_v38 = vld [vmem:[%s8779_s5 + $0x10] sm:$0xff]  }
 0xb55   : > { %v4617_v22 = vpop.f32.mrf.mxu0 }
 0xb56   : > { %v4618_v1 = vadd.f32 %v4617_v22, %v7069_v48  ;;  %v4624_v27 = vmax.f32 %v4616_v59, 0.0  ;;  %v4575_v10 = vadd.f32 %v6246_v24, %v8692_v56 }
 0xb57   : > { %v4619_v57 = vpop.f32.mrf.mxu0 }
 0xb58   : > { %v4620_v58 = vadd.f32 %v4619_v57, %v7067_v47  ;;  %v4625_v35 = vmax.f32 %v4618_v1, 0.0  ;;  %v6590_v47 = vld [vmem:[%s8779_s5 + $0x30] sm:$0xff]  }
 0xb59   : > { %v4621_v61 = vpop.f32.mrf.mxu0 }
 0xb5a   : > { %v4622_v62 = vadd.f32 %v4621_v61, %v7069_v48  ;;  %v4626_v0 = vmax.f32 %v4620_v58, 0.0  ;;  %v6591_v48 = vld [vmem:[%s8779_s5 + $0x28] sm:$0xff]  }
 0xb5c   : > { %v4627_v42 = vmax.f32 %v4622_v62, 0.0  ;;  %v4628_v7 = vpack.c.bf16 %v4626_v0, %v4624_v27 }
 0xb5e   : > { %v4629_v3 = vpack.c.bf16 %v4627_v42, %v4625_v35 }
 0xb60   : > { %4662 = vmatprep.mubr.bf16.mxu0 %v4629_v3 }
 0xb61   : > { %4663 = vmatmul.mubr.bf16.vlgmr.msra.gmra.mxu0 %v4628_v7 }
 0xb62   : > { %6308 = vmatpush3.bf16.msra.mxu0 %v6589_v6  ;;  %6323 = vmatprep.mubr.msk.bf16.mxu0 %vm6859_vm3, %v6858_v41 }
 0xb63   : > { %6309 = vmatprep.subr.bf16.mxu0 %v6858_v41 }
 0xb66   : > { %6310 = vmatpush3.bf16.msra.mxu0 %v6590_v47 }
 0xb67   : > { %6311 = vmatprep.subr.bf16.mxu0 %v6858_v41 }
 0xb6a   : > { %6312 = vmatpush3.bf16.msra.mxu0 %v6591_v48 }
 0xb6b   : > { %6313 = vmatprep.subr.bf16.mxu0 %v6858_v41 }
 0xb6e   : > { %6314 = vmatpush3.bf16.msra.mxu0 %v6592_v8 }
 0xb6f   : > { %6315 = vmatprep.subr.bf16.mxu0 %v6858_v41 }
 0xb72   : > { %6316 = vmatpush3.bf16.msra.mxu0 %v6593_v9 }
 0xb73   : > { %6317 = vmatprep.subr.bf16.mxu0 %v6858_v41 }
 0xb76   : > { %6318 = vmatpush3.bf16.msra.mxu0 %v6594_v38 }
 0xb77   : > { %6319 = vmatprep.subr.bf16.mxu0 %v6858_v41 }
 0xb7a   : > { %6320 = vmatpush3.bf16.msra.mxu0 %v6595_v39 }
 0xb7b   : > { %6321 = vmatprep.subr.bf16.mxu0 %v6858_v41 }
 0xb7e   : > { %6322 = vmatpush3.bf16.msra.mxu0 %v6596_v11 }
 0xb81   : > { %6324 = vmatmul.mubr.bf16.vlgmr.msra.gmra.mxu0 %v8086_v60  ;;  %v6604_v60 = vld [vmem:[%s8779_s5 + $0x40] sm:$0xff]  }
 0xb82   : > { %6302 = vmatpush3.bf16.msra.mxu1 %v6604_v60 }
 0xc21   : > { %v6263_v21 = vpop.f32.mrf.mxu0 }
 0xc23   : > { %v6264_v50 = vpop.f32.mrf.mxu0 }
 0xc24   : > { %v6265_v25 = vadd.f32 %v6264_v50, %v6263_v21 }
 0xc25   : > { %v6266_v29 = vpop.f32.mrf.mxu0 }
 0xc26   : > { %v4671_v4 = vadd.f32 %v6265_v25, %v4574_v23 }
 0xc27   : > { %v6267_v5 = vpop.f32.mrf.mxu0 }
 0xc28   : > { %v6268_v12 = vadd.f32 %v6267_v5, %v6266_v29  ;;  %v4673_v31 = vadd.f32 %v6820_v30, %v4671_v4 }
 0xc2a   : > { %v4672_v16 = vadd.f32 %v6268_v12, %v4575_v10  ;;  %v4675_v33 = vmax.f32 %v4673_v31, 0.0 }
 0xc2c   : > { %v4674_v32 = vadd.f32 %v6820_v30, %v4672_v16 }
 0xc2e   : > { %v4676_v34 = vmax.f32 %v4674_v32, 0.0 }
 0xc30   : > { %v4677_v52 = vpack.c.bf16 %v4676_v34, %v4675_v33 }
 0xc32   : > { %6304 = vmatmul.mubr.bf16.vlgmr.msra.gmra.mxu1 %v4677_v52 }
 0xc41   : > { %v4866_v36 = vpop.f32.mrf.mxu0 }
 0xc43   : > { %v6325_v37 = vpop.f32.mrf.mxu0 }
 0xc45   : > { %v4869_v40 = vpop.f32.mrf.mxu0 }
 0xc47   : > { %v6326_v41 = vpop.f32.mrf.mxu0 }
 0xcf2   : > { %v4777_v43 = vpop.f32.mrf.mxu1 }
 0xcf3   : > { %v4867_v45 = vadd.f32 %v4866_v36, %v4777_v43 }
 0xcf4   : > { %v6305_v49 = vpop.f32.mrf.mxu1 }
 0xcf5   : > { %v4880_v51 = vadd.f32 %v5692_v44, %v4867_v45 }
 0xcf6   : > { %v4780_v14 = vpop.f32.mrf.mxu1 }
 0xcf7   : > { %v4884_v2 = vadd.f32 %v4882_v46, %v4880_v51  ;;  %v4870_v53 = vadd.f32 %v4869_v40, %v4780_v14 }
 0xcf8   : > { %v6306_v55 = vpop.f32.mrf.mxu1 }
 0xcf9   : > { %4886 = vst [vmem:[%s363_s15] sm:$0xff] %v4884_v2  ;;  %v4881_v28 = vadd.f32 %v5692_v44, %v4870_v53 }
 0xcfb   : > { %v4885_v56 = vadd.f32 %v4883_v54, %v4881_v28 }
 0xcfd   : > { %4887 = vst [vmem:[%s363_s15 + $0x8] sm:$0xff] %v4885_v56 }
 0xcfe PF: > { %s18_s29 = sadd.s32 1, %s6843_s29   ;;  %s8793_s27 = smov %s6839_s28 }
 0xcff   : > { %p15_p5 = scmp.ge.s32.totalorder %s18_s29, 4   ;;  %s8794_s28 = smov %s8796_s30 }
 0xd01   :  { %17 = sbr.rel (!%p15_p5) target bundleno = 2 (0x2), region = 98 }

// kernel: _forward.1
= control target key start
LH: loop header
LB: loop body
LE: loop exit
PB: predicated region body
PF: predicated region fallthrough
CT: control target
= control target key end

     0   :  { %s6905_s27 = smov 0   ;;  %s6907_s28 = smov 0   ;;  %s8774_s0 = inlined_call_operand.vmem [shape: bf16[2,1,32,234], index: 0, kind: input, shape index: {}]   ;;  %s8775_s1 = inlined_call_operand.vmem [shape: bf16[18,256], index: 1, kind: input, shape index: {}]   ;;  %s8776_s2 = inlined_call_operand.vmem [shape: f32[1,256], index: 2, kind: input, shape index: {}]   ;;  %s8777_s3 = inlined_call_operand.vmem [shape: bf16[13,256,128], index: 3, kind: input, shape index: {}]   ;;  %s8778_s4 = inlined_call_operand.vmem [shape: f32[1,128], index: 4, kind: input, shape index: {}]   ;;  %s8779_s5 = inlined_call_operand.vmem [shape: bf16[2,128,128], index: 5, kind: input, shape index: {}]   ;;  %s8780_s6 = inlined_call_operand.vmem [shape: f32[1,128], index: 6, kind: input, shape index: {}]   ;;  %s8781_s7 = inlined_call_operand.vmem [shape: f32[16,128], index: 7, kind: input, shape index: {}]   ;;  %s8782_s8 = inlined_call_operand.vmem [shape: f32[2,16,128], index: 8, kind: output, shape index: {}]  }
   0x1   :  { %s6909_s29 = smov 0  }
   0x2 LB: > { %s30_s30 = sadd.s32 1, %s6839_s28  ;;  %p4998_p0 = scmp.ge.s32.totalorder %s6843_s29, 1  ;;  %s6843_s29 = sphi %s6909_s29, %s18_s29   ;;  %s6839_s28 = sphi %s6907_s28, %s8794_s28   ;;  %s6835_s27 = sphi %s6905_s27, %s8793_s27  }
   0x3   : > { %p32_p1 = scmp.ge.s32.totalorder %s30_s30, 2  ;;  %p293_p2 = scmp.lt.s32.totalorder %s6843_s29, 3 }
   0x5   : > { %s8796_s30 = smov (%p32_p1, %s30_s30), 0  ;;  %p294_p3 = pnand %p4998_p0, %p293_p2 }
   0x6   : > { %p340_p4 = scmp.lt.s32.totalorder (!%p294_p3), %s6835_s27, 1  ;;  %s6846_s19 = smov (!%p294_p3), 110  }
   0x7   : > { %297 = sbr.rel (%p294_p3) target bundleno = 3326 (0xcfe), region = 52  ;;  %s6847_s20 = smov (!%p294_p3), 92  }
   0x8   : > { %s6848_s23 = smov (!%p294_p3), 74   ;;  %s6849_s10 = smov (!%p294_p3), 56  }
   0x9   : > { %s6850_s12 = smov (!%p294_p3), 38   ;;  %s6852_s24 = smov (!%p294_p3), 20  }
   0xa   : > { %s8783_s13 = smov (!%p294_p3), 112   ;;  %s8784_s25 = smov (!%p294_p3), 94  }
   0xb   : > { %s8786_s17 = smov (!%p294_p3), 58   ;;  %s8788_s16 = smov (!%p294_p3), 112  }
   0xc   : > { %v368_v0 = vld [vmem:[%s8775_s1 + $0x10] sm:$0x11]  ;;  %vm408_vm0 = vcmask 1040384   ;;  %v6368_v3 = vld [vmem:[%s8775_s1 + $0x4] ss:$8 sps:$4 sm:$0xff]   ;;  %s8798_s27 = smov (!%p340_p4, %s6835_s27), 1  ;;  %v374_v37 = vlaneseq }
   0xd   : > { %v6926_v1 = vcombine.high %v368_v0, %v368_v0  ;;  %v5006_v2 = vcombine.low %v368_v0, %v368_v0  ;;  %v6845_v4 = vmov 0   ;;  %v6370_v6 = vld [vmem:[%s8775_s1] ss:$8 sps:$4 sm:$0xff]   ;;  %s5695_s15 = sshll.u32 %s8798_s27, 5  ;;  %vm404_vm1 = vcmask 146432   ;;  %v6372_v8 = vld [vmem:[%s8777_s3 + $0x78] sm:$0xff]  }
   0xe   : > { %447 = vmatprep.mubr.bf16.mxu1 %v6845_v4  ;;  %s6947_s18 = scalar_lea.vmem %s8774_s0, %s5695_s15  ;;  %v6388_v9 = vld [vmem:[%s8777_s3 + $0xf8] sm:$0xff]   ;;  %v6390_v11 = vld [vmem:[%s8777_s3 + $0xf0] sm:$0xff]   ;;  %v6392_v13 = vld [vmem:[%s8777_s3 + $0xe8] sm:$0xff]   ;;  %v375_v40 = vshrl.u32 %v374_v37, 7  ;;  %s6851_s15 = smov 2   ;;  %vm2001_vm2 = vcmask 15360  }
   0xf   : > { %5008 = vmatprep.subr.msk.bf16.mxu1 %vm408_vm0, %v6926_v1  ;;  %v6937_v5 = vsel %vm408_vm0, %v5006_v2, 0  ;;  %v6371_v7 = vld [vmem:[%s6947_s18] ss:$8 sps:$4 sm:$0xff]   ;;  %v6389_v10 = vld [vmem:[%s8777_s3 + $0xb8] sm:$0xff]   ;;  %5697 = vmatprep.subr.bf16.mxu0 %v6388_v9  ;;  %v6391_v12 = vld [vmem:[%s8777_s3 + $0xb0] sm:$0xff]   ;;  %s8789_s21 = smov 94  }
  0x10   : > { %428 = vmatpush1.bf16.msra.mxu1 %v6937_v5  ;;  %496 = vrot.lane.b32.xlu0 %v6371_v7, %s6846_s19  ;;  %v6393_v14 = vld [vmem:[%s8777_s3 + $0xa8] sm:$0xff]   ;;  %v6394_v15 = vld [vmem:[%s8777_s3 + $0xe0] sm:$0xff]   ;;  %v6396_v17 = vld [vmem:[%s8777_s3 + $0xd8] sm:$0xff]   ;;  %v376_v44 = vsub.s32 0, %v375_v40  ;;  %v380_v46 = vsub.s32 1, %v375_v40  ;;  %vm6859_vm3 = vmmov 0  }
  0x11   : > { %429 = vmatprep.subr.bf16.mxu1 %v6368_v3  ;;  %857 = vrot.lane.b32.xlu1 %v6371_v7, %s6847_s20  ;;  %v6395_v16 = vld [vmem:[%s8777_s3 + $0xa0] sm:$0xff]   ;;  %v6397_v18 = vld [vmem:[%s8777_s3 + $0x98] sm:$0xff]   ;;  %v6374_v20 = vld [vmem:[%s8777_s3 + $0x70] sm:$0xff]  }
  0x12   : > { %5698 = vmatpush3.bf16.msra.mxu0 %v6389_v10  ;;  %v6373_v19 = vld [vmem:[%s8777_s3 + $0x38] sm:$0xff]   ;;  %v6375_v22 = vld [vmem:[%s8777_s3 + $0x30] sm:$0xff]   ;;  %v6376_v23 = vld [vmem:[%s8777_s3 + $0x68] sm:$0xff]  }
  0x13   : > { %5699 = vmatprep.subr.bf16.mxu0 %v6390_v11  ;;  %v6377_v24 = vld [vmem:[%s8777_s3 + $0x28] sm:$0xff]   ;;  %v6378_v25 = vld [vmem:[%s8777_s3 + $0x60] sm:$0xff]   ;;  %v6380_v27 = vld [vmem:[%s8777_s3 + $0x58] sm:$0xff]  }
  0x14   : > { %430 = vmatpush1.bf16.msra.mxu1 %v6370_v6  ;;  %1083 = vrot.lane.b32.xlu0 %v6371_v7, %s6848_s23  ;;  %v6379_v26 = vld [vmem:[%s8777_s3 + $0x20] sm:$0xff]   ;;  %v6381_v28 = vld [vmem:[%s8777_s3 + $0x18] sm:$0xff]   ;;  %v6382_v29 = vld [vmem:[%s8777_s3 + $0x50] sm:$0xff]  }
  0x15   : > { %5010 = vmatprep.subr.msk.bf16.mxu1 %vm408_vm0, %v6926_v1  ;;  %v6383_v30 = vld [vmem:[%s8777_s3 + $0x10] sm:$0xff]   ;;  %v6384_v31 = vld [vmem:[%s8777_s3 + $0x48] sm:$0xff]   ;;  %v6386_v33 = vld [vmem:[%s8777_s3 + $0x40] sm:$0xff]  }
  0x16   : > { %5700 = vmatpush3.bf16.msra.mxu0 %v6391_v12  ;;  %v6385_v32 = vld [vmem:[%s8777_s3 + $0x8] sm:$0xff]   ;;  %v6387_v34 = vld [vmem:[%s8777_s3] sm:$0xff]   ;;  %v6398_v35 = vld [vmem:[%s8777_s3 + $0xd0] sm:$0xff]  }
  0x17   : > { %5009 = vmatmul.mubr.msk.bf16.vlgmr.msra.gmra.mxu1 %vm404_vm1, %v6371_v7  ;;  %5701 = vmatprep.subr.bf16.mxu0 %v6392_v13  ;;  %v6399_v36 = vld [vmem:[%s8777_s3 + $0x90] sm:$0xff]   ;;  %v6400_v38 = vld [vmem:[%s8777_s3 + $0xc8] sm:$0xff]   ;;  %v6402_v41 = vld [vmem:[%s8777_s3 + $0xc0] sm:$0xff]  }
  0x18   : > { %514 = vmatpush1.bf16.msra.mxu1 %v6937_v5  ;;  %533 = vmatprep.mubr.bf16.mxu1 %v6845_v4  ;;  %v6401_v39 = vld [vmem:[%s8777_s3 + $0x88] sm:$0xff]   ;;  %v6403_v43 = vld [vmem:[%s8777_s3 + $0x80] sm:$0xff]   ;;  %v6404_v0 = vld [vmem:[%s8777_s3 + $0x178] sm:$0xff]  }
  0x19   : > { %515 = vmatprep.subr.bf16.mxu1 %v6368_v3  ;;  %v7055_v42 = vld [vmem:[%s6947_s18] ss:$8 sps:$4 sm:$0xff]   ;;  %v7080_v63 = vld [vmem:[%s8775_s1 + $0x4] ss:$8 sps:$4 sm:$0xff]   ;;  %v6406_v7 = vld [vmem:[%s8777_s3 + $0x170] sm:$0xff]  }
  0x1a   : > { %5702 = vmatpush3.bf16.msra.mxu0 %v6393_v14  ;;  %1309 = vrot.lane.b32.xlu0 %v7055_v42, %s6849_s10  ;;  %v369_v45 = vld [vmem:[%s8776_s2] sm:$0x3]  ;;  %v6408_v9 = vld [vmem:[%s8777_s3 + $0x168] sm:$0xff]   ;;  %v6412_v13 = vld [vmem:[%s8777_s3 + $0x158] sm:$0xff]  }
  0x1b   : > { %5703 = vmatprep.subr.bf16.mxu0 %v6394_v15  ;;  %v7067_v47 = vrot.slane %v369_v45, %v376_v44  ;;  %v7069_v48 = vrot.slane %v369_v45, %v380_v46  ;;  %v7089_v2 = vld [vmem:[%s8775_s1] ss:$8 sps:$4 sm:$0xff]   ;;  %v6413_v14 = vld [vmem:[%s8777_s3 + $0x118] sm:$0xff]   ;;  %v6414_v15 = vld [vmem:[%s8777_s3 + $0x150] sm:$0xff]   ;;  %1535 = vrot.lane.b32.xlu1 %v7055_v42, %s6850_s12 }
  0x1c   : > { %516 = vmatpush1.bf16.msra.mxu1 %v6370_v6  ;;  %v6405_v6 = vld [vmem:[%s8777_s3 + $0x138] sm:$0xff]   ;;  %v6409_v10 = vld [vmem:[%s8777_s3 + $0x128] sm:$0xff]   ;;  %v6410_v11 = vld [vmem:[%s8777_s3 + $0x160] sm:$0xff]  }
  0x1d   : > { %5719 = vmatprep.subr.bf16.mxu1 %v6372_v8  ;;  %v6407_v8 = vld [vmem:[%s8777_s3 + $0x130] sm:$0xff]   ;;  %v6411_v12 = vld [vmem:[%s8777_s3 + $0x120] sm:$0xff]   ;;  %v6421_v37 = vld [vmem:[%s8777_s3 + $0x1b8] sm:$0xff]  }
  0x1e   : > { %5704 = vmatpush3.bf16.msra.mxu0 %v6395_v16  ;;  %v6415_v16 = vld [vmem:[%s8777_s3 + $0x110] sm:$0xff]   ;;  %v6424_v40 = vld [vmem:[%s8777_s3 + $0x1e8] sm:$0xff]   ;;  %v6427_v44 = vld [vmem:[%s8777_s3 + $0x1a0] sm:$0xff]  }
  0x1f   : > { %5705 = vmatprep.subr.bf16.mxu0 %v6396_v17  ;;  %v6416_v17 = vld [vmem:[%s8777_s3 + $0x148] sm:$0xff]   ;;  %v6428_v45 = vld [vmem:[%s8777_s3 + $0x1d8] sm:$0xff]  }
  0x20   : > { %v6429_v46 = vld [vmem:[%s8777_s3 + $0x198] sm:$0xff]  }
  0x22   : > { %5706 = vmatpush3.bf16.msra.mxu0 %v6397_v18  ;;  %v6417_v18 = vld [vmem:[%s8777_s3 + $0x108] sm:$0xff]  }
  0x23   : > { %5707 = vmatprep.subr.bf16.mxu0 %v6398_v35  ;;  %v6420_v35 = vld [vmem:[%s8777_s3 + $0x1f8] sm:$0xff]  }
  0x26   : > { %5708 = vmatpush3.bf16.msra.mxu0 %v6399_v36 }
  0x27   : > { %5709 = vmatprep.subr.bf16.mxu0 %v6400_v38  ;;  %v6422_v38 = vld [vmem:[%s8777_s3 + $0x1f0] sm:$0xff]  }
  0x2a   : > { %5710 = vmatpush3.bf16.msra.mxu0 %v6401_v39  ;;  %v6423_v39 = vld [vmem:[%s8777_s3 + $0x1b0] sm:$0xff]  }
  0x2b   : > { %5711 = vmatprep.subr.bf16.mxu0 %v6402_v41  ;;  %v6425_v41 = vld [vmem:[%s8777_s3 + $0x1a8] sm:$0xff]  }
  0x2e   : > { %5712 = vmatpush3.bf16.msra.mxu0 %v6403_v43  ;;  %v6426_v43 = vld [vmem:[%s8777_s3 + $0x1e0] sm:$0xff]  }
  0x2f   : > { %5126 = vmatprep.subr.msk.bf16.mxu0 %vm408_vm0, %v6926_v1 }
  0x82   : > { %v497_v21 = vpop.permute.xlu0 %496 }
  0x83   : > { %5011 = vmatmul.mubr.msk.bf16.vlgmr.msra.gmra.mxu1 %vm404_vm1, %v497_v21  ;;  %v858_v3 = vpop.permute.xlu1 %857 }
  0x84   : > { %5720 = vmatpush3.bf16.msra.mxu1 %v6373_v19  ;;  %v6418_v19 = vld [vmem:[%s8777_s3 + $0x140] sm:$0xff]  }
  0x85   : > { %5721 = vmatprep.subr.bf16.mxu1 %v6374_v20  ;;  %v6419_v20 = vld [vmem:[%s8777_s3 + $0x100] sm:$0xff]  }
  0x86   : > { %v1084_v36 = vpop.permute.xlu0 %1083 }
  0x88   : > { %5722 = vmatpush3.bf16.msra.mxu1 %v6375_v22 }
  0x89   : > { %5723 = vmatprep.subr.bf16.mxu1 %v6376_v23 }
  0x8c   : > { %5724 = vmatpush3.bf16.msra.mxu1 %v6377_v24 }
  0x8d   : > { %5725 = vmatprep.subr.bf16.mxu1 %v6378_v25 }
  0x90   : > { %5726 = vmatpush3.bf16.msra.mxu1 %v6379_v26 }
  0x91   : > { %5727 = vmatprep.subr.bf16.mxu1 %v6380_v27 }
  0x94   : > { %5728 = vmatpush3.bf16.msra.mxu1 %v6381_v28 }
  0x95   : > { %5729 = vmatprep.subr.bf16.mxu1 %v6382_v29 }
  0x98   : > { %5730 = vmatpush3.bf16.msra.mxu1 %v6383_v30 }
  0x99   : > { %5731 = vmatprep.subr.bf16.mxu1 %v6384_v31 }
  0x9c   : > { %5732 = vmatpush3.bf16.msra.mxu1 %v6385_v32 }
  0x9d   : > { %5733 = vmatprep.subr.bf16.mxu1 %v6386_v33 }
  0xa0   : > { %5734 = vmatpush3.bf16.msra.mxu1 %v6387_v34 }
  0xa1   : > { %5076 = vmatprep.subr.msk.bf16.mxu1 %vm408_vm0, %v6926_v1 }
  0xd7   : > { %v449_v49 = vpop.f32.mrf.mxu1 }
  0xd8   : > { %v450_v50 = vadd.f32 %v449_v49, %v7067_v47  ;;  %v6430_v49 = vld [vmem:[%s8777_s3 + $0x1d0] sm:$0xff]  }
  0xd9   : > { %v451_v51 = vpop.f32.mrf.mxu1 }
  0xda   : > { %v452_v52 = vadd.f32 %v451_v51, %v7069_v48  ;;  %v458_v55 = vmax.f32 %v450_v50, 0.0  ;;  %v6431_v50 = vld [vmem:[%s8777_s3 + $0x190] sm:$0xff]   ;;  %v6432_v51 = vld [vmem:[%s6947_s18] ss:$8 sps:$4 sm:$0xff]  }
  0xdb   : > { %v453_v53 = vpop.f32.mrf.mxu1  ;;  %1997 = vrot.lane.b32.xlu1 %v6432_v51, %s6851_s15 }
  0xdc   : > { %v454_v54 = vadd.f32 %v453_v53, %v7067_v47  ;;  %v459_v57 = vmax.f32 %v452_v52, 0.0  ;;  %v6434_v52 = vld [vmem:[%s8777_s3 + $0x1c8] sm:$0xff]  }
  0xdd   : > { %v455_v56 = vpop.f32.mrf.mxu1  ;;  %v6435_v53 = vld [vmem:[%s8777_s3 + $0x188] sm:$0xff]  }
  0xde   : > { %v460_v58 = vmax.f32 %v454_v54, 0.0  ;;  %v456_v59 = vadd.f32 %v455_v56, %v7069_v48  ;;  %v6437_v56 = vld [vmem:[%s8777_s3 + $0x180] sm:$0xff]  }
  0xdf   : > { %1761 = vrot.lane.b32.xlu1 %v7055_v42, %s6852_s24 }
  0xe0   : > { %v461_v60 = vmax.f32 %v456_v59, 0.0  ;;  %v462_v61 = vpack.c.bf16 %v460_v58, %v458_v55  ;;  %v6436_v55 = vld [vmem:[%s8777_s3 + $0x1c0] sm:$0xff]  }
  0xe2   : > { %v463_v62 = vpack.c.bf16 %v461_v60, %v459_v57 }
  0xe4   : > { %848 = vmatprep.mubr.bf16.mxu1 %v463_v62 }
  0xe5   : > { %849 = vmatmul.mubr.bf16.vlgmr.msra.gmra.mxu1 %v462_v61 }
  0xe6   : > { %875 = vmatpush1.bf16.msra.mxu1 %v6937_v5  ;;  %894 = vmatprep.mubr.bf16.mxu1 %v6845_v4 }
  0xe7   : > { %876 = vmatprep.subr.bf16.mxu1 %v7080_v63 }
  0xea   : > { %877 = vmatpush1.bf16.msra.mxu1 %v7089_v2 }
  0xeb   : > { %5741 = vmatprep.subr.bf16.mxu1 %v6404_v0 }
  0xed   : > { %5077 = vmatmul.mubr.msk.bf16.vlgmr.msra.gmra.mxu1 %vm404_vm1, %v858_v3 }
  0xee   : > { %5742 = vmatpush3.bf16.msra.mxu1 %v6405_v6 }
  0xef   : > { %5743 = vmatprep.subr.bf16.mxu1 %v6406_v7 }
  0xf2   : > { %5744 = vmatpush3.bf16.msra.mxu1 %v6407_v8 }
  0xf3   : > { %5745 = vmatprep.subr.bf16.mxu1 %v6408_v9 }
  0xf6   : > { %5746 = vmatpush3.bf16.msra.mxu1 %v6409_v10 }
  0xf7   : > { %5747 = vmatprep.subr.bf16.mxu1 %v6410_v11 }
  0xfa   : > { %5748 = vmatpush3.bf16.msra.mxu1 %v6411_v12 }
  0xfb   : > { %5749 = vmatprep.subr.bf16.mxu1 %v6412_v13 }
  0xfe   : > { %5750 = vmatpush3.bf16.msra.mxu1 %v6413_v14 }
  0xff   : > { %5751 = vmatprep.subr.bf16.mxu1 %v6414_v15 }
 0x102   : > { %5752 = vmatpush3.bf16.msra.mxu1 %v6415_v16  ;;  %v6438_v16 = vld [vmem:[%s8777_s3 + $0x278] sm:$0xff]  }
 0x103   : > { %5753 = vmatprep.subr.bf16.mxu1 %v6416_v17  ;;  %v1310_v17 = vpop.permute.xlu0 %1309 }
 0x106   : > { %5754 = vmatpush3.bf16.msra.mxu1 %v6417_v18  ;;  %v6439_v18 = vld [vmem:[%s8777_s3 + $0x238] sm:$0xff]  }
 0x107   : > { %5755 = vmatprep.subr.bf16.mxu1 %v6418_v19  ;;  %v6440_v19 = vld [vmem:[%s8777_s3 + $0x270] sm:$0xff]  }
 0x10a   : > { %5756 = vmatpush3.bf16.msra.mxu1 %v6419_v20  ;;  %v6441_v20 = vld [vmem:[%s8777_s3 + $0x230] sm:$0xff]  }
 0x10b   : > { %5176 = vmatprep.subr.msk.bf16.mxu1 %vm408_vm0, %v6926_v1 }
 0x143   : > { %v535_v21 = vpop.f32.mrf.mxu1 }
 0x144   : > { %v536_v26 = vadd.f32 %v535_v21, %v7067_v47  ;;  %v6442_v21 = vld [vmem:[%s8777_s3 + $0x268] sm:$0xff]  }
 0x145   : > { %v537_v22 = vpop.f32.mrf.mxu1 }
 0x146   : > { %v538_v24 = vadd.f32 %v537_v22, %v7069_v48  ;;  %v544_v32 = vmax.f32 %v536_v26, 0.0  ;;  %v6443_v22 = vld [vmem:[%s8777_s3 + $0x228] sm:$0xff]   ;;  %v6447_v26 = vld [vmem:[%s8777_s3 + $0x218] sm:$0xff]  }
 0x147   : > { %v539_v23 = vpop.f32.mrf.mxu1 }
 0x148   : > { %v540_v25 = vadd.f32 %v539_v23, %v7067_v47  ;;  %v545_v30 = vmax.f32 %v538_v24, 0.0  ;;  %v6444_v23 = vld [vmem:[%s8777_s3 + $0x260] sm:$0xff]  }
 0x149   : > { %v541_v27 = vpop.f32.mrf.mxu1  ;;  %v6445_v24 = vld [vmem:[%s8777_s3 + $0x220] sm:$0xff]  }
 0x14a   : > { %v542_v28 = vadd.f32 %v541_v27, %v7069_v48  ;;  %v546_v29 = vmax.f32 %v540_v25, 0.0  ;;  %v6446_v25 = vld [vmem:[%s8777_s3 + $0x258] sm:$0xff]   ;;  %v6448_v27 = vld [vmem:[%s8777_s3 + $0x250] sm:$0xff]  }
 0x14c   : > { %v547_v31 = vmax.f32 %v542_v28, 0.0  ;;  %v548_v34 = vpack.c.bf16 %v546_v29, %v544_v32  ;;  %v6449_v28 = vld [vmem:[%s8777_s3 + $0x210] sm:$0xff]   ;;  %v6450_v29 = vld [vmem:[%s8777_s3 + $0x248] sm:$0xff]   ;;  %v6453_v32 = vld [vmem:[%s8777_s3 + $0x200] sm:$0xff]  }
 0x14e   : > { %v549_v33 = vpack.c.bf16 %v547_v31, %v545_v30  ;;  %v6451_v30 = vld [vmem:[%s8777_s3 + $0x208] sm:$0xff]   ;;  %v6452_v31 = vld [vmem:[%s8777_s3 + $0x240] sm:$0xff]  }
 0x150   : > { %711 = vmatprep.mubr.bf16.mxu0 %v549_v33  ;;  %v6454_v33 = vld [vmem:[%s6947_s18 + $0x4] ss:$8 sps:$4 sm:$0xff]  }
 0x151   : > { %712 = vmatmul.mubr.bf16.vlgmr.msra.gmra.mxu0 %v548_v34  ;;  %1999 = vrot.lane.b32.xlu0 %v6454_v33, %s6851_s15 }
 0x152   : > { %1101 = vmatpush1.bf16.msra.mxu0 %v6937_v5  ;;  %1120 = vmatprep.mubr.bf16.mxu0 %v6845_v4 }
 0x153   : > { %1102 = vmatprep.subr.bf16.mxu0 %v7080_v63 }
 0x156   : > { %1103 = vmatpush1.bf16.msra.mxu0 %v7089_v2 }
 0x157   : > { %5763 = vmatprep.subr.bf16.mxu0 %v6420_v35 }
 0x159   : > { %5127 = vmatmul.mubr.msk.bf16.vlgmr.msra.gmra.mxu0 %vm404_vm1, %v1084_v36 }
 0x15a   : > { %5764 = vmatpush3.bf16.msra.mxu0 %v6421_v37 }
 0x15b   : > { %5765 = vmatprep.subr.bf16.mxu0 %v6422_v38 }
 0x15e   : > { %5766 = vmatpush3.bf16.msra.mxu0 %v6423_v39 }
 0x15f   : > { %5767 = vmatprep.subr.bf16.mxu0 %v6424_v40 }
 0x162   : > { %5768 = vmatpush3.bf16.msra.mxu0 %v6425_v41 }
 0x163   : > { %5769 = vmatprep.subr.bf16.mxu0 %v6426_v43 }
 0x166   : > { %5770 = vmatpush3.bf16.msra.mxu0 %v6427_v44 }
 0x167   : > { %5771 = vmatprep.subr.bf16.mxu0 %v6428_v45 }
 0x16a   : > { %5772 = vmatpush3.bf16.msra.mxu0 %v6429_v46 }
 0x16b   : > { %5773 = vmatprep.subr.bf16.mxu0 %v6430_v49 }
 0x16e   : > { %5774 = vmatpush3.bf16.msra.mxu0 %v6431_v50 }
 0x16f   : > { %5775 = vmatprep.subr.bf16.mxu0 %v6434_v52 }
 0x172   : > { %5776 = vmatpush3.bf16.msra.mxu0 %v6435_v53 }
 0x173   : > { %5777 = vmatprep.subr.bf16.mxu0 %v6436_v55 }
 0x176   : > { %5778 = vmatpush3.bf16.msra.mxu0 %v6437_v56 }
 0x177   : > { %5226 = vmatprep.subr.msk.bf16.mxu0 %vm408_vm0, %v6926_v1 }
 0x1a5   : > { %v5735_v54 = vpop.f32.mrf.mxu1 }
 0x1a7   : > { %v5736_v57 = vpop.f32.mrf.mxu1 }
 0x1a8   : > { %v7203_v58 = vadd.f32 %v5736_v57, %v5735_v54 }
 0x1a9   : > { %v5738_v59 = vpop.f32.mrf.mxu1 }
 0x1ab   : > { %v5739_v60 = vpop.f32.mrf.mxu1 }
 0x1ac   : > { %v7207_v61 = vadd.f32 %v5739_v60, %v5738_v59  ;;  %v6455_v59 = vld [vmem:[%s8777_s3 + $0x2f8] sm:$0xff]   ;;  %v1536_v60 = vpop.permute.xlu1 %1535 }
 0x1ad   : > { %v896_v62 = vpop.f32.mrf.mxu1 }
 0x1ae   : > { %v897_v0 = vadd.f32 %v896_v62, %v7067_v47  ;;  %v6457_v62 = vld [vmem:[%s8777_s3 + $0x2f0] sm:$0xff]  }
 0x1af   : > { %v898_v42 = vpop.f32.mrf.mxu1 }
 0x1b0   : > { %v899_v3 = vadd.f32 %v898_v42, %v7069_v48  ;;  %v905_v8 = vmax.f32 %v897_v0, 0.0  ;;  %v6458_v0 = vld [vmem:[%s8777_s3 + $0x2b0] sm:$0xff]   ;;  %v6459_v42 = vld [vmem:[%s8777_s3 + $0x2e8] sm:$0xff]  }
 0x1b1   : > { %v900_v6 = vpop.f32.mrf.mxu1 }
 0x1b2   : > { %v901_v7 = vadd.f32 %v900_v6, %v7067_v47  ;;  %v906_v10 = vmax.f32 %v899_v3, 0.0  ;;  %v6460_v3 = vld [vmem:[%s8777_s3 + $0x2a8] sm:$0xff]   ;;  %v6461_v6 = vld [vmem:[%s8777_s3 + $0x2e0] sm:$0xff]  }
 0x1b3   : > { %v902_v9 = vpop.f32.mrf.mxu1 }
 0x1b4   : > { %v907_v11 = vmax.f32 %v901_v7, 0.0  ;;  %v903_v12 = vadd.f32 %v902_v9, %v7069_v48  ;;  %v6462_v7 = vld [vmem:[%s8777_s3 + $0x2a0] sm:$0xff]   ;;  %v6464_v9 = vld [vmem:[%s8777_s3 + $0x298] sm:$0xff]  }
 0x1b6   : > { %v908_v13 = vmax.f32 %v903_v12, 0.0  ;;  %v909_v14 = vpack.c.bf16 %v907_v11, %v905_v8  ;;  %v6463_v8 = vld [vmem:[%s8777_s3 + $0x2d8] sm:$0xff]   ;;  %v6466_v11 = vld [vmem:[%s8777_s3 + $0x290] sm:$0xff]   ;;  %v6467_v12 = vld [vmem:[%s8777_s3 + $0x2c8] sm:$0xff]  }
 0x1b8   : > { %v910_v15 = vpack.c.bf16 %v908_v13, %v906_v10  ;;  %v6465_v10 = vld [vmem:[%s8777_s3 + $0x2d0] sm:$0xff]   ;;  %v6468_v13 = vld [vmem:[%s8777_s3 + $0x288] sm:$0xff]  }
 0x1ba   : > { %1072 = vmatprep.mubr.bf16.mxu1 %v910_v15 }
 0x1bb   : > { %1073 = vmatmul.mubr.bf16.vlgmr.msra.gmra.mxu1 %v909_v14  ;;  %v7328_v14 = vld [vmem:[%s6947_s18 + $0x4] ss:$8 sps:$4 sm:$0xff]  }
 0x1bc   : > { %1327 = vmatpush1.bf16.msra.mxu1 %v6937_v5  ;;  %1346 = vmatprep.mubr.bf16.mxu1 %v6845_v4 }
 0x1bd   : > { %1328 = vmatprep.subr.bf16.mxu1 %v7080_v63  ;;  %2234 = vrot.lane.b32.xlu1 %v7328_v14, %s8783_s13  ;;  %s8785_s13 = smov 76  }
 0x1be   : > { %2460 = vrot.lane.b32.xlu0 %v7328_v14, %s8784_s25  ;;  %s5696_s25 = sshll.u32 %s8798_s27, 4 }
 0x1c0   : > { %1329 = vmatpush1.bf16.msra.mxu1 %v7089_v2 }
 0x1c1   : > { %5785 = vmatprep.subr.bf16.mxu1 %v6438_v16  ;;  %v6470_v16 = vld [vmem:[%s8777_s3 + $0x2c0] sm:$0xff]   ;;  %2686 = vrot.lane.b32.xlu1 %v7328_v14, %s8785_s13  ;;  %s8787_s13 = smov 40  }
 0x1c2   : > { %2912 = vrot.lane.b32.xlu0 %v7328_v14, %s8786_s17 }
 0x1c3   : > { %5177 = vmatmul.mubr.msk.bf16.vlgmr.msra.gmra.mxu1 %vm404_vm1, %v1310_v17  ;;  %v6471_v17 = vld [vmem:[%s8777_s3 + $0x280] sm:$0xff]  }
 0x1c4   : > { %5786 = vmatpush3.bf16.msra.mxu1 %v6439_v18 }
 0x1c5   : > { %5787 = vmatprep.subr.bf16.mxu1 %v6440_v19  ;;  %3138 = vrot.lane.b32.xlu1 %v7328_v14, %s8787_s13 }
 0x1c8   : > { %5788 = vmatpush3.bf16.msra.mxu1 %v6441_v20 }
 0x1c9   : > { %5789 = vmatprep.subr.bf16.mxu1 %v6442_v21 }
 0x1cc   : > { %5790 = vmatpush3.bf16.msra.mxu1 %v6443_v22 }
 0x1cd   : > { %5791 = vmatprep.subr.bf16.mxu1 %v6444_v23 }
 0x1d0   : > { %5792 = vmatpush3.bf16.msra.mxu1 %v6445_v24 }
 0x1d1   : > { %5793 = vmatprep.subr.bf16.mxu1 %v6446_v25 }
 0x1d4   : > { %5794 = vmatpush3.bf16.msra.mxu1 %v6447_v26 }
 0x1d5   : > { %5795 = vmatprep.subr.bf16.mxu1 %v6448_v27 }
 0x1d8   : > { %5796 = vmatpush3.bf16.msra.mxu1 %v6449_v28 }
 0x1d9   : > { %5797 = vmatprep.subr.bf16.mxu1 %v6450_v29 }
 0x1dc   : > { %5798 = vmatpush3.bf16.msra.mxu1 %v6451_v30 }
 0x1dd   : > { %5799 = vmatprep.subr.bf16.mxu1 %v6452_v31 }
 0x1e0   : > { %5800 = vmatpush3.bf16.msra.mxu1 %v6453_v32 }
 0x1e1   : > { %5276 = vmatprep.subr.msk.bf16.mxu1 %vm408_vm0, %v6926_v1 }
 0x211   : > { %v5713_v34 = vpop.f32.mrf.mxu0 }
 0x213   : > { %v5714_v35 = vpop.f32.mrf.mxu0 }
 0x214   : > { %v5715_v36 = vadd.f32 %v5714_v35, %v5713_v34 }
 0x215   : > { %v5716_v37 = vpop.f32.mrf.mxu0 }
 0x216   : > { %v7271_v38 = vadd.f32 %v7203_v58, %v5715_v36 }
 0x217   : > { %v5717_v39 = vpop.f32.mrf.mxu0 }
 0x218   : > { %v5718_v40 = vadd.f32 %v5717_v39, %v5716_v37  ;;  %v7350_v39 = vpop.permute.xlu1 %1997 }
 0x219   : > { %v1122_v41 = vpop.f32.mrf.mxu0 }
 0x21a   : > { %v7274_v43 = vadd.f32 %v7207_v61, %v5718_v40  ;;  %v1123_v50 = vadd.f32 %v1122_v41, %v7067_v47  ;;  %v6456_v61 = vld [vmem:[%s8777_s3 + $0x2b8] sm:$0xff]  }
 0x21b   : > { %v1124_v44 = vpop.f32.mrf.mxu0  ;;  %v6472_v40 = vld [vmem:[%s8777_s3 + $0x378] sm:$0xff]  }
 0x21c   : > { %v1125_v46 = vadd.f32 %v1124_v44, %v7069_v48  ;;  %v1131_v56 = vmax.f32 %v1123_v50, 0.0  ;;  %v1762_v41 = vpop.permute.xlu1 %1761  ;;  %v6474_v44 = vld [vmem:[%s8777_s3 + $0x370] sm:$0xff]   ;;  %v6478_v50 = vld [vmem:[%s8777_s3 + $0x360] sm:$0xff]  }
 0x21d   : > { %v1126_v45 = vpop.f32.mrf.mxu0 }
 0x21e   : > { %v1127_v49 = vadd.f32 %v1126_v45, %v7067_v47  ;;  %v1132_v54 = vmax.f32 %v1125_v46, 0.0  ;;  %v6475_v45 = vld [vmem:[%s8777_s3 + $0x330] sm:$0xff]   ;;  %v6476_v46 = vld [vmem:[%s8777_s3 + $0x368] sm:$0xff]  }
 0x21f   : > { %v1128_v51 = vpop.f32.mrf.mxu0 }
 0x220   : > { %v1129_v52 = vadd.f32 %v1128_v51, %v7069_v48  ;;  %v1133_v53 = vmax.f32 %v1127_v49, 0.0  ;;  %v6477_v49 = vld [vmem:[%s8777_s3 + $0x328] sm:$0xff]   ;;  %v6479_v51 = vld [vmem:[%s8777_s3 + $0x320] sm:$0xff]  }
 0x222   : > { %v1134_v55 = vmax.f32 %v1129_v52, 0.0  ;;  %v1135_v58 = vpack.c.bf16 %v1133_v53, %v1131_v56  ;;  %v6480_v52 = vld [vmem:[%s8777_s3 + $0x358] sm:$0xff]   ;;  %v6484_v56 = vld [vmem:[%s8777_s3 + $0x348] sm:$0xff]  }
 0x223   : > { %v6481_v53 = vld [vmem:[%s8777_s3 + $0x318] sm:$0xff]  }
 0x224   : > { %v1136_v57 = vpack.c.bf16 %v1134_v55, %v1132_v54  ;;  %v6482_v54 = vld [vmem:[%s8777_s3 + $0x350] sm:$0xff]  }
 0x225   : > { %v6483_v55 = vld [vmem:[%s8777_s3 + $0x310] sm:$0xff]  }
 0x226   : > { %1298 = vmatprep.mubr.bf16.mxu0 %v1136_v57  ;;  %v6485_v57 = vld [vmem:[%s8777_s3 + $0x308] sm:$0xff]  }
 0x227   : > { %1299 = vmatmul.mubr.bf16.vlgmr.msra.gmra.mxu0 %v1135_v58  ;;  %v6486_v58 = vld [vmem:[%s8777_s3 + $0x340] sm:$0xff]  }
 0x228   : > { %1553 = vmatpush1.bf16.msra.mxu0 %v6937_v5  ;;  %1572 = vmatprep.mubr.bf16.mxu0 %v6845_v4 }
 0x229   : > { %1554 = vmatprep.subr.bf16.mxu0 %v7080_v63 }
 0x22c   : > { %1555 = vmatpush1.bf16.msra.mxu0 %v7089_v2 }
 0x22d   : > { %5807 = vmatprep.subr.bf16.mxu0 %v6455_v59  ;;  %v6487_v59 = vld [vmem:[%s8777_s3 + $0x300] sm:$0xff]  }
 0x22f   : > { %5227 = vmatmul.mubr.msk.bf16.vlgmr.msra.gmra.mxu0 %vm404_vm1, %v1536_v60 }
 0x230   : > { %5808 = vmatpush3.bf16.msra.mxu0 %v6456_v61 }
 0x231   : > { %5809 = vmatprep.subr.bf16.mxu0 %v6457_v62 }
 0x234   : > { %5810 = vmatpush3.bf16.msra.mxu0 %v6458_v0 }
 0x235   : > { %5811 = vmatprep.subr.bf16.mxu0 %v6459_v42 }
 0x238   : > { %5812 = vmatpush3.bf16.msra.mxu0 %v6460_v3 }
 0x239   : > { %5813 = vmatprep.subr.bf16.mxu0 %v6461_v6 }
 0x23c   : > { %5814 = vmatpush3.bf16.msra.mxu0 %v6462_v7 }
 0x23d   : > { %5815 = vmatprep.subr.bf16.mxu0 %v6463_v8 }
 0x240   : > { %5816 = vmatpush3.bf16.msra.mxu0 %v6464_v9 }
 0x241   : > { %5817 = vmatprep.subr.bf16.mxu0 %v6465_v10 }
 0x244   : > { %5818 = vmatpush3.bf16.msra.mxu0 %v6466_v11 }
 0x245   : > { %5819 = vmatprep.subr.bf16.mxu0 %v6467_v12 }
 0x248   : > { %5820 = vmatpush3.bf16.msra.mxu0 %v6468_v13 }
 0x249   : > { %5821 = vmatprep.subr.bf16.mxu0 %v6470_v16 }
 0x24c   : > { %5822 = vmatpush3.bf16.msra.mxu0 %v6471_v17 }
 0x24d   : > { %5328 = vmatprep.subr.msk.bf16.mxu0 %vm408_vm0, %v6926_v1 }
 0x27b   : > { %v5757_v15 = vpop.f32.mrf.mxu1 }
 0x27d   : > { %v5758_v18 = vpop.f32.mrf.mxu1 }
 0x27e   : > { %v5759_v19 = vadd.f32 %v5758_v18, %v5757_v15 }
 0x27f   : > { %v5760_v20 = vpop.f32.mrf.mxu1 }
 0x280   : > { %v7341_v21 = vadd.f32 %v5759_v19, %v7271_v38 }
 0x281   : > { %v5761_v22 = vpop.f32.mrf.mxu1 }
 0x282   : > { %v5762_v23 = vadd.f32 %v5761_v22, %v5760_v20 }
 0x283   : > { %v1348_v24 = vpop.f32.mrf.mxu1 }
 0x284   : > { %v7344_v25 = vadd.f32 %v5762_v23, %v7274_v43  ;;  %v1349_v26 = vadd.f32 %v1348_v24, %v7067_v47  ;;  %v6473_v43 = vld [vmem:[%s8777_s3 + $0x338] sm:$0xff]   ;;  %v2000_v23 = vpop.permute.xlu0 %1999 }
 0x285   : > { %v1350_v27 = vpop.f32.mrf.mxu1  ;;  %v6488_v24 = vld [vmem:[%s8777_s3 + $0x3f8] sm:$0xff]  }
 0x286   : > { %v1351_v28 = vadd.f32 %v1350_v27, %v7069_v48  ;;  %v1357_v31 = vmax.f32 %v1349_v26, 0.0  ;;  %v6489_v26 = vld [vmem:[%s8777_s3 + $0x3b8] sm:$0xff]   ;;  %v6490_v27 = vld [vmem:[%s8777_s3 + $0x3f0] sm:$0xff]  }
 0x287   : > { %v1352_v29 = vpop.f32.mrf.mxu1 }
 0x288   : > { %v1353_v30 = vadd.f32 %v1352_v29, %v7067_v47  ;;  %v1358_v33 = vmax.f32 %v1351_v28, 0.0  ;;  %v6491_v28 = vld [vmem:[%s8777_s3 + $0x3b0] sm:$0xff]   ;;  %v6492_v29 = vld [vmem:[%s8777_s3 + $0x3e8] sm:$0xff]  }
 0x289   : > { %v1354_v32 = vpop.f32.mrf.mxu1 }
 0x28a   : > { %v1359_v34 = vmax.f32 %v1353_v30, 0.0  ;;  %v1355_v35 = vadd.f32 %v1354_v32, %v7069_v48  ;;  %v6493_v30 = vld [vmem:[%s8777_s3 + $0x3a8] sm:$0xff]   ;;  %v6495_v32 = vld [vmem:[%s8777_s3 + $0x3a0] sm:$0xff]  }
 0x28c   : > { %v1360_v36 = vmax.f32 %v1355_v35, 0.0  ;;  %v1361_v37 = vpack.c.bf16 %v1359_v34, %v1357_v31  ;;  %v6494_v31 = vld [vmem:[%s8777_s3 + $0x3e0] sm:$0xff]   ;;  %v6497_v34 = vld [vmem:[%s8777_s3 + $0x398] sm:$0xff]   ;;  %v6498_v35 = vld [vmem:[%s8777_s3 + $0x3d0] sm:$0xff]  }
 0x28e   : > { %v1362_v38 = vpack.c.bf16 %v1360_v36, %v1358_v33  ;;  %v6496_v33 = vld [vmem:[%s8777_s3 + $0x3d8] sm:$0xff]   ;;  %v6499_v36 = vld [vmem:[%s8777_s3 + $0x390] sm:$0xff]  }
 0x290   : > { %1524 = vmatprep.mubr.bf16.mxu1 %v1362_v38  ;;  %v6501_v38 = vld [vmem:[%s8777_s3 + $0x388] sm:$0xff]  }
 0x291   : > { %1525 = vmatmul.mubr.bf16.vlgmr.msra.gmra.mxu1 %v1361_v37  ;;  %v6500_v37 = vld [vmem:[%s8777_s3 + $0x3c8] sm:$0xff]  }
 0x292   : > { %1779 = vmatpush1.bf16.msra.mxu1 %v6937_v5  ;;  %1798 = vmatprep.mubr.bf16.mxu1 %v6845_v4 }
 0x293   : > { %1780 = vmatprep.subr.bf16.mxu1 %v7080_v63 }
 0x296   : > { %1781 = vmatpush1.bf16.msra.mxu1 %v7089_v2 }
 0x297   : > { %5829 = vmatprep.subr.bf16.mxu1 %v6472_v40  ;;  %v6502_v40 = vld [vmem:[%s8777_s3 + $0x3c0] sm:$0xff]  }
 0x299   : > { %5277 = vmatmul.mubr.msk.bf16.vlgmr.msra.gmra.mxu1 %vm404_vm1, %v1762_v41  ;;  %v6503_v41 = vld [vmem:[%s8777_s3 + $0x380] sm:$0xff]  }
 0x29a   : > { %5830 = vmatpush3.bf16.msra.mxu1 %v6473_v43 }
 0x29b   : > { %5831 = vmatprep.subr.bf16.mxu1 %v6474_v44 }
 0x29e   : > { %5832 = vmatpush3.bf16.msra.mxu1 %v6475_v45 }
 0x29f   : > { %5833 = vmatprep.subr.bf16.mxu1 %v6476_v46 }
 0x2a2   : > { %5834 = vmatpush3.bf16.msra.mxu1 %v6477_v49 }
 0x2a3   : > { %5835 = vmatprep.subr.bf16.mxu1 %v6478_v50 }
 0x2a6   : > { %5836 = vmatpush3.bf16.msra.mxu1 %v6479_v51 }
 0x2a7   : > { %5837 = vmatprep.subr.bf16.mxu1 %v6480_v52 }
 0x2aa   : > { %5838 = vmatpush3.bf16.msra.mxu1 %v6481_v53 }
 0x2ab   : > { %5839 = vmatprep.subr.bf16.mxu1 %v6482_v54 }
 0x2ae   : > { %5840 = vmatpush3.bf16.msra.mxu1 %v6483_v55 }
 0x2af   : > { %5841 = vmatprep.subr.bf16.mxu1 %v6484_v56 }
 0x2b2   : > { %5842 = vmatpush3.bf16.msra.mxu1 %v6485_v57 }
 0x2b3   : > { %5843 = vmatprep.subr.bf16.mxu1 %v6486_v58 }
 0x2b6   : > { %5844 = vmatpush3.bf16.msra.mxu1 %v6487_v59 }
 0x2b7   : > { %5379 = vmatprep.subr.msk.bf16.mxu1 %vm408_vm0, %v6926_v1 }
 0x2e7   : > { %v5779_v60 = vpop.f32.mrf.mxu0 }
 0x2e9   : > { %v5780_v61 = vpop.f32.mrf.mxu0 }
 0x2ea   : > { %v5781_v62 = vadd.f32 %v5780_v61, %v5779_v60 }
 0x2eb   : > { %v5782_v0 = vpop.f32.mrf.mxu0 }
 0x2ec   : > { %v7410_v42 = vadd.f32 %v5781_v62, %v7341_v21 }
 0x2ed   : > { %v5783_v3 = vpop.f32.mrf.mxu0 }
 0x2ee   : > { %v5784_v6 = vadd.f32 %v5783_v3, %v5782_v0 }
 0x2ef   : > { %v1574_v7 = vpop.f32.mrf.mxu0 }
 0x2f0   : > { %v7413_v8 = vadd.f32 %v5784_v6, %v7344_v25  ;;  %v1575_v13 = vadd.f32 %v1574_v7, %v7067_v47  ;;  %v2002_v25 = vsel %vm2001_vm2, %v7350_v39, %v2000_v23  ;;  %v6504_v6 = vld [vmem:[%s8777_s3 + $0x478] sm:$0xff]   ;;  %v2235_v7 = vpop.permute.xlu1 %2234  ;;  %v6519_v23 = vld [vmem:[%s8777_s3 + $0x400] sm:$0xff]  }
 0x2f1   : > { %v1576_v9 = vpop.f32.mrf.mxu0 }
 0x2f2   : > { %v1577_v11 = vadd.f32 %v1576_v9, %v7069_v48  ;;  %v1583_v20 = vmax.f32 %v1575_v13, 0.0  ;;  %v6506_v9 = vld [vmem:[%s8777_s3 + $0x470] sm:$0xff]   ;;  %v6510_v13 = vld [vmem:[%s8777_s3 + $0x460] sm:$0xff]  }
 0x2f3   : > { %v1578_v10 = vpop.f32.mrf.mxu0 }
 0x2f4   : > { %v1579_v12 = vadd.f32 %v1578_v10, %v7067_v47  ;;  %v1584_v18 = vmax.f32 %v1577_v11, 0.0  ;;  %v6507_v10 = vld [vmem:[%s8777_s3 + $0x430] sm:$0xff]   ;;  %v6508_v11 = vld [vmem:[%s8777_s3 + $0x468] sm:$0xff]  }
 0x2f5   : > { %v1580_v15 = vpop.f32.mrf.mxu0 }
 0x2f6   : > { %v1581_v16 = vadd.f32 %v1580_v15, %v7069_v48  ;;  %v1585_v17 = vmax.f32 %v1579_v12, 0.0  ;;  %v6509_v12 = vld [vmem:[%s8777_s3 + $0x428] sm:$0xff]   ;;  %v6511_v15 = vld [vmem:[%s8777_s3 + $0x420] sm:$0xff]  }
 0x2f8   : > { %v1586_v19 = vmax.f32 %v1581_v16, 0.0  ;;  %v1587_v22 = vpack.c.bf16 %v1585_v17, %v1583_v20  ;;  %v6512_v16 = vld [vmem:[%s8777_s3 + $0x458] sm:$0xff]   ;;  %v6516_v20 = vld [vmem:[%s8777_s3 + $0x448] sm:$0xff]  }
 0x2f9   : > { %v6513_v17 = vld [vmem:[%s8777_s3 + $0x418] sm:$0xff]  }
 0x2fa   : > { %v1588_v21 = vpack.c.bf16 %v1586_v19, %v1584_v18  ;;  %v6514_v18 = vld [vmem:[%s8777_s3 + $0x450] sm:$0xff]  }
 0x2fb   : > { %v6515_v19 = vld [vmem:[%s8777_s3 + $0x410] sm:$0xff]  }
 0x2fc   : > { %1750 = vmatprep.mubr.bf16.mxu0 %v1588_v21  ;;  %v6517_v21 = vld [vmem:[%s8777_s3 + $0x408] sm:$0xff]  }
 0x2fd   : > { %1751 = vmatmul.mubr.bf16.vlgmr.msra.gmra.mxu0 %v1587_v22  ;;  %v6518_v22 = vld [vmem:[%s8777_s3 + $0x440] sm:$0xff]  }
 0x2fe   : > { %2019 = vmatpush1.bf16.msra.mxu0 %v6937_v5  ;;  %2038 = vmatprep.mubr.bf16.mxu0 %v6845_v4 }
 0x2ff   : > { %2020 = vmatprep.subr.bf16.mxu0 %v7080_v63 }
 0x302   : > { %2021 = vmatpush1.bf16.msra.mxu0 %v7089_v2 }
 0x303   : > { %5851 = vmatprep.subr.bf16.mxu0 %v6488_v24 }
 0x305   : > { %5329 = vmatmul.mubr.msk.bf16.vlgmr.msra.gmra.mxu0 %vm404_vm1, %v2002_v25 }
 0x306   : > { %5852 = vmatpush3.bf16.msra.mxu0 %v6489_v26 }
 0x307   : > { %5853 = vmatprep.subr.bf16.mxu0 %v6490_v27 }
 0x30a   : > { %5854 = vmatpush3.bf16.msra.mxu0 %v6491_v28 }
 0x30b   : > { %5855 = vmatprep.subr.bf16.mxu0 %v6492_v29 }
 0x30e   : > { %5856 = vmatpush3.bf16.msra.mxu0 %v6493_v30 }
 0x30f   : > { %5857 = vmatprep.subr.bf16.mxu0 %v6494_v31 }
 0x312   : > { %5858 = vmatpush3.bf16.msra.mxu0 %v6495_v32 }
 0x313   : > { %5859 = vmatprep.subr.bf16.mxu0 %v6496_v33 }
 0x316   : > { %5860 = vmatpush3.bf16.msra.mxu0 %v6497_v34 }
 0x317   : > { %5861 = vmatprep.subr.bf16.mxu0 %v6498_v35 }
 0x31a   : > { %5862 = vmatpush3.bf16.msra.mxu0 %v6499_v36 }
 0x31b   : > { %5863 = vmatprep.subr.bf16.mxu0 %v6500_v37 }
 0x31e   : > { %5864 = vmatpush3.bf16.msra.mxu0 %v6501_v38 }
 0x31f   : > { %5865 = vmatprep.subr.bf16.mxu0 %v6502_v40 }
 0x322   : > { %5866 = vmatpush3.bf16.msra.mxu0 %v6503_v41 }
 0x323   : > { %5429 = vmatprep.subr.msk.bf16.mxu0 %vm408_vm0, %v6926_v1 }
 0x351   : > { %v5801_v39 = vpop.f32.mrf.mxu1 }
 0x353   : > { %v5802_v43 = vpop.f32.mrf.mxu1 }
 0x354   : > { %v5803_v44 = vadd.f32 %v5802_v43, %v5801_v39 }
 0x355   : > { %v5804_v45 = vpop.f32.mrf.mxu1 }
 0x356   : > { %v7479_v46 = vadd.f32 %v5803_v44, %v7410_v42 }
 0x357   : > { %v5805_v49 = vpop.f32.mrf.mxu1 }
 0x358   : > { %v5806_v50 = vadd.f32 %v5805_v49, %v5804_v45  ;;  %v6520_v49 = vld [vmem:[%s8777_s3 + $0x4f8] sm:$0xff]  }
 0x359   : > { %v1800_v51 = vpop.f32.mrf.mxu1 }
 0x35a   : > { %v7482_v52 = vadd.f32 %v5806_v50, %v7413_v8  ;;  %v1801_v53 = vadd.f32 %v1800_v51, %v7067_v47  ;;  %v6505_v8 = vld [vmem:[%s8777_s3 + $0x438] sm:$0xff]   ;;  %v2461_v50 = vpop.permute.xlu0 %2460 }
 0x35b   : > { %v1802_v54 = vpop.f32.mrf.mxu1  ;;  %v6521_v51 = vld [vmem:[%s8777_s3 + $0x4b8] sm:$0xff]  }
 0x35c   : > { %v1803_v55 = vadd.f32 %v1802_v54, %v7069_v48  ;;  %v1809_v58 = vmax.f32 %v1801_v53, 0.0  ;;  %v6525_v53 = vld [vmem:[%s8777_s3 + $0x4a8] sm:$0xff]   ;;  %v6526_v54 = vld [vmem:[%s8777_s3 + $0x4e0] sm:$0xff]  }
 0x35d   : > { %v1804_v56 = vpop.f32.mrf.mxu1 }
 0x35e   : > { %v1805_v57 = vadd.f32 %v1804_v56, %v7067_v47  ;;  %v1810_v60 = vmax.f32 %v1803_v55, 0.0  ;;  %v6527_v55 = vld [vmem:[%s8777_s3 + $0x4a0] sm:$0xff]   ;;  %v6528_v56 = vld [vmem:[%s8777_s3 + $0x4d8] sm:$0xff]  }
 0x35f   : > { %v1806_v59 = vpop.f32.mrf.mxu1 }
 0x360   : > { %v1811_v61 = vmax.f32 %v1805_v57, 0.0  ;;  %v1807_v62 = vadd.f32 %v1806_v59, %v7069_v48  ;;  %v6529_v57 = vld [vmem:[%s8777_s3 + $0x498] sm:$0xff]   ;;  %v6531_v59 = vld [vmem:[%s8777_s3 + $0x490] sm:$0xff]  }
 0x362   : > { %v1812_v0 = vmax.f32 %v1807_v62, 0.0  ;;  %v1813_v42 = vpack.c.bf16 %v1811_v61, %v1809_v58  ;;  %v6530_v58 = vld [vmem:[%s8777_s3 + $0x4d0] sm:$0xff]   ;;  %v6533_v61 = vld [vmem:[%s8777_s3 + $0x488] sm:$0xff]  }
 0x364   : > { %v1814_v3 = vpack.c.bf16 %v1812_v0, %v1810_v60  ;;  %v6532_v60 = vld [vmem:[%s8777_s3 + $0x4c8] sm:$0xff]   ;;  %v6534_v0 = vld [vmem:[%s8777_s3 + $0x4c0] sm:$0xff]  }
 0x366   : > { %1976 = vmatprep.mubr.bf16.mxu1 %v1814_v3 }
 0x367   : > { %1977 = vmatmul.mubr.bf16.vlgmr.msra.gmra.mxu1 %v1813_v42  ;;  %v6535_v42 = vld [vmem:[%s8777_s3 + $0x480] sm:$0xff]  }
 0x368   : > { %2252 = vmatpush1.bf16.msra.mxu1 %v6937_v5  ;;  %2271 = vmatprep.mubr.bf16.mxu1 %v6845_v4 }
 0x369   : > { %2253 = vmatprep.subr.bf16.mxu1 %v7080_v63 }
 0x36c   : > { %2254 = vmatpush1.bf16.msra.mxu1 %v7089_v2 }
 0x36d   : > { %5873 = vmatprep.subr.bf16.mxu1 %v6504_v6 }
 0x36f   : > { %5380 = vmatmul.mubr.msk.bf16.vlgmr.msra.gmra.mxu1 %vm404_vm1, %v2235_v7 }
 0x370   : > { %5874 = vmatpush3.bf16.msra.mxu1 %v6505_v8 }
 0x371   : > { %5875 = vmatprep.subr.bf16.mxu1 %v6506_v9 }
 0x374   : > { %5876 = vmatpush3.bf16.msra.mxu1 %v6507_v10 }
 0x375   : > { %5877 = vmatprep.subr.bf16.mxu1 %v6508_v11 }
 0x378   : > { %5878 = vmatpush3.bf16.msra.mxu1 %v6509_v12 }
 0x379   : > { %5879 = vmatprep.subr.bf16.mxu1 %v6510_v13 }
 0x37c   : > { %5880 = vmatpush3.bf16.msra.mxu1 %v6511_v15 }
 0x37d   : > { %5881 = vmatprep.subr.bf16.mxu1 %v6512_v16 }
 0x380   : > { %5882 = vmatpush3.bf16.msra.mxu1 %v6513_v17 }
 0x381   : > { %5883 = vmatprep.subr.bf16.mxu1 %v6514_v18 }
 0x384   : > { %5884 = vmatpush3.bf16.msra.mxu1 %v6515_v19 }
 0x385   : > { %5885 = vmatprep.subr.bf16.mxu1 %v6516_v20 }
 0x388   : > { %5886 = vmatpush3.bf16.msra.mxu1 %v6517_v21 }
 0x389   : > { %5887 = vmatprep.subr.bf16.mxu1 %v6518_v22 }
 0x38c   : > { %5888 = vmatpush3.bf16.msra.mxu1 %v6519_v23 }
 0x38d   : > { %5479 = vmatprep.subr.msk.bf16.mxu1 %vm408_vm0, %v6926_v1 }
 0x3bd   : > { %v5823_v24 = vpop.f32.mrf.mxu0 }
 0x3bf   : > { %v5824_v25 = vpop.f32.mrf.mxu0 }
 0x3c0   : > { %v5825_v26 = vadd.f32 %v5824_v25, %v5823_v24 }
 0x3c1   : > { %v5826_v27 = vpop.f32.mrf.mxu0 }
 0x3c2   : > { %v7546_v28 = vadd.f32 %v5825_v26, %v7479_v46  ;;  %v7627_v26 = vld [vmem:[%s8775_s1 + $0x4] ss:$8 sps:$4 sm:$0xff]  }
 0x3c3   : > { %v5827_v29 = vpop.f32.mrf.mxu0 }
 0x3c4   : > { %v5828_v30 = vadd.f32 %v5827_v29, %v5826_v27  ;;  %v6536_v27 = vld [vmem:[%s8777_s3 + $0x578] sm:$0xff]   ;;  %v2687_v29 = vpop.permute.xlu1 %2686 }
 0x3c5   : > { %v2040_v31 = vpop.f32.mrf.mxu0 }
 0x3c6   : > { %v7549_v32 = vadd.f32 %v5828_v30, %v7482_v52  ;;  %v2041_v37 = vadd.f32 %v2040_v31, %v7067_v47  ;;  %v6522_v52 = vld [vmem:[%s8777_s3 + $0x4f0] sm:$0xff]   ;;  %v6537_v30 = vld [vmem:[%s8777_s3 + $0x538] sm:$0xff]  }
 0x3c7   : > { %v2042_v33 = vpop.f32.mrf.mxu0  ;;  %v6538_v31 = vld [vmem:[%s8777_s3 + $0x570] sm:$0xff]  }
 0x3c8   : > { %v2043_v35 = vadd.f32 %v2042_v33, %v7069_v48  ;;  %v2049_v44 = vmax.f32 %v2041_v37, 0.0  ;;  %v6540_v33 = vld [vmem:[%s8777_s3 + $0x568] sm:$0xff]   ;;  %v6544_v37 = vld [vmem:[%s8777_s3 + $0x558] sm:$0xff]  }
 0x3c9   : > { %v2044_v34 = vpop.f32.mrf.mxu0 }
 0x3ca   : > { %v2045_v36 = vadd.f32 %v2044_v34, %v7067_v47  ;;  %v2050_v41 = vmax.f32 %v2043_v35, 0.0  ;;  %v6541_v34 = vld [vmem:[%s8777_s3 + $0x528] sm:$0xff]   ;;  %v6542_v35 = vld [vmem:[%s8777_s3 + $0x560] sm:$0xff]  }
 0x3cb   : > { %v2046_v38 = vpop.f32.mrf.mxu0 }
 0x3cc   : > { %v2047_v39 = vadd.f32 %v2046_v38, %v7069_v48  ;;  %v2051_v40 = vmax.f32 %v2045_v36, 0.0  ;;  %v6543_v36 = vld [vmem:[%s8777_s3 + $0x520] sm:$0xff]   ;;  %v6545_v38 = vld [vmem:[%s8777_s3 + $0x518] sm:$0xff]  }
 0x3ce   : > { %v2052_v43 = vmax.f32 %v2047_v39, 0.0  ;;  %v2053_v46 = vpack.c.bf16 %v2051_v40, %v2049_v44  ;;  %v6546_v39 = vld [vmem:[%s8777_s3 + $0x550] sm:$0xff]   ;;  %v6550_v44 = vld [vmem:[%s8777_s3 + $0x540] sm:$0xff]  }
 0x3cf   : > { %v6547_v40 = vld [vmem:[%s8777_s3 + $0x510] sm:$0xff]  }
 0x3d0   : > { %v2054_v45 = vpack.c.bf16 %v2052_v43, %v2050_v41  ;;  %v6548_v41 = vld [vmem:[%s8777_s3 + $0x548] sm:$0xff]  }
 0x3d1   : > { %v6549_v43 = vld [vmem:[%s8777_s3 + $0x508] sm:$0xff]  }
 0x3d2   : > { %2216 = vmatprep.mubr.bf16.mxu0 %v2054_v45  ;;  %v6551_v45 = vld [vmem:[%s8777_s3 + $0x500] sm:$0xff]  }
 0x3d3   : > { %2217 = vmatmul.mubr.bf16.vlgmr.msra.gmra.mxu0 %v2053_v46 }
 0x3d4   : > { %2478 = vmatpush1.bf16.msra.mxu0 %v6937_v5  ;;  %2497 = vmatprep.mubr.bf16.mxu0 %v6845_v4 }
 0x3d5   : > { %2479 = vmatprep.subr.bf16.mxu0 %v7080_v63  ;;  %v6523_v63 = vld [vmem:[%s8777_s3 + $0x4b0] sm:$0xff]  }
 0x3d8   : > { %2480 = vmatpush1.bf16.msra.mxu0 %v7089_v2  ;;  %v6524_v2 = vld [vmem:[%s8777_s3 + $0x4e8] sm:$0xff]  }
 0x3d9   : > { %5895 = vmatprep.subr.bf16.mxu0 %v6520_v49 }
 0x3db   : > { %5430 = vmatmul.mubr.msk.bf16.vlgmr.msra.gmra.mxu0 %vm404_vm1, %v2461_v50 }
 0x3dc   : > { %5896 = vmatpush3.bf16.msra.mxu0 %v6521_v51 }
 0x3dd   : > { %5897 = vmatprep.subr.bf16.mxu0 %v6522_v52  ;;  %v7688_v52 = vld [vmem:[%s6947_s18 + $0x10] ss:$8 sps:$4 sm:$0xff]  }
 0x3de   : > { %3450 = vrot.lane.b32.xlu0 %v7688_v52, %s6846_s19  ;;  %3683 = vrot.lane.b32.xlu1 %v7688_v52, %s6848_s23  ;;  %s8790_s19 = smov 76  }
 0x3e0   : > { %5898 = vmatpush3.bf16.msra.mxu0 %v6523_v63 }
 0x3e1   : > { %5899 = vmatprep.subr.bf16.mxu0 %v6524_v2 }
 0x3e2   : > { %3586 = vrot.lane.b32.xlu0 %v7688_v52, %s6847_s20  ;;  %3877 = vrot.lane.b32.xlu1 %v7688_v52, %s6850_s12  ;;  %s8791_s20 = smov 58  }
 0x3e4   : > { %5900 = vmatpush3.bf16.msra.mxu0 %v6525_v53 }
 0x3e5   : > { %5901 = vmatprep.subr.bf16.mxu0 %v6526_v54 }
 0x3e6   : > { %3780 = vrot.lane.b32.xlu0 %v7688_v52, %s6849_s10 }
 0x3e8   : > { %5902 = vmatpush3.bf16.msra.mxu0 %v6527_v55 }
 0x3e9   : > { %5903 = vmatprep.subr.bf16.mxu0 %v6528_v56 }
 0x3ea   : > { %3974 = vrot.lane.b32.xlu0 %v7688_v52, %s6852_s24 }
 0x3ec   : > { %5904 = vmatpush3.bf16.msra.mxu0 %v6529_v57 }
 0x3ed   : > { %5905 = vmatprep.subr.bf16.mxu0 %v6530_v58 }
 0x3f0   : > { %5906 = vmatpush3.bf16.msra.mxu0 %v6531_v59 }
 0x3f1   : > { %5907 = vmatprep.subr.bf16.mxu0 %v6532_v60 }
 0x3f4   : > { %5908 = vmatpush3.bf16.msra.mxu0 %v6533_v61 }
 0x3f5   : > { %5909 = vmatprep.subr.bf16.mxu0 %v6534_v0 }
 0x3f8   : > { %5910 = vmatpush3.bf16.msra.mxu0 %v6535_v42 }
 0x3f9   : > { %5529 = vmatprep.subr.msk.bf16.mxu0 %vm408_vm0, %v6926_v1 }
 0x427   : > { %v5845_v62 = vpop.f32.mrf.mxu1 }
 0x429   : > { %v5846_v3 = vpop.f32.mrf.mxu1 }
 0x42a   : > { %v5847_v6 = vadd.f32 %v5846_v3, %v5845_v62 }
 0x42b   : > { %v5848_v7 = vpop.f32.mrf.mxu1 }
 0x42c   : > { %v7613_v8 = vadd.f32 %v5847_v6, %v7546_v28  ;;  %v7636_v28 = vld [vmem:[%s8775_s1] ss:$8 sps:$4 sm:$0xff]  }
 0x42d   : > { %v5849_v9 = vpop.f32.mrf.mxu1 }
 0x42e   : > { %v5850_v10 = vadd.f32 %v5849_v9, %v5848_v7  ;;  %v6553_v9 = vld [vmem:[%s8777_s3 + $0x5f8] sm:$0xff]  }
 0x42f   : > { %v2273_v11 = vpop.f32.mrf.mxu1 }
 0x430   : > { %v7616_v14 = vadd.f32 %v5850_v10, %v7549_v32  ;;  %v2274_v12 = vadd.f32 %v2273_v11, %v7067_v47  ;;  %v6539_v32 = vld [vmem:[%s8777_s3 + $0x530] sm:$0xff]   ;;  %v2913_v10 = vpop.permute.xlu0 %2912  ;;  %v6554_v11 = vld [vmem:[%s8777_s3 + $0x5b8] sm:$0xff]  }
 0x431   : > { %v2275_v13 = vpop.f32.mrf.mxu1 }
 0x432   : > { %v2276_v15 = vadd.f32 %v2275_v13, %v7069_v48  ;;  %v2282_v18 = vmax.f32 %v2274_v12, 0.0  ;;  %v6556_v12 = vld [vmem:[%s8777_s3 + $0x5b0] sm:$0xff]   ;;  %v6557_v13 = vld [vmem:[%s8777_s3 + $0x5e8] sm:$0xff]  }
 0x433   : > { %v2277_v16 = vpop.f32.mrf.mxu1 }
 0x434   : > { %v2278_v17 = vadd.f32 %v2277_v16, %v7067_v47  ;;  %v2283_v20 = vmax.f32 %v2276_v15, 0.0  ;;  %v6558_v15 = vld [vmem:[%s8777_s3 + $0x5a8] sm:$0xff]   ;;  %v6559_v16 = vld [vmem:[%s8777_s3 + $0x5e0] sm:$0xff]  }
 0x435   : > { %v2279_v19 = vpop.f32.mrf.mxu1 }
 0x436   : > { %v2284_v21 = vmax.f32 %v2278_v17, 0.0  ;;  %v2280_v22 = vadd.f32 %v2279_v19, %v7069_v48  ;;  %v6560_v17 = vld [vmem:[%s8777_s3 + $0x5a0] sm:$0xff]   ;;  %v6562_v19 = vld [vmem:[%s8777_s3 + $0x598] sm:$0xff]  }
 0x438   : > { %v2285_v23 = vmax.f32 %v2280_v22, 0.0  ;;  %v2286_v24 = vpack.c.bf16 %v2284_v21, %v2282_v18  ;;  %v6561_v18 = vld [vmem:[%s8777_s3 + $0x5d8] sm:$0xff]   ;;  %v6564_v21 = vld [vmem:[%s8777_s3 + $0x590] sm:$0xff]   ;;  %v6565_v22 = vld [vmem:[%s8777_s3 + $0x5c8] sm:$0xff]  }
 0x43a   : > { %v2287_v25 = vpack.c.bf16 %v2285_v23, %v2283_v20  ;;  %v6563_v20 = vld [vmem:[%s8777_s3 + $0x5d0] sm:$0xff]   ;;  %v6566_v23 = vld [vmem:[%s8777_s3 + $0x588] sm:$0xff]  }
 0x43c   : > { %2449 = vmatprep.mubr.bf16.mxu1 %v2287_v25  ;;  %v6567_v25 = vld [vmem:[%s8777_s3 + $0x5c0] sm:$0xff]  }
 0x43d   : > { %2450 = vmatmul.mubr.bf16.vlgmr.msra.gmra.mxu1 %v2286_v24 }
 0x43e   : > { %2704 = vmatpush1.bf16.msra.mxu1 %v6937_v5  ;;  %2723 = vmatprep.mubr.bf16.mxu1 %v6845_v4 }
 0x43f   : > { %2705 = vmatprep.subr.bf16.mxu1 %v7627_v26 }
 0x442   : > { %2706 = vmatpush1.bf16.msra.mxu1 %v7636_v28 }
 0x443   : > { %5917 = vmatprep.subr.bf16.mxu1 %v6536_v27  ;;  %v6568_v27 = vld [vmem:[%s8777_s3 + $0x580] sm:$0xff]  }
 0x445   : > { %5480 = vmatmul.mubr.msk.bf16.vlgmr.msra.gmra.mxu1 %vm404_vm1, %v2687_v29 }
 0x446   : > { %5918 = vmatpush3.bf16.msra.mxu1 %v6537_v30 }
 0x447   : > { %5919 = vmatprep.subr.bf16.mxu1 %v6538_v31 }
 0x44a   : > { %5920 = vmatpush3.bf16.msra.mxu1 %v6539_v32 }
 0x44b   : > { %5921 = vmatprep.subr.bf16.mxu1 %v6540_v33 }
 0x44e   : > { %5922 = vmatpush3.bf16.msra.mxu1 %v6541_v34 }
 0x44f   : > { %5923 = vmatprep.subr.bf16.mxu1 %v6542_v35 }
 0x452   : > { %5924 = vmatpush3.bf16.msra.mxu1 %v6543_v36 }
 0x453   : > { %5925 = vmatprep.subr.bf16.mxu1 %v6544_v37 }
 0x456   : > { %5926 = vmatpush3.bf16.msra.mxu1 %v6545_v38 }
 0x457   : > { %5927 = vmatprep.subr.bf16.mxu1 %v6546_v39 }
 0x45a   : > { %5928 = vmatpush3.bf16.msra.mxu1 %v6547_v40 }
 0x45b   : > { %5929 = vmatprep.subr.bf16.mxu1 %v6548_v41 }
 0x45e   : > { %5930 = vmatpush3.bf16.msra.mxu1 %v6549_v43 }
 0x45f   : > { %5931 = vmatprep.subr.bf16.mxu1 %v6550_v44 }
 0x462   : > { %5932 = vmatpush3.bf16.msra.mxu1 %v6551_v45 }
 0x463   : > { %5579 = vmatprep.subr.msk.bf16.mxu1 %vm408_vm0, %v6926_v1 }
 0x493   : > { %v5867_v46 = vpop.f32.mrf.mxu0 }
 0x495   : > { %v5868_v49 = vpop.f32.mrf.mxu0 }
 0x496   : > { %v5869_v50 = vadd.f32 %v5868_v49, %v5867_v46 }
 0x497   : > { %v5870_v51 = vpop.f32.mrf.mxu0 }
 0x498   : > { %v7691_v63 = vadd.f32 %v5869_v50, %v7613_v8 }
 0x499   : > { %v5871_v2 = vpop.f32.mrf.mxu0 }
 0x49a   : > { %v5872_v53 = vadd.f32 %v5871_v2, %v5870_v51  ;;  %v6569_v2 = vld [vmem:[%s8777_s3 + $0x678] sm:$0xff]  }
 0x49b   : > { %v2499_v54 = vpop.f32.mrf.mxu0 }
 0x49c   : > { %v7698_v55 = vadd.f32 %v5872_v53, %v7616_v14  ;;  %v2500_v60 = vadd.f32 %v2499_v54, %v7067_v47  ;;  %v6555_v14 = vld [vmem:[%s8777_s3 + $0x5f0] sm:$0xff]   ;;  %v3139_v53 = vpop.permute.xlu1 %3138  ;;  %v6570_v54 = vld [vmem:[%s8777_s3 + $0x638] sm:$0xff]  }
 0x49d   : > { %v2501_v56 = vpop.f32.mrf.mxu0 }
 0x49e   : > { %v2502_v58 = vadd.f32 %v2501_v56, %v7069_v48  ;;  %v2508_v6 = vmax.f32 %v2500_v60, 0.0  ;;  %v6572_v56 = vld [vmem:[%s8777_s3 + $0x630] sm:$0xff]   ;;  %v6576_v60 = vld [vmem:[%s8777_s3 + $0x620] sm:$0xff]  }
 0x49f   : > { %v2503_v57 = vpop.f32.mrf.mxu0 }
 0x4a0   : > { %v2504_v59 = vadd.f32 %v2503_v57, %v7067_v47  ;;  %v2509_v42 = vmax.f32 %v2502_v58, 0.0  ;;  %v6573_v57 = vld [vmem:[%s8777_s3 + $0x668] sm:$0xff]  }
 0x4a1   : > { %v2505_v61 = vpop.f32.mrf.mxu0  ;;  %v6574_v58 = vld [vmem:[%s8777_s3 + $0x628] sm:$0xff]  }
 0x4a2   : > { %v2506_v62 = vadd.f32 %v2505_v61, %v7069_v48  ;;  %v2510_v0 = vmax.f32 %v2504_v59, 0.0  ;;  %v6575_v59 = vld [vmem:[%s8777_s3 + $0x660] sm:$0xff]   ;;  %v6577_v61 = vld [vmem:[%s8777_s3 + $0x658] sm:$0xff]  }
 0x4a4   : > { %v2511_v3 = vmax.f32 %v2506_v62, 0.0  ;;  %v2512_v8 = vpack.c.bf16 %v2510_v0, %v2508_v6  ;;  %v6578_v62 = vld [vmem:[%s8777_s3 + $0x618] sm:$0xff]   ;;  %v6579_v0 = vld [vmem:[%s8777_s3 + $0x650] sm:$0xff]   ;;  %v6582_v6 = vld [vmem:[%s8777_s3 + $0x608] sm:$0xff]  }
 0x4a6   : > { %v2513_v7 = vpack.c.bf16 %v2511_v3, %v2509_v42  ;;  %v6580_v42 = vld [vmem:[%s8777_s3 + $0x610] sm:$0xff]   ;;  %v6581_v3 = vld [vmem:[%s8777_s3 + $0x648] sm:$0xff]  }
 0x4a8   : > { %2675 = vmatprep.mubr.bf16.mxu0 %v2513_v7  ;;  %v6583_v7 = vld [vmem:[%s8777_s3 + $0x640] sm:$0xff]  }
 0x4a9   : > { %2676 = vmatmul.mubr.bf16.vlgmr.msra.gmra.mxu0 %v2512_v8  ;;  %v6584_v8 = vld [vmem:[%s8777_s3 + $0x600] sm:$0xff]  }
 0x4aa   : > { %2930 = vmatpush1.bf16.msra.mxu0 %v6937_v5  ;;  %2949 = vmatprep.mubr.bf16.mxu0 %v6845_v4 }
 0x4ab   : > { %2931 = vmatprep.subr.bf16.mxu0 %v7627_v26 }
 0x4ae   : > { %2932 = vmatpush1.bf16.msra.mxu0 %v7636_v28 }
 0x4af   : > { %5939 = vmatprep.subr.bf16.mxu0 %v6553_v9  ;;  %v6610_v9 = vld [vmem:[%s8777_s3 + $0x78] sm:$0xff]  }
 0x4b1   : > { %5530 = vmatmul.mubr.msk.bf16.vlgmr.msra.gmra.mxu0 %vm404_vm1, %v2913_v10 }
 0x4b2   : > { %5940 = vmatpush3.bf16.msra.mxu0 %v6554_v11 }
 0x4b3   : > { %5941 = vmatprep.subr.bf16.mxu0 %v6555_v14 }
 0x4b6   : > { %5942 = vmatpush3.bf16.msra.mxu0 %v6556_v12 }
 0x4b7   : > { %5943 = vmatprep.subr.bf16.mxu0 %v6557_v13 }
 0x4ba   : > { %5944 = vmatpush3.bf16.msra.mxu0 %v6558_v15 }
 0x4bb   : > { %5945 = vmatprep.subr.bf16.mxu0 %v6559_v16 }
 0x4be   : > { %5946 = vmatpush3.bf16.msra.mxu0 %v6560_v17 }
 0x4bf   : > { %5947 = vmatprep.subr.bf16.mxu0 %v6561_v18 }
 0x4c2   : > { %5948 = vmatpush3.bf16.msra.mxu0 %v6562_v19 }
 0x4c3   : > { %5949 = vmatprep.subr.bf16.mxu0 %v6563_v20 }
 0x4c6   : > { %5950 = vmatpush3.bf16.msra.mxu0 %v6564_v21 }
 0x4c7   : > { %5951 = vmatprep.subr.bf16.mxu0 %v6565_v22 }
 0x4ca   : > { %5952 = vmatpush3.bf16.msra.mxu0 %v6566_v23 }
 0x4cb   : > { %5953 = vmatprep.subr.bf16.mxu0 %v6567_v25 }
 0x4ce   : > { %5954 = vmatpush3.bf16.msra.mxu0 %v6568_v27 }
 0x4cf   : > { %5631 = vmatprep.subr.msk.bf16.mxu0 %vm408_vm0, %v6926_v1 }
 0x4fd   : > { %v5889_v24 = vpop.f32.mrf.mxu1 }
 0x4ff   : > { %v5890_v29 = vpop.f32.mrf.mxu1 }
 0x500   : > { %v5891_v30 = vadd.f32 %v5890_v29, %v5889_v24 }
 0x501   : > { %v5892_v31 = vpop.f32.mrf.mxu1 }
 0x502   : > { %v7768_v32 = vadd.f32 %v5891_v30, %v7691_v63 }
 0x503   : > { %v5893_v33 = vpop.f32.mrf.mxu1 }
 0x504   : > { %v5894_v34 = vadd.f32 %v5893_v33, %v5892_v31 }
 0x505   : > { %v2725_v35 = vpop.f32.mrf.mxu1 }
 0x506   : > { %v7771_v36 = vadd.f32 %v5894_v34, %v7698_v55  ;;  %v2726_v37 = vadd.f32 %v2725_v35, %v7067_v47  ;;  %v6571_v55 = vld [vmem:[%s8777_s3 + $0x670] sm:$0xff]   ;;  %v3451_v34 = vpop.permute.xlu0 %3450  ;;  %v6611_v35 = vld [vmem:[%s8777_s3 + $0xf8] sm:$0xff]  }
 0x507   : > { %v2727_v38 = vpop.f32.mrf.mxu1 }
 0x508   : > { %v2728_v39 = vadd.f32 %v2727_v38, %v7069_v48  ;;  %v2734_v43 = vmax.f32 %v2726_v37, 0.0  ;;  %v6614_v37 = vld [vmem:[%s8777_s3 + $0xb0] sm:$0xff]   ;;  %v6615_v38 = vld [vmem:[%s8777_s3 + $0xe8] sm:$0xff]  }
 0x509   : > { %v2729_v40 = vpop.f32.mrf.mxu1 }
 0x50a   : > { %v2730_v41 = vadd.f32 %v2729_v40, %v7067_v47  ;;  %v2735_v45 = vmax.f32 %v2728_v39, 0.0  ;;  %v6616_v39 = vld [vmem:[%s8777_s3 + $0xa8] sm:$0xff]   ;;  %v6617_v40 = vld [vmem:[%s8777_s3 + $0xe0] sm:$0xff]  }
 0x50b   : > { %v2731_v44 = vpop.f32.mrf.mxu1 }
 0x50c   : > { %v2736_v46 = vmax.f32 %v2730_v41, 0.0  ;;  %v2732_v49 = vadd.f32 %v2731_v44, %v7069_v48  ;;  %v6618_v41 = vld [vmem:[%s8777_s3 + $0xa0] sm:$0xff]   ;;  %v6620_v44 = vld [vmem:[%s8777_s3 + $0x98] sm:$0xff]  }
 0x50e   : > { %v2737_v50 = vmax.f32 %v2732_v49, 0.0  ;;  %v2738_v51 = vpack.c.bf16 %v2736_v46, %v2734_v43  ;;  %v6619_v43 = vld [vmem:[%s8777_s3 + $0xd8] sm:$0xff]   ;;  %v6622_v46 = vld [vmem:[%s8777_s3 + $0x90] sm:$0xff]   ;;  %v6623_v49 = vld [vmem:[%s8777_s3 + $0xc8] sm:$0xff]  }
 0x510   : > { %v2739_v63 = vpack.c.bf16 %v2737_v50, %v2735_v45  ;;  %v6621_v45 = vld [vmem:[%s8777_s3 + $0xd0] sm:$0xff]   ;;  %v6624_v50 = vld [vmem:[%s8777_s3 + $0x88] sm:$0xff]  }
 0x512   : > { %2901 = vmatprep.mubr.bf16.mxu1 %v2739_v63  ;;  %v6626_v63 = vld [vmem:[%s8777_s3 + $0x80] sm:$0xff]  }
 0x513   : > { %2902 = vmatmul.mubr.bf16.vlgmr.msra.gmra.mxu1 %v2738_v51  ;;  %v6625_v51 = vld [vmem:[%s8777_s3 + $0xc0] sm:$0xff]  }
 0x514   : > { %3156 = vmatpush1.bf16.msra.mxu1 %v6937_v5  ;;  %3175 = vmatprep.mubr.bf16.mxu1 %v6845_v4 }
 0x515   : > { %3157 = vmatprep.subr.bf16.mxu1 %v7627_v26 }
 0x518   : > { %3158 = vmatpush1.bf16.msra.mxu1 %v7636_v28 }
 0x519   : > { %5961 = vmatprep.subr.bf16.mxu1 %v6569_v2 }
 0x51b   : > { %5580 = vmatmul.mubr.msk.bf16.vlgmr.msra.gmra.mxu1 %vm404_vm1, %v3139_v53 }
 0x51c   : > { %5962 = vmatpush3.bf16.msra.mxu1 %v6570_v54 }
 0x51d   : > { %5963 = vmatprep.subr.bf16.mxu1 %v6571_v55 }
 0x520   : > { %5964 = vmatpush3.bf16.msra.mxu1 %v6572_v56 }
 0x521   : > { %5965 = vmatprep.subr.bf16.mxu1 %v6573_v57 }
 0x524   : > { %5966 = vmatpush3.bf16.msra.mxu1 %v6574_v58 }
 0x525   : > { %5967 = vmatprep.subr.bf16.mxu1 %v6575_v59 }
 0x528   : > { %5968 = vmatpush3.bf16.msra.mxu1 %v6576_v60 }
 0x529   : > { %5969 = vmatprep.subr.bf16.mxu1 %v6577_v61 }
 0x52c   : > { %5970 = vmatpush3.bf16.msra.mxu1 %v6578_v62 }
 0x52d   : > { %5971 = vmatprep.subr.bf16.mxu1 %v6579_v0 }
 0x530   : > { %5972 = vmatpush3.bf16.msra.mxu1 %v6580_v42 }
 0x531   : > { %5973 = vmatprep.subr.bf16.mxu1 %v6581_v3 }
 0x534   : > { %5974 = vmatpush3.bf16.msra.mxu1 %v6582_v6 }
 0x535   : > { %5975 = vmatprep.subr.bf16.mxu1 %v6583_v7 }
 0x538   : > { %5976 = vmatpush3.bf16.msra.mxu1 %v6584_v8 }
 0x539   : > { %6005 = vmatprep.subr.bf16.mxu1 %v6610_v9 }
 0x569   : > { %v5911_v10 = vpop.f32.mrf.mxu0 }
 0x56b   : > { %v5912_v11 = vpop.f32.mrf.mxu0 }
 0x56c   : > { %v5913_v14 = vadd.f32 %v5912_v11, %v5911_v10 }
 0x56d   : > { %v5914_v12 = vpop.f32.mrf.mxu0 }
 0x56e   : > { %v7834_v13 = vadd.f32 %v5913_v14, %v7768_v32 }
 0x56f   : > { %v5915_v15 = vpop.f32.mrf.mxu0 }
 0x570   : > { %v5916_v16 = vadd.f32 %v5915_v15, %v5914_v12  ;;  %v6628_v15 = vld [vmem:[%s8777_s3 + $0x70] sm:$0xff]  }
 0x571   : > { %v2951_v17 = vpop.f32.mrf.mxu0 }
 0x572   : > { %v7837_v18 = vadd.f32 %v5916_v16, %v7771_v36  ;;  %v2952_v23 = vadd.f32 %v2951_v17, %v7067_v47  ;;  %v6613_v36 = vld [vmem:[%s8777_s3 + $0xf0] sm:$0xff]   ;;  %v6630_v17 = vld [vmem:[%s8777_s3 + $0x68] sm:$0xff]  }
 0x573   : > { %v2953_v19 = vpop.f32.mrf.mxu0  ;;  %v6629_v16 = vld [vmem:[%s8777_s3 + $0x30] sm:$0xff]  }
 0x574   : > { %v2954_v21 = vadd.f32 %v2953_v19, %v7069_v48  ;;  %v2960_v31 = vmax.f32 %v2952_v23, 0.0  ;;  %v6632_v19 = vld [vmem:[%s8777_s3 + $0x60] sm:$0xff]   ;;  %v6636_v23 = vld [vmem:[%s8777_s3 + $0x50] sm:$0xff]  }
 0x575   : > { %v2955_v20 = vpop.f32.mrf.mxu0 }
 0x576   : > { %v2956_v22 = vadd.f32 %v2955_v20, %v7067_v47  ;;  %v2961_v29 = vmax.f32 %v2954_v21, 0.0  ;;  %v6633_v20 = vld [vmem:[%s8777_s3 + $0x20] sm:$0xff]   ;;  %v6634_v21 = vld [vmem:[%s8777_s3 + $0x58] sm:$0xff]  }
 0x577   : > { %v2957_v24 = vpop.f32.mrf.mxu0 }
 0x578   : > { %v2958_v25 = vadd.f32 %v2957_v24, %v7069_v48  ;;  %v2962_v27 = vmax.f32 %v2956_v22, 0.0  ;;  %v6635_v22 = vld [vmem:[%s8777_s3 + $0x18] sm:$0xff]   ;;  %v6637_v24 = vld [vmem:[%s8777_s3 + $0x10] sm:$0xff]  }
 0x57a   : > { %v2963_v30 = vmax.f32 %v2958_v25, 0.0  ;;  %v2964_v33 = vpack.c.bf16 %v2962_v27, %v2960_v31  ;;  %v6638_v25 = vld [vmem:[%s8777_s3 + $0x48] sm:$0xff]  }
 0x57b   : > { %v6639_v27 = vld [vmem:[%s8777_s3 + $0x8] sm:$0xff]  }
 0x57c   : > { %v2965_v32 = vpack.c.bf16 %v2963_v30, %v2961_v29  ;;  %v6640_v29 = vld [vmem:[%s8777_s3 + $0x40] sm:$0xff]  }
 0x57d   : > { %v6641_v30 = vld [vmem:[%s8777_s3] sm:$0xff]  }
 0x57e   : > { %3127 = vmatprep.mubr.bf16.mxu0 %v2965_v32 }
 0x57f   : > { %3128 = vmatmul.mubr.bf16.vlgmr.msra.gmra.mxu0 %v2964_v33 }
 0x580   : > { %3414 = vmatpush1.bf16.msra.mxu0 %v6937_v5  ;;  %3433 = vmatprep.mubr.bf16.mxu0 %v6845_v4 }
 0x581   : > { %3415 = vmatprep.subr.bf16.mxu0 %v7627_v26 }
 0x584   : > { %3416 = vmatpush1.bf16.msra.mxu0 %v7636_v28 }
 0x585   : > { %5633 = vmatprep.subr.msk.bf16.mxu0 %vm408_vm0, %v6926_v1 }
 0x587   : > { %5632 = vmatmul.mubr.msk.bf16.vlgmr.msra.gmra.mxu0 %vm404_vm1, %v7688_v52  ;;  %v6612_v52 = vld [vmem:[%s8777_s3 + $0xb8] sm:$0xff]  }
 0x588   : > { %3468 = vmatpush1.bf16.msra.mxu0 %v6937_v5  ;;  %3487 = vmatprep.mubr.bf16.mxu0 %v6845_v4 }
 0x589   : > { %3469 = vmatprep.subr.bf16.mxu0 %v7627_v26 }
 0x58c   : > { %3470 = vmatpush1.bf16.msra.mxu0 %v7636_v28 }
 0x58d   : > { %5983 = vmatprep.subr.bf16.mxu0 %v6611_v35 }
 0x58f   : > { %5634 = vmatmul.mubr.msk.bf16.vlgmr.msra.gmra.mxu0 %vm404_vm1, %v3451_v34 }
 0x590   : > { %5984 = vmatpush3.bf16.msra.mxu0 %v6612_v52 }
 0x591   : > { %5985 = vmatprep.subr.bf16.mxu0 %v6613_v36 }
 0x594   : > { %5986 = vmatpush3.bf16.msra.mxu0 %v6614_v37 }
 0x595   : > { %5987 = vmatprep.subr.bf16.mxu0 %v6615_v38 }
 0x598   : > { %5988 = vmatpush3.bf16.msra.mxu0 %v6616_v39 }
 0x599   : > { %5989 = vmatprep.subr.bf16.mxu0 %v6617_v40 }
 0x59c   : > { %5990 = vmatpush3.bf16.msra.mxu0 %v6618_v41 }
 0x59d   : > { %5991 = vmatprep.subr.bf16.mxu0 %v6619_v43 }
 0x5a0   : > { %5992 = vmatpush3.bf16.msra.mxu0 %v6620_v44 }
 0x5a1   : > { %5993 = vmatprep.subr.bf16.mxu0 %v6621_v45 }
 0x5a4   : > { %5994 = vmatpush3.bf16.msra.mxu0 %v6622_v46 }
 0x5a5   : > { %5995 = vmatprep.subr.bf16.mxu0 %v6623_v49 }
 0x5a8   : > { %5996 = vmatpush3.bf16.msra.mxu0 %v6624_v50 }
 0x5a9   : > { %5997 = vmatprep.subr.bf16.mxu0 %v6625_v51 }
 0x5ac   : > { %5998 = vmatpush3.bf16.msra.mxu0 %v6626_v63 }
 0x5ad   : > { %5635 = vmatprep.subr.msk.bf16.mxu0 %vm408_vm0, %v6926_v1 }
 0x5d3   : > { %v5933_v2 = vpop.f32.mrf.mxu1 }
 0x5d5   : > { %v5934_v53 = vpop.f32.mrf.mxu1 }
 0x5d6   : > { %v5935_v54 = vadd.f32 %v5934_v53, %v5933_v2 }
 0x5d7   : > { %v5936_v55 = vpop.f32.mrf.mxu1 }
 0x5d8   : > { %v2910_v56 = vadd.f32 %v5935_v54, %v7834_v13  ;;  %v6627_v13 = vld [vmem:[%s8777_s3 + $0x38] sm:$0xff]  }
 0x5d9   : > { %v5937_v57 = vpop.f32.mrf.mxu1 }
 0x5da   : > { %v5938_v58 = vadd.f32 %v5937_v57, %v5936_v55 }
 0x5db   : > { %v3177_v59 = vpop.f32.mrf.mxu1 }
 0x5dc   : > { %v2911_v60 = vadd.f32 %v5938_v58, %v7837_v18  ;;  %v3178_v61 = vadd.f32 %v3177_v59, %v7067_v47  ;;  %v6631_v18 = vld [vmem:[%s8777_s3 + $0x28] sm:$0xff]  }
 0x5dd   : > { %v3179_v62 = vpop.f32.mrf.mxu1 }
 0x5de   : > { %v3180_v0 = vadd.f32 %v3179_v62, %v7069_v48  ;;  %v3186_v6 = vmax.f32 %v3178_v61, 0.0 }
 0x5df   : > { %v3181_v42 = vpop.f32.mrf.mxu1 }
 0x5e0   : > { %v3182_v3 = vadd.f32 %v3181_v42, %v7067_v47  ;;  %v3187_v8 = vmax.f32 %v3180_v0, 0.0 }
 0x5e1   : > { %v3183_v7 = vpop.f32.mrf.mxu1 }
 0x5e2   : > { %v3188_v9 = vmax.f32 %v3182_v3, 0.0  ;;  %v3184_v10 = vadd.f32 %v3183_v7, %v7069_v48  ;;  %v3684_v7 = vpop.permute.xlu1 %3683 }
 0x5e4   : > { %v3189_v11 = vmax.f32 %v3184_v10, 0.0  ;;  %v3190_v14 = vpack.c.bf16 %v3188_v9, %v3186_v6  ;;  %v6642_v9 = vld [vmem:[%s8777_s3 + $0x1f8] sm:$0xff]  }
 0x5e5   : > { %v6643_v10 = vld [vmem:[%s8777_s3 + $0x1b8] sm:$0xff]  }
 0x5e6   : > { %v3191_v12 = vpack.c.bf16 %v3189_v11, %v3187_v8  ;;  %v6644_v11 = vld [vmem:[%s8777_s3 + $0x1f0] sm:$0xff]  }
 0x5e8   : > { %3353 = vmatprep.mubr.bf16.mxu1 %v3191_v12  ;;  %v6645_v12 = vld [vmem:[%s8777_s3 + $0x178] sm:$0xff]  }
 0x5e9   : > { %3354 = vmatmul.mubr.bf16.vlgmr.msra.gmra.mxu1 %v3190_v14  ;;  %v3587_v14 = vpop.permute.xlu0 %3586 }
 0x5ea   : > { %6006 = vmatpush3.bf16.msra.mxu1 %v6627_v13  ;;  %v6646_v13 = vld [vmem:[%s8777_s3 + $0x1b0] sm:$0xff]  }
 0x5eb   : > { %6007 = vmatprep.subr.bf16.mxu1 %v6628_v15  ;;  %v6647_v15 = vld [vmem:[%s8777_s3 + $0x1e8] sm:$0xff]  }
 0x5ee   : > { %6008 = vmatpush3.bf16.msra.mxu1 %v6629_v16  ;;  %v6648_v16 = vld [vmem:[%s8777_s3 + $0x138] sm:$0xff]  }
 0x5ef   : > { %6009 = vmatprep.subr.bf16.mxu1 %v6630_v17  ;;  %v6649_v17 = vld [vmem:[%s8777_s3 + $0x170] sm:$0xff]  }
 0x5f2   : > { %6010 = vmatpush3.bf16.msra.mxu1 %v6631_v18  ;;  %v6650_v18 = vld [vmem:[%s8777_s3 + $0x1a8] sm:$0xff]  }
 0x5f3   : > { %6011 = vmatprep.subr.bf16.mxu1 %v6632_v19  ;;  %v6651_v19 = vld [vmem:[%s8777_s3 + $0x1e0] sm:$0xff]  }
 0x5f6   : > { %6012 = vmatpush3.bf16.msra.mxu1 %v6633_v20  ;;  %v6652_v20 = vld [vmem:[%s8777_s3 + $0x130] sm:$0xff]  }
 0x5f7   : > { %6013 = vmatprep.subr.bf16.mxu1 %v6634_v21  ;;  %v6653_v21 = vld [vmem:[%s8777_s3 + $0x168] sm:$0xff]  }
 0x5fa   : > { %6014 = vmatpush3.bf16.msra.mxu1 %v6635_v22  ;;  %v6654_v22 = vld [vmem:[%s8777_s3 + $0x1a0] sm:$0xff]  }
 0x5fb   : > { %6015 = vmatprep.subr.bf16.mxu1 %v6636_v23  ;;  %v6655_v23 = vld [vmem:[%s8777_s3 + $0x1d8] sm:$0xff]  }
 0x5fe   : > { %6016 = vmatpush3.bf16.msra.mxu1 %v6637_v24  ;;  %v6656_v24 = vld [vmem:[%s8777_s3 + $0x128] sm:$0xff]  }
 0x5ff   : > { %6017 = vmatprep.subr.bf16.mxu1 %v6638_v25  ;;  %v6657_v25 = vld [vmem:[%s8777_s3 + $0x160] sm:$0xff]  }
 0x602   : > { %6018 = vmatpush3.bf16.msra.mxu1 %v6639_v27  ;;  %v6658_v27 = vld [vmem:[%s8777_s3 + $0x198] sm:$0xff]  }
 0x603   : > { %6019 = vmatprep.subr.bf16.mxu1 %v6640_v29  ;;  %v6659_v29 = vld [vmem:[%s8777_s3 + $0x1d0] sm:$0xff]  }
 0x606   : > { %6020 = vmatpush3.bf16.msra.mxu1 %v6641_v30  ;;  %v6660_v30 = vld [vmem:[%s8777_s3 + $0x120] sm:$0xff]  }
 0x607   : > { %5637 = vmatprep.subr.msk.bf16.mxu1 %vm408_vm0, %v6926_v1 }
 0x63f   : > { %v5955_v31 = vpop.f32.mrf.mxu0 }
 0x641   : > { %v5956_v32 = vpop.f32.mrf.mxu0 }
 0x642   : > { %v5957_v33 = vadd.f32 %v5956_v32, %v5955_v31  ;;  %v6661_v31 = vld [vmem:[%s8777_s3 + $0x158] sm:$0xff]   ;;  %v6662_v32 = vld [vmem:[%s8777_s3 + $0x190] sm:$0xff]  }
 0x643   : > { %v5958_v34 = vpop.f32.mrf.mxu0 }
 0x644   : > { %v7959_v35 = vadd.f32 %v5957_v33, %v2910_v56  ;;  %v6663_v33 = vld [vmem:[%s8777_s3 + $0x1c8] sm:$0xff]  }
 0x645   : > { %v5959_v52 = vpop.f32.mrf.mxu0 }
 0x646   : > { %v5960_v36 = vadd.f32 %v5959_v52, %v5958_v34  ;;  %v6664_v34 = vld [vmem:[%s8777_s3 + $0x118] sm:$0xff]   ;;  %v6665_v52 = vld [vmem:[%s8777_s3 + $0x150] sm:$0xff]  }
 0x647   : > { %v3435_v37 = vpop.f32.mrf.mxu0 }
 0x648   : > { %v7961_v38 = vadd.f32 %v5960_v36, %v2911_v60  ;;  %v3436_v44 = vadd.f32 %v3435_v37, %v7067_v47  ;;  %v6666_v36 = vld [vmem:[%s8777_s3 + $0x188] sm:$0xff]   ;;  %v6667_v37 = vld [vmem:[%s8777_s3 + $0x1c0] sm:$0xff]  }
 0x649   : > { %v3437_v39 = vpop.f32.mrf.mxu0 }
 0x64a   : > { %v3438_v41 = vadd.f32 %v3437_v39, %v7069_v48  ;;  %v3444_v2 = vmax.f32 %v3436_v44, 0.0  ;;  %v6668_v39 = vld [vmem:[%s8777_s3 + $0x110] sm:$0xff]   ;;  %v6672_v44 = vld [vmem:[%s8777_s3 + $0x140] sm:$0xff]  }
 0x64b   : > { %v3439_v40 = vpop.f32.mrf.mxu0 }
 0x64c   : > { %v3440_v43 = vadd.f32 %v3439_v40, %v7067_v47  ;;  %v3445_v51 = vmax.f32 %v3438_v41, 0.0  ;;  %v6669_v40 = vld [vmem:[%s8777_s3 + $0x148] sm:$0xff]   ;;  %v6670_v41 = vld [vmem:[%s8777_s3 + $0x180] sm:$0xff]  }
 0x64d   : > { %v3441_v45 = vpop.f32.mrf.mxu0 }
 0x64e   : > { %v3442_v46 = vadd.f32 %v3441_v45, %v7069_v48  ;;  %v3446_v49 = vmax.f32 %v3440_v43, 0.0  ;;  %v6671_v43 = vld [vmem:[%s8777_s3 + $0x108] sm:$0xff]   ;;  %v6673_v45 = vld [vmem:[%s8777_s3 + $0x100] sm:$0xff]  }
 0x64f   : > { %v3489_v50 = vpop.f32.mrf.mxu0 }
 0x650   : > { %v3447_v63 = vmax.f32 %v3442_v46, 0.0  ;;  %v3448_v55 = vpack.c.bf16 %v3446_v49, %v3444_v2  ;;  %v3490_v59 = vadd.f32 %v3489_v50, %v7067_v47  ;;  %v5629_v2 = vld [vmem:[%s8778_s4] ss:$0 sm:$0xff] }
 0x651   : > { %v3491_v53 = vpop.f32.mrf.mxu0 }
 0x652   : > { %v3449_v54 = vpack.c.bf16 %v3447_v63, %v3445_v51  ;;  %v3492_v57 = vadd.f32 %v3491_v53, %v7069_v48  ;;  %v3498_v3 = vmax.f32 %v3490_v59, 0.0 }
 0x653   : > { %v3493_v56 = vpop.f32.mrf.mxu0 }
 0x654   : > { %v3494_v58 = vadd.f32 %v3493_v56, %v7067_v47  ;;  %3577 = vmatprep.mubr.bf16.mxu1 %v3449_v54  ;;  %v3499_v0 = vmax.f32 %v3492_v57, 0.0 }
 0x655   : > { %v3495_v60 = vpop.f32.mrf.mxu0  ;;  %3578 = vmatmul.mubr.bf16.vlgmr.msra.gmra.mxu1 %v3448_v55 }
 0x656   : > { %v3496_v61 = vadd.f32 %v3495_v60, %v7069_v48  ;;  %3701 = vmatpush1.bf16.msra.mxu1 %v6937_v5  ;;  %3720 = vmatprep.mubr.bf16.mxu1 %v6845_v4  ;;  %v3500_v62 = vmax.f32 %v3494_v58, 0.0 }
 0x657   : > { %3702 = vmatprep.subr.bf16.mxu1 %v7627_v26 }
 0x658   : > { %v3501_v42 = vmax.f32 %v3496_v61, 0.0  ;;  %v3502_v8 = vpack.c.bf16 %v3500_v62, %v3498_v3  ;;  %v6585_v61 = vld [vmem:[%s6947_s18 + $0x10] ss:$8 sps:$4 sm:$0xff]   ;;  %v6587_v62 = vld [vmem:[%s6947_s18 + $0x14] ss:$8 sps:$4 sm:$0xff]  }
 0x659   : > { %4081 = vrot.lane.b32.xlu1 %v6585_v61, %s6851_s15  ;;  %4083 = vrot.lane.b32.xlu0 %v6587_v62, %s6851_s15  ;;  %v6685_v61 = vld [vmem:[%s8777_s3 + $0x268] sm:$0xff]   ;;  %v6686_v62 = vld [vmem:[%s8777_s3 + $0x2a0] sm:$0xff]   ;;  %s8792_s15 = smov 40  }
 0x65a   : > { %v3503_v6 = vpack.c.bf16 %v3501_v42, %v3499_v0  ;;  %3703 = vmatpush1.bf16.msra.mxu1 %v7636_v28 }
 0x65b   : > { %6049 = vmatprep.subr.bf16.mxu1 %v6642_v9 }
 0x65c   : > { %3536 = vmatprep.mubr.bf16.mxu0 %v3503_v6 }
 0x65d   : > { %3537 = vmatmul.mubr.bf16.vlgmr.msra.gmra.mxu0 %v3502_v8  ;;  %5638 = vmatmul.mubr.msk.bf16.vlgmr.msra.gmra.mxu1 %vm404_vm1, %v3684_v7 }
 0x65e   : > { %3604 = vmatpush1.bf16.msra.mxu0 %v6937_v5  ;;  %3623 = vmatprep.mubr.bf16.mxu0 %v6845_v4 }
 0x65f   : > { %3605 = vmatprep.subr.bf16.mxu0 %v7627_v26  ;;  %6050 = vmatpush3.bf16.msra.mxu1 %v6643_v10 }
 0x660   : > { %6051 = vmatprep.subr.bf16.mxu1 %v6644_v11 }
 0x662   : > { %3606 = vmatpush1.bf16.msra.mxu0 %v7636_v28 }
 0x663   : > { %6027 = vmatprep.subr.bf16.mxu0 %v6645_v12  ;;  %6052 = vmatpush3.bf16.msra.mxu1 %v6646_v13 }
 0x664   : > { %6053 = vmatprep.subr.bf16.mxu1 %v6647_v15 }
 0x665   : > { %5636 = vmatmul.mubr.msk.bf16.vlgmr.msra.gmra.mxu0 %vm404_vm1, %v3587_v14 }
 0x666   : > { %6028 = vmatpush3.bf16.msra.mxu0 %v6648_v16 }
 0x667   : > { %6029 = vmatprep.subr.bf16.mxu0 %v6649_v17  ;;  %6054 = vmatpush3.bf16.msra.mxu1 %v6650_v18 }
 0x668   : > { %6055 = vmatprep.subr.bf16.mxu1 %v6651_v19 }
 0x66a   : > { %6030 = vmatpush3.bf16.msra.mxu0 %v6652_v20 }
 0x66b   : > { %6031 = vmatprep.subr.bf16.mxu0 %v6653_v21  ;;  %6056 = vmatpush3.bf16.msra.mxu1 %v6654_v22 }
 0x66c   : > { %6057 = vmatprep.subr.bf16.mxu1 %v6655_v23 }
 0x66e   : > { %6032 = vmatpush3.bf16.msra.mxu0 %v6656_v24 }
 0x66f   : > { %6033 = vmatprep.subr.bf16.mxu0 %v6657_v25  ;;  %6058 = vmatpush3.bf16.msra.mxu1 %v6658_v27 }
 0x670   : > { %6059 = vmatprep.subr.bf16.mxu1 %v6659_v29 }
 0x672   : > { %6034 = vmatpush3.bf16.msra.mxu0 %v6660_v30 }
 0x673   : > { %6035 = vmatprep.subr.bf16.mxu0 %v6661_v31  ;;  %6060 = vmatpush3.bf16.msra.mxu1 %v6662_v32 }
 0x674   : > { %6061 = vmatprep.subr.bf16.mxu1 %v6663_v33 }
 0x676   : > { %6036 = vmatpush3.bf16.msra.mxu0 %v6664_v34 }
 0x677   : > { %6037 = vmatprep.subr.bf16.mxu0 %v6665_v52  ;;  %6062 = vmatpush3.bf16.msra.mxu1 %v6666_v36 }
 0x678   : > { %6063 = vmatprep.subr.bf16.mxu1 %v6667_v37 }
 0x67a   : > { %6038 = vmatpush3.bf16.msra.mxu0 %v6668_v39 }
 0x67b   : > { %6039 = vmatprep.subr.bf16.mxu0 %v6669_v40  ;;  %6064 = vmatpush3.bf16.msra.mxu1 %v6670_v41 }
 0x67c   : > { %5641 = vmatprep.subr.msk.bf16.mxu1 %vm408_vm0, %v6926_v1 }
 0x67e   : > { %6040 = vmatpush3.bf16.msra.mxu0 %v6671_v43 }
 0x67f   : > { %6041 = vmatprep.subr.bf16.mxu0 %v6672_v44 }
 0x682   : > { %6042 = vmatpush3.bf16.msra.mxu0 %v6673_v45 }
 0x683   : > { %5639 = vmatprep.subr.msk.bf16.mxu0 %vm408_vm0, %v6926_v1 }
 0x6a9   : > { %v5977_v46 = vpop.f32.mrf.mxu1 }
 0x6ab   : > { %v5978_v49 = vpop.f32.mrf.mxu1 }
 0x6ac   : > { %v5979_v50 = vadd.f32 %v5978_v49, %v5977_v46  ;;  %v3878_v46 = vpop.permute.xlu1 %3877 }
 0x6ad   : > { %v5980_v51 = vpop.f32.mrf.mxu1 }
 0x6ae   : > { %v3362_v63 = vadd.f32 %v5979_v50, %v7959_v35  ;;  %v6674_v50 = vld [vmem:[%s8777_s3 + $0x2f8] sm:$0xff]  }
 0x6af   : > { %v5981_v53 = vpop.f32.mrf.mxu1 }
 0x6b0   : > { %v5982_v54 = vadd.f32 %v5981_v53, %v5980_v51  ;;  %v3370_v55 = vadd.f32 %v5629_v2, %v3362_v63  ;;  %v6675_v51 = vld [vmem:[%s8777_s3 + $0x2b8] sm:$0xff]   ;;  %v6676_v63 = vld [vmem:[%s8777_s3 + $0x2f0] sm:$0xff]  }
 0x6b1   : > { %v6677_v53 = vld [vmem:[%s8777_s3 + $0x278] sm:$0xff]  }
 0x6b2   : > { %v3363_v56 = vadd.f32 %v5982_v54, %v7961_v38  ;;  %v3372_v58 = vmax.f32 %v3370_v55, 0.0  ;;  %v6678_v54 = vld [vmem:[%s8777_s3 + $0x2b0] sm:$0xff]   ;;  %v6679_v55 = vld [vmem:[%s8777_s3 + $0x2e8] sm:$0xff]  }
 0x6b4   : > { %v3371_v57 = vadd.f32 %v5629_v2, %v3363_v56  ;;  %v3781_v2 = vpop.permute.xlu0 %3780  ;;  %v6681_v56 = vld [vmem:[%s8777_s3 + $0x270] sm:$0xff]  }
 0x6b6   : > { %v3373_v59 = vmax.f32 %v3371_v57, 0.0  ;;  %v6682_v57 = vld [vmem:[%s8777_s3 + $0x2a8] sm:$0xff]  }
 0x6b8   : > { %v8086_v60 = vpack.c.bf16 %v3373_v59, %v3372_v58  ;;  %v6683_v58 = vld [vmem:[%s8777_s3 + $0x2e0] sm:$0xff]   ;;  %v6684_v59 = vld [vmem:[%s8777_s3 + $0x230] sm:$0xff]  }
 0x715   : > { %v6021_v35 = vpop.f32.mrf.mxu1 }
 0x717   : > { %v6022_v0 = vpop.f32.mrf.mxu1 }
 0x718   : > { %v6023_v42 = vadd.f32 %v6022_v0, %v6021_v35  ;;  %v6687_v35 = vld [vmem:[%s8777_s3 + $0x2d8] sm:$0xff]   ;;  %v6688_v0 = vld [vmem:[%s8777_s3 + $0x228] sm:$0xff]  }
 0x719   : > { %v6024_v3 = vpop.f32.mrf.mxu1 }
 0x71b   : > { %v6025_v6 = vpop.f32.mrf.mxu1 }
 0x71c   : > { %v6026_v7 = vadd.f32 %v6025_v6, %v6024_v3  ;;  %v6690_v3 = vld [vmem:[%s8777_s3 + $0x298] sm:$0xff]   ;;  %v6691_v6 = vld [vmem:[%s8777_s3 + $0x2d0] sm:$0xff]  }
 0x71d   : > { %v5999_v8 = vpop.f32.mrf.mxu0  ;;  %v3722_v9 = vpop.f32.mrf.mxu1 }
 0x71e   : > { %v3723_v10 = vadd.f32 %v3722_v9, %v7067_v47  ;;  %v6694_v9 = vld [vmem:[%s8777_s3 + $0x290] sm:$0xff]  }
 0x71f   : > { %v6000_v38 = vpop.f32.mrf.mxu0  ;;  %v3724_v11 = vpop.f32.mrf.mxu1 }
 0x720   : > { %v6001_v14 = vadd.f32 %v6000_v38, %v5999_v8  ;;  %v3725_v12 = vadd.f32 %v3724_v11, %v7069_v48  ;;  %v3731_v19 = vmax.f32 %v3723_v10, 0.0  ;;  %v6693_v8 = vld [vmem:[%s8777_s3 + $0x258] sm:$0xff]   ;;  %v6695_v38 = vld [vmem:[%s8777_s3 + $0x2c8] sm:$0xff]   ;;  %v6697_v11 = vld [vmem:[%s8777_s3 + $0x250] sm:$0xff]  }
 0x721   : > { %v6002_v13 = vpop.f32.mrf.mxu0  ;;  %v3726_v15 = vpop.f32.mrf.mxu1  ;;  %v6696_v10 = vld [vmem:[%s8777_s3 + $0x218] sm:$0xff]  }
 0x722   : > { %v8094_v16 = vadd.f32 %v6023_v42, %v6001_v14  ;;  %v3727_v17 = vadd.f32 %v3726_v15, %v7067_v47  ;;  %v3732_v22 = vmax.f32 %v3725_v12, 0.0  ;;  %v6689_v42 = vld [vmem:[%s8777_s3 + $0x260] sm:$0xff]   ;;  %v6698_v14 = vld [vmem:[%s8777_s3 + $0x288] sm:$0xff]  }
 0x723   : > { %v6003_v18 = vpop.f32.mrf.mxu0  ;;  %v3728_v20 = vpop.f32.mrf.mxu1  ;;  %v6699_v12 = vld [vmem:[%s8777_s3 + $0x2c0] sm:$0xff]   ;;  %v6701_v15 = vld [vmem:[%s8777_s3 + $0x248] sm:$0xff]  }
 0x724   : > { %v6004_v21 = vadd.f32 %v6003_v18, %v6002_v13  ;;  %v3733_v23 = vmax.f32 %v3727_v17, 0.0  ;;  %v3729_v24 = vadd.f32 %v3728_v20, %v7069_v48  ;;  %v6700_v13 = vld [vmem:[%s8777_s3 + $0x210] sm:$0xff]   ;;  %v6702_v17 = vld [vmem:[%s8777_s3 + $0x280] sm:$0xff]   ;;  %v6703_v18 = vld [vmem:[%s8777_s3 + $0x208] sm:$0xff]  }
 0x725   : > { %v3625_v25 = vpop.f32.mrf.mxu0  ;;  %v6705_v20 = vld [vmem:[%s8777_s3 + $0x200] sm:$0xff]  }
 0x726   : > { %v8098_v27 = vadd.f32 %v6026_v7, %v6004_v21  ;;  %v3734_v29 = vmax.f32 %v3729_v24, 0.0  ;;  %v3735_v31 = vpack.c.bf16 %v3733_v23, %v3731_v19  ;;  %v3626_v36 = vadd.f32 %v3625_v25, %v7067_v47  ;;  %v6692_v7 = vld [vmem:[%s8777_s3 + $0x220] sm:$0xff]   ;;  %v6588_v21 = vld [vmem:[%s6947_s18 + $0x14] ss:$8 sps:$4 sm:$0xff]  }
 0x727   : > { %v3627_v30 = vpop.f32.mrf.mxu0  ;;  %v6704_v19 = vld [vmem:[%s8777_s3 + $0x240] sm:$0xff]   ;;  %4188 = vrot.lane.b32.xlu1 %v6588_v21, %s8788_s16  ;;  %4285 = vrot.lane.b32.xlu0 %v6588_v21, %s8789_s21 }
 0x728   : > { %v3736_v32 = vpack.c.bf16 %v3734_v29, %v3732_v22  ;;  %v3628_v34 = vadd.f32 %v3627_v30, %v7069_v48  ;;  %v3634_v44 = vmax.f32 %v3626_v36, 0.0 }
 0x729   : > { %v3629_v33 = vpop.f32.mrf.mxu0 }
 0x72a   : > { %v3630_v52 = vadd.f32 %v3629_v33, %v7067_v47  ;;  %3769 = vmatprep.mubr.bf16.mxu1 %v3736_v32  ;;  %v3635_v41 = vmax.f32 %v3628_v34, 0.0 }
 0x72b   : > { %v3631_v37 = vpop.f32.mrf.mxu0  ;;  %3770 = vmatmul.mubr.bf16.vlgmr.msra.gmra.mxu1 %v3735_v31  ;;  %4382 = vrot.lane.b32.xlu1 %v6588_v21, %s8790_s19 }
 0x72c   : > { %v3632_v39 = vadd.f32 %v3631_v37, %v7069_v48  ;;  %3895 = vmatpush1.bf16.msra.mxu1 %v6937_v5  ;;  %3914 = vmatprep.mubr.bf16.mxu1 %v6845_v4  ;;  %v3636_v40 = vmax.f32 %v3630_v52, 0.0 }
 0x72d   : > { %3896 = vmatprep.subr.bf16.mxu1 %v7627_v26  ;;  %4479 = vrot.lane.b32.xlu0 %v6588_v21, %s8791_s20 }
 0x72e   : > { %v3637_v43 = vmax.f32 %v3632_v39, 0.0  ;;  %v3638_v49 = vpack.c.bf16 %v3636_v40, %v3634_v44 }
 0x72f   : > { %4576 = vrot.lane.b32.xlu1 %v6588_v21, %s8792_s15  ;;  %v6715_v21 = vld [vmem:[%s8777_s3 + $0x370] sm:$0xff]   ;;  %s363_s15 = scalar_lea.vmem %s8782_s8, %s5696_s25 }
 0x730   : > { %v3639_v45 = vpack.c.bf16 %v3637_v43, %v3635_v41  ;;  %3897 = vmatpush1.bf16.msra.mxu1 %v7636_v28 }
 0x731   : > { %6093 = vmatprep.subr.bf16.mxu1 %v6674_v50 }
 0x732   : > { %3672 = vmatprep.mubr.bf16.mxu0 %v3639_v45 }
 0x733   : > { %3673 = vmatmul.mubr.bf16.vlgmr.msra.gmra.mxu0 %v3638_v49  ;;  %5642 = vmatmul.mubr.msk.bf16.vlgmr.msra.gmra.mxu1 %vm404_vm1, %v3878_v46 }
 0x734   : > { %3798 = vmatpush1.bf16.msra.mxu0 %v6937_v5  ;;  %3817 = vmatprep.mubr.bf16.mxu0 %v6845_v4 }
 0x735   : > { %3799 = vmatprep.subr.bf16.mxu0 %v7627_v26  ;;  %6094 = vmatpush3.bf16.msra.mxu1 %v6675_v51 }
 0x736   : > { %6095 = vmatprep.subr.bf16.mxu1 %v6676_v63 }
 0x738   : > { %3800 = vmatpush1.bf16.msra.mxu0 %v7636_v28  ;;  %v6680_v28 = vld [vmem:[%s8777_s3 + $0x238] sm:$0xff]  }
 0x739   : > { %6071 = vmatprep.subr.bf16.mxu0 %v6677_v53  ;;  %6096 = vmatpush3.bf16.msra.mxu1 %v6678_v54 }
 0x73a   : > { %6097 = vmatprep.subr.bf16.mxu1 %v6679_v55 }
 0x73b   : > { %5640 = vmatmul.mubr.msk.bf16.vlgmr.msra.gmra.mxu0 %vm404_vm1, %v3781_v2 }
 0x73c   : > { %6072 = vmatpush3.bf16.msra.mxu0 %v6680_v28 }
 0x73d   : > { %6073 = vmatprep.subr.bf16.mxu0 %v6681_v56  ;;  %6098 = vmatpush3.bf16.msra.mxu1 %v6682_v57  ;;  %v3975_v57 = vpop.permute.xlu0 %3974 }
 0x73e   : > { %6099 = vmatprep.subr.bf16.mxu1 %v6683_v58 }
 0x740   : > { %6074 = vmatpush3.bf16.msra.mxu0 %v6684_v59 }
 0x741   : > { %6075 = vmatprep.subr.bf16.mxu0 %v6685_v61  ;;  %6100 = vmatpush3.bf16.msra.mxu1 %v6686_v62 }
 0x742   : > { %6101 = vmatprep.subr.bf16.mxu1 %v6687_v35 }
 0x744   : > { %6076 = vmatpush3.bf16.msra.mxu0 %v6688_v0 }
 0x745   : > { %6077 = vmatprep.subr.bf16.mxu0 %v6689_v42  ;;  %6102 = vmatpush3.bf16.msra.mxu1 %v6690_v3  ;;  %v4082_v3 = vpop.permute.xlu1 %4081 }
 0x746   : > { %6103 = vmatprep.subr.bf16.mxu1 %v6691_v6  ;;  %v4084_v6 = vpop.permute.xlu0 %4083 }
 0x748   : > { %6078 = vmatpush3.bf16.msra.mxu0 %v6692_v7 }
 0x749   : > { %6079 = vmatprep.subr.bf16.mxu0 %v6693_v8  ;;  %6104 = vmatpush3.bf16.msra.mxu1 %v6694_v9 }
 0x74a   : > { %6105 = vmatprep.subr.bf16.mxu1 %v6695_v38 }
 0x74c   : > { %6080 = vmatpush3.bf16.msra.mxu0 %v6696_v10  ;;  %v8240_v10 = vld [vmem:[%s8775_s1] ss:$8 sps:$4 sm:$0xff]  }
 0x74d   : > { %6081 = vmatprep.subr.bf16.mxu0 %v6697_v11  ;;  %6106 = vmatpush3.bf16.msra.mxu1 %v6698_v14  ;;  %v4085_v11 = vsel %vm2001_vm2, %v4082_v3, %v4084_v6 }
 0x74e   : > { %6107 = vmatprep.subr.bf16.mxu1 %v6699_v12  ;;  %v8253_v12 = vld [vmem:[%s8775_s1 + $0x4] ss:$8 sps:$4 sm:$0xff]  }
 0x750   : > { %6082 = vmatpush3.bf16.msra.mxu0 %v6700_v13  ;;  %v6709_v13 = vld [vmem:[%s8777_s3 + $0x3b8] sm:$0xff]  }
 0x751   : > { %6083 = vmatprep.subr.bf16.mxu0 %v6701_v15  ;;  %6108 = vmatpush3.bf16.msra.mxu1 %v6702_v17  ;;  %v6710_v15 = vld [vmem:[%s8777_s3 + $0x3f0] sm:$0xff]   ;;  %v6711_v17 = vld [vmem:[%s8777_s3 + $0x378] sm:$0xff]  }
 0x752   : > { %5647 = vmatprep.subr.msk.bf16.mxu1 %vm408_vm0, %v6926_v1 }
 0x754   : > { %6084 = vmatpush3.bf16.msra.mxu0 %v6703_v18  ;;  %v6712_v18 = vld [vmem:[%s8777_s3 + $0x3b0] sm:$0xff]  }
 0x755   : > { %6085 = vmatprep.subr.bf16.mxu0 %v6704_v19  ;;  %v6713_v19 = vld [vmem:[%s8777_s3 + $0x3e8] sm:$0xff]  }
 0x758   : > { %6086 = vmatpush3.bf16.msra.mxu0 %v6705_v20  ;;  %v6714_v20 = vld [vmem:[%s8777_s3 + $0x338] sm:$0xff]  }
 0x759   : > { %5643 = vmatprep.subr.msk.bf16.mxu0 %vm408_vm0, %v6926_v1 }
 0x7eb   : > { %v6065_v22 = vpop.f32.mrf.mxu1 }
 0x7ed   : > { %v6066_v23 = vpop.f32.mrf.mxu1 }
 0x7ee   : > { %v6067_v24 = vadd.f32 %v6066_v23, %v6065_v22  ;;  %v6716_v22 = vld [vmem:[%s8777_s3 + $0x3a8] sm:$0xff]   ;;  %v6717_v23 = vld [vmem:[%s8777_s3 + $0x3e0] sm:$0xff]  }
 0x7ef   : > { %v6068_v25 = vpop.f32.mrf.mxu1 }
 0x7f1   : > { %v6069_v29 = vpop.f32.mrf.mxu1 }
 0x7f2   : > { %v6070_v30 = vadd.f32 %v6069_v29, %v6068_v25  ;;  %v6719_v25 = vld [vmem:[%s8777_s3 + $0x368] sm:$0xff]   ;;  %v6720_v29 = vld [vmem:[%s8777_s3 + $0x3a0] sm:$0xff]  }
 0x7f3   : > { %v6043_v31 = vpop.f32.mrf.mxu0  ;;  %v3916_v32 = vpop.f32.mrf.mxu1 }
 0x7f4   : > { %v3917_v34 = vadd.f32 %v3916_v32, %v7067_v47  ;;  %v6723_v32 = vld [vmem:[%s8777_s3 + $0x360] sm:$0xff]  }
 0x7f5   : > { %v6044_v33 = vpop.f32.mrf.mxu0  ;;  %v3918_v52 = vpop.f32.mrf.mxu1 }
 0x7f6   : > { %v6045_v36 = vadd.f32 %v6044_v33, %v6043_v31  ;;  %v3919_v37 = vadd.f32 %v3918_v52, %v7069_v48  ;;  %v3925_v45 = vmax.f32 %v3917_v34, 0.0  ;;  %v6722_v31 = vld [vmem:[%s8777_s3 + $0x328] sm:$0xff]   ;;  %v6724_v33 = vld [vmem:[%s8777_s3 + $0x398] sm:$0xff]   ;;  %v6725_v34 = vld [vmem:[%s8777_s3 + $0x3d0] sm:$0xff]  }
 0x7f7   : > { %v6046_v39 = vpop.f32.mrf.mxu0  ;;  %v3920_v40 = vpop.f32.mrf.mxu1  ;;  %v6726_v52 = vld [vmem:[%s8777_s3 + $0x320] sm:$0xff]  }
 0x7f8   : > { %v3681_v41 = vadd.f32 %v6045_v36, %v8094_v16  ;;  %v3921_v43 = vadd.f32 %v3920_v40, %v7067_v47  ;;  %v3926_v46 = vmax.f32 %v3919_v37, 0.0  ;;  %v6727_v36 = vld [vmem:[%s8777_s3 + $0x358] sm:$0xff]   ;;  %v6728_v37 = vld [vmem:[%s8777_s3 + $0x390] sm:$0xff]  }
 0x7f9   : > { %v6047_v44 = vpop.f32.mrf.mxu0  ;;  %v3922_v49 = vpop.f32.mrf.mxu1  ;;  %v6730_v40 = vld [vmem:[%s8777_s3 + $0x318] sm:$0xff]  }
 0x7fa   : > { %v8224_v50 = vadd.f32 %v6067_v24, %v3681_v41  ;;  %v6048_v51 = vadd.f32 %v6047_v44, %v6046_v39  ;;  %v3927_v63 = vmax.f32 %v3921_v43, 0.0  ;;  %v3923_v2 = vadd.f32 %v3922_v49, %v7069_v48  ;;  %v6718_v24 = vld [vmem:[%s8777_s3 + $0x330] sm:$0xff]   ;;  %v6729_v39 = vld [vmem:[%s8777_s3 + $0x3c8] sm:$0xff]   ;;  %v6733_v44 = vld [vmem:[%s8777_s3 + $0x3c0] sm:$0xff]  }
 0x7fb   : > { %v3819_v53 = vpop.f32.mrf.mxu0  ;;  %v6731_v41 = vld [vmem:[%s8777_s3 + $0x350] sm:$0xff]   ;;  %v6732_v43 = vld [vmem:[%s8777_s3 + $0x388] sm:$0xff]   ;;  %v6736_v49 = vld [vmem:[%s8777_s3 + $0x380] sm:$0xff]  }
 0x7fc   : > { %v3682_v54 = vadd.f32 %v6048_v51, %v8098_v27  ;;  %v3928_v55 = vmax.f32 %v3923_v2, 0.0  ;;  %v3929_v56 = vpack.c.bf16 %v3927_v63, %v3925_v45  ;;  %v3820_v35 = vadd.f32 %v3819_v53, %v7067_v47  ;;  %v6734_v45 = vld [vmem:[%s8777_s3 + $0x310] sm:$0xff]   ;;  %v6737_v51 = vld [vmem:[%s8777_s3 + $0x308] sm:$0xff]   ;;  %v6738_v63 = vld [vmem:[%s8777_s3 + $0x340] sm:$0xff]  }
 0x7fd   : > { %v3821_v28 = vpop.f32.mrf.mxu0  ;;  %v6739_v2 = vld [vmem:[%s8777_s3 + $0x300] sm:$0xff]  }
 0x7fe   : > { %v8228_v16 = vadd.f32 %v6070_v30, %v3682_v54  ;;  %v3930_v58 = vpack.c.bf16 %v3928_v55, %v3926_v46  ;;  %v3822_v61 = vadd.f32 %v3821_v28, %v7069_v48  ;;  %v3828_v9 = vmax.f32 %v3820_v35, 0.0  ;;  %v6721_v30 = vld [vmem:[%s8777_s3 + $0x3d8] sm:$0xff]   ;;  %v6735_v46 = vld [vmem:[%s8777_s3 + $0x348] sm:$0xff]  }
 0x7ff   : > { %v3823_v59 = vpop.f32.mrf.mxu0 }
 0x800   : > { %v3824_v62 = vadd.f32 %v3823_v59, %v7067_v47  ;;  %3963 = vmatprep.mubr.bf16.mxu1 %v3930_v58  ;;  %v3829_v7 = vmax.f32 %v3822_v61, 0.0 }
 0x801   : > { %v3825_v0 = vpop.f32.mrf.mxu0  ;;  %3964 = vmatmul.mubr.bf16.vlgmr.msra.gmra.mxu1 %v3929_v56 }
 0x802   : > { %v3826_v42 = vadd.f32 %v3825_v0, %v7069_v48  ;;  %4102 = vmatpush1.bf16.msra.mxu1 %v6937_v5  ;;  %4121 = vmatprep.mubr.bf16.mxu1 %v6845_v4  ;;  %v3830_v27 = vmax.f32 %v3824_v62, 0.0 }
 0x803   : > { %4103 = vmatprep.subr.bf16.mxu1 %v7627_v26  ;;  %v6707_v26 = vld [vmem:[%s8777_s3 + $0x3f8] sm:$0xff]  }
 0x804   : > { %v3831_v8 = vmax.f32 %v3826_v42, 0.0  ;;  %v3832_v14 = vpack.c.bf16 %v3830_v27, %v3828_v9 }
 0x806   : > { %v3833_v38 = vpack.c.bf16 %v3831_v8, %v3829_v7  ;;  %4104 = vmatpush1.bf16.msra.mxu1 %v8240_v10 }
 0x807   : > { %6137 = vmatprep.subr.bf16.mxu1 %v6707_v26 }
 0x808   : > { %3866 = vmatprep.mubr.bf16.mxu0 %v3833_v38 }
 0x809   : > { %3867 = vmatmul.mubr.bf16.vlgmr.msra.gmra.mxu0 %v3832_v14  ;;  %5648 = vmatmul.mubr.msk.bf16.vlgmr.msra.gmra.mxu1 %vm404_vm1, %v4085_v11 }
 0x80a   : > { %3992 = vmatpush1.bf16.msra.mxu0 %v6937_v5  ;;  %4011 = vmatprep.mubr.bf16.mxu0 %v6845_v4 }
 0x80b   : > { %3993 = vmatprep.subr.bf16.mxu0 %v8253_v12  ;;  %6138 = vmatpush3.bf16.msra.mxu1 %v6709_v13 }
 0x80c   : > { %6139 = vmatprep.subr.bf16.mxu1 %v6710_v15 }
 0x80e   : > { %3994 = vmatpush1.bf16.msra.mxu0 %v8240_v10 }
 0x80f   : > { %6115 = vmatprep.subr.bf16.mxu0 %v6711_v17  ;;  %6140 = vmatpush3.bf16.msra.mxu1 %v6712_v18 }
 0x810   : > { %6141 = vmatprep.subr.bf16.mxu1 %v6713_v19 }
 0x811   : > { %5644 = vmatmul.mubr.msk.bf16.vlgmr.msra.gmra.mxu0 %vm404_vm1, %v3975_v57 }
 0x812   : > { %6116 = vmatpush3.bf16.msra.mxu0 %v6714_v20 }
 0x813   : > { %6117 = vmatprep.subr.bf16.mxu0 %v6715_v21  ;;  %6142 = vmatpush3.bf16.msra.mxu1 %v6716_v22 }
 0x814   : > { %6143 = vmatprep.subr.bf16.mxu1 %v6717_v23 }
 0x816   : > { %6118 = vmatpush3.bf16.msra.mxu0 %v6718_v24 }
 0x817   : > { %6119 = vmatprep.subr.bf16.mxu0 %v6719_v25  ;;  %6144 = vmatpush3.bf16.msra.mxu1 %v6720_v29 }
 0x818   : > { %6145 = vmatprep.subr.bf16.mxu1 %v6721_v30 }
 0x81a   : > { %6120 = vmatpush3.bf16.msra.mxu0 %v6722_v31 }
 0x81b   : > { %6121 = vmatprep.subr.bf16.mxu0 %v6723_v32  ;;  %6146 = vmatpush3.bf16.msra.mxu1 %v6724_v33 }
 0x81c   : > { %6147 = vmatprep.subr.bf16.mxu1 %v6725_v34 }
 0x81e   : > { %6122 = vmatpush3.bf16.msra.mxu0 %v6726_v52 }
 0x81f   : > { %6123 = vmatprep.subr.bf16.mxu0 %v6727_v36  ;;  %6148 = vmatpush3.bf16.msra.mxu1 %v6728_v37  ;;  %v4286_v36 = vpop.permute.xlu0 %4285 }
 0x820   : > { %6149 = vmatprep.subr.bf16.mxu1 %v6729_v39  ;;  %v6740_v39 = vld [vmem:[%s8777_s3 + $0x4f8] sm:$0xff]  }
 0x822   : > { %6124 = vmatpush3.bf16.msra.mxu0 %v6730_v40  ;;  %v6741_v40 = vld [vmem:[%s8777_s3 + $0x4b8] sm:$0xff]  }
 0x823   : > { %6125 = vmatprep.subr.bf16.mxu0 %v6731_v41  ;;  %6150 = vmatpush3.bf16.msra.mxu1 %v6732_v43  ;;  %v6742_v41 = vld [vmem:[%s8777_s3 + $0x4f0] sm:$0xff]   ;;  %v4189_v43 = vpop.permute.xlu1 %4188 }
 0x824   : > { %6151 = vmatprep.subr.bf16.mxu1 %v6733_v44  ;;  %v6743_v44 = vld [vmem:[%s8777_s3 + $0x478] sm:$0xff]  }
 0x826   : > { %6126 = vmatpush3.bf16.msra.mxu0 %v6734_v45  ;;  %v6744_v45 = vld [vmem:[%s8777_s3 + $0x4b0] sm:$0xff]  }
 0x827   : > { %6127 = vmatprep.subr.bf16.mxu0 %v6735_v46  ;;  %6152 = vmatpush3.bf16.msra.mxu1 %v6736_v49  ;;  %v6745_v46 = vld [vmem:[%s8777_s3 + $0x4e8] sm:$0xff]   ;;  %v6746_v49 = vld [vmem:[%s8777_s3 + $0x438] sm:$0xff]  }
 0x828   : > { %5652 = vmatprep.subr.msk.bf16.mxu1 %vm408_vm0, %v6926_v1 }
 0x82a   : > { %6128 = vmatpush3.bf16.msra.mxu0 %v6737_v51  ;;  %v6747_v51 = vld [vmem:[%s8777_s3 + $0x470] sm:$0xff]  }
 0x82b   : > { %6129 = vmatprep.subr.bf16.mxu0 %v6738_v63  ;;  %v6748_v63 = vld [vmem:[%s8777_s3 + $0x4a8] sm:$0xff]  }
 0x82e   : > { %6130 = vmatpush3.bf16.msra.mxu0 %v6739_v2  ;;  %v6749_v2 = vld [vmem:[%s8777_s3 + $0x4e0] sm:$0xff]  }
 0x82f   : > { %5650 = vmatprep.subr.msk.bf16.mxu0 %vm408_vm0, %v6926_v1 }
 0x8c1   : > { %v6109_v53 = vpop.f32.mrf.mxu1 }
 0x8c3   : > { %v6110_v54 = vpop.f32.mrf.mxu1 }
 0x8c4   : > { %v6111_v55 = vadd.f32 %v6110_v54, %v6109_v53  ;;  %v6750_v53 = vld [vmem:[%s8777_s3 + $0x430] sm:$0xff]   ;;  %v6751_v54 = vld [vmem:[%s8777_s3 + $0x468] sm:$0xff]  }
 0x8c5   : > { %v6112_v28 = vpop.f32.mrf.mxu1 }
 0x8c7   : > { %v6113_v56 = vpop.f32.mrf.mxu1 }
 0x8c8   : > { %v6114_v57 = vadd.f32 %v6113_v56, %v6112_v28  ;;  %v6753_v28 = vld [vmem:[%s8777_s3 + $0x4d8] sm:$0xff]   ;;  %v6754_v56 = vld [vmem:[%s8777_s3 + $0x428] sm:$0xff]  }
 0x8c9   : > { %v6087_v58 = vpop.f32.mrf.mxu0  ;;  %v4123_v59 = vpop.f32.mrf.mxu1 }
 0x8ca   : > { %v4124_v62 = vadd.f32 %v4123_v59, %v7067_v47  ;;  %v6757_v59 = vld [vmem:[%s8777_s3 + $0x4d0] sm:$0xff]  }
 0x8cb   : > { %v6088_v61 = vpop.f32.mrf.mxu0  ;;  %v4125_v35 = vpop.f32.mrf.mxu1 }
 0x8cc   : > { %v6089_v0 = vadd.f32 %v6088_v61, %v6087_v58  ;;  %v4126_v42 = vadd.f32 %v4125_v35, %v7069_v48  ;;  %v4132_v9 = vmax.f32 %v4124_v62, 0.0  ;;  %v6756_v58 = vld [vmem:[%s8777_s3 + $0x498] sm:$0xff]   ;;  %v6758_v61 = vld [vmem:[%s8777_s3 + $0x420] sm:$0xff]   ;;  %v6760_v35 = vld [vmem:[%s8777_s3 + $0x490] sm:$0xff]  }
 0x8cd   : > { %v6090_v27 = vpop.f32.mrf.mxu0  ;;  %v4127_v3 = vpop.f32.mrf.mxu1  ;;  %v6759_v62 = vld [vmem:[%s8777_s3 + $0x458] sm:$0xff]  }
 0x8ce   : > { %v3875_v6 = vadd.f32 %v6089_v0, %v8224_v50  ;;  %v4128_v7 = vadd.f32 %v4127_v3, %v7067_v47  ;;  %v4133_v38 = vmax.f32 %v4126_v42, 0.0  ;;  %v6761_v0 = vld [vmem:[%s8777_s3 + $0x4c8] sm:$0xff]   ;;  %v6762_v42 = vld [vmem:[%s8777_s3 + $0x418] sm:$0xff]  }
 0x8cf   : > { %v6091_v8 = vpop.f32.mrf.mxu0  ;;  %v4129_v11 = vpop.f32.mrf.mxu1  ;;  %v6764_v3 = vld [vmem:[%s8777_s3 + $0x488] sm:$0xff]  }
 0x8d0   : > { %v8359_v14 = vadd.f32 %v6111_v55, %v3875_v6  ;;  %v6092_v26 = vadd.f32 %v6091_v8, %v6090_v27  ;;  %v4134_v13 = vmax.f32 %v4128_v7, 0.0  ;;  %v4130_v15 = vadd.f32 %v4129_v11, %v7069_v48  ;;  %v6752_v55 = vld [vmem:[%s8777_s3 + $0x4a0] sm:$0xff]   ;;  %v6763_v27 = vld [vmem:[%s8777_s3 + $0x450] sm:$0xff]   ;;  %v6767_v8 = vld [vmem:[%s8777_s3 + $0x448] sm:$0xff]  }
 0x8d1   : > { %v4013_v17 = vpop.f32.mrf.mxu0  ;;  %v6765_v6 = vld [vmem:[%s8777_s3 + $0x4c0] sm:$0xff]   ;;  %v6766_v7 = vld [vmem:[%s8777_s3 + $0x410] sm:$0xff]  }
 0x8d2   : > { %v3876_v18 = vadd.f32 %v6092_v26, %v8228_v16  ;;  %v4135_v19 = vmax.f32 %v4130_v15, 0.0  ;;  %v4136_v21 = vpack.c.bf16 %v4134_v13, %v4132_v9  ;;  %v4014_v29 = vadd.f32 %v4013_v17, %v7067_v47  ;;  %v6768_v9 = vld [vmem:[%s8777_s3 + $0x480] sm:$0xff]  }
 0x8d3   : > { %v4015_v20 = vpop.f32.mrf.mxu0  ;;  %v6770_v11 = vld [vmem:[%s8777_s3 + $0x440] sm:$0xff]  }
 0x8d4   : > { %v8363_v22 = vadd.f32 %v6114_v57, %v3876_v18  ;;  %v4137_v50 = vpack.c.bf16 %v4135_v19, %v4133_v38  ;;  %v4016_v24 = vadd.f32 %v4015_v20, %v7069_v48  ;;  %v4022_v34 = vmax.f32 %v4014_v29, 0.0  ;;  %v6755_v57 = vld [vmem:[%s8777_s3 + $0x460] sm:$0xff]   ;;  %v6769_v38 = vld [vmem:[%s8777_s3 + $0x408] sm:$0xff]  }
 0x8d5   : > { %v4017_v23 = vpop.f32.mrf.mxu0  ;;  %v6771_v26 = vld [vmem:[%s8777_s3 + $0x400] sm:$0xff]  }
 0x8d6   : > { %v4018_v25 = vadd.f32 %v4017_v23, %v7067_v47  ;;  %4170 = vmatprep.mubr.bf16.mxu1 %v4137_v50  ;;  %v4023_v32 = vmax.f32 %v4016_v24, 0.0 }
 0x8d7   : > { %v4019_v30 = vpop.f32.mrf.mxu0  ;;  %4171 = vmatmul.mubr.bf16.vlgmr.msra.gmra.mxu1 %v4136_v21 }
 0x8d8   : > { %v4020_v31 = vadd.f32 %v4019_v30, %v7069_v48  ;;  %4303 = vmatpush1.bf16.msra.mxu1 %v6937_v5  ;;  %4322 = vmatprep.mubr.bf16.mxu1 %v6845_v4  ;;  %v4024_v16 = vmax.f32 %v4018_v25, 0.0 }
 0x8d9   : > { %4304 = vmatprep.subr.bf16.mxu1 %v8253_v12 }
 0x8da   : > { %v4025_v33 = vmax.f32 %v4020_v31, 0.0  ;;  %v4026_v37 = vpack.c.bf16 %v4024_v16, %v4022_v34 }
 0x8dc   : > { %v4027_v52 = vpack.c.bf16 %v4025_v33, %v4023_v32  ;;  %4305 = vmatpush1.bf16.msra.mxu1 %v8240_v10 }
 0x8dd   : > { %6181 = vmatprep.subr.bf16.mxu1 %v6740_v39 }
 0x8de   : > { %4060 = vmatprep.mubr.bf16.mxu0 %v4027_v52 }
 0x8df   : > { %4061 = vmatmul.mubr.bf16.vlgmr.msra.gmra.mxu0 %v4026_v37  ;;  %5653 = vmatmul.mubr.msk.bf16.vlgmr.msra.gmra.mxu1 %vm404_vm1, %v4286_v36 }
 0x8e0   : > { %4206 = vmatpush1.bf16.msra.mxu0 %v6937_v5  ;;  %4225 = vmatprep.mubr.bf16.mxu0 %v6845_v4 }
 0x8e1   : > { %4207 = vmatprep.subr.bf16.mxu0 %v8253_v12  ;;  %6182 = vmatpush3.bf16.msra.mxu1 %v6741_v40 }
 0x8e2   : > { %6183 = vmatprep.subr.bf16.mxu1 %v6742_v41 }
 0x8e4   : > { %4208 = vmatpush1.bf16.msra.mxu0 %v8240_v10 }
 0x8e5   : > { %6159 = vmatprep.subr.bf16.mxu0 %v6743_v44  ;;  %6184 = vmatpush3.bf16.msra.mxu1 %v6744_v45 }
 0x8e6   : > { %6185 = vmatprep.subr.bf16.mxu1 %v6745_v46 }
 0x8e7   : > { %5651 = vmatmul.mubr.msk.bf16.vlgmr.msra.gmra.mxu0 %vm404_vm1, %v4189_v43 }
 0x8e8   : > { %6160 = vmatpush3.bf16.msra.mxu0 %v6746_v49 }
 0x8e9   : > { %6161 = vmatprep.subr.bf16.mxu0 %v6747_v51  ;;  %6186 = vmatpush3.bf16.msra.mxu1 %v6748_v63 }
 0x8ea   : > { %6187 = vmatprep.subr.bf16.mxu1 %v6749_v2 }
 0x8ec   : > { %6162 = vmatpush3.bf16.msra.mxu0 %v6750_v53 }
 0x8ed   : > { %6163 = vmatprep.subr.bf16.mxu0 %v6751_v54  ;;  %6188 = vmatpush3.bf16.msra.mxu1 %v6752_v55 }
 0x8ee   : > { %6189 = vmatprep.subr.bf16.mxu1 %v6753_v28 }
 0x8f0   : > { %6164 = vmatpush3.bf16.msra.mxu0 %v6754_v56 }
 0x8f1   : > { %6165 = vmatprep.subr.bf16.mxu0 %v6755_v57  ;;  %6190 = vmatpush3.bf16.msra.mxu1 %v6756_v58 }
 0x8f2   : > { %6191 = vmatprep.subr.bf16.mxu1 %v6757_v59 }
 0x8f4   : > { %6166 = vmatpush3.bf16.msra.mxu0 %v6758_v61 }
 0x8f5   : > { %6167 = vmatprep.subr.bf16.mxu0 %v6759_v62  ;;  %6192 = vmatpush3.bf16.msra.mxu1 %v6760_v35  ;;  %v4480_v62 = vpop.permute.xlu0 %4479 }
 0x8f6   : > { %6193 = vmatprep.subr.bf16.mxu1 %v6761_v0  ;;  %v6772_v0 = vld [vmem:[%s8777_s3 + $0x5f8] sm:$0xff]  }
 0x8f8   : > { %6168 = vmatpush3.bf16.msra.mxu0 %v6762_v42  ;;  %v6773_v42 = vld [vmem:[%s8777_s3 + $0x5b8] sm:$0xff]  }
 0x8f9   : > { %6169 = vmatprep.subr.bf16.mxu0 %v6763_v27  ;;  %6194 = vmatpush3.bf16.msra.mxu1 %v6764_v3  ;;  %v6774_v27 = vld [vmem:[%s8777_s3 + $0x5f0] sm:$0xff]   ;;  %v4383_v3 = vpop.permute.xlu1 %4382 }
 0x8fa   : > { %6195 = vmatprep.subr.bf16.mxu1 %v6765_v6  ;;  %v6775_v6 = vld [vmem:[%s8777_s3 + $0x578] sm:$0xff]  }
 0x8fc   : > { %6170 = vmatpush3.bf16.msra.mxu0 %v6766_v7  ;;  %v6776_v7 = vld [vmem:[%s8777_s3 + $0x5b0] sm:$0xff]  }
 0x8fd   : > { %6171 = vmatprep.subr.bf16.mxu0 %v6767_v8  ;;  %6196 = vmatpush3.bf16.msra.mxu1 %v6768_v9  ;;  %v6777_v8 = vld [vmem:[%s8777_s3 + $0x5e8] sm:$0xff]   ;;  %v6778_v9 = vld [vmem:[%s8777_s3 + $0x538] sm:$0xff]  }
 0x8fe   : > { %5656 = vmatprep.subr.msk.bf16.mxu1 %vm408_vm0, %v6926_v1 }
 0x900   : > { %6172 = vmatpush3.bf16.msra.mxu0 %v6769_v38  ;;  %v6779_v38 = vld [vmem:[%s8777_s3 + $0x570] sm:$0xff]  }
 0x901   : > { %6173 = vmatprep.subr.bf16.mxu0 %v6770_v11  ;;  %v6780_v11 = vld [vmem:[%s8777_s3 + $0x5a8] sm:$0xff]  }
 0x904   : > { %6174 = vmatpush3.bf16.msra.mxu0 %v6771_v26  ;;  %v6781_v26 = vld [vmem:[%s8777_s3 + $0x5e0] sm:$0xff]  }
 0x905   : > { %5654 = vmatprep.subr.msk.bf16.mxu0 %vm408_vm0, %v6926_v1 }
 0x997   : > { %v6153_v13 = vpop.f32.mrf.mxu1 }
 0x999   : > { %v6154_v15 = vpop.f32.mrf.mxu1 }
 0x99a   : > { %v6155_v17 = vadd.f32 %v6154_v15, %v6153_v13  ;;  %v6782_v13 = vld [vmem:[%s8777_s3 + $0x530] sm:$0xff]   ;;  %v6783_v15 = vld [vmem:[%s8777_s3 + $0x568] sm:$0xff]  }
 0x99b   : > { %v6156_v18 = vpop.f32.mrf.mxu1 }
 0x99d   : > { %v6157_v19 = vpop.f32.mrf.mxu1 }
 0x99e   : > { %v6158_v20 = vadd.f32 %v6157_v19, %v6156_v18  ;;  %v6785_v18 = vld [vmem:[%s8777_s3 + $0x5d8] sm:$0xff]   ;;  %v6786_v19 = vld [vmem:[%s8777_s3 + $0x528] sm:$0xff]  }
 0x99f   : > { %v6131_v21 = vpop.f32.mrf.mxu0  ;;  %v4324_v50 = vpop.f32.mrf.mxu1 }
 0x9a0   : > { %v4325_v24 = vadd.f32 %v4324_v50, %v7067_v47  ;;  %v6789_v50 = vld [vmem:[%s8777_s3 + $0x5d0] sm:$0xff]  }
 0x9a1   : > { %v6132_v23 = vpop.f32.mrf.mxu0  ;;  %v4326_v25 = vpop.f32.mrf.mxu1 }
 0x9a2   : > { %v6133_v29 = vadd.f32 %v6132_v23, %v6131_v21  ;;  %v4327_v30 = vadd.f32 %v4326_v25, %v7069_v48  ;;  %v4333_v52 = vmax.f32 %v4325_v24, 0.0  ;;  %v6788_v21 = vld [vmem:[%s8777_s3 + $0x598] sm:$0xff]   ;;  %v6790_v23 = vld [vmem:[%s8777_s3 + $0x520] sm:$0xff]   ;;  %v6792_v25 = vld [vmem:[%s8777_s3 + $0x590] sm:$0xff]  }
 0x9a3   : > { %v6134_v31 = vpop.f32.mrf.mxu0  ;;  %v4328_v16 = vpop.f32.mrf.mxu1  ;;  %v6791_v24 = vld [vmem:[%s8777_s3 + $0x558] sm:$0xff]  }
 0x9a4   : > { %v4069_v32 = vadd.f32 %v6133_v29, %v8359_v14  ;;  %v4329_v33 = vadd.f32 %v4328_v16, %v7067_v47  ;;  %v4334_v36 = vmax.f32 %v4327_v30, 0.0  ;;  %v6793_v29 = vld [vmem:[%s8777_s3 + $0x5c8] sm:$0xff]   ;;  %v6794_v30 = vld [vmem:[%s8777_s3 + $0x518] sm:$0xff]  }
 0x9a5   : > { %v6135_v34 = vpop.f32.mrf.mxu0  ;;  %v4330_v37 = vpop.f32.mrf.mxu1  ;;  %v6796_v16 = vld [vmem:[%s8777_s3 + $0x588] sm:$0xff]  }
 0x9a6   : > { %v8483_v39 = vadd.f32 %v6155_v17, %v4069_v32  ;;  %v6136_v40 = vadd.f32 %v6135_v34, %v6134_v31  ;;  %v4335_v41 = vmax.f32 %v4329_v33, 0.0  ;;  %v4331_v43 = vadd.f32 %v4330_v37, %v7069_v48  ;;  %v6784_v17 = vld [vmem:[%s8777_s3 + $0x5a0] sm:$0xff]   ;;  %v6795_v31 = vld [vmem:[%s8777_s3 + $0x550] sm:$0xff]   ;;  %v6799_v34 = vld [vmem:[%s8777_s3 + $0x548] sm:$0xff]  }
 0x9a7   : > { %v4227_v44 = vpop.f32.mrf.mxu0  ;;  %v6797_v32 = vld [vmem:[%s8777_s3 + $0x5c0] sm:$0xff]   ;;  %v6798_v33 = vld [vmem:[%s8777_s3 + $0x510] sm:$0xff]  }
 0x9a8   : > { %v4070_v45 = vadd.f32 %v6136_v40, %v8363_v22  ;;  %v4336_v46 = vmax.f32 %v4331_v43, 0.0  ;;  %v4337_v51 = vpack.c.bf16 %v4335_v41, %v4333_v52  ;;  %v4228_v55 = vadd.f32 %v4227_v44, %v7067_v47  ;;  %v6800_v52 = vld [vmem:[%s8777_s3 + $0x580] sm:$0xff]  }
 0x9a9   : > { %v4229_v49 = vpop.f32.mrf.mxu0  ;;  %v6802_v37 = vld [vmem:[%s8777_s3 + $0x540] sm:$0xff]  }
 0x9aa   : > { %v8487_v63 = vadd.f32 %v6158_v20, %v4070_v45  ;;  %v4338_v14 = vpack.c.bf16 %v4336_v46, %v4334_v36  ;;  %v4230_v53 = vadd.f32 %v4229_v49, %v7069_v48  ;;  %v4236_v59 = vmax.f32 %v4228_v55, 0.0  ;;  %v6787_v20 = vld [vmem:[%s8777_s3 + $0x560] sm:$0xff]   ;;  %v6801_v36 = vld [vmem:[%s8777_s3 + $0x508] sm:$0xff]  }
 0x9ab   : > { %v4231_v2 = vpop.f32.mrf.mxu0  ;;  %v6803_v40 = vld [vmem:[%s8777_s3 + $0x500] sm:$0xff]  }
 0x9ac   : > { %v4232_v54 = vadd.f32 %v4231_v2, %v7067_v47  ;;  %4371 = vmatprep.mubr.bf16.mxu1 %v4338_v14  ;;  %v4237_v57 = vmax.f32 %v4230_v53, 0.0 }
 0x9ad   : > { %v4233_v28 = vpop.f32.mrf.mxu0  ;;  %4372 = vmatmul.mubr.bf16.vlgmr.msra.gmra.mxu1 %v4337_v51 }
 0x9ae   : > { %v4234_v56 = vadd.f32 %v4233_v28, %v7069_v48  ;;  %4497 = vmatpush1.bf16.msra.mxu1 %v6937_v5  ;;  %4516 = vmatprep.mubr.bf16.mxu1 %v6845_v4  ;;  %v4238_v22 = vmax.f32 %v4232_v54, 0.0 }
 0x9af   : > { %4498 = vmatprep.subr.bf16.mxu1 %v8253_v12 }
 0x9b0   : > { %v4239_v58 = vmax.f32 %v4234_v56, 0.0  ;;  %v4240_v35 = vpack.c.bf16 %v4238_v22, %v4236_v59 }
 0x9b2   : > { %v4241_v61 = vpack.c.bf16 %v4239_v58, %v4237_v57  ;;  %4499 = vmatpush1.bf16.msra.mxu1 %v8240_v10 }
 0x9b3   : > { %6225 = vmatprep.subr.bf16.mxu1 %v6772_v0 }
 0x9b4   : > { %4274 = vmatprep.mubr.bf16.mxu0 %v4241_v61 }
 0x9b5   : > { %4275 = vmatmul.mubr.bf16.vlgmr.msra.gmra.mxu0 %v4240_v35  ;;  %5657 = vmatmul.mubr.msk.bf16.vlgmr.msra.gmra.mxu1 %vm404_vm1, %v4480_v62 }
 0x9b6   : > { %4400 = vmatpush1.bf16.msra.mxu0 %v6937_v5  ;;  %4419 = vmatprep.mubr.bf16.mxu0 %v6845_v4 }
 0x9b7   : > { %4401 = vmatprep.subr.bf16.mxu0 %v8253_v12  ;;  %6226 = vmatpush3.bf16.msra.mxu1 %v6773_v42 }
 0x9b8   : > { %6227 = vmatprep.subr.bf16.mxu1 %v6774_v27 }
 0x9ba   : > { %4402 = vmatpush1.bf16.msra.mxu0 %v8240_v10 }
 0x9bb   : > { %6203 = vmatprep.subr.bf16.mxu0 %v6775_v6  ;;  %6228 = vmatpush3.bf16.msra.mxu1 %v6776_v7 }
 0x9bc   : > { %6229 = vmatprep.subr.bf16.mxu1 %v6777_v8 }
 0x9bd   : > { %5655 = vmatmul.mubr.msk.bf16.vlgmr.msra.gmra.mxu0 %vm404_vm1, %v4383_v3 }
 0x9be   : > { %6204 = vmatpush3.bf16.msra.mxu0 %v6778_v9 }
 0x9bf   : > { %6205 = vmatprep.subr.bf16.mxu0 %v6779_v38  ;;  %6230 = vmatpush3.bf16.msra.mxu1 %v6780_v11 }
 0x9c0   : > { %6231 = vmatprep.subr.bf16.mxu1 %v6781_v26 }
 0x9c2   : > { %6206 = vmatpush3.bf16.msra.mxu0 %v6782_v13 }
 0x9c3   : > { %6207 = vmatprep.subr.bf16.mxu0 %v6783_v15  ;;  %6232 = vmatpush3.bf16.msra.mxu1 %v6784_v17 }
 0x9c4   : > { %6233 = vmatprep.subr.bf16.mxu1 %v6785_v18 }
 0x9c6   : > { %6208 = vmatpush3.bf16.msra.mxu0 %v6786_v19 }
 0x9c7   : > { %6209 = vmatprep.subr.bf16.mxu0 %v6787_v20  ;;  %6234 = vmatpush3.bf16.msra.mxu1 %v6788_v21 }
 0x9c8   : > { %6235 = vmatprep.subr.bf16.mxu1 %v6789_v50 }
 0x9ca   : > { %6210 = vmatpush3.bf16.msra.mxu0 %v6790_v23 }
 0x9cb   : > { %6211 = vmatprep.subr.bf16.mxu0 %v6791_v24  ;;  %6236 = vmatpush3.bf16.msra.mxu1 %v6792_v25  ;;  %v4577_v24 = vpop.permute.xlu1 %4576  ;;  %v6804_v25 = vld [vmem:[%s8777_s3 + $0x678] sm:$0xff]  }
 0x9cc   : > { %6237 = vmatprep.subr.bf16.mxu1 %v6793_v29  ;;  %v6805_v29 = vld [vmem:[%s8777_s3 + $0x638] sm:$0xff]  }
 0x9ce   : > { %6212 = vmatpush3.bf16.msra.mxu0 %v6794_v30  ;;  %v6810_v30 = vld [vmem:[%s8777_s3 + $0x660] sm:$0xff]  }
 0x9cf   : > { %6213 = vmatprep.subr.bf16.mxu0 %v6795_v31  ;;  %6238 = vmatpush3.bf16.msra.mxu1 %v6796_v16  ;;  %v6811_v31 = vld [vmem:[%s8777_s3 + $0x620] sm:$0xff]   ;;  %v6812_v16 = vld [vmem:[%s8777_s3 + $0x658] sm:$0xff]  }
 0x9d0   : > { %6239 = vmatprep.subr.bf16.mxu1 %v6797_v32  ;;  %v6813_v32 = vld [vmem:[%s8777_s3 + $0x618] sm:$0xff]  }
 0x9d2   : > { %6214 = vmatpush3.bf16.msra.mxu0 %v6798_v33  ;;  %v6814_v33 = vld [vmem:[%s8777_s3 + $0x650] sm:$0xff]  }
 0x9d3   : > { %6215 = vmatprep.subr.bf16.mxu0 %v6799_v34  ;;  %6240 = vmatpush3.bf16.msra.mxu1 %v6800_v52  ;;  %v6815_v34 = vld [vmem:[%s8777_s3 + $0x610] sm:$0xff]   ;;  %v6816_v52 = vld [vmem:[%s8777_s3 + $0x648] sm:$0xff]  }
 0x9d6   : > { %6216 = vmatpush3.bf16.msra.mxu0 %v6801_v36  ;;  %v6817_v36 = vld [vmem:[%s8777_s3 + $0x608] sm:$0xff]  }
 0x9d7   : > { %6217 = vmatprep.subr.bf16.mxu0 %v6802_v37  ;;  %v6818_v37 = vld [vmem:[%s8777_s3 + $0x640] sm:$0xff]  }
 0x9da   : > { %6218 = vmatpush3.bf16.msra.mxu0 %v6803_v40  ;;  %v6819_v40 = vld [vmem:[%s8777_s3 + $0x600] sm:$0xff]  }
 0x9db   : > { %5658 = vmatprep.subr.msk.bf16.mxu0 %vm408_vm0, %v6926_v1 }
 0xa6d   : > { %v6197_v41 = vpop.f32.mrf.mxu1 }
 0xa6f   : > { %v6198_v43 = vpop.f32.mrf.mxu1 }
 0xa70   : > { %v6199_v44 = vadd.f32 %v6198_v43, %v6197_v41  ;;  %v6858_v41 = vmov 0.0   ;;  %v6597_v43 = vld [vmem:[%s8779_s5 + $0x78] sm:$0xff]  }
 0xa71   : > { %v6200_v45 = vpop.f32.mrf.mxu1  ;;  %6287 = vmatprep.subr.bf16.mxu1 %v6858_v41 }
 0xa73   : > { %v6201_v46 = vpop.f32.mrf.mxu1 }
 0xa74   : > { %v6202_v49 = vadd.f32 %v6201_v46, %v6200_v45  ;;  %v6599_v45 = vld [vmem:[%s8779_s5 + $0x68] sm:$0xff]   ;;  %v6600_v46 = vld [vmem:[%s8779_s5 + $0x60] sm:$0xff]  }
 0xa75   : > { %v6175_v51 = vpop.f32.mrf.mxu0  ;;  %v4518_v14 = vpop.f32.mrf.mxu1 }
 0xa76   : > { %v4519_v53 = vadd.f32 %v4518_v14, %v7067_v47 }
 0xa77   : > { %v6176_v2 = vpop.f32.mrf.mxu0  ;;  %v4520_v54 = vpop.f32.mrf.mxu1 }
 0xa78   : > { %v6177_v55 = vadd.f32 %v6176_v2, %v6175_v51  ;;  %v4521_v28 = vadd.f32 %v4520_v54, %v7069_v48  ;;  %v4527_v59 = vmax.f32 %v4519_v53, 0.0 }
 0xa79   : > { %v6178_v56 = vpop.f32.mrf.mxu0  ;;  %v4522_v22 = vpop.f32.mrf.mxu1 }
 0xa7a   : > { %v4283_v57 = vadd.f32 %v6177_v55, %v8483_v39  ;;  %v4523_v1 = vadd.f32 %v4522_v22, %v7067_v47  ;;  %v4528_v61 = vmax.f32 %v4521_v28, 0.0 }
 0xa7b   : > { %v6179_v58 = vpop.f32.mrf.mxu0  ;;  %v4524_v62 = vpop.f32.mrf.mxu1 }
 0xa7c   : > { %v8605_v35 = vadd.f32 %v6199_v44, %v4283_v57  ;;  %v6180_v0 = vadd.f32 %v6179_v58, %v6178_v56  ;;  %v4529_v42 = vmax.f32 %v4523_v1, 0.0  ;;  %v4525_v27 = vadd.f32 %v4524_v62, %v7069_v48  ;;  %v6598_v44 = vld [vmem:[%s8779_s5 + $0x70] sm:$0xff]  }
 0xa7d   : > { %v4421_v3 = vpop.f32.mrf.mxu0 }
 0xa7e   : > { %v4284_v6 = vadd.f32 %v6180_v0, %v8487_v63  ;;  %v4530_v7 = vmax.f32 %v4525_v27, 0.0  ;;  %v4531_v9 = vpack.c.bf16 %v4529_v42, %v4527_v59  ;;  %v4422_v15 = vadd.f32 %v4421_v3, %v7067_v47 }
 0xa7f   : > { %v4423_v8 = vpop.f32.mrf.mxu0 }
 0xa80   : > { %v8609_v38 = vadd.f32 %v6202_v49, %v4284_v6  ;;  %v4532_v39 = vpack.c.bf16 %v4530_v7, %v4528_v61  ;;  %v4424_v26 = vadd.f32 %v4423_v8, %v7069_v48  ;;  %v4430_v21 = vmax.f32 %v4422_v15, 0.0  ;;  %v6589_v6 = vld [vmem:[%s8779_s5 + $0x38] sm:$0xff]   ;;  %v6592_v8 = vld [vmem:[%s8779_s5 + $0x20] sm:$0xff]   ;;  %v6603_v15 = vld [vmem:[%s8779_s5 + $0x48] sm:$0xff]  }
 0xa81   : > { %v4425_v11 = vpop.f32.mrf.mxu0 }
 0xa82   : > { %v4426_v13 = vadd.f32 %v4425_v11, %v7067_v47  ;;  %4565 = vmatprep.mubr.bf16.mxu1 %v4532_v39  ;;  %v4431_v63 = vmax.f32 %v4424_v26, 0.0  ;;  %v6595_v39 = vld [vmem:[%s8779_s5 + $0x8] sm:$0xff]   ;;  %v6596_v11 = vld [vmem:[%s8779_s5] sm:$0xff]   ;;  %v6601_v26 = vld [vmem:[%s8779_s5 + $0x58] sm:$0xff]  }
 0xa83   : > { %v4427_v17 = vpop.f32.mrf.mxu0  ;;  %4566 = vmatmul.mubr.bf16.vlgmr.msra.gmra.mxu1 %v4531_v9  ;;  %v6593_v9 = vld [vmem:[%s8779_s5 + $0x18] sm:$0xff]  }
 0xa84   : > { %v4428_v18 = vadd.f32 %v4427_v17, %v7069_v48  ;;  %v4432_v19 = vmax.f32 %v4426_v13, 0.0  ;;  %6303 = vmatprep.mubr.msk.bf16.mxu1 %vm6859_vm3, %v6858_v41  ;;  %6288 = vmatpush3.bf16.msra.mxu1 %v6597_v43  ;;  %v6602_v13 = vld [vmem:[%s8779_s5 + $0x50] sm:$0xff]  }
 0xa85   : > { %6289 = vmatprep.subr.bf16.mxu1 %v6858_v41 }
 0xa86   : > { %v4433_v20 = vmax.f32 %v4428_v18, 0.0  ;;  %v4434_v23 = vpack.c.bf16 %v4432_v19, %v4430_v21 }
 0xa88   : > { %v4435_v50 = vpack.c.bf16 %v4433_v20, %v4431_v63  ;;  %6290 = vmatpush3.bf16.msra.mxu1 %v6598_v44  ;;  %v5692_v44 = vld [vmem:[%s8780_s6] ss:$0 sm:$0xff] }
 0xa89   : > { %6291 = vmatprep.subr.bf16.mxu1 %v6858_v41 }
 0xa8a   : > { %4468 = vmatprep.mubr.bf16.mxu0 %v4435_v50 }
 0xa8b   : > { %4469 = vmatmul.mubr.bf16.vlgmr.msra.gmra.mxu0 %v4434_v23 }
 0xa8c   : > { %4594 = vmatpush1.bf16.msra.mxu0 %v6937_v5  ;;  %4613 = vmatprep.mubr.bf16.mxu0 %v6845_v4  ;;  %v6806_v4 = vld [vmem:[%s8777_s3 + $0x670] sm:$0xff]  }
 0xa8d   : > { %4595 = vmatprep.subr.bf16.mxu0 %v8253_v12  ;;  %v6807_v5 = vld [vmem:[%s8777_s3 + $0x630] sm:$0xff]   ;;  %v6809_v12 = vld [vmem:[%s8777_s3 + $0x628] sm:$0xff]   ;;  %6292 = vmatpush3.bf16.msra.mxu1 %v6599_v45 }
 0xa8e   : > { %6293 = vmatprep.subr.bf16.mxu1 %v6858_v41 }
 0xa90   : > { %4596 = vmatpush1.bf16.msra.mxu0 %v8240_v10  ;;  %v6808_v10 = vld [vmem:[%s8777_s3 + $0x668] sm:$0xff]  }
 0xa91   : > { %6247 = vmatprep.subr.bf16.mxu0 %v6804_v25  ;;  %6294 = vmatpush3.bf16.msra.mxu1 %v6600_v46  ;;  %v4882_v46 = vld [vmem:[%s8781_s7] sm:$0xff] }
 0xa92   : > { %6295 = vmatprep.subr.bf16.mxu1 %v6858_v41 }
 0xa93   : > { %5659 = vmatmul.mubr.msk.bf16.vlgmr.msra.gmra.mxu0 %vm404_vm1, %v4577_v24 }
 0xa94   : > { %6248 = vmatpush3.bf16.msra.mxu0 %v6805_v29 }
 0xa95   : > { %6249 = vmatprep.subr.bf16.mxu0 %v6806_v4  ;;  %6296 = vmatpush3.bf16.msra.mxu1 %v6601_v26 }
 0xa96   : > { %6297 = vmatprep.subr.bf16.mxu1 %v6858_v41 }
 0xa98   : > { %6250 = vmatpush3.bf16.msra.mxu0 %v6807_v5 }
 0xa99   : > { %6251 = vmatprep.subr.bf16.mxu0 %v6808_v10  ;;  %6298 = vmatpush3.bf16.msra.mxu1 %v6602_v13 }
 0xa9a   : > { %6299 = vmatprep.subr.bf16.mxu1 %v6858_v41 }
 0xa9c   : > { %6252 = vmatpush3.bf16.msra.mxu0 %v6809_v12 }
 0xa9d   : > { %6253 = vmatprep.subr.bf16.mxu0 %v6810_v30  ;;  %6300 = vmatpush3.bf16.msra.mxu1 %v6603_v15  ;;  %v6820_v30 = vld [vmem:[%s8778_s4] ss:$0 sm:$0xff] }
 0xa9e   : > { %6301 = vmatprep.subr.bf16.mxu1 %v6858_v41 }
 0xaa0   : > { %6254 = vmatpush3.bf16.msra.mxu0 %v6811_v31 }
 0xaa1   : > { %6255 = vmatprep.subr.bf16.mxu0 %v6812_v16 }
 0xaa4   : > { %6256 = vmatpush3.bf16.msra.mxu0 %v6813_v32 }
 0xaa5   : > { %6257 = vmatprep.subr.bf16.mxu0 %v6814_v33 }
 0xaa8   : > { %6258 = vmatpush3.bf16.msra.mxu0 %v6815_v34 }
 0xaa9   : > { %6259 = vmatprep.subr.bf16.mxu0 %v6816_v52 }
 0xaac   : > { %6260 = vmatpush3.bf16.msra.mxu0 %v6817_v36 }
 0xaad   : > { %6261 = vmatprep.subr.bf16.mxu0 %v6818_v37 }
 0xab0   : > { %6262 = vmatpush3.bf16.msra.mxu0 %v6819_v40 }
 0xab1   : > { %6307 = vmatprep.subr.bf16.mxu0 %v6858_v41 }
 0xb43   : > { %v6241_v17 = vpop.f32.mrf.mxu1 }
 0xb45   : > { %v6242_v18 = vpop.f32.mrf.mxu1 }
 0xb46   : > { %v6243_v63 = vadd.f32 %v6242_v18, %v6241_v17 }
 0xb47   : > { %v6244_v19 = vpop.f32.mrf.mxu1 }
 0xb49   : > { %v6245_v20 = vpop.f32.mrf.mxu1 }
 0xb4a   : > { %v6246_v24 = vadd.f32 %v6245_v20, %v6244_v19 }
 0xb4b   : > { %v6219_v49 = vpop.f32.mrf.mxu0 }
 0xb4d   : > { %v6220_v51 = vpop.f32.mrf.mxu0 }
 0xb4e   : > { %v6221_v14 = vadd.f32 %v6220_v51, %v6219_v49 }
 0xb4f   : > { %v6222_v2 = vpop.f32.mrf.mxu0 }
 0xb50   : > { %v8689_v53 = vadd.f32 %v6221_v14, %v8605_v35 }
 0xb51   : > { %v6223_v54 = vpop.f32.mrf.mxu0 }
 0xb52   : > { %v6224_v55 = vadd.f32 %v6223_v54, %v6222_v2  ;;  %v4574_v23 = vadd.f32 %v6243_v63, %v8689_v53  ;;  %v4883_v54 = vld [vmem:[%s8781_s7 + $0x8] sm:$0xff] }
 0xb53   : > { %v4615_v28 = vpop.f32.mrf.mxu0 }
 0xb54   : > { %v8692_v56 = vadd.f32 %v6224_v55, %v8609_v38  ;;  %v4616_v59 = vadd.f32 %v4615_v28, %v7067_v47  ;;  %v6594_v38 = vld [vmem:[%s8779_s5 + $0x10] sm:$0xff]  }
 0xb55   : > { %v4617_v22 = vpop.f32.mrf.mxu0 }
 0xb56   : > { %v4618_v1 = vadd.f32 %v4617_v22, %v7069_v48  ;;  %v4624_v27 = vmax.f32 %v4616_v59, 0.0  ;;  %v4575_v10 = vadd.f32 %v6246_v24, %v8692_v56 }
 0xb57   : > { %v4619_v57 = vpop.f32.mrf.mxu0 }
 0xb58   : > { %v4620_v58 = vadd.f32 %v4619_v57, %v7067_v47  ;;  %v4625_v35 = vmax.f32 %v4618_v1, 0.0  ;;  %v6590_v47 = vld [vmem:[%s8779_s5 + $0x30] sm:$0xff]  }
 0xb59   : > { %v4621_v61 = vpop.f32.mrf.mxu0 }
 0xb5a   : > { %v4622_v62 = vadd.f32 %v4621_v61, %v7069_v48  ;;  %v4626_v0 = vmax.f32 %v4620_v58, 0.0  ;;  %v6591_v48 = vld [vmem:[%s8779_s5 + $0x28] sm:$0xff]  }
 0xb5c   : > { %v4627_v42 = vmax.f32 %v4622_v62, 0.0  ;;  %v4628_v7 = vpack.c.bf16 %v4626_v0, %v4624_v27 }
 0xb5e   : > { %v4629_v3 = vpack.c.bf16 %v4627_v42, %v4625_v35 }
 0xb60   : > { %4662 = vmatprep.mubr.bf16.mxu0 %v4629_v3 }
 0xb61   : > { %4663 = vmatmul.mubr.bf16.vlgmr.msra.gmra.mxu0 %v4628_v7 }
 0xb62   : > { %6308 = vmatpush3.bf16.msra.mxu0 %v6589_v6  ;;  %6323 = vmatprep.mubr.msk.bf16.mxu0 %vm6859_vm3, %v6858_v41 }
 0xb63   : > { %6309 = vmatprep.subr.bf16.mxu0 %v6858_v41 }
 0xb66   : > { %6310 = vmatpush3.bf16.msra.mxu0 %v6590_v47 }
 0xb67   : > { %6311 = vmatprep.subr.bf16.mxu0 %v6858_v41 }
 0xb6a   : > { %6312 = vmatpush3.bf16.msra.mxu0 %v6591_v48 }
 0xb6b   : > { %6313 = vmatprep.subr.bf16.mxu0 %v6858_v41 }
 0xb6e   : > { %6314 = vmatpush3.bf16.msra.mxu0 %v6592_v8 }
 0xb6f   : > { %6315 = vmatprep.subr.bf16.mxu0 %v6858_v41 }
 0xb72   : > { %6316 = vmatpush3.bf16.msra.mxu0 %v6593_v9 }
 0xb73   : > { %6317 = vmatprep.subr.bf16.mxu0 %v6858_v41 }
 0xb76   : > { %6318 = vmatpush3.bf16.msra.mxu0 %v6594_v38 }
 0xb77   : > { %6319 = vmatprep.subr.bf16.mxu0 %v6858_v41 }
 0xb7a   : > { %6320 = vmatpush3.bf16.msra.mxu0 %v6595_v39 }
 0xb7b   : > { %6321 = vmatprep.subr.bf16.mxu0 %v6858_v41 }
 0xb7e   : > { %6322 = vmatpush3.bf16.msra.mxu0 %v6596_v11 }
 0xb81   : > { %6324 = vmatmul.mubr.bf16.vlgmr.msra.gmra.mxu0 %v8086_v60  ;;  %v6604_v60 = vld [vmem:[%s8779_s5 + $0x40] sm:$0xff]  }
 0xb82   : > { %6302 = vmatpush3.bf16.msra.mxu1 %v6604_v60 }
 0xc21   : > { %v6263_v21 = vpop.f32.mrf.mxu0 }
 0xc23   : > { %v6264_v50 = vpop.f32.mrf.mxu0 }
 0xc24   : > { %v6265_v25 = vadd.f32 %v6264_v50, %v6263_v21 }
 0xc25   : > { %v6266_v29 = vpop.f32.mrf.mxu0 }
 0xc26   : > { %v4671_v4 = vadd.f32 %v6265_v25, %v4574_v23 }
 0xc27   : > { %v6267_v5 = vpop.f32.mrf.mxu0 }
 0xc28   : > { %v6268_v12 = vadd.f32 %v6267_v5, %v6266_v29  ;;  %v4673_v31 = vadd.f32 %v6820_v30, %v4671_v4 }
 0xc2a   : > { %v4672_v16 = vadd.f32 %v6268_v12, %v4575_v10  ;;  %v4675_v33 = vmax.f32 %v4673_v31, 0.0 }
 0xc2c   : > { %v4674_v32 = vadd.f32 %v6820_v30, %v4672_v16 }
 0xc2e   : > { %v4676_v34 = vmax.f32 %v4674_v32, 0.0 }
 0xc30   : > { %v4677_v52 = vpack.c.bf16 %v4676_v34, %v4675_v33 }
 0xc32   : > { %6304 = vmatmul.mubr.bf16.vlgmr.msra.gmra.mxu1 %v4677_v52 }
 0xc41   : > { %v4866_v36 = vpop.f32.mrf.mxu0 }
 0xc43   : > { %v6325_v37 = vpop.f32.mrf.mxu0 }
 0xc45   : > { %v4869_v40 = vpop.f32.mrf.mxu0 }
 0xc47   : > { %v6326_v41 = vpop.f32.mrf.mxu0 }
 0xcf2   : > { %v4777_v43 = vpop.f32.mrf.mxu1 }
 0xcf3   : > { %v4867_v45 = vadd.f32 %v4866_v36, %v4777_v43 }
 0xcf4   : > { %v6305_v49 = vpop.f32.mrf.mxu1 }
 0xcf5   : > { %v4880_v51 = vadd.f32 %v5692_v44, %v4867_v45 }
 0xcf6   : > { %v4780_v14 = vpop.f32.mrf.mxu1 }
 0xcf7   : > { %v4884_v2 = vadd.f32 %v4882_v46, %v4880_v51  ;;  %v4870_v53 = vadd.f32 %v4869_v40, %v4780_v14 }
 0xcf8   : > { %v6306_v55 = vpop.f32.mrf.mxu1 }
 0xcf9   : > { %4886 = vst [vmem:[%s363_s15] sm:$0xff] %v4884_v2  ;;  %v4881_v28 = vadd.f32 %v5692_v44, %v4870_v53 }
 0xcfb   : > { %v4885_v56 = vadd.f32 %v4883_v54, %v4881_v28 }
 0xcfd   : > { %4887 = vst [vmem:[%s363_s15 + $0x8] sm:$0xff] %v4885_v56 }
 0xcfe PF: > { %s18_s29 = sadd.s32 1, %s6843_s29   ;;  %s8793_s27 = smov %s6839_s28 }
 0xcff   : > { %p15_p5 = scmp.ge.s32.totalorder %s18_s29, 4   ;;  %s8794_s28 = smov %s8796_s30 }
 0xd01   :  { %17 = sbr.rel (!%p15_p5) target bundleno = 2 (0x2), region = 98 }

</bundles_post_ra>
